<compile_context>
chip_gen: v7x
topology: tpu7x:2x2x1
jax: 0.10.0
libtpu: 0.0.40
codegen_flags: <defaults>
</compile_context>

<pallas_src>
import functools

import jax
import jax.numpy as jnp
from jax.experimental import pallas as pl
from jax.experimental.pallas import tpu as pltpu


# ---------------------------------------------------------------------------
# Tiling helpers
# ---------------------------------------------------------------------------
def _choose_tn(m):
    """Lane-tile size over the spatial axis (multiple of 128 when possible)."""
    for t in (512, 256, 128):
        if m % t == 0:
            return t
    # TODO(synk): for large M not divisible by 128, pad M / use a masked tail
    # instead of a single full-width block.
    return m


# ---------------------------------------------------------------------------
# Fused conv matmul kernel:  out = act( W @ pre(A) + bias ) [+ residual]
#   A block:   [1, K, TN]   (K = Cin or 9*Cin, TN = spatial lanes)
#   W:         [Cout, K]    (resident, full)
#   bias:      [Cout, 1]
#   optional scale/shift: [K, 1]    (fused BatchNorm normalize on the input)
#   optional residual:    [1, Cout, TN]
# ---------------------------------------------------------------------------
def _make_conv_kernel(pre, has_res, act):
    def kernel(*refs):
        i = 0
        a_ref = refs[i]; i += 1
        w_ref = refs[i]; i += 1
        b_ref = refs[i]; i += 1
        scale_ref = shift_ref = None
        if pre == "bn_relu":
            scale_ref = refs[i]
            shift_ref = refs[i + 1]
            i += 2
        r_ref = None
        if has_res:
            r_ref = refs[i]; i += 1
        o_ref = refs[i]

        a = a_ref[0]                                    # [K, TN]
        if pre == "bn_relu":                            # fused BN normalize + ReLU
            a = a * scale_ref[...] + shift_ref[...]
            a = jnp.maximum(a, 0.0)
        elif pre == "relu":                             # fused leading ReLU
            a = jnp.maximum(a, 0.0)

        # TODO(synk): optional bf16 cast of (w, a) for v6e/v7x MXU rate once
        # validated against the fp32 reference tolerance.
        acc = jnp.dot(w_ref[...], a, preferred_element_type=jnp.float32)
        acc = acc + b_ref[...]                          # bias, broadcast over lanes
        if act == "relu":
            acc = jnp.maximum(acc, 0.0)
        elif act == "tanh":
            acc = jnp.tanh(acc)
        if has_res:
            acc = acc + r_ref[0]                        # fused residual add
        o_ref[0] = acc.astype(o_ref.dtype)
    return kernel


def conv_mm(a, w_mat, bias, *, pre=None, scale=None, shift=None,
            residual=None, act="none"):
    """a: [N, K, M]; w_mat: [Cout, K]; bias: [Cout] -> out [N, Cout, M]."""
    n, k, m = a.shape
    cout = w_mat.shape[0]
    tn = _choose_tn(m)
    grid = (n, m // tn)

    in_specs = [
        pl.BlockSpec((1, k, tn), lambda b, j: (b, 0, j)),
        pl.BlockSpec((cout, k), lambda b, j: (0, 0)),
        pl.BlockSpec((cout, 1), lambda b, j: (0, 0)),
    ]
    args = [a, w_mat, bias.reshape(cout, 1)]
    if pre == "bn_relu":
        in_specs += [pl.BlockSpec((k, 1), lambda b, j: (0, 0)),
                     pl.BlockSpec((k, 1), lambda b, j: (0, 0))]
        args += [scale.reshape(k, 1), shift.reshape(k, 1)]
    if residual is not None:
        in_specs.append(pl.BlockSpec((1, cout, tn), lambda b, j: (b, 0, j)))
        args.append(residual)

    return pl.pallas_call(
        _make_conv_kernel(pre, residual is not None, act),
        out_shape=jax.ShapeDtypeStruct((n, cout, m), jnp.float32),
        grid=grid,
        in_specs=in_specs,
        out_specs=pl.BlockSpec((1, cout, tn), lambda b, j: (b, 0, j)),
        compiler_params=pltpu.CompilerParams(
            dimension_semantics=("parallel", "parallel")),
    )(*args)


# ---------------------------------------------------------------------------
# BatchNorm2d (training-mode batch statistics), two-pass and tiled.
# ---------------------------------------------------------------------------
def _bn_stats_kernel(x_ref, sum_ref, sq_ref):
    @pl.when((pl.program_id(0) == 0) & (pl.program_id(1) == 0))
    def _():
        sum_ref[...] = jnp.zeros_like(sum_ref)
        sq_ref[...] = jnp.zeros_like(sq_ref)
    x = x_ref[0]                                        # [C, TN]
    sum_ref[...] += jnp.sum(x, axis=1, keepdims=True)
    sq_ref[...] += jnp.sum(x * x, axis=1, keepdims=True)


def bn_stats(x):
    """x: [N, C, M] -> (per-channel sum [C,1], sum of squares [C,1])."""
    n, c, m = x.shape
    tn = _choose_tn(m)
    return pl.pallas_call(
        _bn_stats_kernel,
        out_shape=(jax.ShapeDtypeStruct((c, 1), jnp.float32),
                   jax.ShapeDtypeStruct((c, 1), jnp.float32)),
        grid=(n, m // tn),
        in_specs=[pl.BlockSpec((1, c, tn), lambda b, j: (b, 0, j))],
        out_specs=(pl.BlockSpec((c, 1), lambda b, j: (0, 0)),
                   pl.BlockSpec((c, 1), lambda b, j: (0, 0))),
        compiler_params=pltpu.CompilerParams(
            dimension_semantics=("arbitrary", "arbitrary")),
    )(x)


def _bn_scale_shift(s, ss, count, gamma, beta, eps=1e-5):
    """Fold batch stats + affine params into per-channel scale/shift (tiny glue)."""
    mean = s[:, 0] / count
    var = jnp.maximum(ss[:, 0] / count - mean * mean, 0.0)   # biased (train mode)
    scale = gamma * jax.lax.rsqrt(var + eps)
    shift = beta - mean * scale
    return scale, shift


def _bn_norm_kernel(x_ref, scale_ref, shift_ref, o_ref, *, act):
    y = x_ref[0] * scale_ref[...] + shift_ref[...]
    if act == "relu":
        y = jnp.maximum(y, 0.0)
    o_ref[0] = y.astype(o_ref.dtype)


def bn_normalize(x, scale, shift, act="none"):
    """Tiled BN normalize pass (used where it cannot be fused into a conv)."""
    n, c, m = x.shape
    tn = _choose_tn(m)
    return pl.pallas_call(
        functools.partial(_bn_norm_kernel, act=act),
        out_shape=jax.ShapeDtypeStruct((n, c, m), jnp.float32),
        grid=(n, m // tn),
        in_specs=[pl.BlockSpec((1, c, tn), lambda b, j: (b, 0, j)),
                  pl.BlockSpec((c, 1), lambda b, j: (0, 0)),
                  pl.BlockSpec((c, 1), lambda b, j: (0, 0))],
        out_specs=pl.BlockSpec((1, c, tn), lambda b, j: (b, 0, j)),
        compiler_params=pltpu.CompilerParams(
            dimension_semantics=("parallel", "parallel")),
    )(x, scale.reshape(c, 1), shift.reshape(c, 1))


# ---------------------------------------------------------------------------
# im2col glue (tap gather of the 1-padded input, tap-major ordering)
# ---------------------------------------------------------------------------
def _im2col3x3(x, h, w):
    # x: [N, C, H*W] -> [N, 9*C, H*W]
    # TODO(synk): the tap gather is still materialized by XLA; for large d it
    # should become an in-kernel tap grid axis to cut HBM traffic ~9x.
    n, c, _ = x.shape
    x4 = x.reshape(n, c, h, w)
    xp = jnp.pad(x4, ((0, 0), (0, 0), (1, 1), (1, 1)))
    cols = [xp[:, :, dy:dy + h, dx:dx + w] for dy in range(3) for dx in range(3)]
    return jnp.concatenate(cols, axis=1).reshape(n, 9 * c, h * w)


def conv3x3_forward(x, h, w_sp, wgt, bias, *, pre=None, act="none"):
    # x: [N, Cin, H*W]; wgt: [Cout, Cin, 3, 3] (PyTorch layout); pad=1, stride=1
    cout, cin = wgt.shape[0], wgt.shape[1]
    a = _im2col3x3(x, h, w_sp)
    wmat = jnp.transpose(wgt, (0, 2, 3, 1)).reshape(cout, 9 * cin)
    return conv_mm(a, wmat, bias, pre=pre, act=act)


def conv1x1_forward(x, wgt, bias, *, pre=None, scale=None, shift=None,
                    residual=None, act="none"):
    # x: [N, Cin, H*W]; wgt: [Cout, Cin, 1, 1]
    wmat = wgt[:, :, 0, 0]                               # [Cout, Cin]
    return conv_mm(x, wmat, bias, pre=pre, scale=scale, shift=shift,
                   residual=residual, act=act)


# ConvTranspose2d(kernel=4, stride=2, padding=1) taps per output parity,
# offsets are into the 1-padded input:
#   parity 0: (k=3 -> padded offset 0), (k=1 -> padded offset 1)
#   parity 1: (k=2 -> padded offset 1), (k=0 -> padded offset 2)
_CT_TAPS = {0: ((3, 0), (1, 1)), 1: ((2, 1), (0, 2))}


def conv_transpose4x4s2_forward(x, h, w_sp, wgt, bias, act="relu"):
    # x: [N, Cin, H*W]; wgt: [Cin, Cout, 4, 4] (PyTorch ConvTranspose2d layout)
    # One shared 9-tap im2col and ONE matmul producing all 4 output phases.
    n, c, m = x.shape
    cout = wgt.shape[1]
    a = _im2col3x3(x, h, w_sp)                           # [N, 9*Cin, M]

    wbig = jnp.zeros((4 * cout, 9 * c), jnp.float32)
    for py in (0, 1):
        for px in (0, 1):
            p = py * 2 + px
            for ky, dy in _CT_TAPS[py]:
                for kx, dx in _CT_TAPS[px]:
                    t = dy * 3 + dx
                    wbig = wbig.at[p * cout:(p + 1) * cout,
                                   t * c:(t + 1) * c].set(wgt[:, :, ky, kx].T)
    bbig = jnp.tile(bias, 4)

    out = conv_mm(a, wbig, bbig, act=act)                # [N, 4*Cout, M]
    out = out.reshape(n, 2, 2, cout, h, w_sp)            # [N, py, px, Cout, H, W]
    out = jnp.transpose(out, (0, 3, 4, 1, 5, 2))         # [N, Cout, H, 2, W, 2]
    return out.reshape(n, cout, 4 * m)                   # [N, Cout, (2H)*(2W)]


# ---------------------------------------------------------------------------
# Module forward (matches the PyTorch graph)
# ---------------------------------------------------------------------------
def resblock_forward(x, h, w_sp, p):
    # ReLU -> Conv3x3 -> BN -> ReLU -> Conv1x1, then residual add.
    h1 = conv3x3_forward(x, h, w_sp, p["conv1"]["w"], p["conv1"]["b"],
                         pre="relu", act="none")
    s, ss = bn_stats(h1)
    count = h1.shape[0] * h1.shape[2]
    scale, shift = _bn_scale_shift(s, ss, count, p["bn"]["gamma"], p["bn"]["beta"])
    # BN normalize + ReLU fused as conv1x1 prologue; residual add fused in epilogue.
    return conv1x1_forward(h1, p["conv2"]["w"], p["conv2"]["b"],
                           pre="bn_relu", scale=scale, shift=shift,
                           residual=x, act="none")


def decoder_block_forward(x, h, w_sp, p):
    x = resblock_forward(x, h, w_sp, p["res"])
    x = conv3x3_forward(x, h, w_sp, p["convrelu"]["w"], p["convrelu"]["b"], act="relu")
    s, ss = bn_stats(x)
    scale, shift = _bn_scale_shift(s, ss, x.shape[0] * x.shape[2],
                                   p["bn"]["gamma"], p["bn"]["beta"])
    x = bn_normalize(x, scale, shift, act="none")
    x = conv_transpose4x4s2_forward(x, h, w_sp, p["convT"]["w"], p["convT"]["b"],
                                    act="relu")
    return x                                             # spatial now (2h, 2w)


@jax.jit
def decoder_resnet_forward(x_nchw, params):
    n, c, h, w = x_nchw.shape
    x = x_nchw.reshape(n, c, h * w)                      # NCHW consumed directly
    for bp in params["blocks"]:
        x = decoder_block_forward(x, h, w, bp)
        h, w = 2 * h, 2 * w
    x = conv3x3_forward(x, h, w, params["convrelu"]["w"], params["convrelu"]["b"],
                        act="relu")
    s, ss = bn_stats(x)
    scale, shift = _bn_scale_shift(s, ss, x.shape[0] * x.shape[2],
                                   params["bn"]["gamma"], params["bn"]["beta"])
    x = bn_normalize(x, scale, shift, act="none")
    # final ConvTranspose2d followed by F.tanh -> tanh fused in the kernel epilogue
    x = conv_transpose4x4s2_forward(x, h, w, params["convT"]["w"],
                                    params["convT"]["b"], act="tanh")
    h, w = 2 * h, 2 * w
    return x.reshape(n, x.shape[1], h, w)                # NCHW out


# ---------------------------------------------------------------------------
# Deterministic parameter init (shapes from the PyTorch module __init__)
# ---------------------------------------------------------------------------
def _conv_init(key, cin, cout, k):
    kw, kb = jax.random.split(key)
    lim = 1.0 / (cin * k * k) ** 0.5
    w = jax.random.uniform(kw, (cout, cin, k, k), dtype=jnp.float32,
                           minval=-lim, maxval=lim)
    b = jax.random.uniform(kb, (cout,), dtype=jnp.float32, minval=-lim, maxval=lim)
    return {"w": w, "b": b}


def _convT_init(key, cin, cout, k):
    kw, kb = jax.random.split(key)
    lim = 1.0 / (cout * k * k) ** 0.5
    w = jax.random.uniform(kw, (cin, cout, k, k), dtype=jnp.float32,
                           minval=-lim, maxval=lim)
    b = jax.random.uniform(kb, (cout,), dtype=jnp.float32, minval=-lim, maxval=lim)
    return {"w": w, "b": b}


def _bn_init(c):
    return {"gamma": jnp.ones((c,), jnp.float32), "beta": jnp.zeros((c,), jnp.float32)}


def init_params(key, d, num_channels):
    specs = [(d, 4 * d, 4 * d), (4 * d, 2 * d, 2 * d), (2 * d, d, d)]
    keys = jax.random.split(key, 4 * len(specs) + 2)
    blocks, ki = [], 0
    for cin, mid, cout in specs:
        blocks.append({
            "res": {"conv1": _conv_init(keys[ki], cin, cin, 3),
                    "bn": _bn_init(cin),
                    "conv2": _conv_init(keys[ki + 1], cin, cin, 1)},
            "convrelu": _conv_init(keys[ki + 2], cin, mid, 3),
            "bn": _bn_init(mid),
            "convT": _convT_init(keys[ki + 3], mid, cout, 4),
        })
        ki += 4
    return {"blocks": blocks,
            "convrelu": _conv_init(keys[ki], d, num_channels, 3),
            "bn": _bn_init(num_channels),
            "convT": _convT_init(keys[ki + 1], num_channels, num_channels, 4)}


# ---------------------------------------------------------------------------
if __name__ == "__main__":
    d, num_channels = 4, 3
    N, H, W = 2, 8, 8
    key = jax.random.PRNGKey(0)
    kx, kp = jax.random.split(key)
    x = jax.random.normal(kx, (N, d, H, W), dtype=jnp.float32)   # NCHW like PyTorch
    params = init_params(kp, d, num_channels)

    y = decoder_resnet_forward(x, params)
    jax.block_until_ready(y)

    # 3 DecoderBlockV2 (x2 each) + final ConvTranspose (x2) => 16x upsampling
    assert y.shape == (N, num_channels, 16 * H, 16 * W), y.shape
    assert y.dtype == jnp.float32
    assert bool(jnp.all(jnp.isfinite(y)))
    assert bool(jnp.all(jnp.abs(y) <= 1.0))     # tanh output range
    print("KERNEL_OK")
</pallas_src>

<mosaic_0001>
module attributes {stable_mosaic.version = 11 : i64} {
  func.func @kernel(%arg0: i32, %arg1: i32, %arg2: memref<1x36x64xf32, #tpu.memory_space<vmem>>, %arg3: memref<4x36xf32, #tpu.memory_space<vmem>>, %arg4: memref<4x1xf32, #tpu.memory_space<vmem>>, %arg5: memref<1x4x64xf32, #tpu.memory_space<vmem>>) attributes {dimension_semantics = [#tpu.dimension_semantics<parallel>, #tpu.dimension_semantics<parallel>], iteration_bounds = array<i64: 2, 1>, scalar_prefetch = 0 : i64, scratch_operands = 0 : i64, tpu.core_type = #tpu.core_type<tc>, window_params = [{transform_indices = @transform_0, window_bounds = array<i64: 1, 36, 64>}, {pipeline_mode = #tpu.pipeline_mode<synchronous>, transform_indices = @transform_1, window_bounds = array<i64: 4, 36>}, {pipeline_mode = #tpu.pipeline_mode<synchronous>, transform_indices = @transform_2, window_bounds = array<i64: 4, 1>}, {transform_indices = @transform_3, window_bounds = array<i64: 1, 4, 64>}]} {
    %c0 = arith.constant 0 : index
    %c0_0 = arith.constant 0 : index
    %c0_1 = arith.constant 0 : index
    %0 = vector.load %arg2[%c0, %c0_0, %c0_1] : memref<1x36x64xf32, #tpu.memory_space<vmem>>, vector<1x36x64xf32>
    %1 = vector.shape_cast %0 : vector<1x36x64xf32> to vector<36x64xf32>
    %cst = arith.constant 0.000000e+00 : f32
    %2 = vector.broadcast %cst : f32 to vector<36x64xf32>
    %3 = arith.maximumf %1, %2 : vector<36x64xf32>
    %c0_2 = arith.constant 0 : index
    %c0_3 = arith.constant 0 : index
    %4 = vector.load %arg3[%c0_2, %c0_3] : memref<4x36xf32, #tpu.memory_space<vmem>>, vector<4x36xf32>
    %cst_4 = arith.constant dense<0.000000e+00> : vector<4x64xf32>
    %5 = tpu.matmul %4, %3, %cst_4 {dimension_numbers = #tpu.dot_dimension_numbers<[1], [0], [0], [1], [0, 0, 1, 1], [], []>} : vector<4x36xf32>, vector<36x64xf32>, vector<4x64xf32> -> vector<4x64xf32>
    %c0_5 = arith.constant 0 : index
    %c0_6 = arith.constant 0 : index
    %6 = vector.load %arg4[%c0_5, %c0_6] : memref<4x1xf32, #tpu.memory_space<vmem>>, vector<4x1xf32>
    %7 = vector.broadcast %6 : vector<4x1xf32> to vector<4x64xf32>
    %8 = arith.addf %5, %7 : vector<4x64xf32>
    %c0_7 = arith.constant 0 : index
    %c0_8 = arith.constant 0 : index
    %c0_9 = arith.constant 0 : index
    %9 = vector.load %arg5[%c0_7, %c0_8, %c0_9] : memref<1x4x64xf32, #tpu.memory_space<vmem>>, vector<1x4x64xf32>
    %10 = vector.shape_cast %9 : vector<1x4x64xf32> to vector<4x64xf32>
    %11 = vector.shape_cast %8 : vector<4x64xf32> to vector<1x4x64xf32>
    tpu.vector_store %arg5[%c0_7, %c0_8, %c0_9], %11 {strides = array<i32>} : memref<1x4x64xf32, #tpu.memory_space<vmem>>, vector<1x4x64xf32>,
    return
  }
  func.func @transform_0(%arg0: i32, %arg1: i32) -> (i32, i32, i32) {
    %c0_i32 = arith.constant 0 : i32
    %c0_i32_0 = arith.constant 0 : i32
    return %arg0, %c0_i32, %arg1 : i32, i32, i32
  }
  func.func @transform_1(%arg0: i32, %arg1: i32) -> (i32, i32) {
    %c0_i32 = arith.constant 0 : i32
    %c0_i32_0 = arith.constant 0 : i32
    %c0_i32_1 = arith.constant 0 : i32
    return %c0_i32, %c0_i32_0 : i32, i32
  }
  func.func @transform_2(%arg0: i32, %arg1: i32) -> (i32, i32) {
    %c0_i32 = arith.constant 0 : i32
    %c0_i32_0 = arith.constant 0 : i32
    %c0_i32_1 = arith.constant 0 : i32
    return %c0_i32, %c0_i32_0 : i32, i32
  }
  func.func @transform_3(%arg0: i32, %arg1: i32) -> (i32, i32, i32) {
    %c0_i32 = arith.constant 0 : i32
    %c0_i32_0 = arith.constant 0 : i32
    return %arg0, %c0_i32, %arg1 : i32, i32, i32
  }
}

module attributes {stable_mosaic.version = 11 : i64} {
  func.func @_bn_stats_kernel(%arg0: i32, %arg1: i32, %arg2: memref<1x4x64xf32, #tpu.memory_space<vmem>>, %arg3: memref<4x1xf32, #tpu.memory_space<vmem>>, %arg4: memref<4x1xf32, #tpu.memory_space<vmem>>) attributes {dimension_semantics = [#tpu.dimension_semantics<arbitrary>, #tpu.dimension_semantics<arbitrary>], iteration_bounds = array<i64: 2, 1>, scalar_prefetch = 0 : i64, scratch_operands = 0 : i64, tpu.core_type = #tpu.core_type<tc>, window_params = [{transform_indices = @transform_0, window_bounds = array<i64: 1, 4, 64>}, {pipeline_mode = #tpu.pipeline_mode<synchronous>, transform_indices = @transform_1, window_bounds = array<i64: 4, 1>}, {pipeline_mode = #tpu.pipeline_mode<synchronous>, transform_indices = @transform_2, window_bounds = array<i64: 4, 1>}]} {
    %c0_i32 = arith.constant 0 : i32
    %0 = arith.cmpi eq, %arg0, %c0_i32 : i32
    %c0_i32_0 = arith.constant 0 : i32
    %1 = arith.cmpi eq, %arg1, %c0_i32_0 : i32
    %2 = arith.andi %0, %1 : i1
    %3 = arith.extui %2 : i1 to i32
    %c0_i32_1 = arith.constant 0 : i32
    %4 = arith.cmpi ne, %3, %c0_i32_1 : i32
    scf.if %4 {
      %cst_13 = arith.constant 0.000000e+00 : f32
      %18 = vector.broadcast %cst_13 : f32 to vector<4x1xf32>
      %c0_14 = arith.constant 0 : index
      %c0_15 = arith.constant 0 : index
      %19 = vector.load %arg3[%c0_14, %c0_15] : memref<4x1xf32, #tpu.memory_space<vmem>>, vector<4x1xf32>
      tpu.vector_store %arg3[%c0_14, %c0_15], %18 {strides = array<i32>} : memref<4x1xf32, #tpu.memory_space<vmem>>, vector<4x1xf32>,
      %cst_16 = arith.constant 0.000000e+00 : f32
      %20 = vector.broadcast %cst_16 : f32 to vector<4x1xf32>
      %c0_17 = arith.constant 0 : index
      %c0_18 = arith.constant 0 : index
      %21 = vector.load %arg4[%c0_17, %c0_18] : memref<4x1xf32, #tpu.memory_space<vmem>>, vector<4x1xf32>
      tpu.vector_store %arg4[%c0_17, %c0_18], %20 {strides = array<i32>} : memref<4x1xf32, #tpu.memory_space<vmem>>, vector<4x1xf32>,
    } else {
    }
    %c0 = arith.constant 0 : index
    %c0_2 = arith.constant 0 : index
    %c0_3 = arith.constant 0 : index
    %5 = vector.load %arg2[%c0, %c0_2, %c0_3] : memref<1x4x64xf32, #tpu.memory_space<vmem>>, vector<1x4x64xf32>
    %6 = vector.shape_cast %5 : vector<1x4x64xf32> to vector<4x64xf32>
    %c0_4 = arith.constant 0 : index
    %c0_5 = arith.constant 0 : index
    %7 = vector.load %arg3[%c0_4, %c0_5] : memref<4x1xf32, #tpu.memory_space<vmem>>, vector<4x1xf32>
    %cst = arith.constant dense<0.000000e+00> : vector<4xf32>
    %8 = vector.multi_reduction <add>, %6, %cst [1] : vector<4x64xf32> to vector<4xf32>
    %9 = vector.shape_cast %8 : vector<4xf32> to vector<4x1xf32>
    %10 = arith.addf %7, %9 : vector<4x1xf32>
    %c0_6 = arith.constant 0 : index
    %c0_7 = arith.constant 0 : index
    %11 = vector.load %arg3[%c0_6, %c0_7] : memref<4x1xf32, #tpu.memory_space<vmem>>, vector<4x1xf32>
    tpu.vector_store %arg3[%c0_6, %c0_7], %10 {strides = array<i32>} : memref<4x1xf32, #tpu.memory_space<vmem>>, vector<4x1xf32>,
    %c0_8 = arith.constant 0 : index
    %c0_9 = arith.constant 0 : index
    %12 = vector.load %arg4[%c0_8, %c0_9] : memref<4x1xf32, #tpu.memory_space<vmem>>, vector<4x1xf32>
    %13 = arith.mulf %6, %6 : vector<4x64xf32>
    %cst_10 = arith.constant dense<0.000000e+00> : vector<4xf32>
    %14 = vector.multi_reduction <add>, %13, %cst_10 [1] : vector<4x64xf32> to vector<4xf32>
    %15 = vector.shape_cast %14 : vector<4xf32> to vector<4x1xf32>
    %16 = arith.addf %12, %15 : vector<4x1xf32>
    %c0_11 = arith.constant 0 : index
    %c0_12 = arith.constant 0 : index
    %17 = vector.load %arg4[%c0_11, %c0_12] : memref<4x1xf32, #tpu.memory_space<vmem>>, vector<4x1xf32>
    tpu.vector_store %arg4[%c0_11, %c0_12], %16 {strides = array<i32>} : memref<4x1xf32, #tpu.memory_space<vmem>>, vector<4x1xf32>,
    return
  }
  func.func @transform_0(%arg0: i32, %arg1: i32) -> (i32, i32, i32) {
    %c0_i32 = arith.constant 0 : i32
    %c0_i32_0 = arith.constant 0 : i32
    return %arg0, %c0_i32, %arg1 : i32, i32, i32
  }
  func.func @transform_1(%arg0: i32, %arg1: i32) -> (i32, i32) {
    %c0_i32 = arith.constant 0 : i32
    %c0_i32_0 = arith.constant 0 : i32
    %c0_i32_1 = arith.constant 0 : i32
    return %c0_i32, %c0_i32_0 : i32, i32
  }
  func.func @transform_2(%arg0: i32, %arg1: i32) -> (i32, i32) {
    %c0_i32 = arith.constant 0 : i32
    %c0_i32_0 = arith.constant 0 : i32
    %c0_i32_1 = arith.constant 0 : i32
    return %c0_i32, %c0_i32_0 : i32, i32
  }
}

module attributes {stable_mosaic.version = 11 : i64} {
  func.func @kernel(%arg0: i32, %arg1: i32, %arg2: memref<1x4x64xf32, #tpu.memory_space<vmem>>, %arg3: memref<4x4xf32, #tpu.memory_space<vmem>>, %arg4: memref<4x1xf32, #tpu.memory_space<vmem>>, %arg5: memref<4x1xf32, #tpu.memory_space<vmem>>, %arg6: memref<4x1xf32, #tpu.memory_space<vmem>>, %arg7: memref<1x4x64xf32, #tpu.memory_space<vmem>>, %arg8: memref<1x4x64xf32, #tpu.memory_space<vmem>>) attributes {dimension_semantics = [#tpu.dimension_semantics<parallel>, #tpu.dimension_semantics<parallel>], iteration_bounds = array<i64: 2, 1>, scalar_prefetch = 0 : i64, scratch_operands = 0 : i64, tpu.core_type = #tpu.core_type<tc>, window_params = [{transform_indices = @transform_0, window_bounds = array<i64: 1, 4, 64>}, {pipeline_mode = #tpu.pipeline_mode<synchronous>, transform_indices = @transform_1, window_bounds = array<i64: 4, 4>}, {pipeline_mode = #tpu.pipeline_mode<synchronous>, transform_indices = @transform_2, window_bounds = array<i64: 4, 1>}, {pipeline_mode = #tpu.pipeline_mode<synchronous>, transform_indices = @transform_3, window_bounds = array<i64: 4, 1>}, {pipeline_mode = #tpu.pipeline_mode<synchronous>, transform_indices = @transform_4, window_bounds = array<i64: 4, 1>}, {transform_indices = @transform_5, window_bounds = array<i64: 1, 4, 64>}, {transform_indices = @transform_6, window_bounds = array<i64: 1, 4, 64>}]} {
    %c0 = arith.constant 0 : index
    %c0_0 = arith.constant 0 : index
    %c0_1 = arith.constant 0 : index
    %0 = vector.load %arg2[%c0, %c0_0, %c0_1] : memref<1x4x64xf32, #tpu.memory_space<vmem>>, vector<1x4x64xf32>
    %1 = vector.shape_cast %0 : vector<1x4x64xf32> to vector<4x64xf32>
    %c0_2 = arith.constant 0 : index
    %c0_3 = arith.constant 0 : index
    %2 = vector.load %arg5[%c0_2, %c0_3] : memref<4x1xf32, #tpu.memory_space<vmem>>, vector<4x1xf32>
    %3 = vector.broadcast %2 : vector<4x1xf32> to vector<4x64xf32>
    %4 = arith.mulf %1, %3 : vector<4x64xf32>
    %c0_4 = arith.constant 0 : index
    %c0_5 = arith.constant 0 : index
    %5 = vector.load %arg6[%c0_4, %c0_5] : memref<4x1xf32, #tpu.memory_space<vmem>>, vector<4x1xf32>
    %6 = vector.broadcast %5 : vector<4x1xf32> to vector<4x64xf32>
    %7 = arith.addf %4, %6 : vector<4x64xf32>
    %cst = arith.constant 0.000000e+00 : f32
    %8 = vector.broadcast %cst : f32 to vector<4x64xf32>
    %9 = arith.maximumf %7, %8 : vector<4x64xf32>
    %c0_6 = arith.constant 0 : index
    %c0_7 = arith.constant 0 : index
    %10 = vector.load %arg3[%c0_6, %c0_7] : memref<4x4xf32, #tpu.memory_space<vmem>>, vector<4x4xf32>
    %cst_8 = arith.constant dense<0.000000e+00> : vector<4x64xf32>
    %11 = tpu.matmul %10, %9, %cst_8 {dimension_numbers = #tpu.dot_dimension_numbers<[1], [0], [0], [1], [0, 0, 1, 1], [], []>} : vector<4x4xf32>, vector<4x64xf32>, vector<4x64xf32> -> vector<4x64xf32>
    %c0_9 = arith.constant 0 : index
    %c0_10 = arith.constant 0 : index
    %12 = vector.load %arg4[%c0_9, %c0_10] : memref<4x1xf32, #tpu.memory_space<vmem>>, vector<4x1xf32>
    %13 = vector.broadcast %12 : vector<4x1xf32> to vector<4x64xf32>
    %14 = arith.addf %11, %13 : vector<4x64xf32>
    %c0_11 = arith.constant 0 : index
    %c0_12 = arith.constant 0 : index
    %c0_13 = arith.constant 0 : index
    %15 = vector.load %arg7[%c0_11, %c0_12, %c0_13] : memref<1x4x64xf32, #tpu.memory_space<vmem>>, vector<1x4x64xf32>
    %16 = vector.shape_cast %15 : vector<1x4x64xf32> to vector<4x64xf32>
    %17 = arith.addf %14, %16 : vector<4x64xf32>
    %c0_14 = arith.constant 0 : index
    %c0_15 = arith.constant 0 : index
    %c0_16 = arith.constant 0 : index
    %18 = vector.load %arg8[%c0_14, %c0_15, %c0_16] : memref<1x4x64xf32, #tpu.memory_space<vmem>>, vector<1x4x64xf32>
    %19 = vector.shape_cast %18 : vector<1x4x64xf32> to vector<4x64xf32>
    %20 = vector.shape_cast %17 : vector<4x64xf32> to vector<1x4x64xf32>
    tpu.vector_store %arg8[%c0_14, %c0_15, %c0_16], %20 {strides = array<i32>} : memref<1x4x64xf32, #tpu.memory_space<vmem>>, vector<1x4x64xf32>,
    return
  }
  func.func @transform_0(%arg0: i32, %arg1: i32) -> (i32, i32, i32) {
    %c0_i32 = arith.constant 0 : i32
    %c0_i32_0 = arith.constant 0 : i32
    return %arg0, %c0_i32, %arg1 : i32, i32, i32
  }
  func.func @transform_1(%arg0: i32, %arg1: i32) -> (i32, i32) {
    %c0_i32 = arith.constant 0 : i32
    %c0_i32_0 = arith.constant 0 : i32
    %c0_i32_1 = arith.constant 0 : i32
    return %c0_i32, %c0_i32_0 : i32, i32
  }
  func.func @transform_2(%arg0: i32, %arg1: i32) -> (i32, i32) {
    %c0_i32 = arith.constant 0 : i32
    %c0_i32_0 = arith.constant 0 : i32
    %c0_i32_1 = arith.constant 0 : i32
    return %c0_i32, %c0_i32_0 : i32, i32
  }
  func.func @transform_3(%arg0: i32, %arg1: i32) -> (i32, i32) {
    %c0_i32 = arith.constant 0 : i32
    %c0_i32_0 = arith.constant 0 : i32
    %c0_i32_1 = arith.constant 0 : i32
    return %c0_i32, %c0_i32_0 : i32, i32
  }
  func.func @transform_4(%arg0: i32, %arg1: i32) -> (i32, i32) {
    %c0_i32 = arith.constant 0 : i32
    %c0_i32_0 = arith.constant 0 : i32
    %c0_i32_1 = arith.constant 0 : i32
    return %c0_i32, %c0_i32_0 : i32, i32
  }
  func.func @transform_5(%arg0: i32, %arg1: i32) -> (i32, i32, i32) {
    %c0_i32 = arith.constant 0 : i32
    %c0_i32_0 = arith.constant 0 : i32
    return %arg0, %c0_i32, %arg1 : i32, i32, i32
  }
  func.func @transform_6(%arg0: i32, %arg1: i32) -> (i32, i32, i32) {
    %c0_i32 = arith.constant 0 : i32
    %c0_i32_0 = arith.constant 0 : i32
    return %arg0, %c0_i32, %arg1 : i32, i32, i32
  }
}

module attributes {stable_mosaic.version = 11 : i64} {
  func.func @_bn_stats_kernel(%arg0: i32, %arg1: i32, %arg2: memref<1x16x64xf32, #tpu.memory_space<vmem>>, %arg3: memref<16x1xf32, #tpu.memory_space<vmem>>, %arg4: memref<16x1xf32, #tpu.memory_space<vmem>>) attributes {dimension_semantics = [#tpu.dimension_semantics<arbitrary>, #tpu.dimension_semantics<arbitrary>], iteration_bounds = array<i64: 2, 1>, scalar_prefetch = 0 : i64, scratch_operands = 0 : i64, tpu.core_type = #tpu.core_type<tc>, window_params = [{transform_indices = @transform_0, window_bounds = array<i64: 1, 16, 64>}, {pipeline_mode = #tpu.pipeline_mode<synchronous>, transform_indices = @transform_1, window_bounds = array<i64: 16, 1>}, {pipeline_mode = #tpu.pipeline_mode<synchronous>, transform_indices = @transform_2, window_bounds = array<i64: 16, 1>}]} {
    %c0_i32 = arith.constant 0 : i32
    %0 = arith.cmpi eq, %arg0, %c0_i32 : i32
    %c0_i32_0 = arith.constant 0 : i32
    %1 = arith.cmpi eq, %arg1, %c0_i32_0 : i32
    %2 = arith.andi %0, %1 : i1
    %3 = arith.extui %2 : i1 to i32
    %c0_i32_1 = arith.constant 0 : i32
    %4 = arith.cmpi ne, %3, %c0_i32_1 : i32
    scf.if %4 {
      %cst_13 = arith.constant 0.000000e+00 : f32
      %18 = vector.broadcast %cst_13 : f32 to vector<16x1xf32>
      %c0_14 = arith.constant 0 : index
      %c0_15 = arith.constant 0 : index
      %19 = vector.load %arg3[%c0_14, %c0_15] : memref<16x1xf32, #tpu.memory_space<vmem>>, vector<16x1xf32>
      tpu.vector_store %arg3[%c0_14, %c0_15], %18 {strides = array<i32>} : memref<16x1xf32, #tpu.memory_space<vmem>>, vector<16x1xf32>,
      %cst_16 = arith.constant 0.000000e+00 : f32
      %20 = vector.broadcast %cst_16 : f32 to vector<16x1xf32>
      %c0_17 = arith.constant 0 : index
      %c0_18 = arith.constant 0 : index
      %21 = vector.load %arg4[%c0_17, %c0_18] : memref<16x1xf32, #tpu.memory_space<vmem>>, vector<16x1xf32>
      tpu.vector_store %arg4[%c0_17, %c0_18], %20 {strides = array<i32>} : memref<16x1xf32, #tpu.memory_space<vmem>>, vector<16x1xf32>,
    } else {
    }
    %c0 = arith.constant 0 : index
    %c0_2 = arith.constant 0 : index
    %c0_3 = arith.constant 0 : index
    %5 = vector.load %arg2[%c0, %c0_2, %c0_3] : memref<1x16x64xf32, #tpu.memory_space<vmem>>, vector<1x16x64xf32>
    %6 = vector.shape_cast %5 : vector<1x16x64xf32> to vector<16x64xf32>
    %c0_4 = arith.constant 0 : index
    %c0_5 = arith.constant 0 : index
    %7 = vector.load %arg3[%c0_4, %c0_5] : memref<16x1xf32, #tpu.memory_space<vmem>>, vector<16x1xf32>
    %cst = arith.constant dense<0.000000e+00> : vector<16xf32>
    %8 = vector.multi_reduction <add>, %6, %cst [1] : vector<16x64xf32> to vector<16xf32>
    %9 = vector.shape_cast %8 : vector<16xf32> to vector<16x1xf32>
    %10 = arith.addf %7, %9 : vector<16x1xf32>
    %c0_6 = arith.constant 0 : index
    %c0_7 = arith.constant 0 : index
    %11 = vector.load %arg3[%c0_6, %c0_7] : memref<16x1xf32, #tpu.memory_space<vmem>>, vector<16x1xf32>
    tpu.vector_store %arg3[%c0_6, %c0_7], %10 {strides = array<i32>} : memref<16x1xf32, #tpu.memory_space<vmem>>, vector<16x1xf32>,
    %c0_8 = arith.constant 0 : index
    %c0_9 = arith.constant 0 : index
    %12 = vector.load %arg4[%c0_8, %c0_9] : memref<16x1xf32, #tpu.memory_space<vmem>>, vector<16x1xf32>
    %13 = arith.mulf %6, %6 : vector<16x64xf32>
    %cst_10 = arith.constant dense<0.000000e+00> : vector<16xf32>
    %14 = vector.multi_reduction <add>, %13, %cst_10 [1] : vector<16x64xf32> to vector<16xf32>
    %15 = vector.shape_cast %14 : vector<16xf32> to vector<16x1xf32>
    %16 = arith.addf %12, %15 : vector<16x1xf32>
    %c0_11 = arith.constant 0 : index
    %c0_12 = arith.constant 0 : index
    %17 = vector.load %arg4[%c0_11, %c0_12] : memref<16x1xf32, #tpu.memory_space<vmem>>, vector<16x1xf32>
    tpu.vector_store %arg4[%c0_11, %c0_12], %16 {strides = array<i32>} : memref<16x1xf32, #tpu.memory_space<vmem>>, vector<16x1xf32>,
    return
  }
  func.func @transform_0(%arg0: i32, %arg1: i32) -> (i32, i32, i32) {
    %c0_i32 = arith.constant 0 : i32
    %c0_i32_0 = arith.constant 0 : i32
    return %arg0, %c0_i32, %arg1 : i32, i32, i32
  }
  func.func @transform_1(%arg0: i32, %arg1: i32) -> (i32, i32) {
    %c0_i32 = arith.constant 0 : i32
    %c0_i32_0 = arith.constant 0 : i32
    %c0_i32_1 = arith.constant 0 : i32
    return %c0_i32, %c0_i32_0 : i32, i32
  }
  func.func @transform_2(%arg0: i32, %arg1: i32) -> (i32, i32) {
    %c0_i32 = arith.constant 0 : i32
    %c0_i32_0 = arith.constant 0 : i32
    %c0_i32_1 = arith.constant 0 : i32
    return %c0_i32, %c0_i32_0 : i32, i32
  }
}

module attributes {stable_mosaic.version = 11 : i64} {
  func.func @kernel(%arg0: i32, %arg1: i32, %arg2: memref<1x36x64xf32, #tpu.memory_space<vmem>>, %arg3: memref<16x36xf32, #tpu.memory_space<vmem>>, %arg4: memref<16x1xf32, #tpu.memory_space<vmem>>, %arg5: memref<1x16x64xf32, #tpu.memory_space<vmem>>) attributes {dimension_semantics = [#tpu.dimension_semantics<parallel>, #tpu.dimension_semantics<parallel>], iteration_bounds = array<i64: 2, 1>, scalar_prefetch = 0 : i64, scratch_operands = 0 : i64, tpu.core_type = #tpu.core_type<tc>, window_params = [{transform_indices = @transform_0, window_bounds = array<i64: 1, 36, 64>}, {pipeline_mode = #tpu.pipeline_mode<synchronous>, transform_indices = @transform_1, window_bounds = array<i64: 16, 36>}, {pipeline_mode = #tpu.pipeline_mode<synchronous>, transform_indices = @transform_2, window_bounds = array<i64: 16, 1>}, {transform_indices = @transform_3, window_bounds = array<i64: 1, 16, 64>}]} {
    %c0 = arith.constant 0 : index
    %c0_0 = arith.constant 0 : index
    %c0_1 = arith.constant 0 : index
    %0 = vector.load %arg2[%c0, %c0_0, %c0_1] : memref<1x36x64xf32, #tpu.memory_space<vmem>>, vector<1x36x64xf32>
    %1 = vector.shape_cast %0 : vector<1x36x64xf32> to vector<36x64xf32>
    %c0_2 = arith.constant 0 : index
    %c0_3 = arith.constant 0 : index
    %2 = vector.load %arg3[%c0_2, %c0_3] : memref<16x36xf32, #tpu.memory_space<vmem>>, vector<16x36xf32>
    %cst = arith.constant dense<0.000000e+00> : vector<16x64xf32>
    %3 = tpu.matmul %2, %1, %cst {dimension_numbers = #tpu.dot_dimension_numbers<[1], [0], [0], [1], [0, 0, 1, 1], [], []>} : vector<16x36xf32>, vector<36x64xf32>, vector<16x64xf32> -> vector<16x64xf32>
    %c0_4 = arith.constant 0 : index
    %c0_5 = arith.constant 0 : index
    %4 = vector.load %arg4[%c0_4, %c0_5] : memref<16x1xf32, #tpu.memory_space<vmem>>, vector<16x1xf32>
    %5 = vector.broadcast %4 : vector<16x1xf32> to vector<16x64xf32>
    %6 = arith.addf %3, %5 : vector<16x64xf32>
    %cst_6 = arith.constant 0.000000e+00 : f32
    %7 = vector.broadcast %cst_6 : f32 to vector<16x64xf32>
    %8 = arith.maximumf %6, %7 : vector<16x64xf32>
    %c0_7 = arith.constant 0 : index
    %c0_8 = arith.constant 0 : index
    %c0_9 = arith.constant 0 : index
    %9 = vector.load %arg5[%c0_7, %c0_8, %c0_9] : memref<1x16x64xf32, #tpu.memory_space<vmem>>, vector<1x16x64xf32>
    %10 = vector.shape_cast %9 : vector<1x16x64xf32> to vector<16x64xf32>
    %11 = vector.shape_cast %8 : vector<16x64xf32> to vector<1x16x64xf32>
    tpu.vector_store %arg5[%c0_7, %c0_8, %c0_9], %11 {strides = array<i32>} : memref<1x16x64xf32, #tpu.memory_space<vmem>>, vector<1x16x64xf32>,
    return
  }
  func.func @transform_0(%arg0: i32, %arg1: i32) -> (i32, i32, i32) {
    %c0_i32 = arith.constant 0 : i32
    %c0_i32_0 = arith.constant 0 : i32
    return %arg0, %c0_i32, %arg1 : i32, i32, i32
  }
  func.func @transform_1(%arg0: i32, %arg1: i32) -> (i32, i32) {
    %c0_i32 = arith.constant 0 : i32
    %c0_i32_0 = arith.constant 0 : i32
    %c0_i32_1 = arith.constant 0 : i32
    return %c0_i32, %c0_i32_0 : i32, i32
  }
  func.func @transform_2(%arg0: i32, %arg1: i32) -> (i32, i32) {
    %c0_i32 = arith.constant 0 : i32
    %c0_i32_0 = arith.constant 0 : i32
    %c0_i32_1 = arith.constant 0 : i32
    return %c0_i32, %c0_i32_0 : i32, i32
  }
  func.func @transform_3(%arg0: i32, %arg1: i32) -> (i32, i32, i32) {
    %c0_i32 = arith.constant 0 : i32
    %c0_i32_0 = arith.constant 0 : i32
    return %arg0, %c0_i32, %arg1 : i32, i32, i32
  }
}

module attributes {stable_mosaic.version = 11 : i64} {
  func.func @_bn_norm_kernel(%arg0: i32, %arg1: i32, %arg2: memref<1x16x64xf32, #tpu.memory_space<vmem>>, %arg3: memref<16x1xf32, #tpu.memory_space<vmem>>, %arg4: memref<16x1xf32, #tpu.memory_space<vmem>>, %arg5: memref<1x16x64xf32, #tpu.memory_space<vmem>>) attributes {dimension_semantics = [#tpu.dimension_semantics<parallel>, #tpu.dimension_semantics<parallel>], iteration_bounds = array<i64: 2, 1>, scalar_prefetch = 0 : i64, scratch_operands = 0 : i64, tpu.core_type = #tpu.core_type<tc>, window_params = [{transform_indices = @transform_0, window_bounds = array<i64: 1, 16, 64>}, {pipeline_mode = #tpu.pipeline_mode<synchronous>, transform_indices = @transform_1, window_bounds = array<i64: 16, 1>}, {pipeline_mode = #tpu.pipeline_mode<synchronous>, transform_indices = @transform_2, window_bounds = array<i64: 16, 1>}, {transform_indices = @transform_3, window_bounds = array<i64: 1, 16, 64>}]} {
    %c0 = arith.constant 0 : index
    %c0_0 = arith.constant 0 : index
    %c0_1 = arith.constant 0 : index
    %0 = vector.load %arg2[%c0, %c0_0, %c0_1] : memref<1x16x64xf32, #tpu.memory_space<vmem>>, vector<1x16x64xf32>
    %1 = vector.shape_cast %0 : vector<1x16x64xf32> to vector<16x64xf32>
    %c0_2 = arith.constant 0 : index
    %c0_3 = arith.constant 0 : index
    %2 = vector.load %arg3[%c0_2, %c0_3] : memref<16x1xf32, #tpu.memory_space<vmem>>, vector<16x1xf32>
    %3 = vector.broadcast %2 : vector<16x1xf32> to vector<16x64xf32>
    %4 = arith.mulf %1, %3 : vector<16x64xf32>
    %c0_4 = arith.constant 0 : index
    %c0_5 = arith.constant 0 : index
    %5 = vector.load %arg4[%c0_4, %c0_5] : memref<16x1xf32, #tpu.memory_space<vmem>>, vector<16x1xf32>
    %6 = vector.broadcast %5 : vector<16x1xf32> to vector<16x64xf32>
    %7 = arith.addf %4, %6 : vector<16x64xf32>
    %c0_6 = arith.constant 0 : index
    %c0_7 = arith.constant 0 : index
    %c0_8 = arith.constant 0 : index
    %8 = vector.load %arg5[%c0_6, %c0_7, %c0_8] : memref<1x16x64xf32, #tpu.memory_space<vmem>>, vector<1x16x64xf32>
    %9 = vector.shape_cast %8 : vector<1x16x64xf32> to vector<16x64xf32>
    %10 = vector.shape_cast %7 : vector<16x64xf32> to vector<1x16x64xf32>
    tpu.vector_store %arg5[%c0_6, %c0_7, %c0_8], %10 {strides = array<i32>} : memref<1x16x64xf32, #tpu.memory_space<vmem>>, vector<1x16x64xf32>,
    return
  }
  func.func @transform_0(%arg0: i32, %arg1: i32) -> (i32, i32, i32) {
    %c0_i32 = arith.constant 0 : i32
    %c0_i32_0 = arith.constant 0 : i32
    return %arg0, %c0_i32, %arg1 : i32, i32, i32
  }
  func.func @transform_1(%arg0: i32, %arg1: i32) -> (i32, i32) {
    %c0_i32 = arith.constant 0 : i32
    %c0_i32_0 = arith.constant 0 : i32
    %c0_i32_1 = arith.constant 0 : i32
    return %c0_i32, %c0_i32_0 : i32, i32
  }
  func.func @transform_2(%arg0: i32, %arg1: i32) -> (i32, i32) {
    %c0_i32 = arith.constant 0 : i32
    %c0_i32_0 = arith.constant 0 : i32
    %c0_i32_1 = arith.constant 0 : i32
    return %c0_i32, %c0_i32_0 : i32, i32
  }
  func.func @transform_3(%arg0: i32, %arg1: i32) -> (i32, i32, i32) {
    %c0_i32 = arith.constant 0 : i32
    %c0_i32_0 = arith.constant 0 : i32
    return %arg0, %c0_i32, %arg1 : i32, i32, i32
  }
}

module attributes {stable_mosaic.version = 11 : i64} {
  func.func @kernel(%arg0: i32, %arg1: i32, %arg2: memref<1x144x64xf32, #tpu.memory_space<vmem>>, %arg3: memref<64x144xf32, #tpu.memory_space<vmem>>, %arg4: memref<64x1xf32, #tpu.memory_space<vmem>>, %arg5: memref<1x64x64xf32, #tpu.memory_space<vmem>>) attributes {dimension_semantics = [#tpu.dimension_semantics<parallel>, #tpu.dimension_semantics<parallel>], iteration_bounds = array<i64: 2, 1>, scalar_prefetch = 0 : i64, scratch_operands = 0 : i64, tpu.core_type = #tpu.core_type<tc>, window_params = [{transform_indices = @transform_0, window_bounds = array<i64: 1, 144, 64>}, {pipeline_mode = #tpu.pipeline_mode<synchronous>, transform_indices = @transform_1, window_bounds = array<i64: 64, 144>}, {pipeline_mode = #tpu.pipeline_mode<synchronous>, transform_indices = @transform_2, window_bounds = array<i64: 64, 1>}, {transform_indices = @transform_3, window_bounds = array<i64: 1, 64, 64>}]} {
    %c0 = arith.constant 0 : index
    %c0_0 = arith.constant 0 : index
    %c0_1 = arith.constant 0 : index
    %0 = vector.load %arg2[%c0, %c0_0, %c0_1] : memref<1x144x64xf32, #tpu.memory_space<vmem>>, vector<1x144x64xf32>
    %1 = vector.shape_cast %0 : vector<1x144x64xf32> to vector<144x64xf32>
    %c0_2 = arith.constant 0 : index
    %c0_3 = arith.constant 0 : index
    %2 = vector.load %arg3[%c0_2, %c0_3] : memref<64x144xf32, #tpu.memory_space<vmem>>, vector<64x144xf32>
    %cst = arith.constant dense<0.000000e+00> : vector<64x64xf32>
    %3 = tpu.matmul %2, %1, %cst {dimension_numbers = #tpu.dot_dimension_numbers<[1], [0], [0], [1], [0, 0, 1, 1], [], []>} : vector<64x144xf32>, vector<144x64xf32>, vector<64x64xf32> -> vector<64x64xf32>
    %c0_4 = arith.constant 0 : index
    %c0_5 = arith.constant 0 : index
    %4 = vector.load %arg4[%c0_4, %c0_5] : memref<64x1xf32, #tpu.memory_space<vmem>>, vector<64x1xf32>
    %5 = vector.broadcast %4 : vector<64x1xf32> to vector<64x64xf32>
    %6 = arith.addf %3, %5 : vector<64x64xf32>
    %cst_6 = arith.constant 0.000000e+00 : f32
    %7 = vector.broadcast %cst_6 : f32 to vector<64x64xf32>
    %8 = arith.maximumf %6, %7 : vector<64x64xf32>
    %c0_7 = arith.constant 0 : index
    %c0_8 = arith.constant 0 : index
    %c0_9 = arith.constant 0 : index
    %9 = vector.load %arg5[%c0_7, %c0_8, %c0_9] : memref<1x64x64xf32, #tpu.memory_space<vmem>>, vector<1x64x64xf32>
    %10 = vector.shape_cast %9 : vector<1x64x64xf32> to vector<64x64xf32>
    %11 = vector.shape_cast %8 : vector<64x64xf32> to vector<1x64x64xf32>
    tpu.vector_store %arg5[%c0_7, %c0_8, %c0_9], %11 {strides = array<i32>} : memref<1x64x64xf32, #tpu.memory_space<vmem>>, vector<1x64x64xf32>,
    return
  }
  func.func @transform_0(%arg0: i32, %arg1: i32) -> (i32, i32, i32) {
    %c0_i32 = arith.constant 0 : i32
    %c0_i32_0 = arith.constant 0 : i32
    return %arg0, %c0_i32, %arg1 : i32, i32, i32
  }
  func.func @transform_1(%arg0: i32, %arg1: i32) -> (i32, i32) {
    %c0_i32 = arith.constant 0 : i32
    %c0_i32_0 = arith.constant 0 : i32
    %c0_i32_1 = arith.constant 0 : i32
    return %c0_i32, %c0_i32_0 : i32, i32
  }
  func.func @transform_2(%arg0: i32, %arg1: i32) -> (i32, i32) {
    %c0_i32 = arith.constant 0 : i32
    %c0_i32_0 = arith.constant 0 : i32
    %c0_i32_1 = arith.constant 0 : i32
    return %c0_i32, %c0_i32_0 : i32, i32
  }
  func.func @transform_3(%arg0: i32, %arg1: i32) -> (i32, i32, i32) {
    %c0_i32 = arith.constant 0 : i32
    %c0_i32_0 = arith.constant 0 : i32
    return %arg0, %c0_i32, %arg1 : i32, i32, i32
  }
}

module attributes {stable_mosaic.version = 11 : i64} {
  func.func @kernel(%arg0: i32, %arg1: i32, %arg2: memref<1x144x256xf32, #tpu.memory_space<vmem>>, %arg3: memref<16x144xf32, #tpu.memory_space<vmem>>, %arg4: memref<16x1xf32, #tpu.memory_space<vmem>>, %arg5: memref<1x16x256xf32, #tpu.memory_space<vmem>>) attributes {dimension_semantics = [#tpu.dimension_semantics<parallel>, #tpu.dimension_semantics<parallel>], iteration_bounds = array<i64: 2, 1>, scalar_prefetch = 0 : i64, scratch_operands = 0 : i64, tpu.core_type = #tpu.core_type<tc>, window_params = [{transform_indices = @transform_0, window_bounds = array<i64: 1, 144, 256>}, {pipeline_mode = #tpu.pipeline_mode<synchronous>, transform_indices = @transform_1, window_bounds = array<i64: 16, 144>}, {pipeline_mode = #tpu.pipeline_mode<synchronous>, transform_indices = @transform_2, window_bounds = array<i64: 16, 1>}, {transform_indices = @transform_3, window_bounds = array<i64: 1, 16, 256>}]} {
    %c0 = arith.constant 0 : index
    %c0_0 = arith.constant 0 : index
    %c0_1 = arith.constant 0 : index
    %0 = vector.load %arg2[%c0, %c0_0, %c0_1] : memref<1x144x256xf32, #tpu.memory_space<vmem>>, vector<1x144x256xf32>
    %1 = vector.shape_cast %0 : vector<1x144x256xf32> to vector<144x256xf32>
    %cst = arith.constant 0.000000e+00 : f32
    %2 = vector.broadcast %cst : f32 to vector<144x256xf32>
    %3 = arith.maximumf %1, %2 : vector<144x256xf32>
    %c0_2 = arith.constant 0 : index
    %c0_3 = arith.constant 0 : index
    %4 = vector.load %arg3[%c0_2, %c0_3] : memref<16x144xf32, #tpu.memory_space<vmem>>, vector<16x144xf32>
    %cst_4 = arith.constant dense<0.000000e+00> : vector<16x256xf32>
    %5 = tpu.matmul %4, %3, %cst_4 {dimension_numbers = #tpu.dot_dimension_numbers<[1], [0], [0], [1], [0, 0, 1, 1], [], []>} : vector<16x144xf32>, vector<144x256xf32>, vector<16x256xf32> -> vector<16x256xf32>
    %c0_5 = arith.constant 0 : index
    %c0_6 = arith.constant 0 : index
    %6 = vector.load %arg4[%c0_5, %c0_6] : memref<16x1xf32, #tpu.memory_space<vmem>>, vector<16x1xf32>
    %7 = vector.broadcast %6 : vector<16x1xf32> to vector<16x256xf32>
    %8 = arith.addf %5, %7 : vector<16x256xf32>
    %c0_7 = arith.constant 0 : index
    %c0_8 = arith.constant 0 : index
    %c0_9 = arith.constant 0 : index
    %9 = vector.load %arg5[%c0_7, %c0_8, %c0_9] : memref<1x16x256xf32, #tpu.memory_space<vmem>>, vector<1x16x256xf32>
    %10 = vector.shape_cast %9 : vector<1x16x256xf32> to vector<16x256xf32>
    %11 = vector.shape_cast %8 : vector<16x256xf32> to vector<1x16x256xf32>
    tpu.vector_store %arg5[%c0_7, %c0_8, %c0_9], %11 {strides = array<i32>} : memref<1x16x256xf32, #tpu.memory_space<vmem>>, vector<1x16x256xf32>,
    return
  }
  func.func @transform_0(%arg0: i32, %arg1: i32) -> (i32, i32, i32) {
    %c0_i32 = arith.constant 0 : i32
    %c0_i32_0 = arith.constant 0 : i32
    return %arg0, %c0_i32, %arg1 : i32, i32, i32
  }
  func.func @transform_1(%arg0: i32, %arg1: i32) -> (i32, i32) {
    %c0_i32 = arith.constant 0 : i32
    %c0_i32_0 = arith.constant 0 : i32
    %c0_i32_1 = arith.constant 0 : i32
    return %c0_i32, %c0_i32_0 : i32, i32
  }
  func.func @transform_2(%arg0: i32, %arg1: i32) -> (i32, i32) {
    %c0_i32 = arith.constant 0 : i32
    %c0_i32_0 = arith.constant 0 : i32
    %c0_i32_1 = arith.constant 0 : i32
    return %c0_i32, %c0_i32_0 : i32, i32
  }
  func.func @transform_3(%arg0: i32, %arg1: i32) -> (i32, i32, i32) {
    %c0_i32 = arith.constant 0 : i32
    %c0_i32_0 = arith.constant 0 : i32
    return %arg0, %c0_i32, %arg1 : i32, i32, i32
  }
}

module attributes {stable_mosaic.version = 11 : i64} {
  func.func @_bn_stats_kernel(%arg0: i32, %arg1: i32, %arg2: memref<1x16x256xf32, #tpu.memory_space<vmem>>, %arg3: memref<16x1xf32, #tpu.memory_space<vmem>>, %arg4: memref<16x1xf32, #tpu.memory_space<vmem>>) attributes {dimension_semantics = [#tpu.dimension_semantics<arbitrary>, #tpu.dimension_semantics<arbitrary>], iteration_bounds = array<i64: 2, 1>, scalar_prefetch = 0 : i64, scratch_operands = 0 : i64, tpu.core_type = #tpu.core_type<tc>, window_params = [{transform_indices = @transform_0, window_bounds = array<i64: 1, 16, 256>}, {pipeline_mode = #tpu.pipeline_mode<synchronous>, transform_indices = @transform_1, window_bounds = array<i64: 16, 1>}, {pipeline_mode = #tpu.pipeline_mode<synchronous>, transform_indices = @transform_2, window_bounds = array<i64: 16, 1>}]} {
    %c0_i32 = arith.constant 0 : i32
    %0 = arith.cmpi eq, %arg0, %c0_i32 : i32
    %c0_i32_0 = arith.constant 0 : i32
    %1 = arith.cmpi eq, %arg1, %c0_i32_0 : i32
    %2 = arith.andi %0, %1 : i1
    %3 = arith.extui %2 : i1 to i32
    %c0_i32_1 = arith.constant 0 : i32
    %4 = arith.cmpi ne, %3, %c0_i32_1 : i32
    scf.if %4 {
      %cst_13 = arith.constant 0.000000e+00 : f32
      %18 = vector.broadcast %cst_13 : f32 to vector<16x1xf32>
      %c0_14 = arith.constant 0 : index
      %c0_15 = arith.constant 0 : index
      %19 = vector.load %arg3[%c0_14, %c0_15] : memref<16x1xf32, #tpu.memory_space<vmem>>, vector<16x1xf32>
      tpu.vector_store %arg3[%c0_14, %c0_15], %18 {strides = array<i32>} : memref<16x1xf32, #tpu.memory_space<vmem>>, vector<16x1xf32>,
      %cst_16 = arith.constant 0.000000e+00 : f32
      %20 = vector.broadcast %cst_16 : f32 to vector<16x1xf32>
      %c0_17 = arith.constant 0 : index
      %c0_18 = arith.constant 0 : index
      %21 = vector.load %arg4[%c0_17, %c0_18] : memref<16x1xf32, #tpu.memory_space<vmem>>, vector<16x1xf32>
      tpu.vector_store %arg4[%c0_17, %c0_18], %20 {strides = array<i32>} : memref<16x1xf32, #tpu.memory_space<vmem>>, vector<16x1xf32>,
    } else {
    }
    %c0 = arith.constant 0 : index
    %c0_2 = arith.constant 0 : index
    %c0_3 = arith.constant 0 : index
    %5 = vector.load %arg2[%c0, %c0_2, %c0_3] : memref<1x16x256xf32, #tpu.memory_space<vmem>>, vector<1x16x256xf32>
    %6 = vector.shape_cast %5 : vector<1x16x256xf32> to vector<16x256xf32>
    %c0_4 = arith.constant 0 : index
    %c0_5 = arith.constant 0 : index
    %7 = vector.load %arg3[%c0_4, %c0_5] : memref<16x1xf32, #tpu.memory_space<vmem>>, vector<16x1xf32>
    %cst = arith.constant dense<0.000000e+00> : vector<16xf32>
    %8 = vector.multi_reduction <add>, %6, %cst [1] : vector<16x256xf32> to vector<16xf32>
    %9 = vector.shape_cast %8 : vector<16xf32> to vector<16x1xf32>
    %10 = arith.addf %7, %9 : vector<16x1xf32>
    %c0_6 = arith.constant 0 : index
    %c0_7 = arith.constant 0 : index
    %11 = vector.load %arg3[%c0_6, %c0_7] : memref<16x1xf32, #tpu.memory_space<vmem>>, vector<16x1xf32>
    tpu.vector_store %arg3[%c0_6, %c0_7], %10 {strides = array<i32>} : memref<16x1xf32, #tpu.memory_space<vmem>>, vector<16x1xf32>,
    %c0_8 = arith.constant 0 : index
    %c0_9 = arith.constant 0 : index
    %12 = vector.load %arg4[%c0_8, %c0_9] : memref<16x1xf32, #tpu.memory_space<vmem>>, vector<16x1xf32>
    %13 = arith.mulf %6, %6 : vector<16x256xf32>
    %cst_10 = arith.constant dense<0.000000e+00> : vector<16xf32>
    %14 = vector.multi_reduction <add>, %13, %cst_10 [1] : vector<16x256xf32> to vector<16xf32>
    %15 = vector.shape_cast %14 : vector<16xf32> to vector<16x1xf32>
    %16 = arith.addf %12, %15 : vector<16x1xf32>
    %c0_11 = arith.constant 0 : index
    %c0_12 = arith.constant 0 : index
    %17 = vector.load %arg4[%c0_11, %c0_12] : memref<16x1xf32, #tpu.memory_space<vmem>>, vector<16x1xf32>
    tpu.vector_store %arg4[%c0_11, %c0_12], %16 {strides = array<i32>} : memref<16x1xf32, #tpu.memory_space<vmem>>, vector<16x1xf32>,
    return
  }
  func.func @transform_0(%arg0: i32, %arg1: i32) -> (i32, i32, i32) {
    %c0_i32 = arith.constant 0 : i32
    %c0_i32_0 = arith.constant 0 : i32
    return %arg0, %c0_i32, %arg1 : i32, i32, i32
  }
  func.func @transform_1(%arg0: i32, %arg1: i32) -> (i32, i32) {
    %c0_i32 = arith.constant 0 : i32
    %c0_i32_0 = arith.constant 0 : i32
    %c0_i32_1 = arith.constant 0 : i32
    return %c0_i32, %c0_i32_0 : i32, i32
  }
  func.func @transform_2(%arg0: i32, %arg1: i32) -> (i32, i32) {
    %c0_i32 = arith.constant 0 : i32
    %c0_i32_0 = arith.constant 0 : i32
    %c0_i32_1 = arith.constant 0 : i32
    return %c0_i32, %c0_i32_0 : i32, i32
  }
}

module attributes {stable_mosaic.version = 11 : i64} {
  func.func @kernel(%arg0: i32, %arg1: i32, %arg2: memref<1x16x256xf32, #tpu.memory_space<vmem>>, %arg3: memref<16x16xf32, #tpu.memory_space<vmem>>, %arg4: memref<16x1xf32, #tpu.memory_space<vmem>>, %arg5: memref<16x1xf32, #tpu.memory_space<vmem>>, %arg6: memref<16x1xf32, #tpu.memory_space<vmem>>, %arg7: memref<1x16x256xf32, #tpu.memory_space<vmem>>, %arg8: memref<1x16x256xf32, #tpu.memory_space<vmem>>) attributes {dimension_semantics = [#tpu.dimension_semantics<parallel>, #tpu.dimension_semantics<parallel>], iteration_bounds = array<i64: 2, 1>, scalar_prefetch = 0 : i64, scratch_operands = 0 : i64, tpu.core_type = #tpu.core_type<tc>, window_params = [{transform_indices = @transform_0, window_bounds = array<i64: 1, 16, 256>}, {pipeline_mode = #tpu.pipeline_mode<synchronous>, transform_indices = @transform_1, window_bounds = array<i64: 16, 16>}, {pipeline_mode = #tpu.pipeline_mode<synchronous>, transform_indices = @transform_2, window_bounds = array<i64: 16, 1>}, {pipeline_mode = #tpu.pipeline_mode<synchronous>, transform_indices = @transform_3, window_bounds = array<i64: 16, 1>}, {pipeline_mode = #tpu.pipeline_mode<synchronous>, transform_indices = @transform_4, window_bounds = array<i64: 16, 1>}, {transform_indices = @transform_5, window_bounds = array<i64: 1, 16, 256>}, {transform_indices = @transform_6, window_bounds = array<i64: 1, 16, 256>}]} {
    %c0 = arith.constant 0 : index
    %c0_0 = arith.constant 0 : index
    %c0_1 = arith.constant 0 : index
    %0 = vector.load %arg2[%c0, %c0_0, %c0_1] : memref<1x16x256xf32, #tpu.memory_space<vmem>>, vector<1x16x256xf32>
    %1 = vector.shape_cast %0 : vector<1x16x256xf32> to vector<16x256xf32>
    %c0_2 = arith.constant 0 : index
    %c0_3 = arith.constant 0 : index
    %2 = vector.load %arg5[%c0_2, %c0_3] : memref<16x1xf32, #tpu.memory_space<vmem>>, vector<16x1xf32>
    %3 = vector.broadcast %2 : vector<16x1xf32> to vector<16x256xf32>
    %4 = arith.mulf %1, %3 : vector<16x256xf32>
    %c0_4 = arith.constant 0 : index
    %c0_5 = arith.constant 0 : index
    %5 = vector.load %arg6[%c0_4, %c0_5] : memref<16x1xf32, #tpu.memory_space<vmem>>, vector<16x1xf32>
    %6 = vector.broadcast %5 : vector<16x1xf32> to vector<16x256xf32>
    %7 = arith.addf %4, %6 : vector<16x256xf32>
    %cst = arith.constant 0.000000e+00 : f32
    %8 = vector.broadcast %cst : f32 to vector<16x256xf32>
    %9 = arith.maximumf %7, %8 : vector<16x256xf32>
    %c0_6 = arith.constant 0 : index
    %c0_7 = arith.constant 0 : index
    %10 = vector.load %arg3[%c0_6, %c0_7] : memref<16x16xf32, #tpu.memory_space<vmem>>, vector<16x16xf32>
    %cst_8 = arith.constant dense<0.000000e+00> : vector<16x256xf32>
    %11 = tpu.matmul %10, %9, %cst_8 {dimension_numbers = #tpu.dot_dimension_numbers<[1], [0], [0], [1], [0, 0, 1, 1], [], []>} : vector<16x16xf32>, vector<16x256xf32>, vector<16x256xf32> -> vector<16x256xf32>
    %c0_9 = arith.constant 0 : index
    %c0_10 = arith.constant 0 : index
    %12 = vector.load %arg4[%c0_9, %c0_10] : memref<16x1xf32, #tpu.memory_space<vmem>>, vector<16x1xf32>
    %13 = vector.broadcast %12 : vector<16x1xf32> to vector<16x256xf32>
    %14 = arith.addf %11, %13 : vector<16x256xf32>
    %c0_11 = arith.constant 0 : index
    %c0_12 = arith.constant 0 : index
    %c0_13 = arith.constant 0 : index
    %15 = vector.load %arg7[%c0_11, %c0_12, %c0_13] : memref<1x16x256xf32, #tpu.memory_space<vmem>>, vector<1x16x256xf32>
    %16 = vector.shape_cast %15 : vector<1x16x256xf32> to vector<16x256xf32>
    %17 = arith.addf %14, %16 : vector<16x256xf32>
    %c0_14 = arith.constant 0 : index
    %c0_15 = arith.constant 0 : index
    %c0_16 = arith.constant 0 : index
    %18 = vector.load %arg8[%c0_14, %c0_15, %c0_16] : memref<1x16x256xf32, #tpu.memory_space<vmem>>, vector<1x16x256xf32>
    %19 = vector.shape_cast %18 : vector<1x16x256xf32> to vector<16x256xf32>
    %20 = vector.shape_cast %17 : vector<16x256xf32> to vector<1x16x256xf32>
    tpu.vector_store %arg8[%c0_14, %c0_15, %c0_16], %20 {strides = array<i32>} : memref<1x16x256xf32, #tpu.memory_space<vmem>>, vector<1x16x256xf32>,
    return
  }
  func.func @transform_0(%arg0: i32, %arg1: i32) -> (i32, i32, i32) {
    %c0_i32 = arith.constant 0 : i32
    %c0_i32_0 = arith.constant 0 : i32
    return %arg0, %c0_i32, %arg1 : i32, i32, i32
  }
  func.func @transform_1(%arg0: i32, %arg1: i32) -> (i32, i32) {
    %c0_i32 = arith.constant 0 : i32
    %c0_i32_0 = arith.constant 0 : i32
    %c0_i32_1 = arith.constant 0 : i32
    return %c0_i32, %c0_i32_0 : i32, i32
  }
  func.func @transform_2(%arg0: i32, %arg1: i32) -> (i32, i32) {
    %c0_i32 = arith.constant 0 : i32
    %c0_i32_0 = arith.constant 0 : i32
    %c0_i32_1 = arith.constant 0 : i32
    return %c0_i32, %c0_i32_0 : i32, i32
  }
  func.func @transform_3(%arg0: i32, %arg1: i32) -> (i32, i32) {
    %c0_i32 = arith.constant 0 : i32
    %c0_i32_0 = arith.constant 0 : i32
    %c0_i32_1 = arith.constant 0 : i32
    return %c0_i32, %c0_i32_0 : i32, i32
  }
  func.func @transform_4(%arg0: i32, %arg1: i32) -> (i32, i32) {
    %c0_i32 = arith.constant 0 : i32
    %c0_i32_0 = arith.constant 0 : i32
    %c0_i32_1 = arith.constant 0 : i32
    return %c0_i32, %c0_i32_0 : i32, i32
  }
  func.func @transform_5(%arg0: i32, %arg1: i32) -> (i32, i32, i32) {
    %c0_i32 = arith.constant 0 : i32
    %c0_i32_0 = arith.constant 0 : i32
    return %arg0, %c0_i32, %arg1 : i32, i32, i32
  }
  func.func @transform_6(%arg0: i32, %arg1: i32) -> (i32, i32, i32) {
    %c0_i32 = arith.constant 0 : i32
    %c0_i32_0 = arith.constant 0 : i32
    return %arg0, %c0_i32, %arg1 : i32, i32, i32
  }
}

module attributes {stable_mosaic.version = 11 : i64} {
  func.func @kernel(%arg0: i32, %arg1: i32, %arg2: memref<1x144x256xf32, #tpu.memory_space<vmem>>, %arg3: memref<8x144xf32, #tpu.memory_space<vmem>>, %arg4: memref<8x1xf32, #tpu.memory_space<vmem>>, %arg5: memref<1x8x256xf32, #tpu.memory_space<vmem>>) attributes {dimension_semantics = [#tpu.dimension_semantics<parallel>, #tpu.dimension_semantics<parallel>], iteration_bounds = array<i64: 2, 1>, scalar_prefetch = 0 : i64, scratch_operands = 0 : i64, tpu.core_type = #tpu.core_type<tc>, window_params = [{transform_indices = @transform_0, window_bounds = array<i64: 1, 144, 256>}, {pipeline_mode = #tpu.pipeline_mode<synchronous>, transform_indices = @transform_1, window_bounds = array<i64: 8, 144>}, {pipeline_mode = #tpu.pipeline_mode<synchronous>, transform_indices = @transform_2, window_bounds = array<i64: 8, 1>}, {transform_indices = @transform_3, window_bounds = array<i64: 1, 8, 256>}]} {
    %c0 = arith.constant 0 : index
    %c0_0 = arith.constant 0 : index
    %c0_1 = arith.constant 0 : index
    %0 = vector.load %arg2[%c0, %c0_0, %c0_1] : memref<1x144x256xf32, #tpu.memory_space<vmem>>, vector<1x144x256xf32>
    %1 = vector.shape_cast %0 : vector<1x144x256xf32> to vector<144x256xf32>
    %c0_2 = arith.constant 0 : index
    %c0_3 = arith.constant 0 : index
    %2 = vector.load %arg3[%c0_2, %c0_3] : memref<8x144xf32, #tpu.memory_space<vmem>>, vector<8x144xf32>
    %cst = arith.constant dense<0.000000e+00> : vector<8x256xf32>
    %3 = tpu.matmul %2, %1, %cst {dimension_numbers = #tpu.dot_dimension_numbers<[1], [0], [0], [1], [0, 0, 1, 1], [], []>} : vector<8x144xf32>, vector<144x256xf32>, vector<8x256xf32> -> vector<8x256xf32>
    %c0_4 = arith.constant 0 : index
    %c0_5 = arith.constant 0 : index
    %4 = vector.load %arg4[%c0_4, %c0_5] : memref<8x1xf32, #tpu.memory_space<vmem>>, vector<8x1xf32>
    %5 = vector.broadcast %4 : vector<8x1xf32> to vector<8x256xf32>
    %6 = arith.addf %3, %5 : vector<8x256xf32>
    %cst_6 = arith.constant 0.000000e+00 : f32
    %7 = vector.broadcast %cst_6 : f32 to vector<8x256xf32>
    %8 = arith.maximumf %6, %7 : vector<8x256xf32>
    %c0_7 = arith.constant 0 : index
    %c0_8 = arith.constant 0 : index
    %c0_9 = arith.constant 0 : index
    %9 = vector.load %arg5[%c0_7, %c0_8, %c0_9] : memref<1x8x256xf32, #tpu.memory_space<vmem>>, vector<1x8x256xf32>
    %10 = vector.shape_cast %9 : vector<1x8x256xf32> to vector<8x256xf32>
    %11 = vector.shape_cast %8 : vector<8x256xf32> to vector<1x8x256xf32>
    tpu.vector_store %arg5[%c0_7, %c0_8, %c0_9], %11 {strides = array<i32>} : memref<1x8x256xf32, #tpu.memory_space<vmem>>, vector<1x8x256xf32>,
    return
  }
  func.func @transform_0(%arg0: i32, %arg1: i32) -> (i32, i32, i32) {
    %c0_i32 = arith.constant 0 : i32
    %c0_i32_0 = arith.constant 0 : i32
    return %arg0, %c0_i32, %arg1 : i32, i32, i32
  }
  func.func @transform_1(%arg0: i32, %arg1: i32) -> (i32, i32) {
    %c0_i32 = arith.constant 0 : i32
    %c0_i32_0 = arith.constant 0 : i32
    %c0_i32_1 = arith.constant 0 : i32
    return %c0_i32, %c0_i32_0 : i32, i32
  }
  func.func @transform_2(%arg0: i32, %arg1: i32) -> (i32, i32) {
    %c0_i32 = arith.constant 0 : i32
    %c0_i32_0 = arith.constant 0 : i32
    %c0_i32_1 = arith.constant 0 : i32
    return %c0_i32, %c0_i32_0 : i32, i32
  }
  func.func @transform_3(%arg0: i32, %arg1: i32) -> (i32, i32, i32) {
    %c0_i32 = arith.constant 0 : i32
    %c0_i32_0 = arith.constant 0 : i32
    return %arg0, %c0_i32, %arg1 : i32, i32, i32
  }
}

module attributes {stable_mosaic.version = 11 : i64} {
  func.func @_bn_stats_kernel(%arg0: i32, %arg1: i32, %arg2: memref<1x8x256xf32, #tpu.memory_space<vmem>>, %arg3: memref<8x1xf32, #tpu.memory_space<vmem>>, %arg4: memref<8x1xf32, #tpu.memory_space<vmem>>) attributes {dimension_semantics = [#tpu.dimension_semantics<arbitrary>, #tpu.dimension_semantics<arbitrary>], iteration_bounds = array<i64: 2, 1>, scalar_prefetch = 0 : i64, scratch_operands = 0 : i64, tpu.core_type = #tpu.core_type<tc>, window_params = [{transform_indices = @transform_0, window_bounds = array<i64: 1, 8, 256>}, {pipeline_mode = #tpu.pipeline_mode<synchronous>, transform_indices = @transform_1, window_bounds = array<i64: 8, 1>}, {pipeline_mode = #tpu.pipeline_mode<synchronous>, transform_indices = @transform_2, window_bounds = array<i64: 8, 1>}]} {
    %c0_i32 = arith.constant 0 : i32
    %0 = arith.cmpi eq, %arg0, %c0_i32 : i32
    %c0_i32_0 = arith.constant 0 : i32
    %1 = arith.cmpi eq, %arg1, %c0_i32_0 : i32
    %2 = arith.andi %0, %1 : i1
    %3 = arith.extui %2 : i1 to i32
    %c0_i32_1 = arith.constant 0 : i32
    %4 = arith.cmpi ne, %3, %c0_i32_1 : i32
    scf.if %4 {
      %cst_13 = arith.constant 0.000000e+00 : f32
      %18 = vector.broadcast %cst_13 : f32 to vector<8x1xf32>
      %c0_14 = arith.constant 0 : index
      %c0_15 = arith.constant 0 : index
      %19 = vector.load %arg3[%c0_14, %c0_15] : memref<8x1xf32, #tpu.memory_space<vmem>>, vector<8x1xf32>
      tpu.vector_store %arg3[%c0_14, %c0_15], %18 {strides = array<i32>} : memref<8x1xf32, #tpu.memory_space<vmem>>, vector<8x1xf32>,
      %cst_16 = arith.constant 0.000000e+00 : f32
      %20 = vector.broadcast %cst_16 : f32 to vector<8x1xf32>
      %c0_17 = arith.constant 0 : index
      %c0_18 = arith.constant 0 : index
      %21 = vector.load %arg4[%c0_17, %c0_18] : memref<8x1xf32, #tpu.memory_space<vmem>>, vector<8x1xf32>
      tpu.vector_store %arg4[%c0_17, %c0_18], %20 {strides = array<i32>} : memref<8x1xf32, #tpu.memory_space<vmem>>, vector<8x1xf32>,
    } else {
    }
    %c0 = arith.constant 0 : index
    %c0_2 = arith.constant 0 : index
    %c0_3 = arith.constant 0 : index
    %5 = vector.load %arg2[%c0, %c0_2, %c0_3] : memref<1x8x256xf32, #tpu.memory_space<vmem>>, vector<1x8x256xf32>
    %6 = vector.shape_cast %5 : vector<1x8x256xf32> to vector<8x256xf32>
    %c0_4 = arith.constant 0 : index
    %c0_5 = arith.constant 0 : index
    %7 = vector.load %arg3[%c0_4, %c0_5] : memref<8x1xf32, #tpu.memory_space<vmem>>, vector<8x1xf32>
    %cst = arith.constant dense<0.000000e+00> : vector<8xf32>
    %8 = vector.multi_reduction <add>, %6, %cst [1] : vector<8x256xf32> to vector<8xf32>
    %9 = vector.shape_cast %8 : vector<8xf32> to vector<8x1xf32>
    %10 = arith.addf %7, %9 : vector<8x1xf32>
    %c0_6 = arith.constant 0 : index
    %c0_7 = arith.constant 0 : index
    %11 = vector.load %arg3[%c0_6, %c0_7] : memref<8x1xf32, #tpu.memory_space<vmem>>, vector<8x1xf32>
    tpu.vector_store %arg3[%c0_6, %c0_7], %10 {strides = array<i32>} : memref<8x1xf32, #tpu.memory_space<vmem>>, vector<8x1xf32>,
    %c0_8 = arith.constant 0 : index
    %c0_9 = arith.constant 0 : index
    %12 = vector.load %arg4[%c0_8, %c0_9] : memref<8x1xf32, #tpu.memory_space<vmem>>, vector<8x1xf32>
    %13 = arith.mulf %6, %6 : vector<8x256xf32>
    %cst_10 = arith.constant dense<0.000000e+00> : vector<8xf32>
    %14 = vector.multi_reduction <add>, %13, %cst_10 [1] : vector<8x256xf32> to vector<8xf32>
    %15 = vector.shape_cast %14 : vector<8xf32> to vector<8x1xf32>
    %16 = arith.addf %12, %15 : vector<8x1xf32>
    %c0_11 = arith.constant 0 : index
    %c0_12 = arith.constant 0 : index
    %17 = vector.load %arg4[%c0_11, %c0_12] : memref<8x1xf32, #tpu.memory_space<vmem>>, vector<8x1xf32>
    tpu.vector_store %arg4[%c0_11, %c0_12], %16 {strides = array<i32>} : memref<8x1xf32, #tpu.memory_space<vmem>>, vector<8x1xf32>,
    return
  }
  func.func @transform_0(%arg0: i32, %arg1: i32) -> (i32, i32, i32) {
    %c0_i32 = arith.constant 0 : i32
    %c0_i32_0 = arith.constant 0 : i32
    return %arg0, %c0_i32, %arg1 : i32, i32, i32
  }
  func.func @transform_1(%arg0: i32, %arg1: i32) -> (i32, i32) {
    %c0_i32 = arith.constant 0 : i32
    %c0_i32_0 = arith.constant 0 : i32
    %c0_i32_1 = arith.constant 0 : i32
    return %c0_i32, %c0_i32_0 : i32, i32
  }
  func.func @transform_2(%arg0: i32, %arg1: i32) -> (i32, i32) {
    %c0_i32 = arith.constant 0 : i32
    %c0_i32_0 = arith.constant 0 : i32
    %c0_i32_1 = arith.constant 0 : i32
    return %c0_i32, %c0_i32_0 : i32, i32
  }
}

module attributes {stable_mosaic.version = 11 : i64} {
  func.func @_bn_norm_kernel(%arg0: i32, %arg1: i32, %arg2: memref<1x8x256xf32, #tpu.memory_space<vmem>>, %arg3: memref<8x1xf32, #tpu.memory_space<vmem>>, %arg4: memref<8x1xf32, #tpu.memory_space<vmem>>, %arg5: memref<1x8x256xf32, #tpu.memory_space<vmem>>) attributes {dimension_semantics = [#tpu.dimension_semantics<parallel>, #tpu.dimension_semantics<parallel>], iteration_bounds = array<i64: 2, 1>, scalar_prefetch = 0 : i64, scratch_operands = 0 : i64, tpu.core_type = #tpu.core_type<tc>, window_params = [{transform_indices = @transform_0, window_bounds = array<i64: 1, 8, 256>}, {pipeline_mode = #tpu.pipeline_mode<synchronous>, transform_indices = @transform_1, window_bounds = array<i64: 8, 1>}, {pipeline_mode = #tpu.pipeline_mode<synchronous>, transform_indices = @transform_2, window_bounds = array<i64: 8, 1>}, {transform_indices = @transform_3, window_bounds = array<i64: 1, 8, 256>}]} {
    %c0 = arith.constant 0 : index
    %c0_0 = arith.constant 0 : index
    %c0_1 = arith.constant 0 : index
    %0 = vector.load %arg2[%c0, %c0_0, %c0_1] : memref<1x8x256xf32, #tpu.memory_space<vmem>>, vector<1x8x256xf32>
    %1 = vector.shape_cast %0 : vector<1x8x256xf32> to vector<8x256xf32>
    %c0_2 = arith.constant 0 : index
    %c0_3 = arith.constant 0 : index
    %2 = vector.load %arg3[%c0_2, %c0_3] : memref<8x1xf32, #tpu.memory_space<vmem>>, vector<8x1xf32>
    %3 = vector.broadcast %2 : vector<8x1xf32> to vector<8x256xf32>
    %4 = arith.mulf %1, %3 : vector<8x256xf32>
    %c0_4 = arith.constant 0 : index
    %c0_5 = arith.constant 0 : index
    %5 = vector.load %arg4[%c0_4, %c0_5] : memref<8x1xf32, #tpu.memory_space<vmem>>, vector<8x1xf32>
    %6 = vector.broadcast %5 : vector<8x1xf32> to vector<8x256xf32>
    %7 = arith.addf %4, %6 : vector<8x256xf32>
    %c0_6 = arith.constant 0 : index
    %c0_7 = arith.constant 0 : index
    %c0_8 = arith.constant 0 : index
    %8 = vector.load %arg5[%c0_6, %c0_7, %c0_8] : memref<1x8x256xf32, #tpu.memory_space<vmem>>, vector<1x8x256xf32>
    %9 = vector.shape_cast %8 : vector<1x8x256xf32> to vector<8x256xf32>
    %10 = vector.shape_cast %7 : vector<8x256xf32> to vector<1x8x256xf32>
    tpu.vector_store %arg5[%c0_6, %c0_7, %c0_8], %10 {strides = array<i32>} : memref<1x8x256xf32, #tpu.memory_space<vmem>>, vector<1x8x256xf32>,
    return
  }
  func.func @transform_0(%arg0: i32, %arg1: i32) -> (i32, i32, i32) {
    %c0_i32 = arith.constant 0 : i32
    %c0_i32_0 = arith.constant 0 : i32
    return %arg0, %c0_i32, %arg1 : i32, i32, i32
  }
  func.func @transform_1(%arg0: i32, %arg1: i32) -> (i32, i32) {
    %c0_i32 = arith.constant 0 : i32
    %c0_i32_0 = arith.constant 0 : i32
    %c0_i32_1 = arith.constant 0 : i32
    return %c0_i32, %c0_i32_0 : i32, i32
  }
  func.func @transform_2(%arg0: i32, %arg1: i32) -> (i32, i32) {
    %c0_i32 = arith.constant 0 : i32
    %c0_i32_0 = arith.constant 0 : i32
    %c0_i32_1 = arith.constant 0 : i32
    return %c0_i32, %c0_i32_0 : i32, i32
  }
  func.func @transform_3(%arg0: i32, %arg1: i32) -> (i32, i32, i32) {
    %c0_i32 = arith.constant 0 : i32
    %c0_i32_0 = arith.constant 0 : i32
    return %arg0, %c0_i32, %arg1 : i32, i32, i32
  }
}

module attributes {stable_mosaic.version = 11 : i64} {
  func.func @kernel(%arg0: i32, %arg1: i32, %arg2: memref<1x72x256xf32, #tpu.memory_space<vmem>>, %arg3: memref<32x72xf32, #tpu.memory_space<vmem>>, %arg4: memref<32x1xf32, #tpu.memory_space<vmem>>, %arg5: memref<1x32x256xf32, #tpu.memory_space<vmem>>) attributes {dimension_semantics = [#tpu.dimension_semantics<parallel>, #tpu.dimension_semantics<parallel>], iteration_bounds = array<i64: 2, 1>, scalar_prefetch = 0 : i64, scratch_operands = 0 : i64, tpu.core_type = #tpu.core_type<tc>, window_params = [{transform_indices = @transform_0, window_bounds = array<i64: 1, 72, 256>}, {pipeline_mode = #tpu.pipeline_mode<synchronous>, transform_indices = @transform_1, window_bounds = array<i64: 32, 72>}, {pipeline_mode = #tpu.pipeline_mode<synchronous>, transform_indices = @transform_2, window_bounds = array<i64: 32, 1>}, {transform_indices = @transform_3, window_bounds = array<i64: 1, 32, 256>}]} {
    %c0 = arith.constant 0 : index
    %c0_0 = arith.constant 0 : index
    %c0_1 = arith.constant 0 : index
    %0 = vector.load %arg2[%c0, %c0_0, %c0_1] : memref<1x72x256xf32, #tpu.memory_space<vmem>>, vector<1x72x256xf32>
    %1 = vector.shape_cast %0 : vector<1x72x256xf32> to vector<72x256xf32>
    %c0_2 = arith.constant 0 : index
    %c0_3 = arith.constant 0 : index
    %2 = vector.load %arg3[%c0_2, %c0_3] : memref<32x72xf32, #tpu.memory_space<vmem>>, vector<32x72xf32>
    %cst = arith.constant dense<0.000000e+00> : vector<32x256xf32>
    %3 = tpu.matmul %2, %1, %cst {dimension_numbers = #tpu.dot_dimension_numbers<[1], [0], [0], [1], [0, 0, 1, 1], [], []>} : vector<32x72xf32>, vector<72x256xf32>, vector<32x256xf32> -> vector<32x256xf32>
    %c0_4 = arith.constant 0 : index
    %c0_5 = arith.constant 0 : index
    %4 = vector.load %arg4[%c0_4, %c0_5] : memref<32x1xf32, #tpu.memory_space<vmem>>, vector<32x1xf32>
    %5 = vector.broadcast %4 : vector<32x1xf32> to vector<32x256xf32>
    %6 = arith.addf %3, %5 : vector<32x256xf32>
    %cst_6 = arith.constant 0.000000e+00 : f32
    %7 = vector.broadcast %cst_6 : f32 to vector<32x256xf32>
    %8 = arith.maximumf %6, %7 : vector<32x256xf32>
    %c0_7 = arith.constant 0 : index
    %c0_8 = arith.constant 0 : index
    %c0_9 = arith.constant 0 : index
    %9 = vector.load %arg5[%c0_7, %c0_8, %c0_9] : memref<1x32x256xf32, #tpu.memory_space<vmem>>, vector<1x32x256xf32>
    %10 = vector.shape_cast %9 : vector<1x32x256xf32> to vector<32x256xf32>
    %11 = vector.shape_cast %8 : vector<32x256xf32> to vector<1x32x256xf32>
    tpu.vector_store %arg5[%c0_7, %c0_8, %c0_9], %11 {strides = array<i32>} : memref<1x32x256xf32, #tpu.memory_space<vmem>>, vector<1x32x256xf32>,
    return
  }
  func.func @transform_0(%arg0: i32, %arg1: i32) -> (i32, i32, i32) {
    %c0_i32 = arith.constant 0 : i32
    %c0_i32_0 = arith.constant 0 : i32
    return %arg0, %c0_i32, %arg1 : i32, i32, i32
  }
  func.func @transform_1(%arg0: i32, %arg1: i32) -> (i32, i32) {
    %c0_i32 = arith.constant 0 : i32
    %c0_i32_0 = arith.constant 0 : i32
    %c0_i32_1 = arith.constant 0 : i32
    return %c0_i32, %c0_i32_0 : i32, i32
  }
  func.func @transform_2(%arg0: i32, %arg1: i32) -> (i32, i32) {
    %c0_i32 = arith.constant 0 : i32
    %c0_i32_0 = arith.constant 0 : i32
    %c0_i32_1 = arith.constant 0 : i32
    return %c0_i32, %c0_i32_0 : i32, i32
  }
  func.func @transform_3(%arg0: i32, %arg1: i32) -> (i32, i32, i32) {
    %c0_i32 = arith.constant 0 : i32
    %c0_i32_0 = arith.constant 0 : i32
    return %arg0, %c0_i32, %arg1 : i32, i32, i32
  }
}

module attributes {stable_mosaic.version = 11 : i64} {
  func.func @_bn_stats_kernel(%arg0: i32, %arg1: i32, %arg2: memref<1x8x512xf32, #tpu.memory_space<vmem>>, %arg3: memref<8x1xf32, #tpu.memory_space<vmem>>, %arg4: memref<8x1xf32, #tpu.memory_space<vmem>>) attributes {dimension_semantics = [#tpu.dimension_semantics<arbitrary>, #tpu.dimension_semantics<arbitrary>], iteration_bounds = array<i64: 2, 2>, scalar_prefetch = 0 : i64, scratch_operands = 0 : i64, tpu.core_type = #tpu.core_type<tc>, window_params = [{transform_indices = @transform_0, window_bounds = array<i64: 1, 8, 512>}, {pipeline_mode = #tpu.pipeline_mode<synchronous>, transform_indices = @transform_1, window_bounds = array<i64: 8, 1>}, {pipeline_mode = #tpu.pipeline_mode<synchronous>, transform_indices = @transform_2, window_bounds = array<i64: 8, 1>}]} {
    %c0_i32 = arith.constant 0 : i32
    %0 = arith.cmpi eq, %arg0, %c0_i32 : i32
    %c0_i32_0 = arith.constant 0 : i32
    %1 = arith.cmpi eq, %arg1, %c0_i32_0 : i32
    %2 = arith.andi %0, %1 : i1
    %3 = arith.extui %2 : i1 to i32
    %c0_i32_1 = arith.constant 0 : i32
    %4 = arith.cmpi ne, %3, %c0_i32_1 : i32
    scf.if %4 {
      %cst_13 = arith.constant 0.000000e+00 : f32
      %18 = vector.broadcast %cst_13 : f32 to vector<8x1xf32>
      %c0_14 = arith.constant 0 : index
      %c0_15 = arith.constant 0 : index
      %19 = vector.load %arg3[%c0_14, %c0_15] : memref<8x1xf32, #tpu.memory_space<vmem>>, vector<8x1xf32>
      tpu.vector_store %arg3[%c0_14, %c0_15], %18 {strides = array<i32>} : memref<8x1xf32, #tpu.memory_space<vmem>>, vector<8x1xf32>,
      %cst_16 = arith.constant 0.000000e+00 : f32
      %20 = vector.broadcast %cst_16 : f32 to vector<8x1xf32>
      %c0_17 = arith.constant 0 : index
      %c0_18 = arith.constant 0 : index
      %21 = vector.load %arg4[%c0_17, %c0_18] : memref<8x1xf32, #tpu.memory_space<vmem>>, vector<8x1xf32>
      tpu.vector_store %arg4[%c0_17, %c0_18], %20 {strides = array<i32>} : memref<8x1xf32, #tpu.memory_space<vmem>>, vector<8x1xf32>,
    } else {
    }
    %c0 = arith.constant 0 : index
    %c0_2 = arith.constant 0 : index
    %c0_3 = arith.constant 0 : index
    %5 = vector.load %arg2[%c0, %c0_2, %c0_3] : memref<1x8x512xf32, #tpu.memory_space<vmem>>, vector<1x8x512xf32>
    %6 = vector.shape_cast %5 : vector<1x8x512xf32> to vector<8x512xf32>
    %c0_4 = arith.constant 0 : index
    %c0_5 = arith.constant 0 : index
    %7 = vector.load %arg3[%c0_4, %c0_5] : memref<8x1xf32, #tpu.memory_space<vmem>>, vector<8x1xf32>
    %cst = arith.constant dense<0.000000e+00> : vector<8xf32>
    %8 = vector.multi_reduction <add>, %6, %cst [1] : vector<8x512xf32> to vector<8xf32>
    %9 = vector.shape_cast %8 : vector<8xf32> to vector<8x1xf32>
    %10 = arith.addf %7, %9 : vector<8x1xf32>
    %c0_6 = arith.constant 0 : index
    %c0_7 = arith.constant 0 : index
    %11 = vector.load %arg3[%c0_6, %c0_7] : memref<8x1xf32, #tpu.memory_space<vmem>>, vector<8x1xf32>
    tpu.vector_store %arg3[%c0_6, %c0_7], %10 {strides = array<i32>} : memref<8x1xf32, #tpu.memory_space<vmem>>, vector<8x1xf32>,
    %c0_8 = arith.constant 0 : index
    %c0_9 = arith.constant 0 : index
    %12 = vector.load %arg4[%c0_8, %c0_9] : memref<8x1xf32, #tpu.memory_space<vmem>>, vector<8x1xf32>
    %13 = arith.mulf %6, %6 : vector<8x512xf32>
    %cst_10 = arith.constant dense<0.000000e+00> : vector<8xf32>
    %14 = vector.multi_reduction <add>, %13, %cst_10 [1] : vector<8x512xf32> to vector<8xf32>
    %15 = vector.shape_cast %14 : vector<8xf32> to vector<8x1xf32>
    %16 = arith.addf %12, %15 : vector<8x1xf32>
    %c0_11 = arith.constant 0 : index
    %c0_12 = arith.constant 0 : index
    %17 = vector.load %arg4[%c0_11, %c0_12] : memref<8x1xf32, #tpu.memory_space<vmem>>, vector<8x1xf32>
    tpu.vector_store %arg4[%c0_11, %c0_12], %16 {strides = array<i32>} : memref<8x1xf32, #tpu.memory_space<vmem>>, vector<8x1xf32>,
    return
  }
  func.func @transform_0(%arg0: i32, %arg1: i32) -> (i32, i32, i32) {
    %c0_i32 = arith.constant 0 : i32
    %c0_i32_0 = arith.constant 0 : i32
    return %arg0, %c0_i32, %arg1 : i32, i32, i32
  }
  func.func @transform_1(%arg0: i32, %arg1: i32) -> (i32, i32) {
    %c0_i32 = arith.constant 0 : i32
    %c0_i32_0 = arith.constant 0 : i32
    %c0_i32_1 = arith.constant 0 : i32
    return %c0_i32, %c0_i32_0 : i32, i32
  }
  func.func @transform_2(%arg0: i32, %arg1: i32) -> (i32, i32) {
    %c0_i32 = arith.constant 0 : i32
    %c0_i32_0 = arith.constant 0 : i32
    %c0_i32_1 = arith.constant 0 : i32
    return %c0_i32, %c0_i32_0 : i32, i32
  }
}

module attributes {stable_mosaic.version = 11 : i64} {
  func.func @kernel(%arg0: i32, %arg1: i32, %arg2: memref<1x72x512xf32, #tpu.memory_space<vmem>>, %arg3: memref<8x72xf32, #tpu.memory_space<vmem>>, %arg4: memref<8x1xf32, #tpu.memory_space<vmem>>, %arg5: memref<1x8x512xf32, #tpu.memory_space<vmem>>) attributes {dimension_semantics = [#tpu.dimension_semantics<parallel>, #tpu.dimension_semantics<parallel>], iteration_bounds = array<i64: 2, 2>, scalar_prefetch = 0 : i64, scratch_operands = 0 : i64, tpu.core_type = #tpu.core_type<tc>, window_params = [{transform_indices = @transform_0, window_bounds = array<i64: 1, 72, 512>}, {pipeline_mode = #tpu.pipeline_mode<synchronous>, transform_indices = @transform_1, window_bounds = array<i64: 8, 72>}, {pipeline_mode = #tpu.pipeline_mode<synchronous>, transform_indices = @transform_2, window_bounds = array<i64: 8, 1>}, {transform_indices = @transform_3, window_bounds = array<i64: 1, 8, 512>}]} {
    %c0 = arith.constant 0 : index
    %c0_0 = arith.constant 0 : index
    %c0_1 = arith.constant 0 : index
    %0 = vector.load %arg2[%c0, %c0_0, %c0_1] : memref<1x72x512xf32, #tpu.memory_space<vmem>>, vector<1x72x512xf32>
    %1 = vector.shape_cast %0 : vector<1x72x512xf32> to vector<72x512xf32>
    %cst = arith.constant 0.000000e+00 : f32
    %2 = vector.broadcast %cst : f32 to vector<72x512xf32>
    %3 = arith.maximumf %1, %2 : vector<72x512xf32>
    %c0_2 = arith.constant 0 : index
    %c0_3 = arith.constant 0 : index
    %4 = vector.load %arg3[%c0_2, %c0_3] : memref<8x72xf32, #tpu.memory_space<vmem>>, vector<8x72xf32>
    %cst_4 = arith.constant dense<0.000000e+00> : vector<8x512xf32>
    %5 = tpu.matmul %4, %3, %cst_4 {dimension_numbers = #tpu.dot_dimension_numbers<[1], [0], [0], [1], [0, 0, 1, 1], [], []>} : vector<8x72xf32>, vector<72x512xf32>, vector<8x512xf32> -> vector<8x512xf32>
    %c0_5 = arith.constant 0 : index
    %c0_6 = arith.constant 0 : index
    %6 = vector.load %arg4[%c0_5, %c0_6] : memref<8x1xf32, #tpu.memory_space<vmem>>, vector<8x1xf32>
    %7 = vector.broadcast %6 : vector<8x1xf32> to vector<8x512xf32>
    %8 = arith.addf %5, %7 : vector<8x512xf32>
    %c0_7 = arith.constant 0 : index
    %c0_8 = arith.constant 0 : index
    %c0_9 = arith.constant 0 : index
    %9 = vector.load %arg5[%c0_7, %c0_8, %c0_9] : memref<1x8x512xf32, #tpu.memory_space<vmem>>, vector<1x8x512xf32>
    %10 = vector.shape_cast %9 : vector<1x8x512xf32> to vector<8x512xf32>
    %11 = vector.shape_cast %8 : vector<8x512xf32> to vector<1x8x512xf32>
    tpu.vector_store %arg5[%c0_7, %c0_8, %c0_9], %11 {strides = array<i32>} : memref<1x8x512xf32, #tpu.memory_space<vmem>>, vector<1x8x512xf32>,
    return
  }
  func.func @transform_0(%arg0: i32, %arg1: i32) -> (i32, i32, i32) {
    %c0_i32 = arith.constant 0 : i32
    %c0_i32_0 = arith.constant 0 : i32
    return %arg0, %c0_i32, %arg1 : i32, i32, i32
  }
  func.func @transform_1(%arg0: i32, %arg1: i32) -> (i32, i32) {
    %c0_i32 = arith.constant 0 : i32
    %c0_i32_0 = arith.constant 0 : i32
    %c0_i32_1 = arith.constant 0 : i32
    return %c0_i32, %c0_i32_0 : i32, i32
  }
  func.func @transform_2(%arg0: i32, %arg1: i32) -> (i32, i32) {
    %c0_i32 = arith.constant 0 : i32
    %c0_i32_0 = arith.constant 0 : i32
    %c0_i32_1 = arith.constant 0 : i32
    return %c0_i32, %c0_i32_0 : i32, i32
  }
  func.func @transform_3(%arg0: i32, %arg1: i32) -> (i32, i32, i32) {
    %c0_i32 = arith.constant 0 : i32
    %c0_i32_0 = arith.constant 0 : i32
    return %arg0, %c0_i32, %arg1 : i32, i32, i32
  }
}

module attributes {stable_mosaic.version = 11 : i64} {
  func.func @kernel(%arg0: i32, %arg1: i32, %arg2: memref<1x8x512xf32, #tpu.memory_space<vmem>>, %arg3: memref<8x8xf32, #tpu.memory_space<vmem>>, %arg4: memref<8x1xf32, #tpu.memory_space<vmem>>, %arg5: memref<8x1xf32, #tpu.memory_space<vmem>>, %arg6: memref<8x1xf32, #tpu.memory_space<vmem>>, %arg7: memref<1x8x512xf32, #tpu.memory_space<vmem>>, %arg8: memref<1x8x512xf32, #tpu.memory_space<vmem>>) attributes {dimension_semantics = [#tpu.dimension_semantics<parallel>, #tpu.dimension_semantics<parallel>], iteration_bounds = array<i64: 2, 2>, scalar_prefetch = 0 : i64, scratch_operands = 0 : i64, tpu.core_type = #tpu.core_type<tc>, window_params = [{transform_indices = @transform_0, window_bounds = array<i64: 1, 8, 512>}, {pipeline_mode = #tpu.pipeline_mode<synchronous>, transform_indices = @transform_1, window_bounds = array<i64: 8, 8>}, {pipeline_mode = #tpu.pipeline_mode<synchronous>, transform_indices = @transform_2, window_bounds = array<i64: 8, 1>}, {pipeline_mode = #tpu.pipeline_mode<synchronous>, transform_indices = @transform_3, window_bounds = array<i64: 8, 1>}, {pipeline_mode = #tpu.pipeline_mode<synchronous>, transform_indices = @transform_4, window_bounds = array<i64: 8, 1>}, {transform_indices = @transform_5, window_bounds = array<i64: 1, 8, 512>}, {transform_indices = @transform_6, window_bounds = array<i64: 1, 8, 512>}]} {
    %c0 = arith.constant 0 : index
    %c0_0 = arith.constant 0 : index
    %c0_1 = arith.constant 0 : index
    %0 = vector.load %arg2[%c0, %c0_0, %c0_1] : memref<1x8x512xf32, #tpu.memory_space<vmem>>, vector<1x8x512xf32>
    %1 = vector.shape_cast %0 : vector<1x8x512xf32> to vector<8x512xf32>
    %c0_2 = arith.constant 0 : index
    %c0_3 = arith.constant 0 : index
    %2 = vector.load %arg5[%c0_2, %c0_3] : memref<8x1xf32, #tpu.memory_space<vmem>>, vector<8x1xf32>
    %3 = vector.broadcast %2 : vector<8x1xf32> to vector<8x512xf32>
    %4 = arith.mulf %1, %3 : vector<8x512xf32>
    %c0_4 = arith.constant 0 : index
    %c0_5 = arith.constant 0 : index
    %5 = vector.load %arg6[%c0_4, %c0_5] : memref<8x1xf32, #tpu.memory_space<vmem>>, vector<8x1xf32>
    %6 = vector.broadcast %5 : vector<8x1xf32> to vector<8x512xf32>
    %7 = arith.addf %4, %6 : vector<8x512xf32>
    %cst = arith.constant 0.000000e+00 : f32
    %8 = vector.broadcast %cst : f32 to vector<8x512xf32>
    %9 = arith.maximumf %7, %8 : vector<8x512xf32>
    %c0_6 = arith.constant 0 : index
    %c0_7 = arith.constant 0 : index
    %10 = vector.load %arg3[%c0_6, %c0_7] : memref<8x8xf32, #tpu.memory_space<vmem>>, vector<8x8xf32>
    %cst_8 = arith.constant dense<0.000000e+00> : vector<8x512xf32>
    %11 = tpu.matmul %10, %9, %cst_8 {dimension_numbers = #tpu.dot_dimension_numbers<[1], [0], [0], [1], [0, 0, 1, 1], [], []>} : vector<8x8xf32>, vector<8x512xf32>, vector<8x512xf32> -> vector<8x512xf32>
    %c0_9 = arith.constant 0 : index
    %c0_10 = arith.constant 0 : index
    %12 = vector.load %arg4[%c0_9, %c0_10] : memref<8x1xf32, #tpu.memory_space<vmem>>, vector<8x1xf32>
    %13 = vector.broadcast %12 : vector<8x1xf32> to vector<8x512xf32>
    %14 = arith.addf %11, %13 : vector<8x512xf32>
    %c0_11 = arith.constant 0 : index
    %c0_12 = arith.constant 0 : index
    %c0_13 = arith.constant 0 : index
    %15 = vector.load %arg7[%c0_11, %c0_12, %c0_13] : memref<1x8x512xf32, #tpu.memory_space<vmem>>, vector<1x8x512xf32>
    %16 = vector.shape_cast %15 : vector<1x8x512xf32> to vector<8x512xf32>
    %17 = arith.addf %14, %16 : vector<8x512xf32>
    %c0_14 = arith.constant 0 : index
    %c0_15 = arith.constant 0 : index
    %c0_16 = arith.constant 0 : index
    %18 = vector.load %arg8[%c0_14, %c0_15, %c0_16] : memref<1x8x512xf32, #tpu.memory_space<vmem>>, vector<1x8x512xf32>
    %19 = vector.shape_cast %18 : vector<1x8x512xf32> to vector<8x512xf32>
    %20 = vector.shape_cast %17 : vector<8x512xf32> to vector<1x8x512xf32>
    tpu.vector_store %arg8[%c0_14, %c0_15, %c0_16], %20 {strides = array<i32>} : memref<1x8x512xf32, #tpu.memory_space<vmem>>, vector<1x8x512xf32>,
    return
  }
  func.func @transform_0(%arg0: i32, %arg1: i32) -> (i32, i32, i32) {
    %c0_i32 = arith.constant 0 : i32
    %c0_i32_0 = arith.constant 0 : i32
    return %arg0, %c0_i32, %arg1 : i32, i32, i32
  }
  func.func @transform_1(%arg0: i32, %arg1: i32) -> (i32, i32) {
    %c0_i32 = arith.constant 0 : i32
    %c0_i32_0 = arith.constant 0 : i32
    %c0_i32_1 = arith.constant 0 : i32
    return %c0_i32, %c0_i32_0 : i32, i32
  }
  func.func @transform_2(%arg0: i32, %arg1: i32) -> (i32, i32) {
    %c0_i32 = arith.constant 0 : i32
    %c0_i32_0 = arith.constant 0 : i32
    %c0_i32_1 = arith.constant 0 : i32
    return %c0_i32, %c0_i32_0 : i32, i32
  }
  func.func @transform_3(%arg0: i32, %arg1: i32) -> (i32, i32) {
    %c0_i32 = arith.constant 0 : i32
    %c0_i32_0 = arith.constant 0 : i32
    %c0_i32_1 = arith.constant 0 : i32
    return %c0_i32, %c0_i32_0 : i32, i32
  }
  func.func @transform_4(%arg0: i32, %arg1: i32) -> (i32, i32) {
    %c0_i32 = arith.constant 0 : i32
    %c0_i32_0 = arith.constant 0 : i32
    %c0_i32_1 = arith.constant 0 : i32
    return %c0_i32, %c0_i32_0 : i32, i32
  }
  func.func @transform_5(%arg0: i32, %arg1: i32) -> (i32, i32, i32) {
    %c0_i32 = arith.constant 0 : i32
    %c0_i32_0 = arith.constant 0 : i32
    return %arg0, %c0_i32, %arg1 : i32, i32, i32
  }
  func.func @transform_6(%arg0: i32, %arg1: i32) -> (i32, i32, i32) {
    %c0_i32 = arith.constant 0 : i32
    %c0_i32_0 = arith.constant 0 : i32
    return %arg0, %c0_i32, %arg1 : i32, i32, i32
  }
}

module attributes {stable_mosaic.version = 11 : i64} {
  func.func @kernel(%arg0: i32, %arg1: i32, %arg2: memref<1x72x512xf32, #tpu.memory_space<vmem>>, %arg3: memref<4x72xf32, #tpu.memory_space<vmem>>, %arg4: memref<4x1xf32, #tpu.memory_space<vmem>>, %arg5: memref<1x4x512xf32, #tpu.memory_space<vmem>>) attributes {dimension_semantics = [#tpu.dimension_semantics<parallel>, #tpu.dimension_semantics<parallel>], iteration_bounds = array<i64: 2, 2>, scalar_prefetch = 0 : i64, scratch_operands = 0 : i64, tpu.core_type = #tpu.core_type<tc>, window_params = [{transform_indices = @transform_0, window_bounds = array<i64: 1, 72, 512>}, {pipeline_mode = #tpu.pipeline_mode<synchronous>, transform_indices = @transform_1, window_bounds = array<i64: 4, 72>}, {pipeline_mode = #tpu.pipeline_mode<synchronous>, transform_indices = @transform_2, window_bounds = array<i64: 4, 1>}, {transform_indices = @transform_3, window_bounds = array<i64: 1, 4, 512>}]} {
    %c0 = arith.constant 0 : index
    %c0_0 = arith.constant 0 : index
    %c0_1 = arith.constant 0 : index
    %0 = vector.load %arg2[%c0, %c0_0, %c0_1] : memref<1x72x512xf32, #tpu.memory_space<vmem>>, vector<1x72x512xf32>
    %1 = vector.shape_cast %0 : vector<1x72x512xf32> to vector<72x512xf32>
    %c0_2 = arith.constant 0 : index
    %c0_3 = arith.constant 0 : index
    %2 = vector.load %arg3[%c0_2, %c0_3] : memref<4x72xf32, #tpu.memory_space<vmem>>, vector<4x72xf32>
    %cst = arith.constant dense<0.000000e+00> : vector<4x512xf32>
    %3 = tpu.matmul %2, %1, %cst {dimension_numbers = #tpu.dot_dimension_numbers<[1], [0], [0], [1], [0, 0, 1, 1], [], []>} : vector<4x72xf32>, vector<72x512xf32>, vector<4x512xf32> -> vector<4x512xf32>
    %c0_4 = arith.constant 0 : index
    %c0_5 = arith.constant 0 : index
    %4 = vector.load %arg4[%c0_4, %c0_5] : memref<4x1xf32, #tpu.memory_space<vmem>>, vector<4x1xf32>
    %5 = vector.broadcast %4 : vector<4x1xf32> to vector<4x512xf32>
    %6 = arith.addf %3, %5 : vector<4x512xf32>
    %cst_6 = arith.constant 0.000000e+00 : f32
    %7 = vector.broadcast %cst_6 : f32 to vector<4x512xf32>
    %8 = arith.maximumf %6, %7 : vector<4x512xf32>
    %c0_7 = arith.constant 0 : index
    %c0_8 = arith.constant 0 : index
    %c0_9 = arith.constant 0 : index
    %9 = vector.load %arg5[%c0_7, %c0_8, %c0_9] : memref<1x4x512xf32, #tpu.memory_space<vmem>>, vector<1x4x512xf32>
    %10 = vector.shape_cast %9 : vector<1x4x512xf32> to vector<4x512xf32>
    %11 = vector.shape_cast %8 : vector<4x512xf32> to vector<1x4x512xf32>
    tpu.vector_store %arg5[%c0_7, %c0_8, %c0_9], %11 {strides = array<i32>} : memref<1x4x512xf32, #tpu.memory_space<vmem>>, vector<1x4x512xf32>,
    return
  }
  func.func @transform_0(%arg0: i32, %arg1: i32) -> (i32, i32, i32) {
    %c0_i32 = arith.constant 0 : i32
    %c0_i32_0 = arith.constant 0 : i32
    return %arg0, %c0_i32, %arg1 : i32, i32, i32
  }
  func.func @transform_1(%arg0: i32, %arg1: i32) -> (i32, i32) {
    %c0_i32 = arith.constant 0 : i32
    %c0_i32_0 = arith.constant 0 : i32
    %c0_i32_1 = arith.constant 0 : i32
    return %c0_i32, %c0_i32_0 : i32, i32
  }
  func.func @transform_2(%arg0: i32, %arg1: i32) -> (i32, i32) {
    %c0_i32 = arith.constant 0 : i32
    %c0_i32_0 = arith.constant 0 : i32
    %c0_i32_1 = arith.constant 0 : i32
    return %c0_i32, %c0_i32_0 : i32, i32
  }
  func.func @transform_3(%arg0: i32, %arg1: i32) -> (i32, i32, i32) {
    %c0_i32 = arith.constant 0 : i32
    %c0_i32_0 = arith.constant 0 : i32
    return %arg0, %c0_i32, %arg1 : i32, i32, i32
  }
}

module attributes {stable_mosaic.version = 11 : i64} {
  func.func @_bn_stats_kernel(%arg0: i32, %arg1: i32, %arg2: memref<1x4x512xf32, #tpu.memory_space<vmem>>, %arg3: memref<4x1xf32, #tpu.memory_space<vmem>>, %arg4: memref<4x1xf32, #tpu.memory_space<vmem>>) attributes {dimension_semantics = [#tpu.dimension_semantics<arbitrary>, #tpu.dimension_semantics<arbitrary>], iteration_bounds = array<i64: 2, 2>, scalar_prefetch = 0 : i64, scratch_operands = 0 : i64, tpu.core_type = #tpu.core_type<tc>, window_params = [{transform_indices = @transform_0, window_bounds = array<i64: 1, 4, 512>}, {pipeline_mode = #tpu.pipeline_mode<synchronous>, transform_indices = @transform_1, window_bounds = array<i64: 4, 1>}, {pipeline_mode = #tpu.pipeline_mode<synchronous>, transform_indices = @transform_2, window_bounds = array<i64: 4, 1>}]} {
    %c0_i32 = arith.constant 0 : i32
    %0 = arith.cmpi eq, %arg0, %c0_i32 : i32
    %c0_i32_0 = arith.constant 0 : i32
    %1 = arith.cmpi eq, %arg1, %c0_i32_0 : i32
    %2 = arith.andi %0, %1 : i1
    %3 = arith.extui %2 : i1 to i32
    %c0_i32_1 = arith.constant 0 : i32
    %4 = arith.cmpi ne, %3, %c0_i32_1 : i32
    scf.if %4 {
      %cst_13 = arith.constant 0.000000e+00 : f32
      %18 = vector.broadcast %cst_13 : f32 to vector<4x1xf32>
      %c0_14 = arith.constant 0 : index
      %c0_15 = arith.constant 0 : index
      %19 = vector.load %arg3[%c0_14, %c0_15] : memref<4x1xf32, #tpu.memory_space<vmem>>, vector<4x1xf32>
      tpu.vector_store %arg3[%c0_14, %c0_15], %18 {strides = array<i32>} : memref<4x1xf32, #tpu.memory_space<vmem>>, vector<4x1xf32>,
      %cst_16 = arith.constant 0.000000e+00 : f32
      %20 = vector.broadcast %cst_16 : f32 to vector<4x1xf32>
      %c0_17 = arith.constant 0 : index
      %c0_18 = arith.constant 0 : index
      %21 = vector.load %arg4[%c0_17, %c0_18] : memref<4x1xf32, #tpu.memory_space<vmem>>, vector<4x1xf32>
      tpu.vector_store %arg4[%c0_17, %c0_18], %20 {strides = array<i32>} : memref<4x1xf32, #tpu.memory_space<vmem>>, vector<4x1xf32>,
    } else {
    }
    %c0 = arith.constant 0 : index
    %c0_2 = arith.constant 0 : index
    %c0_3 = arith.constant 0 : index
    %5 = vector.load %arg2[%c0, %c0_2, %c0_3] : memref<1x4x512xf32, #tpu.memory_space<vmem>>, vector<1x4x512xf32>
    %6 = vector.shape_cast %5 : vector<1x4x512xf32> to vector<4x512xf32>
    %c0_4 = arith.constant 0 : index
    %c0_5 = arith.constant 0 : index
    %7 = vector.load %arg3[%c0_4, %c0_5] : memref<4x1xf32, #tpu.memory_space<vmem>>, vector<4x1xf32>
    %cst = arith.constant dense<0.000000e+00> : vector<4xf32>
    %8 = vector.multi_reduction <add>, %6, %cst [1] : vector<4x512xf32> to vector<4xf32>
    %9 = vector.shape_cast %8 : vector<4xf32> to vector<4x1xf32>
    %10 = arith.addf %7, %9 : vector<4x1xf32>
    %c0_6 = arith.constant 0 : index
    %c0_7 = arith.constant 0 : index
    %11 = vector.load %arg3[%c0_6, %c0_7] : memref<4x1xf32, #tpu.memory_space<vmem>>, vector<4x1xf32>
    tpu.vector_store %arg3[%c0_6, %c0_7], %10 {strides = array<i32>} : memref<4x1xf32, #tpu.memory_space<vmem>>, vector<4x1xf32>,
    %c0_8 = arith.constant 0 : index
    %c0_9 = arith.constant 0 : index
    %12 = vector.load %arg4[%c0_8, %c0_9] : memref<4x1xf32, #tpu.memory_space<vmem>>, vector<4x1xf32>
    %13 = arith.mulf %6, %6 : vector<4x512xf32>
    %cst_10 = arith.constant dense<0.000000e+00> : vector<4xf32>
    %14 = vector.multi_reduction <add>, %13, %cst_10 [1] : vector<4x512xf32> to vector<4xf32>
    %15 = vector.shape_cast %14 : vector<4xf32> to vector<4x1xf32>
    %16 = arith.addf %12, %15 : vector<4x1xf32>
    %c0_11 = arith.constant 0 : index
    %c0_12 = arith.constant 0 : index
    %17 = vector.load %arg4[%c0_11, %c0_12] : memref<4x1xf32, #tpu.memory_space<vmem>>, vector<4x1xf32>
    tpu.vector_store %arg4[%c0_11, %c0_12], %16 {strides = array<i32>} : memref<4x1xf32, #tpu.memory_space<vmem>>, vector<4x1xf32>,
    return
  }
  func.func @transform_0(%arg0: i32, %arg1: i32) -> (i32, i32, i32) {
    %c0_i32 = arith.constant 0 : i32
    %c0_i32_0 = arith.constant 0 : i32
    return %arg0, %c0_i32, %arg1 : i32, i32, i32
  }
  func.func @transform_1(%arg0: i32, %arg1: i32) -> (i32, i32) {
    %c0_i32 = arith.constant 0 : i32
    %c0_i32_0 = arith.constant 0 : i32
    %c0_i32_1 = arith.constant 0 : i32
    return %c0_i32, %c0_i32_0 : i32, i32
  }
  func.func @transform_2(%arg0: i32, %arg1: i32) -> (i32, i32) {
    %c0_i32 = arith.constant 0 : i32
    %c0_i32_0 = arith.constant 0 : i32
    %c0_i32_1 = arith.constant 0 : i32
    return %c0_i32, %c0_i32_0 : i32, i32
  }
}

module attributes {stable_mosaic.version = 11 : i64} {
  func.func @_bn_norm_kernel(%arg0: i32, %arg1: i32, %arg2: memref<1x4x512xf32, #tpu.memory_space<vmem>>, %arg3: memref<4x1xf32, #tpu.memory_space<vmem>>, %arg4: memref<4x1xf32, #tpu.memory_space<vmem>>, %arg5: memref<1x4x512xf32, #tpu.memory_space<vmem>>) attributes {dimension_semantics = [#tpu.dimension_semantics<parallel>, #tpu.dimension_semantics<parallel>], iteration_bounds = array<i64: 2, 2>, scalar_prefetch = 0 : i64, scratch_operands = 0 : i64, tpu.core_type = #tpu.core_type<tc>, window_params = [{transform_indices = @transform_0, window_bounds = array<i64: 1, 4, 512>}, {pipeline_mode = #tpu.pipeline_mode<synchronous>, transform_indices = @transform_1, window_bounds = array<i64: 4, 1>}, {pipeline_mode = #tpu.pipeline_mode<synchronous>, transform_indices = @transform_2, window_bounds = array<i64: 4, 1>}, {transform_indices = @transform_3, window_bounds = array<i64: 1, 4, 512>}]} {
    %c0 = arith.constant 0 : index
    %c0_0 = arith.constant 0 : index
    %c0_1 = arith.constant 0 : index
    %0 = vector.load %arg2[%c0, %c0_0, %c0_1] : memref<1x4x512xf32, #tpu.memory_space<vmem>>, vector<1x4x512xf32>
    %1 = vector.shape_cast %0 : vector<1x4x512xf32> to vector<4x512xf32>
    %c0_2 = arith.constant 0 : index
    %c0_3 = arith.constant 0 : index
    %2 = vector.load %arg3[%c0_2, %c0_3] : memref<4x1xf32, #tpu.memory_space<vmem>>, vector<4x1xf32>
    %3 = vector.broadcast %2 : vector<4x1xf32> to vector<4x512xf32>
    %4 = arith.mulf %1, %3 : vector<4x512xf32>
    %c0_4 = arith.constant 0 : index
    %c0_5 = arith.constant 0 : index
    %5 = vector.load %arg4[%c0_4, %c0_5] : memref<4x1xf32, #tpu.memory_space<vmem>>, vector<4x1xf32>
    %6 = vector.broadcast %5 : vector<4x1xf32> to vector<4x512xf32>
    %7 = arith.addf %4, %6 : vector<4x512xf32>
    %c0_6 = arith.constant 0 : index
    %c0_7 = arith.constant 0 : index
    %c0_8 = arith.constant 0 : index
    %8 = vector.load %arg5[%c0_6, %c0_7, %c0_8] : memref<1x4x512xf32, #tpu.memory_space<vmem>>, vector<1x4x512xf32>
    %9 = vector.shape_cast %8 : vector<1x4x512xf32> to vector<4x512xf32>
    %10 = vector.shape_cast %7 : vector<4x512xf32> to vector<1x4x512xf32>
    tpu.vector_store %arg5[%c0_6, %c0_7, %c0_8], %10 {strides = array<i32>} : memref<1x4x512xf32, #tpu.memory_space<vmem>>, vector<1x4x512xf32>,
    return
  }
  func.func @transform_0(%arg0: i32, %arg1: i32) -> (i32, i32, i32) {
    %c0_i32 = arith.constant 0 : i32
    %c0_i32_0 = arith.constant 0 : i32
    return %arg0, %c0_i32, %arg1 : i32, i32, i32
  }
  func.func @transform_1(%arg0: i32, %arg1: i32) -> (i32, i32) {
    %c0_i32 = arith.constant 0 : i32
    %c0_i32_0 = arith.constant 0 : i32
    %c0_i32_1 = arith.constant 0 : i32
    return %c0_i32, %c0_i32_0 : i32, i32
  }
  func.func @transform_2(%arg0: i32, %arg1: i32) -> (i32, i32) {
    %c0_i32 = arith.constant 0 : i32
    %c0_i32_0 = arith.constant 0 : i32
    %c0_i32_1 = arith.constant 0 : i32
    return %c0_i32, %c0_i32_0 : i32, i32
  }
  func.func @transform_3(%arg0: i32, %arg1: i32) -> (i32, i32, i32) {
    %c0_i32 = arith.constant 0 : i32
    %c0_i32_0 = arith.constant 0 : i32
    return %arg0, %c0_i32, %arg1 : i32, i32, i32
  }
}

module attributes {stable_mosaic.version = 11 : i64} {
  func.func @kernel(%arg0: i32, %arg1: i32, %arg2: memref<1x36x512xf32, #tpu.memory_space<vmem>>, %arg3: memref<16x36xf32, #tpu.memory_space<vmem>>, %arg4: memref<16x1xf32, #tpu.memory_space<vmem>>, %arg5: memref<1x16x512xf32, #tpu.memory_space<vmem>>) attributes {dimension_semantics = [#tpu.dimension_semantics<parallel>, #tpu.dimension_semantics<parallel>], iteration_bounds = array<i64: 2, 2>, scalar_prefetch = 0 : i64, scratch_operands = 0 : i64, tpu.core_type = #tpu.core_type<tc>, window_params = [{transform_indices = @transform_0, window_bounds = array<i64: 1, 36, 512>}, {pipeline_mode = #tpu.pipeline_mode<synchronous>, transform_indices = @transform_1, window_bounds = array<i64: 16, 36>}, {pipeline_mode = #tpu.pipeline_mode<synchronous>, transform_indices = @transform_2, window_bounds = array<i64: 16, 1>}, {transform_indices = @transform_3, window_bounds = array<i64: 1, 16, 512>}]} {
    %c0 = arith.constant 0 : index
    %c0_0 = arith.constant 0 : index
    %c0_1 = arith.constant 0 : index
    %0 = vector.load %arg2[%c0, %c0_0, %c0_1] : memref<1x36x512xf32, #tpu.memory_space<vmem>>, vector<1x36x512xf32>
    %1 = vector.shape_cast %0 : vector<1x36x512xf32> to vector<36x512xf32>
    %c0_2 = arith.constant 0 : index
    %c0_3 = arith.constant 0 : index
    %2 = vector.load %arg3[%c0_2, %c0_3] : memref<16x36xf32, #tpu.memory_space<vmem>>, vector<16x36xf32>
    %cst = arith.constant dense<0.000000e+00> : vector<16x512xf32>
    %3 = tpu.matmul %2, %1, %cst {dimension_numbers = #tpu.dot_dimension_numbers<[1], [0], [0], [1], [0, 0, 1, 1], [], []>} : vector<16x36xf32>, vector<36x512xf32>, vector<16x512xf32> -> vector<16x512xf32>
    %c0_4 = arith.constant 0 : index
    %c0_5 = arith.constant 0 : index
    %4 = vector.load %arg4[%c0_4, %c0_5] : memref<16x1xf32, #tpu.memory_space<vmem>>, vector<16x1xf32>
    %5 = vector.broadcast %4 : vector<16x1xf32> to vector<16x512xf32>
    %6 = arith.addf %3, %5 : vector<16x512xf32>
    %cst_6 = arith.constant 0.000000e+00 : f32
    %7 = vector.broadcast %cst_6 : f32 to vector<16x512xf32>
    %8 = arith.maximumf %6, %7 : vector<16x512xf32>
    %c0_7 = arith.constant 0 : index
    %c0_8 = arith.constant 0 : index
    %c0_9 = arith.constant 0 : index
    %9 = vector.load %arg5[%c0_7, %c0_8, %c0_9] : memref<1x16x512xf32, #tpu.memory_space<vmem>>, vector<1x16x512xf32>
    %10 = vector.shape_cast %9 : vector<1x16x512xf32> to vector<16x512xf32>
    %11 = vector.shape_cast %8 : vector<16x512xf32> to vector<1x16x512xf32>
    tpu.vector_store %arg5[%c0_7, %c0_8, %c0_9], %11 {strides = array<i32>} : memref<1x16x512xf32, #tpu.memory_space<vmem>>, vector<1x16x512xf32>,
    return
  }
  func.func @transform_0(%arg0: i32, %arg1: i32) -> (i32, i32, i32) {
    %c0_i32 = arith.constant 0 : i32
    %c0_i32_0 = arith.constant 0 : i32
    return %arg0, %c0_i32, %arg1 : i32, i32, i32
  }
  func.func @transform_1(%arg0: i32, %arg1: i32) -> (i32, i32) {
    %c0_i32 = arith.constant 0 : i32
    %c0_i32_0 = arith.constant 0 : i32
    %c0_i32_1 = arith.constant 0 : i32
    return %c0_i32, %c0_i32_0 : i32, i32
  }
  func.func @transform_2(%arg0: i32, %arg1: i32) -> (i32, i32) {
    %c0_i32 = arith.constant 0 : i32
    %c0_i32_0 = arith.constant 0 : i32
    %c0_i32_1 = arith.constant 0 : i32
    return %c0_i32, %c0_i32_0 : i32, i32
  }
  func.func @transform_3(%arg0: i32, %arg1: i32) -> (i32, i32, i32) {
    %c0_i32 = arith.constant 0 : i32
    %c0_i32_0 = arith.constant 0 : i32
    return %arg0, %c0_i32, %arg1 : i32, i32, i32
  }
}

module attributes {stable_mosaic.version = 11 : i64} {
  func.func @kernel(%arg0: i32, %arg1: i32, %arg2: memref<1x36x512xf32, #tpu.memory_space<vmem>>, %arg3: memref<3x36xf32, #tpu.memory_space<vmem>>, %arg4: memref<3x1xf32, #tpu.memory_space<vmem>>, %arg5: memref<1x3x512xf32, #tpu.memory_space<vmem>>) attributes {dimension_semantics = [#tpu.dimension_semantics<parallel>, #tpu.dimension_semantics<parallel>], iteration_bounds = array<i64: 2, 8>, scalar_prefetch = 0 : i64, scratch_operands = 0 : i64, tpu.core_type = #tpu.core_type<tc>, window_params = [{transform_indices = @transform_0, window_bounds = array<i64: 1, 36, 512>}, {pipeline_mode = #tpu.pipeline_mode<synchronous>, transform_indices = @transform_1, window_bounds = array<i64: 3, 36>}, {pipeline_mode = #tpu.pipeline_mode<synchronous>, transform_indices = @transform_2, window_bounds = array<i64: 3, 1>}, {transform_indices = @transform_3, window_bounds = array<i64: 1, 3, 512>}]} {
    %c0 = arith.constant 0 : index
    %c0_0 = arith.constant 0 : index
    %c0_1 = arith.constant 0 : index
    %0 = vector.load %arg2[%c0, %c0_0, %c0_1] : memref<1x36x512xf32, #tpu.memory_space<vmem>>, vector<1x36x512xf32>
    %1 = vector.shape_cast %0 : vector<1x36x512xf32> to vector<36x512xf32>
    %c0_2 = arith.constant 0 : index
    %c0_3 = arith.constant 0 : index
    %2 = vector.load %arg3[%c0_2, %c0_3] : memref<3x36xf32, #tpu.memory_space<vmem>>, vector<3x36xf32>
    %cst = arith.constant dense<0.000000e+00> : vector<3x512xf32>
    %3 = tpu.matmul %2, %1, %cst {dimension_numbers = #tpu.dot_dimension_numbers<[1], [0], [0], [1], [0, 0, 1, 1], [], []>} : vector<3x36xf32>, vector<36x512xf32>, vector<3x512xf32> -> vector<3x512xf32>
    %c0_4 = arith.constant 0 : index
    %c0_5 = arith.constant 0 : index
    %4 = vector.load %arg4[%c0_4, %c0_5] : memref<3x1xf32, #tpu.memory_space<vmem>>, vector<3x1xf32>
    %5 = vector.broadcast %4 : vector<3x1xf32> to vector<3x512xf32>
    %6 = arith.addf %3, %5 : vector<3x512xf32>
    %cst_6 = arith.constant 0.000000e+00 : f32
    %7 = vector.broadcast %cst_6 : f32 to vector<3x512xf32>
    %8 = arith.maximumf %6, %7 : vector<3x512xf32>
    %c0_7 = arith.constant 0 : index
    %c0_8 = arith.constant 0 : index
    %c0_9 = arith.constant 0 : index
    %9 = vector.load %arg5[%c0_7, %c0_8, %c0_9] : memref<1x3x512xf32, #tpu.memory_space<vmem>>, vector<1x3x512xf32>
    %10 = vector.shape_cast %9 : vector<1x3x512xf32> to vector<3x512xf32>
    %11 = vector.shape_cast %8 : vector<3x512xf32> to vector<1x3x512xf32>
    tpu.vector_store %arg5[%c0_7, %c0_8, %c0_9], %11 {strides = array<i32>} : memref<1x3x512xf32, #tpu.memory_space<vmem>>, vector<1x3x512xf32>,
    return
  }
  func.func @transform_0(%arg0: i32, %arg1: i32) -> (i32, i32, i32) {
    %c0_i32 = arith.constant 0 : i32
    %c0_i32_0 = arith.constant 0 : i32
    return %arg0, %c0_i32, %arg1 : i32, i32, i32
  }
  func.func @transform_1(%arg0: i32, %arg1: i32) -> (i32, i32) {
    %c0_i32 = arith.constant 0 : i32
    %c0_i32_0 = arith.constant 0 : i32
    %c0_i32_1 = arith.constant 0 : i32
    return %c0_i32, %c0_i32_0 : i32, i32
  }
  func.func @transform_2(%arg0: i32, %arg1: i32) -> (i32, i32) {
    %c0_i32 = arith.constant 0 : i32
    %c0_i32_0 = arith.constant 0 : i32
    %c0_i32_1 = arith.constant 0 : i32
    return %c0_i32, %c0_i32_0 : i32, i32
  }
  func.func @transform_3(%arg0: i32, %arg1: i32) -> (i32, i32, i32) {
    %c0_i32 = arith.constant 0 : i32
    %c0_i32_0 = arith.constant 0 : i32
    return %arg0, %c0_i32, %arg1 : i32, i32, i32
  }
}

module attributes {stable_mosaic.version = 11 : i64} {
  func.func @_bn_stats_kernel(%arg0: i32, %arg1: i32, %arg2: memref<1x3x512xf32, #tpu.memory_space<vmem>>, %arg3: memref<3x1xf32, #tpu.memory_space<vmem>>, %arg4: memref<3x1xf32, #tpu.memory_space<vmem>>) attributes {dimension_semantics = [#tpu.dimension_semantics<arbitrary>, #tpu.dimension_semantics<arbitrary>], iteration_bounds = array<i64: 2, 8>, scalar_prefetch = 0 : i64, scratch_operands = 0 : i64, tpu.core_type = #tpu.core_type<tc>, window_params = [{transform_indices = @transform_0, window_bounds = array<i64: 1, 3, 512>}, {pipeline_mode = #tpu.pipeline_mode<synchronous>, transform_indices = @transform_1, window_bounds = array<i64: 3, 1>}, {pipeline_mode = #tpu.pipeline_mode<synchronous>, transform_indices = @transform_2, window_bounds = array<i64: 3, 1>}]} {
    %c0_i32 = arith.constant 0 : i32
    %0 = arith.cmpi eq, %arg0, %c0_i32 : i32
    %c0_i32_0 = arith.constant 0 : i32
    %1 = arith.cmpi eq, %arg1, %c0_i32_0 : i32
    %2 = arith.andi %0, %1 : i1
    %3 = arith.extui %2 : i1 to i32
    %c0_i32_1 = arith.constant 0 : i32
    %4 = arith.cmpi ne, %3, %c0_i32_1 : i32
    scf.if %4 {
      %cst_13 = arith.constant 0.000000e+00 : f32
      %18 = vector.broadcast %cst_13 : f32 to vector<3x1xf32>
      %c0_14 = arith.constant 0 : index
      %c0_15 = arith.constant 0 : index
      %19 = vector.load %arg3[%c0_14, %c0_15] : memref<3x1xf32, #tpu.memory_space<vmem>>, vector<3x1xf32>
      tpu.vector_store %arg3[%c0_14, %c0_15], %18 {strides = array<i32>} : memref<3x1xf32, #tpu.memory_space<vmem>>, vector<3x1xf32>,
      %cst_16 = arith.constant 0.000000e+00 : f32
      %20 = vector.broadcast %cst_16 : f32 to vector<3x1xf32>
      %c0_17 = arith.constant 0 : index
      %c0_18 = arith.constant 0 : index
      %21 = vector.load %arg4[%c0_17, %c0_18] : memref<3x1xf32, #tpu.memory_space<vmem>>, vector<3x1xf32>
      tpu.vector_store %arg4[%c0_17, %c0_18], %20 {strides = array<i32>} : memref<3x1xf32, #tpu.memory_space<vmem>>, vector<3x1xf32>,
    } else {
    }
    %c0 = arith.constant 0 : index
    %c0_2 = arith.constant 0 : index
    %c0_3 = arith.constant 0 : index
    %5 = vector.load %arg2[%c0, %c0_2, %c0_3] : memref<1x3x512xf32, #tpu.memory_space<vmem>>, vector<1x3x512xf32>
    %6 = vector.shape_cast %5 : vector<1x3x512xf32> to vector<3x512xf32>
    %c0_4 = arith.constant 0 : index
    %c0_5 = arith.constant 0 : index
    %7 = vector.load %arg3[%c0_4, %c0_5] : memref<3x1xf32, #tpu.memory_space<vmem>>, vector<3x1xf32>
    %cst = arith.constant dense<0.000000e+00> : vector<3xf32>
    %8 = vector.multi_reduction <add>, %6, %cst [1] : vector<3x512xf32> to vector<3xf32>
    %9 = vector.shape_cast %8 : vector<3xf32> to vector<3x1xf32>
    %10 = arith.addf %7, %9 : vector<3x1xf32>
    %c0_6 = arith.constant 0 : index
    %c0_7 = arith.constant 0 : index
    %11 = vector.load %arg3[%c0_6, %c0_7] : memref<3x1xf32, #tpu.memory_space<vmem>>, vector<3x1xf32>
    tpu.vector_store %arg3[%c0_6, %c0_7], %10 {strides = array<i32>} : memref<3x1xf32, #tpu.memory_space<vmem>>, vector<3x1xf32>,
    %c0_8 = arith.constant 0 : index
    %c0_9 = arith.constant 0 : index
    %12 = vector.load %arg4[%c0_8, %c0_9] : memref<3x1xf32, #tpu.memory_space<vmem>>, vector<3x1xf32>
    %13 = arith.mulf %6, %6 : vector<3x512xf32>
    %cst_10 = arith.constant dense<0.000000e+00> : vector<3xf32>
    %14 = vector.multi_reduction <add>, %13, %cst_10 [1] : vector<3x512xf32> to vector<3xf32>
    %15 = vector.shape_cast %14 : vector<3xf32> to vector<3x1xf32>
    %16 = arith.addf %12, %15 : vector<3x1xf32>
    %c0_11 = arith.constant 0 : index
    %c0_12 = arith.constant 0 : index
    %17 = vector.load %arg4[%c0_11, %c0_12] : memref<3x1xf32, #tpu.memory_space<vmem>>, vector<3x1xf32>
    tpu.vector_store %arg4[%c0_11, %c0_12], %16 {strides = array<i32>} : memref<3x1xf32, #tpu.memory_space<vmem>>, vector<3x1xf32>,
    return
  }
  func.func @transform_0(%arg0: i32, %arg1: i32) -> (i32, i32, i32) {
    %c0_i32 = arith.constant 0 : i32
    %c0_i32_0 = arith.constant 0 : i32
    return %arg0, %c0_i32, %arg1 : i32, i32, i32
  }
  func.func @transform_1(%arg0: i32, %arg1: i32) -> (i32, i32) {
    %c0_i32 = arith.constant 0 : i32
    %c0_i32_0 = arith.constant 0 : i32
    %c0_i32_1 = arith.constant 0 : i32
    return %c0_i32, %c0_i32_0 : i32, i32
  }
  func.func @transform_2(%arg0: i32, %arg1: i32) -> (i32, i32) {
    %c0_i32 = arith.constant 0 : i32
    %c0_i32_0 = arith.constant 0 : i32
    %c0_i32_1 = arith.constant 0 : i32
    return %c0_i32, %c0_i32_0 : i32, i32
  }
}

module attributes {stable_mosaic.version = 11 : i64} {
  func.func @_bn_norm_kernel(%arg0: i32, %arg1: i32, %arg2: memref<1x3x512xf32, #tpu.memory_space<vmem>>, %arg3: memref<3x1xf32, #tpu.memory_space<vmem>>, %arg4: memref<3x1xf32, #tpu.memory_space<vmem>>, %arg5: memref<1x3x512xf32, #tpu.memory_space<vmem>>) attributes {dimension_semantics = [#tpu.dimension_semantics<parallel>, #tpu.dimension_semantics<parallel>], iteration_bounds = array<i64: 2, 8>, scalar_prefetch = 0 : i64, scratch_operands = 0 : i64, tpu.core_type = #tpu.core_type<tc>, window_params = [{transform_indices = @transform_0, window_bounds = array<i64: 1, 3, 512>}, {pipeline_mode = #tpu.pipeline_mode<synchronous>, transform_indices = @transform_1, window_bounds = array<i64: 3, 1>}, {pipeline_mode = #tpu.pipeline_mode<synchronous>, transform_indices = @transform_2, window_bounds = array<i64: 3, 1>}, {transform_indices = @transform_3, window_bounds = array<i64: 1, 3, 512>}]} {
    %c0 = arith.constant 0 : index
    %c0_0 = arith.constant 0 : index
    %c0_1 = arith.constant 0 : index
    %0 = vector.load %arg2[%c0, %c0_0, %c0_1] : memref<1x3x512xf32, #tpu.memory_space<vmem>>, vector<1x3x512xf32>
    %1 = vector.shape_cast %0 : vector<1x3x512xf32> to vector<3x512xf32>
    %c0_2 = arith.constant 0 : index
    %c0_3 = arith.constant 0 : index
    %2 = vector.load %arg3[%c0_2, %c0_3] : memref<3x1xf32, #tpu.memory_space<vmem>>, vector<3x1xf32>
    %3 = vector.broadcast %2 : vector<3x1xf32> to vector<3x512xf32>
    %4 = arith.mulf %1, %3 : vector<3x512xf32>
    %c0_4 = arith.constant 0 : index
    %c0_5 = arith.constant 0 : index
    %5 = vector.load %arg4[%c0_4, %c0_5] : memref<3x1xf32, #tpu.memory_space<vmem>>, vector<3x1xf32>
    %6 = vector.broadcast %5 : vector<3x1xf32> to vector<3x512xf32>
    %7 = arith.addf %4, %6 : vector<3x512xf32>
    %c0_6 = arith.constant 0 : index
    %c0_7 = arith.constant 0 : index
    %c0_8 = arith.constant 0 : index
    %8 = vector.load %arg5[%c0_6, %c0_7, %c0_8] : memref<1x3x512xf32, #tpu.memory_space<vmem>>, vector<1x3x512xf32>
    %9 = vector.shape_cast %8 : vector<1x3x512xf32> to vector<3x512xf32>
    %10 = vector.shape_cast %7 : vector<3x512xf32> to vector<1x3x512xf32>
    tpu.vector_store %arg5[%c0_6, %c0_7, %c0_8], %10 {strides = array<i32>} : memref<1x3x512xf32, #tpu.memory_space<vmem>>, vector<1x3x512xf32>,
    return
  }
  func.func @transform_0(%arg0: i32, %arg1: i32) -> (i32, i32, i32) {
    %c0_i32 = arith.constant 0 : i32
    %c0_i32_0 = arith.constant 0 : i32
    return %arg0, %c0_i32, %arg1 : i32, i32, i32
  }
  func.func @transform_1(%arg0: i32, %arg1: i32) -> (i32, i32) {
    %c0_i32 = arith.constant 0 : i32
    %c0_i32_0 = arith.constant 0 : i32
    %c0_i32_1 = arith.constant 0 : i32
    return %c0_i32, %c0_i32_0 : i32, i32
  }
  func.func @transform_2(%arg0: i32, %arg1: i32) -> (i32, i32) {
    %c0_i32 = arith.constant 0 : i32
    %c0_i32_0 = arith.constant 0 : i32
    %c0_i32_1 = arith.constant 0 : i32
    return %c0_i32, %c0_i32_0 : i32, i32
  }
  func.func @transform_3(%arg0: i32, %arg1: i32) -> (i32, i32, i32) {
    %c0_i32 = arith.constant 0 : i32
    %c0_i32_0 = arith.constant 0 : i32
    return %arg0, %c0_i32, %arg1 : i32, i32, i32
  }
}

module attributes {stable_mosaic.version = 11 : i64} {
  func.func @kernel(%arg0: i32, %arg1: i32, %arg2: memref<1x27x512xf32, #tpu.memory_space<vmem>>, %arg3: memref<12x27xf32, #tpu.memory_space<vmem>>, %arg4: memref<12x1xf32, #tpu.memory_space<vmem>>, %arg5: memref<1x12x512xf32, #tpu.memory_space<vmem>>) attributes {dimension_semantics = [#tpu.dimension_semantics<parallel>, #tpu.dimension_semantics<parallel>], iteration_bounds = array<i64: 2, 8>, scalar_prefetch = 0 : i64, scratch_operands = 0 : i64, tpu.core_type = #tpu.core_type<tc>, window_params = [{transform_indices = @transform_0, window_bounds = array<i64: 1, 27, 512>}, {pipeline_mode = #tpu.pipeline_mode<synchronous>, transform_indices = @transform_1, window_bounds = array<i64: 12, 27>}, {pipeline_mode = #tpu.pipeline_mode<synchronous>, transform_indices = @transform_2, window_bounds = array<i64: 12, 1>}, {transform_indices = @transform_3, window_bounds = array<i64: 1, 12, 512>}]} {
    %c0 = arith.constant 0 : index
    %c0_0 = arith.constant 0 : index
    %c0_1 = arith.constant 0 : index
    %0 = vector.load %arg2[%c0, %c0_0, %c0_1] : memref<1x27x512xf32, #tpu.memory_space<vmem>>, vector<1x27x512xf32>
    %1 = vector.shape_cast %0 : vector<1x27x512xf32> to vector<27x512xf32>
    %c0_2 = arith.constant 0 : index
    %c0_3 = arith.constant 0 : index
    %2 = vector.load %arg3[%c0_2, %c0_3] : memref<12x27xf32, #tpu.memory_space<vmem>>, vector<12x27xf32>
    %cst = arith.constant dense<0.000000e+00> : vector<12x512xf32>
    %3 = tpu.matmul %2, %1, %cst {dimension_numbers = #tpu.dot_dimension_numbers<[1], [0], [0], [1], [0, 0, 1, 1], [], []>} : vector<12x27xf32>, vector<27x512xf32>, vector<12x512xf32> -> vector<12x512xf32>
    %c0_4 = arith.constant 0 : index
    %c0_5 = arith.constant 0 : index
    %4 = vector.load %arg4[%c0_4, %c0_5] : memref<12x1xf32, #tpu.memory_space<vmem>>, vector<12x1xf32>
    %5 = vector.broadcast %4 : vector<12x1xf32> to vector<12x512xf32>
    %6 = arith.addf %3, %5 : vector<12x512xf32>
    %7 = math.tanh %6 : vector<12x512xf32>
    %c0_6 = arith.constant 0 : index
    %c0_7 = arith.constant 0 : index
    %c0_8 = arith.constant 0 : index
    %8 = vector.load %arg5[%c0_6, %c0_7, %c0_8] : memref<1x12x512xf32, #tpu.memory_space<vmem>>, vector<1x12x512xf32>
    %9 = vector.shape_cast %8 : vector<1x12x512xf32> to vector<12x512xf32>
    %10 = vector.shape_cast %7 : vector<12x512xf32> to vector<1x12x512xf32>
    tpu.vector_store %arg5[%c0_6, %c0_7, %c0_8], %10 {strides = array<i32>} : memref<1x12x512xf32, #tpu.memory_space<vmem>>, vector<1x12x512xf32>,
    return
  }
  func.func @transform_0(%arg0: i32, %arg1: i32) -> (i32, i32, i32) {
    %c0_i32 = arith.constant 0 : i32
    %c0_i32_0 = arith.constant 0 : i32
    return %arg0, %c0_i32, %arg1 : i32, i32, i32
  }
  func.func @transform_1(%arg0: i32, %arg1: i32) -> (i32, i32) {
    %c0_i32 = arith.constant 0 : i32
    %c0_i32_0 = arith.constant 0 : i32
    %c0_i32_1 = arith.constant 0 : i32
    return %c0_i32, %c0_i32_0 : i32, i32
  }
  func.func @transform_2(%arg0: i32, %arg1: i32) -> (i32, i32) {
    %c0_i32 = arith.constant 0 : i32
    %c0_i32_0 = arith.constant 0 : i32
    %c0_i32_1 = arith.constant 0 : i32
    return %c0_i32, %c0_i32_0 : i32, i32
  }
  func.func @transform_3(%arg0: i32, %arg1: i32) -> (i32, i32, i32) {
    %c0_i32 = arith.constant 0 : i32
    %c0_i32_0 = arith.constant 0 : i32
    return %arg0, %c0_i32, %arg1 : i32, i32, i32
  }
}

</mosaic_0001>

<bundles_post_ra>
// kernel: decoder_resnet_forward.26
= control target key start
LH: loop header
LB: loop body
LE: loop exit
PB: predicated region body
PF: predicated region fallthrough
CT: control target
= control target key end

     0   :  { %s291_s9 = smov 0   ;;  %s293_s10 = smov 0   ;;  %s339_s0 = inlined_call_operand.vmem [shape: f32[2,4,64], index: 0, kind: input, shape index: {}]   ;;  %s340_s1 = inlined_call_operand.vmem [shape: f32[4,1], index: 1, kind: output, shape index: {0}]   ;;  %s341_s2 = inlined_call_operand.vmem [shape: f32[4,1], index: 2, kind: output, shape index: {1}]  }
   0x1   :  { %s295_s11 = smov 0  }
   0x2 LB: > { %s25_s12 = sadd.s32 1, %s269_s10  ;;  %p220_p0 = scmp.ge.s32.totalorder %s273_s11, 1  ;;  %s273_s11 = sphi %s295_s11, %s13_s11   ;;  %s269_s10 = sphi %s293_s10, %s343_s10   ;;  %s265_s9 = sphi %s291_s9, %s342_s9  }
   0x3   : > { %p27_p1 = scmp.ge.s32.totalorder %s25_s12, 2  ;;  %p121_p2 = scmp.lt.s32.totalorder %s273_s11, 3 }
   0x5   : > { %s345_s12 = smov (%p27_p1, %s25_s12), 0  ;;  %p122_p3 = pnand %p220_p0, %p121_p2 }
   0x6   : > { %p140_p4 = scmp.lt.s32.totalorder (!%p122_p3), %s265_s9, 1  ;;  %p147_p5 = scmp.eq.s32.totalorder (!%p122_p3), %s265_s9, 0 }
   0x7   : > { %125 = sbr.rel (%p122_p3) target bundleno = 172 (0xac), region = 24 }
   0xe   : > { %s347_s9 = smov (!%p140_p4, %s265_s9), 1  ;;  %152 = sbr.rel (!%p147_p5) target bundleno = 21 (0x15), region = 28 }
   0xf   : > { %s221_s13 = sshll.u32 %s347_s9, 2  ;;  %vm153_vm0 = vcmask (%p147_p5), 3072   ;;  %v275_v0 = vmov (%p147_p5), 0.0  }
  0x10   : > { %s146_s16 = scalar_lea.vmem %s339_s0, %s221_s13  ;;  %154 = vst.msk [vmem:[%s340_s1] sm:$0xf] (%p147_p5), %vm153_vm0, %v275_v0  ;;  %155 = vst.msk [vmem:[%s341_s2] sm:$0xf] (%p147_p5), %vm153_vm0, %v275_v0 }
  0x15 PF: > { %v156_v1 = vld [vmem:[%s146_s16] sm:$0xf]  ;;  %vm158_vm1 = vcmask 519168   ;;  %vm163_vm2 = vcmask 3072  }
  0x16   : > { %v159_v2 = vsel %vm158_vm1, %v156_v1, 0.0  ;;  %v166_v3 = vmul.f32 %v156_v1, %v156_v1 }
  0x17   : > { %160 = vadd.xlane.f32.xlu0 %v159_v2  ;;  %v157_v5 = vld [vmem:[%s340_s1] sm:$0xf] }
  0x18   : > { %v167_v4 = vsel %vm158_vm1, %v166_v3, 0.0  ;;  %v165_v8 = vld [vmem:[%s341_s2] sm:$0xf] }
  0x1b   : > { %168 = vadd.xlane.f32.xlu0 %v167_v4 }
  0xa4   : > { %v161_v6 = vpop.xlane.xlu0 %160 }
  0xa5   : > { %v162_v7 = vadd.f32 %v161_v6, %v157_v5 }
  0xa7   : > { %164 = vst.msk [vmem:[%s340_s1] sm:$0xf] %vm163_vm2, %v162_v7 }
  0xa8   : > { %v169_v9 = vpop.xlane.xlu0 %168 }
  0xa9   : > { %v170_v10 = vadd.f32 %v169_v9, %v165_v8 }
  0xab   : > { %171 = vst.msk [vmem:[%s341_s2] sm:$0xf] %vm163_vm2, %v170_v10 }
  0xac PF: > { %s13_s11 = sadd.s32 1, %s273_s11   ;;  %s342_s9 = smov %s269_s10 }
  0xad   : > { %p10_p6 = scmp.ge.s32.totalorder %s13_s11, 4   ;;  %s343_s10 = smov %s345_s12 }
  0xaf   :  { %12 = sbr.rel (!%p10_p6) target bundleno = 2 (0x2), region = 62 }

// kernel: decoder_resnet_forward.25
= control target key start
LH: loop header
LB: loop body
LE: loop exit
PB: predicated region body
PF: predicated region fallthrough
CT: control target
= control target key end

     0   :  { %s488_s12 = smov 0   ;;  %s490_s13 = smov 0   ;;  %s531_s0 = inlined_call_operand.vmem [shape: f32[2,36,64], index: 0, kind: input, shape index: {}]   ;;  %s532_s1 = inlined_call_operand.vmem [shape: f32[4,36], index: 1, kind: input, shape index: {}]   ;;  %s533_s2 = inlined_call_operand.vmem [shape: f32[4,1], index: 2, kind: input, shape index: {}]   ;;  %s534_s3 = inlined_call_operand.vmem [shape: f32[2,4,64], index: 3, kind: output, shape index: {}]  }
   0x1   :  { %s492_s14 = smov 0  }
   0x2 LB: > { %s25_s15 = sadd.s32 1, %s458_s13  ;;  %p378_p0 = scmp.ge.s32.totalorder %s462_s14, 1  ;;  %s462_s14 = sphi %s492_s14, %s13_s14   ;;  %s458_s13 = sphi %s490_s13, %s536_s13   ;;  %s454_s12 = sphi %s488_s12, %s535_s12  }
   0x3   : > { %p27_p1 = scmp.ge.s32.totalorder %s25_s15, 2  ;;  %p156_p2 = scmp.lt.s32.totalorder %s462_s14, 3 }
   0x5   : > { %s538_s15 = smov (%p27_p1, %s25_s15), 0  ;;  %p157_p3 = pnand %p378_p0, %p156_p2 }
   0x6   : > { %p185_p4 = scmp.lt.s32.totalorder (!%p157_p3), %s454_s12, 1  ;;  %v464_v0 = vmov (!%p157_p3), 0.0|0.0   ;;  %vm465_vm0 = vmmov (!%p157_p3), 0   ;;  %v466_v1 = vmov (!%p157_p3), 0.0   ;;  %v211_v2 = vld [vmem:[%s533_s2] sm:$0xf] (!%p157_p3) }
   0x7   : > { %160 = sbr.rel (%p157_p3) target bundleno = 247 (0xf7), region = 32  ;;  %404 = vmatprep.subr.bf16.mxu0 (!%p157_p3), %v464_v0  ;;  %401 = vmatprep.mubr.msk.f32.mxu0 (!%p157_p3), %vm465_vm0, %v466_v1  ;;  %v467_v3 = vmov (!%p157_p3), 0   ;;  %vm221_vm1 = vcmask (!%p157_p3), 1043456   ;;  %v210_v16 = vld [vmem:[%s532_s1] sm:$0xf] (!%p157_p3)  ;;  %vm217_vm2 = vcmask (!%p157_p3), 293888  }
   0x8   : > { %439 = vset.pattern.permute.xlu0 (!%p157_p3), %v467_v3  ;;  %vm295_vm3 = vcmask (!%p157_p3), 519168  }
   0x9   : > { %214 = vperm.xlu0 (!%p157_p3), %439, %v211_v2  }
   0xe   : > { %s540_s12 = smov (!%p185_p4, %s454_s12), 1 }
   0xf   : > { %s410_s18 = smul.u32 40, %s540_s12  ;;  %s380_s24 = sshll.u32 %s540_s12, 2 }
  0x10   : > { %s199_s27 = scalar_lea.vmem %s534_s3, %s380_s24 }
  0x11   : > { %s192_s21 = scalar_lea.vmem %s531_s0, %s410_s18 }
  0x12   : > { %v200_v4 = vld [vmem:[%s192_s21] sm:$0xff]  ;;  %v201_v5 = vld [vmem:[%s192_s21 + $0x8] sm:$0xff]  ;;  %v202_v6 = vld [vmem:[%s192_s21 + $0x10] sm:$0xff] }
  0x13   : > { %v205_v7 = vmax.f32 %v200_v4, 0.0  ;;  %v206_v8 = vmax.f32 %v201_v5, 0.0  ;;  %v203_v9 = vld [vmem:[%s192_s21 + $0x18] sm:$0xff]  ;;  %v207_v10 = vmax.f32 %v202_v6, 0.0  ;;  %v204_v14 = vld [vmem:[%s192_s21 + $0x20] sm:$0xf] }
  0x14   : > { %v208_v11 = vmax.f32 %v203_v9, 0.0  ;;  %v209_v15 = vmax.f32 %v204_v14, 0.0 }
  0x15   : > { %v405_v12 = vpack.c.bf16 %v206_v8, %v205_v7 }
  0x16   : > { %v408_v13 = vpack.c.bf16 %v208_v11, %v207_v10 }
  0x17   : > { %406 = vmatpush3.bf16.msra.mxu0 %v405_v12 }
  0x18   : > { %407 = vmatprep.subr.bf16.mxu0 %v464_v0 }
  0x1b   : > { %409 = vmatpush3.bf16.msra.mxu0 %v408_v13 }
  0x1c   : > { %399 = vmatprep.subr.mxu0 %v466_v1 }
  0x1f   : > { %400 = vmatpush3.msk.msra.mxu0 %vm221_vm1, %v209_v15 }
  0x20   : > { %402 = vmatmul.mubr.msk.f32.vlgmr.msra.gmra.mrb[0].mxu0 %vm217_vm2, %v210_v16 }
  0x88   : > { %v215_v17 = vpop.permute.xlu0 %214 }
  0xf3   : > { %v291_v18 = vpop.f32.mrb[0].mxu0 }
  0xf4   : > { %v292_v19 = vadd.f32 %v291_v18, %v215_v17  ;;  %v403_v20 = vpop.f32.mrb[1].mxu0 }
  0xf6   : > { %296 = vst.msk [vmem:[%s199_s27] sm:$0xf] %vm295_vm3, %v292_v19 }
  0xf7 PF: > { %s13_s14 = sadd.s32 1, %s462_s14   ;;  %s535_s12 = smov %s458_s13 }
  0xf8   : > { %p10_p5 = scmp.ge.s32.totalorder %s13_s14, 4   ;;  %s536_s13 = smov %s538_s15 }
  0xfa   :  { %12 = sbr.rel (!%p10_p5) target bundleno = 2 (0x2), region = 62 }

// kernel: decoder_resnet_forward.27
= control target key start
LH: loop header
LB: loop body
LE: loop exit
PB: predicated region body
PF: predicated region fallthrough
CT: control target
= control target key end

     0   :  { %11 = vsyncpa [#allocation3], 0  ;;  %s682_s21 = smov 0   ;;  %s684_s22 = smov 0   ;;  %s770_s0 = inlined_call_operand.vmem [shape: f32[2,4,64], index: 0, kind: input, shape index: {}]   ;;  %s771_s1 = inlined_call_operand.hbm [shape: f32[4,4], index: 1, kind: input, shape index: {}]   ;;  %s772_s2 = inlined_call_operand.vmem [shape: f32[4,1], index: 2, kind: input, shape index: {}]   ;;  %s773_s3 = inlined_call_operand.vmem [shape: f32[4,1], index: 3, kind: input, shape index: {}]   ;;  %s774_s4 = inlined_call_operand.vmem [shape: f32[4,1], index: 4, kind: input, shape index: {}]   ;;  %s775_s5 = inlined_call_operand.vmem [shape: f32[2,4,64], index: 5, kind: input, shape index: {}]   ;;  %s776_s6 = inlined_call_operand.vmem [shape: f32[2,4,64], index: 6, kind: output, shape index: {}]  }
   0x1   :  { %s686_s23 = smov 0  }
   0x2 LB: > { %s526_s24 = sadd.s32 4294967295, %s641_s23   ;;  %s29_s25 = sadd.s32 1, %s637_s22  ;;  %s641_s23 = sphi %s686_s23, %s17_s23   ;;  %s637_s22 = sphi %s684_s22, %s786_s22   ;;  %s633_s21 = sphi %s682_s21, %s785_s21  }
   0x3   : > { %p31_p0 = scmp.ge.s32.totalorder %s29_s25, 2  ;;  %p528_p1 = scmp.ge.s32.totalorder %s641_s23, 1 }
   0x4   : > { %p202_p2 = scmp.lt.s32.totalorder %s641_s23, 3  ;;  %p707_p4 = scmp.eq.s32.totalorder %s526_s24, 0 }
   0x5   : > { %s788_s25 = smov (%p31_p0, %s29_s25), 0  ;;  %s643_s28 = smov [#allocation2]  }
   0x6   : > { %p703_p3 = pnand %p528_p1, %p202_p2  ;;  %s215_s29 = sshll.u32 %s643_s28, 4  ;;  %s216_s29 = int_to_ptr.vmem [resolvable:$true] %s215_s29 }
   0x7   : > { %s781_s27 = scalar_select %p707_p4, 1, 0 }
   0x8   : > { %s780_s26 = scalar_select %p703_p3, 1, 0 }
   0x9   : > { %p551_p5 = pneg %p703_p3  ;;  %s587_s9 = scalar_lea.hbm %s771_s1, 64 }
   0xa   : > { %p588_p7 = scmp.ne.s32.totalorder %s771_s1, %s587_s9  ;;  %p594_p11 = scmp.lt.u32.totalorder %s587_s9, %s771_s1 }
   0xb   : > { %p715_p6 = pnand %p707_p4, %p551_p5 }
   0xd   : > { %p589_p8 = pneg %p715_p6 }
   0xf   : > { %p590_p9 = pnand %p589_p8, %p588_p7 }
  0x11   : > { %p591_p10 = pneg %p590_p9 }
  0x13   : > { %p596_p12 = pnand %p594_p11, %p591_p10 }
  0x15   : > { %599 = shalt.err (!%p596_p12)
}
  0x16   : > { %s600_s14 = scalar_lea.vmem %s216_s29, 64  ;;  %p608_p2 = scmp.lt.s32.totalorder %s216_s29, %s216_s29 }
  0x17   : > { %p601_p13 = scmp.ne.s32.totalorder %s216_s29, %s600_s14  ;;  %p609_p5 = scmp.lt.s32.totalorder %s600_s14, %s600_s14 }
  0x19   : > { %p603_p0 = pnand %p601_p13, %p589_p8  ;;  %p610_p4 = por %p609_p5, %p608_p2 }
  0x1b   : > { %p604_p1 = pneg %p603_p0 }
  0x1d   : > { %p611_p3 = pnand %p610_p4, %p604_p1 }
  0x1f   : > { %614 = shalt.err (!%p611_p3)
}
  0x20   : > { %554 = dma.hbm_to_vmem [thread:$0]  (!%p715_p6), %s771_s1, 64, %s216_s29, [#allocation3]  }
  0x21   : > { %p783_p7 = scmp.ne.s32.totalorder %s780_s26, 0 }
  0x22   : > { %p784_p9 = scmp.ne.s32.totalorder (!%p783_p7), %s781_s27, 0 }
  0x23   : > { %257 = sbr.rel (%p783_p7) target bundleno = 399 (0x18f), region = 44 }
  0x2a   : > { %628 = dma.done.wait (%p784_p9), [#allocation3], 64  }
  0x2b   : > { %630 = vsyncadd (%p784_p9), [#allocation3], 4294967232  ;;  %v644_v0 = vmov 0   ;;  %v320_v1 = vld [vmem:[%s773_s3] sm:$0xf]  ;;  %v645_v3 = vmov 0.0  }
  0x2c   : > { %585 = vset.pattern.permute.xlu0 %v644_v0  ;;  %586 = vset.pattern.permute.xlu1 %v644_v0  ;;  %v327_v2 = vld [vmem:[%s774_s4] sm:$0xf]  ;;  %vm646_vm0 = vmmov 0   ;;  %p298_p3 = scmp.lt.s32.totalorder %s633_s21, 1  ;;  %vm346_vm1 = vcmask 1043456   ;;  %vm342_vm2 = vcmask 31744  }
  0x2d   : > { %323 = vperm.xlu0 %585, %v320_v1   ;;  %542 = vmatprep.subr.mxu0 %v645_v3  ;;  %v336_v4 = vld [vmem:[%s772_s2] sm:$0xf]  ;;  %vm422_vm3 = vcmask 519168  }
  0x2e   : > { %544 = vmatprep.mubr.msk.f32.mxu0 %vm646_vm0, %v645_v3  ;;  %339 = vperm.xlu1 %586, %v336_v4   ;;  %s790_s21 = smov (!%p298_p3, %s633_s21), 1  ;;  %v335_v11 = vld [vmem:[#allocation2] sm:$0xf] }
  0x2f   : > { %s533_s27 = sshll.u32 %s790_s21, 2 }
  0x30   : > { %s304_s30 = scalar_lea.vmem %s770_s0, %s533_s27  ;;  %s311_s9 = scalar_lea.vmem %s775_s5, %s533_s27 }
  0x31   : > { %330 = vperm.xlu0 %585, %v327_v2   ;;  %v319_v6 = vld [vmem:[%s304_s30] sm:$0xf]  ;;  %s318_s11 = scalar_lea.vmem %s776_s6, %s533_s27 }
  0x32   : > { %v420_v14 = vld [vmem:[%s311_s9] sm:$0xf] }
  0xac   : > { %v324_v5 = vpop.permute.xlu0 %323 }
  0xad   : > { %v326_v7 = vmul.f32 %v324_v5, %v319_v6  ;;  %v340_v12 = vpop.permute.xlu1 %339 }
  0xb0   : > { %v331_v8 = vpop.permute.xlu0 %330 }
  0xb1   : > { %v333_v9 = vadd.f32 %v331_v8, %v326_v7 }
  0xb3   : > { %v334_v10 = vmax.f32 %v333_v9, 0.0 }
  0xb5   : > { %543 = vmatpush3.msk.msra.mxu0 %vm346_vm1, %v334_v10 }
  0xb6   : > { %545 = vmatmul.mubr.msk.f32.vlgmr.msra.gmra.mrb[0].mxu0 %vm342_vm2, %v335_v11 }
 0x189   : > { %v416_v13 = vpop.f32.mrb[0].mxu0 }
 0x18a   : > { %v417_v15 = vadd.f32 %v416_v13, %v340_v12  ;;  %v546_v16 = vpop.f32.mrb[1].mxu0 }
 0x18c   : > { %v421_v17 = vadd.f32 %v420_v14, %v417_v15 }
 0x18e   : > { %423 = vst.msk [vmem:[%s318_s11] sm:$0xf] %vm422_vm3, %v421_v17 }
 0x18f PF: > { %s17_s23 = sadd.s32 1, %s641_s23   ;;  %s785_s21 = smov %s637_s22 }
 0x190   : > { %p14_p4 = scmp.ge.s32.totalorder %s17_s23, 4   ;;  %s786_s22 = smov %s788_s25 }
 0x192   :  { %16 = sbr.rel (!%p14_p4) target bundleno = 2 (0x2), region = 82 }
 0x199   :  { %449 = vsyncpa [#allocation3], 1 }
 0x19a   :  { %451 = vsyncpa [#allocation3 + $0x1], 1 }

// kernel: decoder_resnet_forward.29
= control target key start
LH: loop header
LB: loop body
LE: loop exit
PB: predicated region body
PF: predicated region fallthrough
CT: control target
= control target key end

     0   :  { %s315_s9 = smov 0   ;;  %s317_s10 = smov 0   ;;  %s381_s0 = inlined_call_operand.vmem [shape: f32[2,16,64], index: 0, kind: input, shape index: {}]   ;;  %s382_s1 = inlined_call_operand.vmem [shape: f32[16,1], index: 1, kind: output, shape index: {0}]   ;;  %s383_s2 = inlined_call_operand.vmem [shape: f32[16,1], index: 2, kind: output, shape index: {1}]  }
   0x1   :  { %s319_s11 = smov 0  }
   0x2 LB: > { %s25_s12 = sadd.s32 1, %s293_s10  ;;  %p242_p0 = scmp.ge.s32.totalorder %s297_s11, 1  ;;  %s297_s11 = sphi %s319_s11, %s13_s11   ;;  %s293_s10 = sphi %s317_s10, %s385_s10   ;;  %s289_s9 = sphi %s315_s9, %s384_s9  }
   0x3   : > { %p27_p1 = scmp.ge.s32.totalorder %s25_s12, 2  ;;  %p122_p2 = scmp.lt.s32.totalorder %s297_s11, 3 }
   0x5   : > { %s387_s12 = smov (%p27_p1, %s25_s12), 0  ;;  %p123_p3 = pnand %p242_p0, %p122_p2 }
   0x6   : > { %p142_p4 = scmp.lt.s32.totalorder (!%p123_p3), %s289_s9, 1  ;;  %p150_p5 = scmp.eq.s32.totalorder (!%p123_p3), %s289_s9, 0 }
   0x7   : > { %126 = sbr.rel (%p123_p3) target bundleno = 174 (0xae), region = 24 }
   0xe   : > { %s389_s9 = smov (!%p142_p4, %s289_s9), 1  ;;  %155 = sbr.rel (!%p150_p5) target bundleno = 21 (0x15), region = 28 }
   0xf   : > { %s248_s13 = sshll.u32 %s389_s9, 4  ;;  %vm156_vm0 = vcmask (%p150_p5), 7168   ;;  %v299_v0 = vmov (%p150_p5), 0.0  }
  0x10   : > { %s149_s16 = scalar_lea.vmem %s381_s0, %s248_s13  ;;  %157 = vst.msk [vmem:[%s382_s1] sm:$0xff] (%p150_p5), %vm156_vm0, %v299_v0  ;;  %158 = vst.msk [vmem:[%s382_s1 + $0x8] sm:$0xff] (%p150_p5), %vm156_vm0, %v299_v0 }
  0x11   : > { %159 = vst.msk [vmem:[%s383_s2] sm:$0xff] (%p150_p5), %vm156_vm0, %v299_v0  ;;  %160 = vst.msk [vmem:[%s383_s2 + $0x8] sm:$0xff] (%p150_p5), %vm156_vm0, %v299_v0 }
  0x15 PF: > { %v161_v1 = vld [vmem:[%s149_s16] sm:$0xff]  ;;  %vm165_vm1 = vcmask 523264   ;;  %v162_v2 = vld [vmem:[%s149_s16 + $0x8] sm:$0xff]  ;;  %vm174_vm2 = vcmask 7168  }
  0x16   : > { %v179_v3 = vmul.f32 %v161_v1, %v161_v1  ;;  %v166_v4 = vsel %vm165_vm1, %v161_v1, 0.0  ;;  %v180_v5 = vmul.f32 %v162_v2, %v162_v2  ;;  %v169_v7 = vsel %vm165_vm1, %v162_v2, 0.0 }
  0x17   : > { %167 = vadd.xlane.f32.xlu0 %v166_v4  ;;  %v163_v9 = vld [vmem:[%s382_s1] sm:$0xff]  ;;  %v164_v14 = vld [vmem:[%s382_s1 + $0x8] sm:$0xff] }
  0x18   : > { %v181_v6 = vsel %vm165_vm1, %v179_v3, 0.0  ;;  %v184_v8 = vsel %vm165_vm1, %v180_v5, 0.0  ;;  %v177_v10 = vld [vmem:[%s383_s2] sm:$0xff]  ;;  %v178_v16 = vld [vmem:[%s383_s2 + $0x8] sm:$0xff] }
  0x19   : > { %182 = vadd.xlane.f32.xlu1 %v181_v6 }
  0x1b   : > { %170 = vadd.xlane.f32.xlu0 %v169_v7 }
  0x1d   : > { %185 = vadd.xlane.f32.xlu1 %v184_v8 }
  0xa4   : > { %v168_v11 = vpop.xlane.xlu0 %167 }
  0xa5   : > { %v172_v12 = vadd.f32 %v168_v11, %v163_v9 }
  0xa6   : > { %v183_v13 = vpop.xlane.xlu1 %182 }
  0xa7   : > { %v187_v15 = vadd.f32 %v183_v13, %v177_v10  ;;  %175 = vst.msk [vmem:[%s382_s1] sm:$0xff] %vm174_vm2, %v172_v12 }
  0xa8   : > { %v171_v17 = vpop.xlane.xlu0 %170 }
  0xa9   : > { %189 = vst.msk [vmem:[%s383_s2] sm:$0xff] %vm174_vm2, %v187_v15  ;;  %v173_v18 = vadd.f32 %v171_v17, %v164_v14 }
  0xaa   : > { %v186_v19 = vpop.xlane.xlu1 %185 }
  0xab   : > { %v188_v20 = vadd.f32 %v186_v19, %v178_v16  ;;  %176 = vst.msk [vmem:[%s382_s1 + $0x8] sm:$0xff] %vm174_vm2, %v173_v18 }
  0xad   : > { %190 = vst.msk [vmem:[%s383_s2 + $0x8] sm:$0xff] %vm174_vm2, %v188_v20 }
  0xae PF: > { %s13_s11 = sadd.s32 1, %s297_s11   ;;  %s384_s9 = smov %s293_s10 }
  0xaf   : > { %p10_p6 = scmp.ge.s32.totalorder %s13_s11, 4   ;;  %s385_s10 = smov %s387_s12 }
  0xb1   :  { %12 = sbr.rel (!%p10_p6) target bundleno = 2 (0x2), region = 62 }

// kernel: decoder_resnet_forward.28
= control target key start
LH: loop header
LB: loop body
LE: loop exit
PB: predicated region body
PF: predicated region fallthrough
CT: control target
= control target key end

     0   :  { %s509_s12 = smov 0   ;;  %s511_s13 = smov 0   ;;  %s560_s0 = inlined_call_operand.vmem [shape: f32[2,36,64], index: 0, kind: input, shape index: {}]   ;;  %s561_s1 = inlined_call_operand.vmem [shape: f32[16,36], index: 1, kind: input, shape index: {}]   ;;  %s562_s2 = inlined_call_operand.vmem [shape: f32[16,1], index: 2, kind: input, shape index: {}]   ;;  %s563_s3 = inlined_call_operand.vmem [shape: f32[2,16,64], index: 3, kind: output, shape index: {}]  }
   0x1   :  { %s513_s14 = smov 0  }
   0x2 LB: > { %s25_s15 = sadd.s32 1, %s482_s13  ;;  %p399_p0 = scmp.ge.s32.totalorder %s486_s14, 1  ;;  %s486_s14 = sphi %s513_s14, %s13_s14   ;;  %s482_s13 = sphi %s511_s13, %s565_s13   ;;  %s478_s12 = sphi %s509_s12, %s564_s12  }
   0x3   : > { %p27_p1 = scmp.ge.s32.totalorder %s25_s15, 2  ;;  %p156_p2 = scmp.lt.s32.totalorder %s486_s14, 3 }
   0x5   : > { %s567_s15 = smov (%p27_p1, %s25_s15), 0  ;;  %p157_p3 = pnand %p399_p0, %p156_p2 }
   0x6   : > { %p186_p4 = scmp.lt.s32.totalorder (!%p157_p3), %s478_s12, 1  ;;  %v207_v0 = vld [vmem:[%s561_s1] sm:$0xff] (!%p157_p3)  ;;  %vm221_vm0 = vcmask (!%p157_p3), 293888   ;;  %v488_v1 = vmov (!%p157_p3), 0   ;;  %v210_v3 = vld [vmem:[%s562_s2 + $0x8] sm:$0xff] (!%p157_p3)  ;;  %vm228_vm1 = vcmask (!%p157_p3), 1043456  }
   0x7   : > { %160 = sbr.rel (%p157_p3) target bundleno = 249 (0xf9), region = 32  ;;  %426 = vmatprep.mubr.msk.f32.mxu0 (!%p157_p3), %vm221_vm0, %v207_v0  ;;  %463 = vset.pattern.permute.xlu0 (!%p157_p3), %v488_v1  ;;  %v209_v2 = vld [vmem:[%s562_s2] sm:$0xff] (!%p157_p3)  ;;  %v208_v11 = vld [vmem:[%s561_s1 + $0x8] sm:$0xff] (!%p157_p3)  ;;  %vm309_vm2 = vcmask (!%p157_p3), 523264  }
   0x8   : > { %213 = vperm.xlu0 (!%p157_p3), %463, %v209_v2  }
   0xc   : > { %218 = vperm.xlu0 (!%p157_p3), %463, %v210_v3  }
   0xe   : > { %s569_s12 = smov (!%p186_p4, %s478_s12), 1 }
   0xf   : > { %s437_s22 = smul.u32 40, %s569_s12  ;;  %s408_s28 = sshll.u32 %s569_s12, 4 }
  0x10   : > { %s201_s4 = scalar_lea.vmem %s563_s3, %s408_s28 }
  0x11   : > { %s193_s25 = scalar_lea.vmem %s560_s0, %s437_s22 }
  0x12   : > { %v202_v4 = vld [vmem:[%s193_s25] sm:$0xff]  ;;  %v203_v5 = vld [vmem:[%s193_s25 + $0x8] sm:$0xff]  ;;  %v204_v6 = vld [vmem:[%s193_s25 + $0x10] sm:$0xff] }
  0x13   : > { %v429_v7 = vpack.c.bf16 %v203_v5, %v202_v4  ;;  %v205_v8 = vld [vmem:[%s193_s25 + $0x18] sm:$0xff]  ;;  %v206_v10 = vld [vmem:[%s193_s25 + $0x20] sm:$0xf] }
  0x14   : > { %v433_v9 = vpack.c.bf16 %v205_v8, %v204_v6 }
  0x15   : > { %430 = vmatprep.subr.bf16.mxu0 %v429_v7 }
  0x16   : > { %432 = vmatpush3.bf16.msra.mxu0 %v429_v7 }
  0x17   : > { %434 = vmatprep.subr.bf16.mxu0 %v433_v9 }
  0x1a   : > { %436 = vmatpush3.bf16.msra.mxu0 %v433_v9 }
  0x1b   : > { %424 = vmatprep.subr.msk.mxu0 %vm228_vm1, %v206_v10 }
  0x1e   : > { %425 = vmatpush3.msk.msra.mxu0 %vm228_vm1, %v206_v10 }
  0x1f   : > { %427 = vmatmul.mubr.msk.f32.vlgmr.msra.gmra.mrb[0].mxu0 %vm221_vm0, %v208_v11 }
  0x87   : > { %v214_v12 = vpop.permute.xlu0 %213 }
  0x8b   : > { %v219_v13 = vpop.permute.xlu0 %218 }
  0xf2   : > { %v428_v14 = vpop.f32.mrb[0].mxu0 }
  0xf3   : > { %v304_v15 = vadd.f32 %v428_v14, %v219_v13  ;;  %v298_v16 = vpop.f32.mrb[1].mxu0 }
  0xf4   : > { %v299_v17 = vadd.f32 %v298_v16, %v214_v12 }
  0xf5   : > { %v308_v18 = vmax.f32 %v304_v15, 0.0 }
  0xf6   : > { %v307_v19 = vmax.f32 %v299_v17, 0.0 }
  0xf7   : > { %311 = vst.msk [vmem:[%s201_s4 + $0x8] sm:$0xff] %vm309_vm2, %v308_v18 }
  0xf8   : > { %310 = vst.msk [vmem:[%s201_s4] sm:$0xff] %vm309_vm2, %v307_v19 }
  0xf9 PF: > { %s13_s14 = sadd.s32 1, %s486_s14   ;;  %s564_s12 = smov %s482_s13 }
  0xfa   : > { %p10_p5 = scmp.ge.s32.totalorder %s13_s14, 4   ;;  %s565_s13 = smov %s567_s15 }
  0xfc   :  { %12 = sbr.rel (!%p10_p5) target bundleno = 2 (0x2), region = 62 }

// kernel: decoder_resnet_forward.30
= control target key start
LH: loop header
LB: loop body
LE: loop exit
PB: predicated region body
PF: predicated region fallthrough
CT: control target
= control target key end

     0   :  { %s403_s12 = smov 0   ;;  %s405_s13 = smov 0   ;;  %s448_s0 = inlined_call_operand.vmem [shape: f32[2,16,64], index: 0, kind: input, shape index: {}]   ;;  %s449_s1 = inlined_call_operand.vmem [shape: f32[16,1], index: 1, kind: input, shape index: {}]   ;;  %s450_s2 = inlined_call_operand.vmem [shape: f32[16,1], index: 2, kind: input, shape index: {}]   ;;  %s451_s3 = inlined_call_operand.vmem [shape: f32[2,16,64], index: 3, kind: output, shape index: {}]  }
   0x1   :  { %s407_s14 = smov 0  }
   0x2 LB: > { %s25_s15 = sadd.s32 1, %s376_s13  ;;  %p322_p0 = scmp.ge.s32.totalorder %s380_s14, 1  ;;  %s380_s14 = sphi %s407_s14, %s13_s14   ;;  %s376_s13 = sphi %s405_s13, %s453_s13   ;;  %s372_s12 = sphi %s403_s12, %s452_s12  }
   0x3   : > { %p27_p1 = scmp.ge.s32.totalorder %s25_s15, 2  ;;  %p156_p2 = scmp.lt.s32.totalorder %s380_s14, 3 }
   0x5   : > { %s455_s15 = smov (%p27_p1, %s25_s15), 0  ;;  %p157_p3 = pnand %p322_p0, %p156_p2 }
   0x6   : > { %v218_v0 = vld [vmem:[%s450_s2] sm:$0xff] (!%p157_p3)  ;;  %v382_v2 = vmov (!%p157_p3), 0   ;;  %v219_v3 = vld [vmem:[%s450_s2 + $0x8] sm:$0xff] (!%p157_p3)  ;;  %p186_p4 = scmp.lt.s32.totalorder (!%p157_p3), %s372_s12, 1  ;;  %vm232_vm0 = vcmask (!%p157_p3), 523264  }
   0x7   : > { %160 = sbr.rel (%p157_p3) target bundleno = 145 (0x91), region = 32  ;;  %v204_v1 = vld [vmem:[%s449_s1] sm:$0xff] (!%p157_p3)  ;;  %357 = vset.pattern.permute.xlu1 (!%p157_p3), %v382_v2  ;;  %356 = vset.pattern.permute.xlu0 (!%p157_p3), %v382_v2  ;;  %v205_v4 = vld [vmem:[%s449_s1 + $0x8] sm:$0xff] (!%p157_p3) }
   0x8   : > { %222 = vperm.xlu1 (!%p157_p3), %357, %v218_v0   ;;  %208 = vperm.xlu0 (!%p157_p3), %356, %v204_v1  }
   0xc   : > { %227 = vperm.xlu1 (!%p157_p3), %357, %v219_v3   ;;  %213 = vperm.xlu0 (!%p157_p3), %356, %v205_v4  }
   0xe   : > { %s457_s12 = smov (!%p186_p4, %s372_s12), 1 }
   0xf   : > { %s329_s24 = sshll.u32 %s457_s12, 4 }
  0x10   : > { %s193_s27 = scalar_lea.vmem %s448_s0, %s329_s24  ;;  %s201_s30 = scalar_lea.vmem %s451_s3, %s329_s24 }
  0x11   : > { %v202_v5 = vld [vmem:[%s193_s27] sm:$0xff]  ;;  %v203_v9 = vld [vmem:[%s193_s27 + $0x8] sm:$0xff] }
  0x87   : > { %v223_v6 = vpop.permute.xlu1 %222  ;;  %v209_v7 = vpop.permute.xlu0 %208 }
  0x88   : > { %v216_v8 = vmul.f32 %v209_v7, %v202_v5 }
  0x8a   : > { %v230_v10 = vadd.f32 %v223_v6, %v216_v8 }
  0x8b   : > { %v214_v11 = vpop.permute.xlu0 %213  ;;  %v228_v13 = vpop.permute.xlu1 %227 }
  0x8c   : > { %233 = vst.msk [vmem:[%s201_s30] sm:$0xff] %vm232_vm0, %v230_v10  ;;  %v217_v12 = vmul.f32 %v214_v11, %v203_v9 }
  0x8e   : > { %v231_v14 = vadd.f32 %v228_v13, %v217_v12 }
  0x90   : > { %234 = vst.msk [vmem:[%s201_s30 + $0x8] sm:$0xff] %vm232_vm0, %v231_v14 }
  0x91 PF: > { %s13_s14 = sadd.s32 1, %s380_s14   ;;  %s452_s12 = smov %s376_s13 }
  0x92   : > { %p10_p5 = scmp.ge.s32.totalorder %s13_s14, 4   ;;  %s453_s13 = smov %s455_s15 }
  0x94   :  { %12 = sbr.rel (!%p10_p5) target bundleno = 2 (0x2), region = 62 }

// kernel: tile.23
= control target key start
LH: loop header
LB: loop body
LE: loop exit
PB: predicated region body
PF: predicated region fallthrough
CT: control target
= control target key end

     0   :  { %s22_s0 = inlined_call_operand.vmem [shape: f32[16], index: 0, kind: input, shape index: {}]   ;;  %s23_s1 = inlined_call_operand.vmem [shape: f32[4,16], index: 1, kind: output, shape index: {}]  }
   0x1   :  { %v4_v0 = vld [vmem:[%s22_s0] ss:$0 sm:$0xff] }
   0x2   :  { %5 = vst [vmem:[%s23_s1] sm:$0xf] %v4_v0 }

// kernel: tile.0
= control target key start
LH: loop header
LB: loop body
LE: loop exit
PB: predicated region body
PF: predicated region fallthrough
CT: control target
= control target key end

     0   :  { %s176_s8 = smov 125   ;;  %s177_s9 = smov 126   ;;  %vm7_vm0 = vcmask 7168   ;;  %s331_s0 = inlined_call_operand.vmem [shape: f32[4,16], index: 0, kind: input, shape index: {}]   ;;  %s332_s1 = inlined_call_operand.vmem [shape: f32[64,1], index: 1, kind: output, shape index: {}]  }
   0x1   :  { %v4_v0 = vld [vmem:[%s331_s0] sm:$0xf]  ;;  %s175_s0 = smov 127   ;;  %s178_s10 = smov 124  }
   0x2   :  { %5 = vst [vmem:[#allocation0] sm:$0xf] %v4_v0  ;;  %s179_s11 = smov 123   ;;  %s180_s12 = smov 122  }
   0x3   :  { %s181_s13 = smov 121   ;;  %s182_s14 = smov 120  }
   0x4   :  { %s183_s19 = smov 119   ;;  %s184_s20 = smov 118  }
   0x5   :  { %s185_s21 = smov 117   ;;  %s186_s22 = smov 116  }
   0x6   :  { %s187_s23 = smov 115   ;;  %s188_s24 = smov 114  }
   0x7   :  { %s189_s25 = smov 113  }
   0x9   :  { %v10_v1 = vld [vmem:[#allocation0] sm:$0xf]  }
   0xa   :  { %v26_v2 = vld [vmem:[#allocation0] sm:$0xf]   ;;  %11 = vrot.lane.b32.xlu0 %v10_v1, %s175_s0 }
   0xb   :  { %27 = vrot.lane.b32.xlu1 %v26_v2, %s176_s8  ;;  %v18_v3 = vld [vmem:[#allocation0] sm:$0xf]  }
   0xc   :  { %v34_v4 = vld [vmem:[#allocation0] sm:$0xf]  }
   0xd   :  { %v42_v5 = vld [vmem:[#allocation0] sm:$0xf]  }
   0xe   :  { %19 = vrot.lane.b32.xlu0 %v18_v3, %s177_s9  ;;  %v50_v6 = vld [vmem:[#allocation0] sm:$0xf]  }
   0xf   :  { %35 = vrot.lane.b32.xlu1 %v34_v4, %s178_s10  ;;  %v58_v7 = vld [vmem:[#allocation0] sm:$0xf]  }
  0x10   :  { %v66_v8 = vld [vmem:[#allocation0] sm:$0xf]  }
  0x11   :  { %v74_v9 = vld [vmem:[#allocation0] sm:$0xf]  }
  0x12   :  { %43 = vrot.lane.b32.xlu0 %v42_v5, %s179_s11  ;;  %v82_v10 = vld [vmem:[#allocation0] sm:$0xf]  }
  0x13   :  { %51 = vrot.lane.b32.xlu1 %v50_v6, %s180_s12  ;;  %v6_v11 = vld [vmem:[#allocation0] sm:$0xf]  }
  0x14   :  { %8 = vst.msk [vmem:[%s332_s1] ss:$16 sm:$0x3] %vm7_vm0, %v6_v11   ;;  %9 = vst.msk [vmem:[%s332_s1] ss:$16 sm:$0xc] %vm7_vm0, %v6_v11  }
  0x15   :  { %v90_v12 = vld [vmem:[#allocation0] sm:$0xf]  }
  0x16   :  { %59 = vrot.lane.b32.xlu0 %v58_v7, %s181_s13  ;;  %v98_v13 = vld [vmem:[#allocation0] sm:$0xf]  }
  0x17   :  { %67 = vrot.lane.b32.xlu1 %v66_v8, %s182_s14  ;;  %v106_v14 = vld [vmem:[#allocation0] sm:$0xf]  }
  0x18   :  { %v114_v15 = vld [vmem:[#allocation0] sm:$0xf]  }
  0x19   :  { %v122_v16 = vld [vmem:[#allocation0] sm:$0xf]  }
  0x1a   :  { %75 = vrot.lane.b32.xlu0 %v74_v9, %s183_s19 }
  0x1b   :  { %83 = vrot.lane.b32.xlu1 %v82_v10, %s184_s20 }
  0x1e   :  { %91 = vrot.lane.b32.xlu0 %v90_v12, %s185_s21 }
  0x1f   :  { %99 = vrot.lane.b32.xlu1 %v98_v13, %s186_s22 }
  0x22   :  { %107 = vrot.lane.b32.xlu0 %v106_v14, %s187_s23 }
  0x23   :  { %115 = vrot.lane.b32.xlu1 %v114_v15, %s188_s24 }
  0x26   :  { %123 = vrot.lane.b32.xlu0 %v122_v16, %s189_s25 }
  0x7c   :  { %v12_v17 = vpop.permute.xlu0 %11  }
  0x7d   :  { %v28_v18 = vpop.permute.xlu1 %27   ;;  %130 = vst.msk [vmem:[%s332_s1 + $0x1] ss:$16 sm:$0x3] %vm7_vm0, %v12_v17   ;;  %131 = vst.msk [vmem:[%s332_s1 + $0x1] ss:$16 sm:$0xc] %vm7_vm0, %v12_v17  }
  0x7e   :  { %134 = vst.msk [vmem:[%s332_s1 + $0x3] ss:$16 sm:$0x3] %vm7_vm0, %v28_v18   ;;  %135 = vst.msk [vmem:[%s332_s1 + $0x3] ss:$16 sm:$0xc] %vm7_vm0, %v28_v18  }
  0x80   :  { %v20_v19 = vpop.permute.xlu0 %19  }
  0x81   :  { %v36_v20 = vpop.permute.xlu1 %35   ;;  %132 = vst.msk [vmem:[%s332_s1 + $0x2] ss:$16 sm:$0x3] %vm7_vm0, %v20_v19   ;;  %133 = vst.msk [vmem:[%s332_s1 + $0x2] ss:$16 sm:$0xc] %vm7_vm0, %v20_v19  }
  0x82   :  { %136 = vst.msk [vmem:[%s332_s1 + $0x4] ss:$16 sm:$0x3] %vm7_vm0, %v36_v20   ;;  %137 = vst.msk [vmem:[%s332_s1 + $0x4] ss:$16 sm:$0xc] %vm7_vm0, %v36_v20  }
  0x84   :  { %v44_v21 = vpop.permute.xlu0 %43  }
  0x85   :  { %v52_v22 = vpop.permute.xlu1 %51   ;;  %138 = vst.msk [vmem:[%s332_s1 + $0x5] ss:$16 sm:$0x3] %vm7_vm0, %v44_v21   ;;  %139 = vst.msk [vmem:[%s332_s1 + $0x5] ss:$16 sm:$0xc] %vm7_vm0, %v44_v21  }
  0x86   :  { %140 = vst.msk [vmem:[%s332_s1 + $0x6] ss:$16 sm:$0x3] %vm7_vm0, %v52_v22   ;;  %141 = vst.msk [vmem:[%s332_s1 + $0x6] ss:$16 sm:$0xc] %vm7_vm0, %v52_v22  }
  0x88   :  { %v60_v23 = vpop.permute.xlu0 %59  }
  0x89   :  { %v68_v24 = vpop.permute.xlu1 %67   ;;  %142 = vst.msk [vmem:[%s332_s1 + $0x7] ss:$16 sm:$0x3] %vm7_vm0, %v60_v23   ;;  %143 = vst.msk [vmem:[%s332_s1 + $0x7] ss:$16 sm:$0xc] %vm7_vm0, %v60_v23  }
  0x8a   :  { %144 = vst.msk [vmem:[%s332_s1 + $0x8] ss:$16 sm:$0x3] %vm7_vm0, %v68_v24   ;;  %145 = vst.msk [vmem:[%s332_s1 + $0x8] ss:$16 sm:$0xc] %vm7_vm0, %v68_v24  }
  0x8c   :  { %v76_v25 = vpop.permute.xlu0 %75  }
  0x8d   :  { %v84_v26 = vpop.permute.xlu1 %83   ;;  %146 = vst.msk [vmem:[%s332_s1 + $0x9] ss:$16 sm:$0x3] %vm7_vm0, %v76_v25   ;;  %147 = vst.msk [vmem:[%s332_s1 + $0x9] ss:$16 sm:$0xc] %vm7_vm0, %v76_v25  }
  0x8e   :  { %148 = vst.msk [vmem:[%s332_s1 + $0xa] ss:$16 sm:$0x3] %vm7_vm0, %v84_v26   ;;  %149 = vst.msk [vmem:[%s332_s1 + $0xa] ss:$16 sm:$0xc] %vm7_vm0, %v84_v26  }
  0x90   :  { %v92_v27 = vpop.permute.xlu0 %91  }
  0x91   :  { %v100_v28 = vpop.permute.xlu1 %99   ;;  %150 = vst.msk [vmem:[%s332_s1 + $0xb] ss:$16 sm:$0x3] %vm7_vm0, %v92_v27   ;;  %151 = vst.msk [vmem:[%s332_s1 + $0xb] ss:$16 sm:$0xc] %vm7_vm0, %v92_v27  }
  0x92   :  { %152 = vst.msk [vmem:[%s332_s1 + $0xc] ss:$16 sm:$0x3] %vm7_vm0, %v100_v28   ;;  %153 = vst.msk [vmem:[%s332_s1 + $0xc] ss:$16 sm:$0xc] %vm7_vm0, %v100_v28  }
  0x94   :  { %v108_v29 = vpop.permute.xlu0 %107  }
  0x95   :  { %v116_v30 = vpop.permute.xlu1 %115   ;;  %154 = vst.msk [vmem:[%s332_s1 + $0xd] ss:$16 sm:$0x3] %vm7_vm0, %v108_v29   ;;  %155 = vst.msk [vmem:[%s332_s1 + $0xd] ss:$16 sm:$0xc] %vm7_vm0, %v108_v29  }
  0x96   :  { %156 = vst.msk [vmem:[%s332_s1 + $0xe] ss:$16 sm:$0x3] %vm7_vm0, %v116_v30   ;;  %157 = vst.msk [vmem:[%s332_s1 + $0xe] ss:$16 sm:$0xc] %vm7_vm0, %v116_v30  }
  0x98   :  { %v124_v31 = vpop.permute.xlu0 %123  }
  0x99   :  { %158 = vst.msk [vmem:[%s332_s1 + $0xf] ss:$16 sm:$0x3] %vm7_vm0, %v124_v31   ;;  %159 = vst.msk [vmem:[%s332_s1 + $0xf] ss:$16 sm:$0xc] %vm7_vm0, %v124_v31  }

// kernel: decoder_resnet_forward.31
= control target key start
LH: loop header
LB: loop body
LE: loop exit
PB: predicated region body
PF: predicated region fallthrough
CT: control target
= control target key end

     0   :  { %s653_s12 = smov 0   ;;  %s655_s13 = smov 0   ;;  %s826_s0 = inlined_call_operand.vmem [shape: f32[2,144,64], index: 0, kind: input, shape index: {}]   ;;  %s827_s1 = inlined_call_operand.vmem [shape: f32[64,144], index: 1, kind: input, shape index: {}]   ;;  %s828_s2 = inlined_call_operand.vmem [shape: f32[64,1], index: 2, kind: input, shape index: {}]   ;;  %s829_s3 = inlined_call_operand.vmem [shape: f32[2,64,64], index: 3, kind: output, shape index: {}]  }
   0x1   :  { %s657_s14 = smov 0  }
   0x2 LB: > { %s25_s15 = sadd.s32 1, %s625_s13  ;;  %p518_p0 = scmp.ge.s32.totalorder %s629_s14, 1  ;;  %s629_s14 = sphi %s657_s14, %s13_s14   ;;  %s625_s13 = sphi %s655_s13, %s831_s13   ;;  %s621_s12 = sphi %s653_s12, %s830_s12  }
   0x3   : > { %p27_p1 = scmp.ge.s32.totalorder %s25_s15, 2  ;;  %p156_p2 = scmp.lt.s32.totalorder %s629_s14, 3 }
   0x5   : > { %s833_s15 = smov (%p27_p1, %s25_s15), 0  ;;  %p157_p3 = pnand %p518_p0, %p156_p2 }
   0x6   : > { %p186_p4 = scmp.lt.s32.totalorder (!%p157_p3), %s621_s12, 1  ;;  %v221_v0 = vld [vmem:[%s827_s1 + $0x8] sm:$0xff] (!%p157_p3)  ;;  %vm284_vm0 = vcmask (!%p157_p3), 130048   ;;  %v631_v2 = vmov (!%p157_p3), 0.0|0.0   ;;  %v632_v3 = vmov (!%p157_p3), 0   ;;  %v238_v4 = vld [vmem:[%s828_s2 + $0x10] sm:$0xff] (!%p157_p3) }
   0x7   : > { %160 = sbr.rel (%p157_p3) target bundleno = 285 (0x11d), region = 32  ;;  %v229_v1 = vld [vmem:[%s827_s1 + $0x48] sm:$0xff] (!%p157_p3)  ;;  %533 = vmatprep.subr.bf16.mxu0 (!%p157_p3), %v631_v2  ;;  %560 = vmatprep.subr.bf16.mxu1 (!%p157_p3), %v631_v2  ;;  %v236_v5 = vld [vmem:[%s828_s2] sm:$0xff] (!%p157_p3)  ;;  %v239_v11 = vld [vmem:[%s828_s2 + $0x18] sm:$0xff] (!%p157_p3)  ;;  %vm422_vm1 = vcmask (!%p157_p3), 523264  }
   0x8   : > { %522 = vmatprep.mubr.msk.f32.mxu0 (!%p157_p3), %vm284_vm0, %v221_v0  ;;  %526 = vmatprep.mubr.msk.f32.mxu1 (!%p157_p3), %vm284_vm0, %v229_v1  ;;  %v237_v12 = vld [vmem:[%s828_s2 + $0x8] sm:$0xff] (!%p157_p3)  ;;  %v240_v17 = vld [vmem:[%s828_s2 + $0x20] sm:$0xff] (!%p157_p3)  ;;  %v243_v21 = vld [vmem:[%s828_s2 + $0x38] sm:$0xff] (!%p157_p3) }
   0x9   : > { %606 = vset.pattern.permute.xlu1 (!%p157_p3), %v632_v3  ;;  %605 = vset.pattern.permute.xlu0 (!%p157_p3), %v632_v3  ;;  %v241_v16 = vld [vmem:[%s828_s2 + $0x28] sm:$0xff] (!%p157_p3)  ;;  %v242_v22 = vld [vmem:[%s828_s2 + $0x30] sm:$0xff] (!%p157_p3)  ;;  %v220_v39 = vld [vmem:[%s827_s1] sm:$0xff] (!%p157_p3) }
   0xa   : > { %256 = vperm.xlu1 (!%p157_p3), %606, %v238_v4   ;;  %246 = vperm.xlu0 (!%p157_p3), %605, %v236_v5   ;;  %v228_v40 = vld [vmem:[%s827_s1 + $0x40] sm:$0xff] (!%p157_p3)  ;;  %v223_v41 = vld [vmem:[%s827_s1 + $0x18] sm:$0xff] (!%p157_p3)  ;;  %v222_v43 = vld [vmem:[%s827_s1 + $0x10] sm:$0xff] (!%p157_p3) }
   0xb   : > { %v231_v42 = vld [vmem:[%s827_s1 + $0x58] sm:$0xff] (!%p157_p3)  ;;  %v230_v44 = vld [vmem:[%s827_s1 + $0x50] sm:$0xff] (!%p157_p3)  ;;  %v225_v45 = vld [vmem:[%s827_s1 + $0x28] sm:$0xff] (!%p157_p3) }
   0xc   : > { %v233_v46 = vld [vmem:[%s827_s1 + $0x68] sm:$0xff] (!%p157_p3)  ;;  %v224_v47 = vld [vmem:[%s827_s1 + $0x20] sm:$0xff] (!%p157_p3)  ;;  %v227_v49 = vld [vmem:[%s827_s1 + $0x38] sm:$0xff] (!%p157_p3) }
   0xd   : > { %v232_v48 = vld [vmem:[%s827_s1 + $0x60] sm:$0xff] (!%p157_p3)  ;;  %v235_v50 = vld [vmem:[%s827_s1 + $0x78] sm:$0xff] (!%p157_p3)  ;;  %v226_v51 = vld [vmem:[%s827_s1 + $0x30] sm:$0xff] (!%p157_p3) }
   0xe   : > { %s835_s12 = smov (!%p186_p4, %s621_s12), 1  ;;  %261 = vperm.xlu1 %606, %v239_v11   ;;  %251 = vperm.xlu0 %605, %v237_v12   ;;  %v234_v52 = vld [vmem:[%s827_s1 + $0x70] sm:$0xff] }
   0xf   : > { %s578_s20 = smul.u32 144, %s835_s12  ;;  %s532_s22 = sshll.u32 %s835_s12, 6 }
  0x10   : > { %s799_s25 = scalar_lea.vmem %s829_s3, %s532_s22 }
  0x11   : > { %s693_s27 = scalar_lea.vmem %s826_s0, %s578_s20 }
  0x12   : > { %v202_v6 = vld [vmem:[%s693_s27] sm:$0xff]  ;;  %v203_v7 = vld [vmem:[%s693_s27 + $0x8] sm:$0xff]  ;;  %v204_v8 = vld [vmem:[%s693_s27 + $0x10] sm:$0xff]  ;;  %271 = vperm.xlu1 %606, %v241_v16   ;;  %266 = vperm.xlu0 %605, %v240_v17  }
  0x13   : > { %v534_v9 = vpack.c.bf16 %v203_v7, %v202_v6  ;;  %v205_v10 = vld [vmem:[%s693_s27 + $0x18] sm:$0xff]  ;;  %v206_v14 = vld [vmem:[%s693_s27 + $0x20] sm:$0xff]  ;;  %v207_v15 = vld [vmem:[%s693_s27 + $0x28] sm:$0xff] }
  0x14   : > { %v537_v13 = vpack.c.bf16 %v205_v10, %v204_v8  ;;  %v540_v18 = vpack.c.bf16 %v207_v15, %v206_v14  ;;  %v208_v19 = vld [vmem:[%s693_s27 + $0x30] sm:$0xff]  ;;  %v209_v20 = vld [vmem:[%s693_s27 + $0x38] sm:$0xff]  ;;  %v210_v24 = vld [vmem:[%s693_s27 + $0x40] sm:$0xff] }
  0x15   : > { %535 = vmatpush1.bf16.msra.mxu0 %v534_v9  ;;  %569 = vmatpush1.bf16.msra.mxu1 %v534_v9  ;;  %v543_v23 = vpack.c.bf16 %v209_v20, %v208_v19  ;;  %v211_v25 = vld [vmem:[%s693_s27 + $0x48] sm:$0xff]  ;;  %v212_v27 = vld [vmem:[%s693_s27 + $0x50] sm:$0xff]  ;;  %v213_v28 = vld [vmem:[%s693_s27 + $0x58] sm:$0xff] }
  0x16   : > { %536 = vmatprep.subr.bf16.mxu0 %v631_v2  ;;  %561 = vmatprep.subr.bf16.mxu1 %v631_v2  ;;  %v546_v26 = vpack.c.bf16 %v211_v25, %v210_v24  ;;  %v549_v29 = vpack.c.bf16 %v213_v28, %v212_v27  ;;  %v214_v30 = vld [vmem:[%s693_s27 + $0x60] sm:$0xff]  ;;  %v215_v31 = vld [vmem:[%s693_s27 + $0x68] sm:$0xff]  ;;  %v216_v33 = vld [vmem:[%s693_s27 + $0x70] sm:$0xff] }
  0x17   : > { %281 = vperm.xlu1 %606, %v243_v21   ;;  %276 = vperm.xlu0 %605, %v242_v22   ;;  %v552_v32 = vpack.c.bf16 %v215_v31, %v214_v30  ;;  %v217_v34 = vld [vmem:[%s693_s27 + $0x78] sm:$0xff]  ;;  %v218_v36 = vld [vmem:[%s693_s27 + $0x80] sm:$0xff]  ;;  %v219_v37 = vld [vmem:[%s693_s27 + $0x88] sm:$0xff] }
  0x18   : > { %v555_v35 = vpack.c.bf16 %v217_v34, %v216_v33  ;;  %v558_v38 = vpack.c.bf16 %v219_v37, %v218_v36 }
  0x19   : > { %538 = vmatpush1.bf16.msra.mxu0 %v537_v13  ;;  %570 = vmatpush1.bf16.msra.mxu1 %v537_v13 }
  0x1a   : > { %539 = vmatprep.subr.bf16.mxu0 %v631_v2  ;;  %562 = vmatprep.subr.bf16.mxu1 %v631_v2 }
  0x1d   : > { %541 = vmatpush1.bf16.msra.mxu0 %v540_v18  ;;  %571 = vmatpush1.bf16.msra.mxu1 %v540_v18 }
  0x1e   : > { %542 = vmatprep.subr.bf16.mxu0 %v631_v2  ;;  %563 = vmatprep.subr.bf16.mxu1 %v631_v2 }
  0x21   : > { %544 = vmatpush1.bf16.msra.mxu0 %v543_v23  ;;  %572 = vmatpush1.bf16.msra.mxu1 %v543_v23 }
  0x22   : > { %545 = vmatprep.subr.bf16.mxu0 %v631_v2  ;;  %564 = vmatprep.subr.bf16.mxu1 %v631_v2 }
  0x25   : > { %547 = vmatpush1.bf16.msra.mxu0 %v546_v26  ;;  %573 = vmatpush1.bf16.msra.mxu1 %v546_v26 }
  0x26   : > { %548 = vmatprep.subr.bf16.mxu0 %v631_v2  ;;  %565 = vmatprep.subr.bf16.mxu1 %v631_v2 }
  0x29   : > { %550 = vmatpush1.bf16.msra.mxu0 %v549_v29  ;;  %574 = vmatpush1.bf16.msra.mxu1 %v549_v29 }
  0x2a   : > { %551 = vmatprep.subr.bf16.mxu0 %v631_v2  ;;  %566 = vmatprep.subr.bf16.mxu1 %v631_v2 }
  0x2d   : > { %553 = vmatpush1.bf16.msra.mxu0 %v552_v32  ;;  %575 = vmatpush1.bf16.msra.mxu1 %v552_v32 }
  0x2e   : > { %554 = vmatprep.subr.bf16.mxu0 %v631_v2  ;;  %567 = vmatprep.subr.bf16.mxu1 %v631_v2 }
  0x31   : > { %556 = vmatpush1.bf16.msra.mxu0 %v555_v35  ;;  %576 = vmatpush1.bf16.msra.mxu1 %v555_v35 }
  0x32   : > { %557 = vmatprep.subr.bf16.mxu0 %v631_v2  ;;  %568 = vmatprep.subr.bf16.mxu1 %v631_v2 }
  0x35   : > { %559 = vmatpush1.bf16.msra.mxu0 %v558_v38  ;;  %577 = vmatpush1.bf16.msra.mxu1 %v558_v38 }
  0x38   : > { %374 = vmatmul.mubr.f32.vlgmr.msra.gmra.mrb[0].mxu0 %v220_v39  ;;  %394 = vmatmul.mubr.f32.vlgmr.msra.gmra.mrb[0].mxu1 %v228_v40 }
  0x39   : > { %523 = vmatprep.mubr.msk.f32.mxu0 %vm284_vm0, %v223_v41  ;;  %527 = vmatprep.mubr.msk.f32.mxu1 %vm284_vm0, %v231_v42 }
  0x3c   : > { %379 = vmatmul.mubr.f32.gmra.mrb[2].mxu0 %v222_v43  ;;  %399 = vmatmul.mubr.f32.gmra.mrb[2].mxu1 %v230_v44 }
  0x3d   : > { %524 = vmatprep.mubr.msk.f32.mxu0 %vm284_vm0, %v225_v45  ;;  %528 = vmatprep.mubr.msk.f32.mxu1 %vm284_vm0, %v233_v46 }
  0x40   : > { %384 = vmatmul.mubr.f32.gmra.mrb[4].mxu0 %v224_v47  ;;  %404 = vmatmul.mubr.f32.gmra.mrb[4].mxu1 %v232_v48 }
  0x41   : > { %525 = vmatprep.mubr.msk.f32.mxu0 %vm284_vm0, %v227_v49  ;;  %529 = vmatprep.mubr.msk.f32.mxu1 %vm284_vm0, %v235_v50 }
  0x44   : > { %389 = vmatmul.mubr.f32.gmra.mrb[6].mxu0 %v226_v51  ;;  %409 = vmatmul.mubr.f32.gmra.mrb[6].mxu1 %v234_v52 }
  0x89   : > { %v247_v53 = vpop.permute.xlu0 %246  ;;  %v257_v54 = vpop.permute.xlu1 %256 }
  0x8d   : > { %v252_v55 = vpop.permute.xlu0 %251  ;;  %v262_v56 = vpop.permute.xlu1 %261 }
  0x91   : > { %v267_v57 = vpop.permute.xlu0 %266  ;;  %v272_v0 = vpop.permute.xlu1 %271 }
  0x96   : > { %v277_v9 = vpop.permute.xlu0 %276  ;;  %v282_v18 = vpop.permute.xlu1 %281 }
 0x10b   : > { %v375_v58 = vpop.f32.mrb[0].mxu0  ;;  %v395_v59 = vpop.f32.mrb[0].mxu1 }
 0x10c   : > { %v376_v60 = vadd.f32 %v375_v58, %v247_v53  ;;  %v396_v61 = vadd.f32 %v395_v59, %v267_v57  ;;  %v377_v62 = vpop.f32.mrb[1].mxu0  ;;  %v397_v63 = vpop.f32.mrb[1].mxu1 }
 0x10e   : > { %v414_v1 = vmax.f32 %v376_v60, 0.0  ;;  %v418_v2 = vmax.f32 %v396_v61, 0.0 }
 0x10f   : > { %v380_v3 = vpop.f32.mrb[2].mxu0  ;;  %v400_v4 = vpop.f32.mrb[2].mxu1 }
 0x110   : > { %423 = vst.msk [vmem:[%s799_s25] sm:$0xff] %vm422_vm1, %v414_v1  ;;  %427 = vst.msk [vmem:[%s799_s25 + $0x20] sm:$0xff] %vm422_vm1, %v418_v2  ;;  %v381_v5 = vadd.f32 %v380_v3, %v252_v55  ;;  %v401_v6 = vadd.f32 %v400_v4, %v272_v0  ;;  %v382_v7 = vpop.f32.mrb[3].mxu0  ;;  %v402_v8 = vpop.f32.mrb[3].mxu1 }
 0x112   : > { %v415_v10 = vmax.f32 %v381_v5, 0.0  ;;  %v419_v11 = vmax.f32 %v401_v6, 0.0 }
 0x113   : > { %v385_v12 = vpop.f32.mrb[4].mxu0  ;;  %v405_v13 = vpop.f32.mrb[4].mxu1 }
 0x114   : > { %424 = vst.msk [vmem:[%s799_s25 + $0x8] sm:$0xff] %vm422_vm1, %v415_v10  ;;  %428 = vst.msk [vmem:[%s799_s25 + $0x28] sm:$0xff] %vm422_vm1, %v419_v11  ;;  %v386_v14 = vadd.f32 %v385_v12, %v257_v54  ;;  %v406_v15 = vadd.f32 %v405_v13, %v277_v9  ;;  %v387_v16 = vpop.f32.mrb[5].mxu0  ;;  %v407_v17 = vpop.f32.mrb[5].mxu1 }
 0x116   : > { %v416_v19 = vmax.f32 %v386_v14, 0.0  ;;  %v420_v20 = vmax.f32 %v406_v15, 0.0 }
 0x117   : > { %v390_v21 = vpop.f32.mrb[6].mxu0  ;;  %v410_v22 = vpop.f32.mrb[6].mxu1 }
 0x118   : > { %425 = vst.msk [vmem:[%s799_s25 + $0x10] sm:$0xff] %vm422_vm1, %v416_v19  ;;  %429 = vst.msk [vmem:[%s799_s25 + $0x30] sm:$0xff] %vm422_vm1, %v420_v20  ;;  %v391_v23 = vadd.f32 %v390_v21, %v262_v56  ;;  %v411_v24 = vadd.f32 %v410_v22, %v282_v18  ;;  %v392_v25 = vpop.f32.mrb[7].mxu0  ;;  %v412_v26 = vpop.f32.mrb[7].mxu1 }
 0x11a   : > { %v417_v27 = vmax.f32 %v391_v23, 0.0  ;;  %v421_v28 = vmax.f32 %v411_v24, 0.0 }
 0x11c   : > { %426 = vst.msk [vmem:[%s799_s25 + $0x18] sm:$0xff] %vm422_vm1, %v417_v27  ;;  %430 = vst.msk [vmem:[%s799_s25 + $0x38] sm:$0xff] %vm422_vm1, %v421_v28 }
 0x11d PF: > { %s13_s14 = sadd.s32 1, %s629_s14   ;;  %s830_s12 = smov %s625_s13 }
 0x11e   : > { %p10_p5 = scmp.ge.s32.totalorder %s13_s14, 4   ;;  %s831_s13 = smov %s833_s15 }
 0x120   :  { %12 = sbr.rel (!%p10_p5) target bundleno = 2 (0x2), region = 62 }

// kernel: decoder_resnet_forward.33
= control target key start
LH: loop header
LB: loop body
LE: loop exit
PB: predicated region body
PF: predicated region fallthrough
CT: control target
= control target key end

     0   :  { %s323_s9 = smov 0   ;;  %s325_s10 = smov 0   ;;  %s389_s0 = inlined_call_operand.vmem [shape: f32[2,16,256], index: 0, kind: input, shape index: {}]   ;;  %s390_s1 = inlined_call_operand.vmem [shape: f32[16,1], index: 1, kind: output, shape index: {0}]   ;;  %s391_s2 = inlined_call_operand.vmem [shape: f32[16,1], index: 2, kind: output, shape index: {1}]  }
   0x1   :  { %s327_s11 = smov 0  }
   0x2 LB: > { %s25_s12 = sadd.s32 1, %s301_s10  ;;  %p250_p0 = scmp.ge.s32.totalorder %s305_s11, 1  ;;  %s305_s11 = sphi %s327_s11, %s13_s11   ;;  %s301_s10 = sphi %s325_s10, %s393_s10   ;;  %s297_s9 = sphi %s323_s9, %s392_s9  }
   0x3   : > { %p27_p1 = scmp.ge.s32.totalorder %s25_s12, 2  ;;  %p124_p2 = scmp.lt.s32.totalorder %s305_s11, 3 }
   0x5   : > { %s395_s12 = smov (%p27_p1, %s25_s12), 0  ;;  %p125_p3 = pnand %p250_p0, %p124_p2 }
   0x6   : > { %p146_p4 = scmp.lt.s32.totalorder (!%p125_p3), %s297_s9, 1  ;;  %p155_p5 = scmp.eq.s32.totalorder (!%p125_p3), %s297_s9, 0 }
   0x7   : > { %128 = sbr.rel (%p125_p3) target bundleno = 175 (0xaf), region = 24 }
   0xe   : > { %s397_s9 = smov (!%p146_p4, %s297_s9), 1  ;;  %160 = sbr.rel (!%p155_p5) target bundleno = 21 (0x15), region = 28 }
   0xf   : > { %s256_s13 = sshll.u32 %s397_s9, 5  ;;  %vm161_vm0 = vcmask (%p155_p5), 7168   ;;  %v307_v0 = vmov (%p155_p5), 0.0  }
  0x10   : > { %s153_s16 = scalar_lea.vmem %s389_s0, %s256_s13  ;;  %162 = vst.msk [vmem:[%s390_s1] sm:$0xff] (%p155_p5), %vm161_vm0, %v307_v0  ;;  %163 = vst.msk [vmem:[%s390_s1 + $0x8] sm:$0xff] (%p155_p5), %vm161_vm0, %v307_v0 }
  0x11   : > { %164 = vst.msk [vmem:[%s391_s2] sm:$0xff] (%p155_p5), %vm161_vm0, %v307_v0  ;;  %165 = vst.msk [vmem:[%s391_s2 + $0x8] sm:$0xff] (%p155_p5), %vm161_vm0, %v307_v0 }
  0x15 PF: > { %v166_v1 = vld [vmem:[%s153_s16] sm:$0xff]  ;;  %v167_v2 = vld [vmem:[%s153_s16 + $0x8] sm:$0xff]  ;;  %v168_v3 = vld [vmem:[%s153_s16 + $0x10] sm:$0xff]  ;;  %vm180_vm1 = vcmask 7168  }
  0x16   : > { %v185_v4 = vmul.f32 %v166_v1, %v166_v1  ;;  %v186_v5 = vmul.f32 %v167_v2, %v167_v2  ;;  %v172_v6 = vadd.f32 %v167_v2, %v166_v1  ;;  %v169_v7 = vld [vmem:[%s153_s16 + $0x18] sm:$0xff]  ;;  %v187_v8 = vmul.f32 %v168_v3, %v168_v3 }
  0x17   : > { %v188_v9 = vmul.f32 %v169_v7, %v169_v7  ;;  %v175_v11 = vadd.f32 %v169_v7, %v168_v3  ;;  %v170_v13 = vld [vmem:[%s390_s1] sm:$0xff]  ;;  %v171_v18 = vld [vmem:[%s390_s1 + $0x8] sm:$0xff] }
  0x18   : > { %v189_v10 = vadd.f32 %v186_v5, %v185_v4  ;;  %173 = vadd.xlane.f32.xlu0 %v172_v6  ;;  %v183_v14 = vld [vmem:[%s391_s2] sm:$0xff]  ;;  %v184_v20 = vld [vmem:[%s391_s2 + $0x8] sm:$0xff] }
  0x19   : > { %v192_v12 = vadd.f32 %v188_v9, %v187_v8 }
  0x1a   : > { %190 = vadd.xlane.f32.xlu1 %v189_v10 }
  0x1c   : > { %176 = vadd.xlane.f32.xlu0 %v175_v11 }
  0x1e   : > { %193 = vadd.xlane.f32.xlu1 %v192_v12 }
  0xa5   : > { %v174_v15 = vpop.xlane.xlu0 %173 }
  0xa6   : > { %v178_v16 = vadd.f32 %v174_v15, %v170_v13 }
  0xa7   : > { %v191_v17 = vpop.xlane.xlu1 %190 }
  0xa8   : > { %v195_v19 = vadd.f32 %v191_v17, %v183_v14  ;;  %181 = vst.msk [vmem:[%s390_s1] sm:$0xff] %vm180_vm1, %v178_v16 }
  0xa9   : > { %v177_v21 = vpop.xlane.xlu0 %176 }
  0xaa   : > { %197 = vst.msk [vmem:[%s391_s2] sm:$0xff] %vm180_vm1, %v195_v19  ;;  %v179_v22 = vadd.f32 %v177_v21, %v171_v18 }
  0xab   : > { %v194_v23 = vpop.xlane.xlu1 %193 }
  0xac   : > { %v196_v24 = vadd.f32 %v194_v23, %v184_v20  ;;  %182 = vst.msk [vmem:[%s390_s1 + $0x8] sm:$0xff] %vm180_vm1, %v179_v22 }
  0xae   : > { %198 = vst.msk [vmem:[%s391_s2 + $0x8] sm:$0xff] %vm180_vm1, %v196_v24 }
  0xaf PF: > { %s13_s11 = sadd.s32 1, %s305_s11   ;;  %s392_s9 = smov %s301_s10 }
  0xb0   : > { %p10_p6 = scmp.ge.s32.totalorder %s13_s11, 4   ;;  %s393_s10 = smov %s395_s12 }
  0xb2   :  { %12 = sbr.rel (!%p10_p6) target bundleno = 2 (0x2), region = 62 }

// kernel: decoder_resnet_forward.32
= control target key start
LH: loop header
LB: loop body
LE: loop exit
PB: predicated region body
PF: predicated region fallthrough
CT: control target
= control target key end

     0   :  { %s612_s12 = smov 0   ;;  %s614_s13 = smov 0   ;;  %s705_s0 = inlined_call_operand.vmem [shape: f32[2,144,256], index: 0, kind: input, shape index: {}]   ;;  %s706_s1 = inlined_call_operand.vmem [shape: f32[16,144], index: 1, kind: input, shape index: {}]   ;;  %s707_s2 = inlined_call_operand.vmem [shape: f32[16,1], index: 2, kind: input, shape index: {}]   ;;  %s708_s3 = inlined_call_operand.vmem [shape: f32[2,16,256], index: 3, kind: output, shape index: {}]  }
   0x1   :  { %s616_s14 = smov 0  }
   0x2 LB: > { %s25_s15 = sadd.s32 1, %s585_s13  ;;  %p477_p0 = scmp.ge.s32.totalorder %s589_s14, 1  ;;  %s589_s14 = sphi %s616_s14, %s13_s14   ;;  %s585_s13 = sphi %s614_s13, %s710_s13   ;;  %s581_s12 = sphi %s612_s12, %s709_s12  }
   0x3   : > { %p27_p1 = scmp.ge.s32.totalorder %s25_s15, 2  ;;  %p158_p2 = scmp.lt.s32.totalorder %s589_s14, 3 }
   0x5   : > { %s712_s15 = smov (%p27_p1, %s25_s15), 0  ;;  %p159_p3 = pnand %p477_p0, %p158_p2 }
   0x6   : > { %p191_p4 = scmp.lt.s32.totalorder (!%p159_p3), %s581_s12, 1  ;;  %v283_v0 = vld [vmem:[%s706_s1 + $0x8] sm:$0xff] (!%p159_p3)  ;;  %vm298_vm0 = vcmask (!%p159_p3), 130048   ;;  %v285_v1 = vld [vmem:[%s706_s1 + $0x18] sm:$0xff] (!%p159_p3)  ;;  %v286_v2 = vld [vmem:[%s707_s2] sm:$0xff] (!%p159_p3)  ;;  %v591_v3 = vmov (!%p159_p3), 0  }
   0x7   : > { %162 = sbr.rel (%p159_p3) target bundleno = 275 (0x113), region = 32  ;;  %481 = vmatprep.mubr.msk.f32.mxu0 (!%p159_p3), %vm298_vm0, %v283_v0  ;;  %482 = vmatprep.mubr.msk.f32.mxu1 (!%p159_p3), %vm298_vm0, %v285_v1  ;;  %v287_v4 = vld [vmem:[%s707_s2 + $0x8] sm:$0xff] (!%p159_p3) }
   0x8   : > { %566 = vset.pattern.permute.xlu0 (!%p159_p3), %v591_v3 }
   0x9   : > { %290 = vperm.xlu0 (!%p159_p3), %566, %v286_v2  }
   0xd   : > { %295 = vperm.xlu0 (!%p159_p3), %566, %v287_v4  }
   0xe   : > { %s714_s12 = smov (!%p191_p4, %s581_s12), 1 }
   0xf   : > { %s540_s22 = smul.u32 288, %s714_s12  ;;  %s485_s5 = sshll.u32 %s714_s12, 5 }
  0x10   : > { %s208_s8 = scalar_lea.vmem %s708_s3, %s485_s5 }
  0x11   : > { %s648_s27 = scalar_lea.vmem %s705_s0, %s540_s22 }
  0x12   : > { %v211_v5 = vld [vmem:[%s648_s27 + $0x8] sm:$0xff]  ;;  %v213_v6 = vld [vmem:[%s648_s27 + $0x18] sm:$0xff]  ;;  %v210_v7 = vld [vmem:[%s648_s27] sm:$0xff] }
  0x13   : > { %v247_v8 = vmax.f32 %v211_v5, 0.0  ;;  %v249_v9 = vmax.f32 %v213_v6, 0.0  ;;  %v212_v10 = vld [vmem:[%s648_s27 + $0x10] sm:$0xff]  ;;  %v246_v11 = vmax.f32 %v210_v7, 0.0  ;;  %v215_v12 = vld [vmem:[%s648_s27 + $0x28] sm:$0xff]  ;;  %v217_v13 = vld [vmem:[%s648_s27 + $0x38] sm:$0xff] }
  0x14   : > { %v248_v14 = vmax.f32 %v212_v10, 0.0  ;;  %v251_v15 = vmax.f32 %v215_v12, 0.0  ;;  %v253_v16 = vmax.f32 %v217_v13, 0.0  ;;  %v214_v17 = vld [vmem:[%s648_s27 + $0x20] sm:$0xff]  ;;  %v216_v18 = vld [vmem:[%s648_s27 + $0x30] sm:$0xff]  ;;  %v219_v19 = vld [vmem:[%s648_s27 + $0x48] sm:$0xff] }
  0x15   : > { %v486_v20 = vpack.c.bf16 %v249_v9, %v247_v8  ;;  %v250_v21 = vmax.f32 %v214_v17, 0.0  ;;  %v252_v22 = vmax.f32 %v216_v18, 0.0  ;;  %v221_v23 = vld [vmem:[%s648_s27 + $0x58] sm:$0xff]  ;;  %v255_v24 = vmax.f32 %v219_v19, 0.0  ;;  %v218_v25 = vld [vmem:[%s648_s27 + $0x40] sm:$0xff]  ;;  %v220_v26 = vld [vmem:[%s648_s27 + $0x50] sm:$0xff] }
  0x16   : > { %v488_v27 = vpack.c.bf16 %v248_v14, %v246_v11  ;;  %v490_v28 = vpack.c.bf16 %v253_v16, %v251_v15  ;;  %v257_v29 = vmax.f32 %v221_v23, 0.0  ;;  %v223_v30 = vld [vmem:[%s648_s27 + $0x68] sm:$0xff]  ;;  %v225_v31 = vld [vmem:[%s648_s27 + $0x78] sm:$0xff]  ;;  %v254_v33 = vmax.f32 %v218_v25, 0.0  ;;  %v222_v38 = vld [vmem:[%s648_s27 + $0x60] sm:$0xff] }
  0x17   : > { %487 = vmatprep.subr.bf16.mxu0 %v486_v20  ;;  %522 = vmatprep.subr.bf16.mxu1 %v486_v20  ;;  %v492_v32 = vpack.c.bf16 %v252_v22, %v250_v21  ;;  %v256_v34 = vmax.f32 %v220_v26, 0.0  ;;  %v259_v36 = vmax.f32 %v223_v30, 0.0  ;;  %v261_v37 = vmax.f32 %v225_v31, 0.0  ;;  %v224_v39 = vld [vmem:[%s648_s27 + $0x70] sm:$0xff]  ;;  %v227_v40 = vld [vmem:[%s648_s27 + $0x88] sm:$0xff]  ;;  %v229_v41 = vld [vmem:[%s648_s27 + $0x98] sm:$0xff] }
  0x18   : > { %489 = vmatpush1.bf16.msra.mxu0 %v488_v27  ;;  %531 = vmatpush1.bf16.msra.mxu1 %v488_v27  ;;  %v494_v35 = vpack.c.bf16 %v257_v29, %v255_v24  ;;  %v258_v43 = vmax.f32 %v222_v38, 0.0  ;;  %v260_v44 = vmax.f32 %v224_v39, 0.0  ;;  %v263_v46 = vmax.f32 %v227_v40, 0.0  ;;  %v226_v48 = vld [vmem:[%s648_s27 + $0x80] sm:$0xff]  ;;  %v228_v49 = vld [vmem:[%s648_s27 + $0x90] sm:$0xff]  ;;  %v231_v50 = vld [vmem:[%s648_s27 + $0xa8] sm:$0xff] }
  0x19   : > { %491 = vmatprep.subr.bf16.mxu0 %v490_v28  ;;  %523 = vmatprep.subr.bf16.mxu1 %v490_v28  ;;  %v496_v42 = vpack.c.bf16 %v256_v34, %v254_v33  ;;  %v498_v45 = vpack.c.bf16 %v261_v37, %v259_v36  ;;  %v265_v47 = vmax.f32 %v229_v41, 0.0  ;;  %v233_v51 = vld [vmem:[%s648_s27 + $0xb8] sm:$0xff]  ;;  %v262_v53 = vmax.f32 %v226_v48, 0.0  ;;  %v230_v58 = vld [vmem:[%s648_s27 + $0xa0] sm:$0xff]  ;;  %v232_v59 = vld [vmem:[%s648_s27 + $0xb0] sm:$0xff] }
  0x1a   : > { %v500_v52 = vpack.c.bf16 %v260_v44, %v258_v43  ;;  %v264_v54 = vmax.f32 %v228_v49, 0.0  ;;  %v267_v56 = vmax.f32 %v231_v50, 0.0  ;;  %v269_v57 = vmax.f32 %v233_v51, 0.0  ;;  %v235_v60 = vld [vmem:[%s648_s27 + $0xc8] sm:$0xff]  ;;  %v237_v61 = vld [vmem:[%s648_s27 + $0xd8] sm:$0xff]  ;;  %v234_v4 = vld [vmem:[%s648_s27 + $0xc0] sm:$0xff] }
  0x1b   : > { %v502_v55 = vpack.c.bf16 %v265_v47, %v263_v46  ;;  %v266_v63 = vmax.f32 %v230_v58, 0.0  ;;  %v268_v0 = vmax.f32 %v232_v59, 0.0  ;;  %v271_v2 = vmax.f32 %v235_v60, 0.0  ;;  %v236_v5 = vld [vmem:[%s648_s27 + $0xd0] sm:$0xff]  ;;  %v239_v6 = vld [vmem:[%s648_s27 + $0xe8] sm:$0xff]  ;;  %v241_v7 = vld [vmem:[%s648_s27 + $0xf8] sm:$0xff] }
  0x1c   : > { %493 = vmatpush1.bf16.msra.mxu0 %v492_v32  ;;  %532 = vmatpush1.bf16.msra.mxu1 %v492_v32  ;;  %v504_v62 = vpack.c.bf16 %v264_v54, %v262_v53  ;;  %v506_v1 = vpack.c.bf16 %v269_v57, %v267_v56  ;;  %v273_v3 = vmax.f32 %v237_v61, 0.0  ;;  %v270_v9 = vmax.f32 %v234_v4, 0.0  ;;  %v238_v14 = vld [vmem:[%s648_s27 + $0xe0] sm:$0xff]  ;;  %v240_v15 = vld [vmem:[%s648_s27 + $0xf0] sm:$0xff]  ;;  %v243_v16 = vld [vmem:[%s648_s27 + $0x108] sm:$0xff] }
  0x1d   : > { %495 = vmatprep.subr.bf16.mxu0 %v494_v35  ;;  %524 = vmatprep.subr.bf16.mxu1 %v494_v35  ;;  %v508_v8 = vpack.c.bf16 %v268_v0, %v266_v63  ;;  %v272_v10 = vmax.f32 %v236_v5, 0.0  ;;  %v275_v12 = vmax.f32 %v239_v6, 0.0  ;;  %v277_v13 = vmax.f32 %v241_v7, 0.0  ;;  %v245_v17 = vld [vmem:[%s648_s27 + $0x118] sm:$0xff]  ;;  %v242_v24 = vld [vmem:[%s648_s27 + $0x100] sm:$0xff]  ;;  %v244_v25 = vld [vmem:[%s648_s27 + $0x110] sm:$0xff] }
  0x1e   : > { %v510_v11 = vpack.c.bf16 %v273_v3, %v271_v2  ;;  %v274_v19 = vmax.f32 %v238_v14, 0.0  ;;  %v276_v20 = vmax.f32 %v240_v15, 0.0  ;;  %v279_v22 = vmax.f32 %v243_v16, 0.0  ;;  %v282_v31 = vld [vmem:[%s706_s1] sm:$0xff]  ;;  %v284_v32 = vld [vmem:[%s706_s1 + $0x10] sm:$0xff] }
  0x1f   : > { %v512_v18 = vpack.c.bf16 %v272_v10, %v270_v9  ;;  %v514_v21 = vpack.c.bf16 %v277_v13, %v275_v12  ;;  %v281_v23 = vmax.f32 %v245_v17, 0.0  ;;  %v278_v27 = vmax.f32 %v242_v24, 0.0 }
  0x20   : > { %497 = vmatpush1.bf16.msra.mxu0 %v496_v42  ;;  %533 = vmatpush1.bf16.msra.mxu1 %v496_v42  ;;  %v516_v26 = vpack.c.bf16 %v276_v20, %v274_v19  ;;  %v280_v28 = vmax.f32 %v244_v25, 0.0 }
  0x21   : > { %499 = vmatprep.subr.bf16.mxu0 %v498_v45  ;;  %525 = vmatprep.subr.bf16.mxu1 %v498_v45  ;;  %v518_v29 = vpack.c.bf16 %v281_v23, %v279_v22 }
  0x22   : > { %v520_v30 = vpack.c.bf16 %v280_v28, %v278_v27 }
  0x24   : > { %501 = vmatpush1.bf16.msra.mxu0 %v500_v52  ;;  %534 = vmatpush1.bf16.msra.mxu1 %v500_v52 }
  0x25   : > { %503 = vmatprep.subr.bf16.mxu0 %v502_v55  ;;  %526 = vmatprep.subr.bf16.mxu1 %v502_v55 }
  0x28   : > { %505 = vmatpush1.bf16.msra.mxu0 %v504_v62  ;;  %535 = vmatpush1.bf16.msra.mxu1 %v504_v62 }
  0x29   : > { %507 = vmatprep.subr.bf16.mxu0 %v506_v1  ;;  %527 = vmatprep.subr.bf16.mxu1 %v506_v1 }
  0x2c   : > { %509 = vmatpush1.bf16.msra.mxu0 %v508_v8  ;;  %536 = vmatpush1.bf16.msra.mxu1 %v508_v8 }
  0x2d   : > { %511 = vmatprep.subr.bf16.mxu0 %v510_v11  ;;  %528 = vmatprep.subr.bf16.mxu1 %v510_v11 }
  0x30   : > { %513 = vmatpush1.bf16.msra.mxu0 %v512_v18  ;;  %537 = vmatpush1.bf16.msra.mxu1 %v512_v18 }
  0x31   : > { %515 = vmatprep.subr.bf16.mxu0 %v514_v21  ;;  %529 = vmatprep.subr.bf16.mxu1 %v514_v21 }
  0x34   : > { %517 = vmatpush1.bf16.msra.mxu0 %v516_v26  ;;  %538 = vmatpush1.bf16.msra.mxu1 %v516_v26 }
  0x35   : > { %519 = vmatprep.subr.bf16.mxu0 %v518_v29  ;;  %530 = vmatprep.subr.bf16.mxu1 %v518_v29 }
  0x38   : > { %521 = vmatpush1.bf16.msra.mxu0 %v520_v30  ;;  %539 = vmatpush1.bf16.msra.mxu1 %v520_v30 }
  0x3b   : > { %370 = vmatmul.mubr.f32.vlgmr.msra.gmra.mrb[0].mxu0 %v282_v31  ;;  %376 = vmatmul.mubr.f32.vlgmr.msra.gmra.mrb[0].mxu1 %v284_v32 }
  0x88   : > { %v291_v33 = vpop.permute.xlu0 %290 }
  0x8c   : > { %v296_v34 = vpop.permute.xlu0 %295 }
 0x10e   : > { %v371_v35 = vpop.f32.mrb[0].mxu0  ;;  %v377_v36 = vpop.f32.mrb[0].mxu1 }
 0x10f   : > { %v372_v37 = vadd.f32 %v371_v35, %v291_v33  ;;  %v378_v38 = vadd.f32 %v377_v36, %v296_v34  ;;  %v373_v39 = vpop.f32.mrb[1].mxu0  ;;  %v379_v40 = vpop.f32.mrb[1].mxu1 }
 0x110   : > { %v374_v41 = vadd.f32 %v373_v39, %v291_v33  ;;  %v380_v42 = vadd.f32 %v379_v40, %v296_v34 }
 0x111   : > { %382 = vst [vmem:[%s208_s8] sm:$0xff] %v372_v37  ;;  %384 = vst [vmem:[%s208_s8 + $0x10] sm:$0xff] %v378_v38 }
 0x112   : > { %383 = vst [vmem:[%s208_s8 + $0x8] sm:$0xff] %v374_v41  ;;  %385 = vst [vmem:[%s208_s8 + $0x18] sm:$0xff] %v380_v42 }
 0x113 PF: > { %s13_s14 = sadd.s32 1, %s589_s14   ;;  %s709_s12 = smov %s585_s13 }
 0x114   : > { %p10_p5 = scmp.ge.s32.totalorder %s13_s14, 4   ;;  %s710_s13 = smov %s712_s15 }
 0x116   :  { %12 = sbr.rel (!%p10_p5) target bundleno = 2 (0x2), region = 62 }

// kernel: decoder_resnet_forward.34
= control target key start
LH: loop header
LB: loop body
LE: loop exit
PB: predicated region body
PF: predicated region fallthrough
CT: control target
= control target key end

     0   :  { %s695_s21 = smov 0   ;;  %s697_s22 = smov 0   ;;  %s760_s0 = inlined_call_operand.vmem [shape: f32[2,16,256], index: 0, kind: input, shape index: {}]   ;;  %s761_s1 = inlined_call_operand.vmem [shape: f32[16,16], index: 1, kind: input, shape index: {}]   ;;  %s762_s2 = inlined_call_operand.vmem [shape: f32[16,1], index: 2, kind: input, shape index: {}]   ;;  %s763_s3 = inlined_call_operand.vmem [shape: f32[16,1], index: 3, kind: input, shape index: {}]   ;;  %s764_s4 = inlined_call_operand.vmem [shape: f32[16,1], index: 4, kind: input, shape index: {}]   ;;  %s765_s5 = inlined_call_operand.vmem [shape: f32[2,16,256], index: 5, kind: input, shape index: {}]   ;;  %s766_s6 = inlined_call_operand.vmem [shape: f32[2,16,256], index: 6, kind: output, shape index: {}]  }
   0x1   :  { %s699_s23 = smov 0  }
   0x2 LB: > { %s28_s24 = sadd.s32 1, %s652_s22  ;;  %p586_p0 = scmp.ge.s32.totalorder %s656_s23, 1  ;;  %s656_s23 = sphi %s699_s23, %s16_s23   ;;  %s652_s22 = sphi %s697_s22, %s768_s22   ;;  %s648_s21 = sphi %s695_s21, %s767_s21  }
   0x3   : > { %p30_p1 = scmp.ge.s32.totalorder %s28_s24, 2  ;;  %p250_p2 = scmp.lt.s32.totalorder %s656_s23, 3 }
   0x5   : > { %s770_s24 = smov (%p30_p1, %s28_s24), 0  ;;  %p251_p3 = pnand %p586_p0, %p250_p2 }
   0x6   : > { %v347_v0 = vld [vmem:[%s764_s4] sm:$0xff] (!%p251_p3)  ;;  %v658_v2 = vmov (!%p251_p3), 0   ;;  %v348_v3 = vld [vmem:[%s764_s4 + $0x8] sm:$0xff] (!%p251_p3)  ;;  %v659_v7 = vmov (!%p251_p3), 0.0   ;;  %p298_p4 = scmp.lt.s32.totalorder (!%p251_p3), %s648_s21, 1  ;;  %vm381_vm0 = vcmask (!%p251_p3), 130048  }
   0x7   : > { %254 = sbr.rel (%p251_p3) target bundleno = 370 (0x172), region = 44  ;;  %v331_v1 = vld [vmem:[%s763_s3] sm:$0xff] (!%p251_p3)  ;;  %633 = vset.pattern.permute.xlu1 (!%p251_p3), %v658_v2  ;;  %632 = vset.pattern.permute.xlu0 (!%p251_p3), %v658_v2  ;;  %v332_v4 = vld [vmem:[%s763_s3 + $0x8] sm:$0xff] (!%p251_p3) }
   0x8   : > { %351 = vperm.xlu1 (!%p251_p3), %633, %v347_v0   ;;  %335 = vperm.xlu0 (!%p251_p3), %632, %v331_v1   ;;  %v370_v5 = vld [vmem:[%s762_s2 + $0x8] sm:$0xff] (!%p251_p3)  ;;  %v369_v6 = vld [vmem:[%s762_s2] sm:$0xff] (!%p251_p3) }
   0x9   : > { %452 = vmatprep.mubr.f32.mxu0 (!%p251_p3), %v659_v7  ;;  %458 = vmatprep.mubr.f32.mxu1 (!%p251_p3), %v659_v7  ;;  %v367_v30 = vld [vmem:[%s761_s1] sm:$0xff] (!%p251_p3)  ;;  %v368_v31 = vld [vmem:[%s761_s1 + $0x8] sm:$0xff] (!%p251_p3) }
   0xc   : > { %356 = vperm.xlu1 (!%p251_p3), %633, %v348_v3   ;;  %340 = vperm.xlu0 (!%p251_p3), %632, %v332_v4  }
   0xe   : > { %s772_s21 = smov (!%p298_p4, %s648_s21), 1 }
   0xf   : > { %s731_s13 = sshll.u32 %s772_s21, 5 }
  0x10   : > { %378 = vperm.xlu1 %633, %v370_v5   ;;  %373 = vperm.xlu0 %632, %v369_v6   ;;  %s305_s16 = scalar_lea.vmem %s760_s0, %s731_s13  ;;  %s315_s26 = scalar_lea.vmem %s765_s5, %s731_s13 }
  0x11   : > { %v327_v8 = vld [vmem:[%s305_s16] sm:$0xff]  ;;  %v328_v9 = vld [vmem:[%s305_s16 + $0x8] sm:$0xff]  ;;  %v329_v14 = vld [vmem:[%s305_s16 + $0x10] sm:$0xff]  ;;  %s325_s29 = scalar_lea.vmem %s766_s6, %s731_s13 }
  0x12   : > { %v330_v15 = vld [vmem:[%s305_s16 + $0x18] sm:$0xff]  ;;  %v465_v35 = vld [vmem:[%s315_s26] sm:$0xff]  ;;  %v467_v37 = vld [vmem:[%s315_s26 + $0x10] sm:$0xff] }
  0x13   : > { %v466_v41 = vld [vmem:[%s315_s26 + $0x8] sm:$0xff]  ;;  %v468_v43 = vld [vmem:[%s315_s26 + $0x18] sm:$0xff] }
  0x87   : > { %v352_v10 = vpop.permute.xlu1 %351  ;;  %v336_v11 = vpop.permute.xlu0 %335 }
  0x88   : > { %v343_v12 = vmul.f32 %v336_v11, %v327_v8  ;;  %v344_v13 = vmul.f32 %v336_v11, %v328_v9 }
  0x8a   : > { %v359_v17 = vadd.f32 %v352_v10, %v343_v12  ;;  %v360_v18 = vadd.f32 %v352_v10, %v344_v13 }
  0x8b   : > { %v341_v16 = vpop.permute.xlu0 %340  ;;  %v357_v21 = vpop.permute.xlu1 %356 }
  0x8c   : > { %v345_v19 = vmul.f32 %v341_v16, %v329_v14  ;;  %v346_v20 = vmul.f32 %v341_v16, %v330_v15  ;;  %v364_v24 = vmax.f32 %v360_v18, 0.0  ;;  %v363_v26 = vmax.f32 %v359_v17, 0.0 }
  0x8e   : > { %v361_v22 = vadd.f32 %v357_v21, %v345_v19  ;;  %v362_v23 = vadd.f32 %v357_v21, %v346_v20 }
  0x8f   : > { %v379_v32 = vpop.permute.xlu1 %378  ;;  %v374_v33 = vpop.permute.xlu0 %373 }
  0x90   : > { %v366_v25 = vmax.f32 %v362_v23, 0.0  ;;  %v365_v27 = vmax.f32 %v361_v22, 0.0 }
  0x92   : > { %v600_v28 = vpack.c.bf16 %v366_v25, %v364_v24  ;;  %v602_v29 = vpack.c.bf16 %v365_v27, %v363_v26 }
  0x94   : > { %601 = vmatprep.subr.bf16.mxu0 %v600_v28  ;;  %604 = vmatprep.subr.bf16.mxu1 %v600_v28 }
  0x95   : > { %603 = vmatpush1.bf16.msra.mxu0 %v602_v29  ;;  %605 = vmatpush1.bf16.msra.mxu1 %v602_v29 }
  0x98   : > { %593 = vmatmul.mubr.msk.f32.vlgmr.msra.gmra.mrb[0].mxu0 %vm381_vm0, %v367_v30  ;;  %594 = vmatmul.mubr.msk.f32.vlgmr.msra.gmra.mrb[0].mxu1 %vm381_vm0, %v368_v31 }
 0x16b   : > { %v454_v34 = vpop.f32.mrb[0].mxu0  ;;  %v460_v36 = vpop.f32.mrb[0].mxu1 }
 0x16c   : > { %v455_v38 = vadd.f32 %v454_v34, %v374_v33  ;;  %v461_v39 = vadd.f32 %v460_v36, %v379_v32  ;;  %v456_v40 = vpop.f32.mrb[1].mxu0  ;;  %v462_v42 = vpop.f32.mrb[1].mxu1 }
 0x16d   : > { %v457_v44 = vadd.f32 %v456_v40, %v374_v33  ;;  %v463_v45 = vadd.f32 %v462_v42, %v379_v32 }
 0x16e   : > { %v469_v46 = vadd.f32 %v465_v35, %v455_v38  ;;  %v471_v47 = vadd.f32 %v467_v37, %v461_v39 }
 0x16f   : > { %v470_v48 = vadd.f32 %v466_v41, %v457_v44  ;;  %v472_v49 = vadd.f32 %v468_v43, %v463_v45 }
 0x170   : > { %473 = vst [vmem:[%s325_s29] sm:$0xff] %v469_v46  ;;  %475 = vst [vmem:[%s325_s29 + $0x10] sm:$0xff] %v471_v47 }
 0x171   : > { %474 = vst [vmem:[%s325_s29 + $0x8] sm:$0xff] %v470_v48  ;;  %476 = vst [vmem:[%s325_s29 + $0x18] sm:$0xff] %v472_v49 }
 0x172 PF: > { %s16_s23 = sadd.s32 1, %s656_s23   ;;  %s767_s21 = smov %s652_s22 }
 0x173   : > { %p13_p5 = scmp.ge.s32.totalorder %s16_s23, 4   ;;  %s768_s22 = smov %s770_s24 }
 0x175   :  { %15 = sbr.rel (!%p13_p5) target bundleno = 2 (0x2), region = 77 }

// kernel: decoder_resnet_forward.36
= control target key start
LH: loop header
LB: loop body
LE: loop exit
PB: predicated region body
PF: predicated region fallthrough
CT: control target
= control target key end

     0   :  { %s305_s9 = smov 0   ;;  %s307_s10 = smov 0   ;;  %s353_s0 = inlined_call_operand.vmem [shape: f32[2,8,256], index: 0, kind: input, shape index: {}]   ;;  %s354_s1 = inlined_call_operand.vmem [shape: f32[8,1], index: 1, kind: output, shape index: {0}]   ;;  %s355_s2 = inlined_call_operand.vmem [shape: f32[8,1], index: 2, kind: output, shape index: {1}]  }
   0x1   :  { %s309_s11 = smov 0  }
   0x2 LB: > { %s25_s12 = sadd.s32 1, %s283_s10  ;;  %p232_p0 = scmp.ge.s32.totalorder %s287_s11, 1  ;;  %s287_s11 = sphi %s309_s11, %s13_s11   ;;  %s283_s10 = sphi %s307_s10, %s357_s10   ;;  %s279_s9 = sphi %s305_s9, %s356_s9  }
   0x3   : > { %p27_p1 = scmp.ge.s32.totalorder %s25_s12, 2  ;;  %p124_p2 = scmp.lt.s32.totalorder %s287_s11, 3 }
   0x5   : > { %s359_s12 = smov (%p27_p1, %s25_s12), 0  ;;  %p125_p3 = pnand %p232_p0, %p124_p2 }
   0x6   : > { %p146_p4 = scmp.lt.s32.totalorder (!%p125_p3), %s279_s9, 1  ;;  %p155_p5 = scmp.eq.s32.totalorder (!%p125_p3), %s279_s9, 0 }
   0x7   : > { %128 = sbr.rel (%p125_p3) target bundleno = 173 (0xad), region = 24 }
   0xe   : > { %s361_s9 = smov (!%p146_p4, %s279_s9), 1  ;;  %160 = sbr.rel (!%p155_p5) target bundleno = 21 (0x15), region = 28 }
   0xf   : > { %s238_s13 = sshll.u32 %s361_s9, 4  ;;  %vm161_vm0 = vcmask (%p155_p5), 7168   ;;  %v289_v0 = vmov (%p155_p5), 0.0  }
  0x10   : > { %s153_s16 = scalar_lea.vmem %s353_s0, %s238_s13  ;;  %162 = vst.msk [vmem:[%s354_s1] sm:$0xff] (%p155_p5), %vm161_vm0, %v289_v0  ;;  %163 = vst.msk [vmem:[%s355_s2] sm:$0xff] (%p155_p5), %vm161_vm0, %v289_v0 }
  0x15 PF: > { %v164_v1 = vld [vmem:[%s153_s16] sm:$0xff]  ;;  %v165_v2 = vld [vmem:[%s153_s16 + $0x8] sm:$0xff]  ;;  %vm171_vm1 = vcmask 7168  }
  0x16   : > { %v167_v3 = vadd.f32 %v165_v2, %v164_v1  ;;  %v174_v4 = vmul.f32 %v164_v1, %v164_v1  ;;  %v175_v5 = vmul.f32 %v165_v2, %v165_v2 }
  0x17   : > { %v166_v7 = vld [vmem:[%s354_s1] sm:$0xff] }
  0x18   : > { %168 = vadd.xlane.f32.xlu0 %v167_v3  ;;  %v176_v6 = vadd.f32 %v175_v5, %v174_v4  ;;  %v173_v10 = vld [vmem:[%s355_s2] sm:$0xff] }
  0x1c   : > { %177 = vadd.xlane.f32.xlu0 %v176_v6 }
  0xa5   : > { %v169_v8 = vpop.xlane.xlu0 %168 }
  0xa6   : > { %v170_v9 = vadd.f32 %v169_v8, %v166_v7 }
  0xa8   : > { %172 = vst.msk [vmem:[%s354_s1] sm:$0xff] %vm171_vm1, %v170_v9 }
  0xa9   : > { %v178_v11 = vpop.xlane.xlu0 %177 }
  0xaa   : > { %v179_v12 = vadd.f32 %v178_v11, %v173_v10 }
  0xac   : > { %180 = vst.msk [vmem:[%s355_s2] sm:$0xff] %vm171_vm1, %v179_v12 }
  0xad PF: > { %s13_s11 = sadd.s32 1, %s287_s11   ;;  %s356_s9 = smov %s283_s10 }
  0xae   : > { %p10_p6 = scmp.ge.s32.totalorder %s13_s11, 4   ;;  %s357_s10 = smov %s359_s12 }
  0xb0   :  { %12 = sbr.rel (!%p10_p6) target bundleno = 2 (0x2), region = 62 }

// kernel: decoder_resnet_forward.35
= control target key start
LH: loop header
LB: loop body
LE: loop exit
PB: predicated region body
PF: predicated region fallthrough
CT: control target
= control target key end

     0   :  { %s540_s12 = smov 0   ;;  %s542_s13 = smov 0   ;;  %s624_s0 = inlined_call_operand.vmem [shape: f32[2,144,256], index: 0, kind: input, shape index: {}]   ;;  %s625_s1 = inlined_call_operand.vmem [shape: f32[8,144], index: 1, kind: input, shape index: {}]   ;;  %s626_s2 = inlined_call_operand.vmem [shape: f32[8,1], index: 2, kind: input, shape index: {}]   ;;  %s627_s3 = inlined_call_operand.vmem [shape: f32[2,8,256], index: 3, kind: output, shape index: {}]  }
   0x1   :  { %s544_s14 = smov 0  }
   0x2 LB: > { %s25_s15 = sadd.s32 1, %s513_s13  ;;  %p424_p0 = scmp.ge.s32.totalorder %s517_s14, 1  ;;  %s517_s14 = sphi %s544_s14, %s13_s14   ;;  %s513_s13 = sphi %s542_s13, %s629_s13   ;;  %s509_s12 = sphi %s540_s12, %s628_s12  }
   0x3   : > { %p27_p1 = scmp.ge.s32.totalorder %s25_s15, 2  ;;  %p158_p2 = scmp.lt.s32.totalorder %s517_s14, 3 }
   0x5   : > { %s631_s15 = smov (%p27_p1, %s25_s15), 0  ;;  %p159_p3 = pnand %p424_p0, %p158_p2 }
   0x6   : > { %p191_p4 = scmp.lt.s32.totalorder (!%p159_p3), %s509_s12, 1  ;;  %v247_v0 = vld [vmem:[%s625_s1 + $0x8] sm:$0xff] (!%p159_p3)  ;;  %vm254_vm0 = vcmask (!%p159_p3), 130048   ;;  %v248_v1 = vld [vmem:[%s626_s2] sm:$0xff] (!%p159_p3)  ;;  %v519_v2 = vmov (!%p159_p3), 0  }
   0x7   : > { %162 = sbr.rel (%p159_p3) target bundleno = 275 (0x113), region = 32  ;;  %428 = vmatprep.mubr.msk.f32.mxu0 (!%p159_p3), %vm254_vm0, %v247_v0  ;;  %494 = vset.pattern.permute.xlu0 (!%p159_p3), %v519_v2  ;;  %v246_v57 = vld [vmem:[%s625_s1] sm:$0xff] (!%p159_p3) }
   0x8   : > { %251 = vperm.xlu0 (!%p159_p3), %494, %v248_v1  }
   0xe   : > { %s633_s12 = smov (!%p191_p4, %s509_s12), 1 }
   0xf   : > { %s468_s20 = smul.u32 288, %s633_s12  ;;  %s431_s26 = sshll.u32 %s633_s12, 4 }
  0x10   : > { %s208_s29 = scalar_lea.vmem %s627_s3, %s431_s26 }
  0x11   : > { %s570_s23 = scalar_lea.vmem %s624_s0, %s468_s20 }
  0x12   : > { %v211_v3 = vld [vmem:[%s570_s23 + $0x8] sm:$0xff]  ;;  %v213_v4 = vld [vmem:[%s570_s23 + $0x18] sm:$0xff]  ;;  %v210_v5 = vld [vmem:[%s570_s23] sm:$0xff] }
  0x13   : > { %v432_v6 = vpack.c.bf16 %v213_v4, %v211_v3  ;;  %v212_v7 = vld [vmem:[%s570_s23 + $0x10] sm:$0xff]  ;;  %v215_v8 = vld [vmem:[%s570_s23 + $0x28] sm:$0xff]  ;;  %v217_v9 = vld [vmem:[%s570_s23 + $0x38] sm:$0xff] }
  0x14   : > { %v434_v10 = vpack.c.bf16 %v212_v7, %v210_v5  ;;  %v436_v11 = vpack.c.bf16 %v217_v9, %v215_v8  ;;  %v214_v12 = vld [vmem:[%s570_s23 + $0x20] sm:$0xff]  ;;  %v216_v13 = vld [vmem:[%s570_s23 + $0x30] sm:$0xff]  ;;  %v219_v14 = vld [vmem:[%s570_s23 + $0x48] sm:$0xff] }
  0x15   : > { %433 = vmatprep.subr.bf16.mxu0 %v432_v6  ;;  %v221_v15 = vld [vmem:[%s570_s23 + $0x58] sm:$0xff]  ;;  %v438_v16 = vpack.c.bf16 %v216_v13, %v214_v12  ;;  %v218_v18 = vld [vmem:[%s570_s23 + $0x40] sm:$0xff]  ;;  %v220_v19 = vld [vmem:[%s570_s23 + $0x50] sm:$0xff] }
  0x16   : > { %435 = vmatpush1.bf16.msra.mxu0 %v434_v10  ;;  %v440_v17 = vpack.c.bf16 %v221_v15, %v219_v14  ;;  %v223_v20 = vld [vmem:[%s570_s23 + $0x68] sm:$0xff]  ;;  %v225_v21 = vld [vmem:[%s570_s23 + $0x78] sm:$0xff]  ;;  %v442_v22 = vpack.c.bf16 %v220_v19, %v218_v18  ;;  %v222_v24 = vld [vmem:[%s570_s23 + $0x60] sm:$0xff] }
  0x17   : > { %437 = vmatprep.subr.bf16.mxu0 %v436_v11  ;;  %v444_v23 = vpack.c.bf16 %v225_v21, %v223_v20  ;;  %v224_v25 = vld [vmem:[%s570_s23 + $0x70] sm:$0xff]  ;;  %v227_v26 = vld [vmem:[%s570_s23 + $0x88] sm:$0xff]  ;;  %v229_v27 = vld [vmem:[%s570_s23 + $0x98] sm:$0xff] }
  0x18   : > { %v446_v28 = vpack.c.bf16 %v224_v25, %v222_v24  ;;  %v448_v29 = vpack.c.bf16 %v229_v27, %v227_v26  ;;  %v226_v30 = vld [vmem:[%s570_s23 + $0x80] sm:$0xff]  ;;  %v228_v31 = vld [vmem:[%s570_s23 + $0x90] sm:$0xff]  ;;  %v231_v32 = vld [vmem:[%s570_s23 + $0xa8] sm:$0xff] }
  0x19   : > { %v233_v33 = vld [vmem:[%s570_s23 + $0xb8] sm:$0xff]  ;;  %v450_v34 = vpack.c.bf16 %v228_v31, %v226_v30  ;;  %v230_v36 = vld [vmem:[%s570_s23 + $0xa0] sm:$0xff]  ;;  %v232_v37 = vld [vmem:[%s570_s23 + $0xb0] sm:$0xff] }
  0x1a   : > { %439 = vmatpush1.bf16.msra.mxu0 %v438_v16  ;;  %v452_v35 = vpack.c.bf16 %v233_v33, %v231_v32  ;;  %v235_v38 = vld [vmem:[%s570_s23 + $0xc8] sm:$0xff]  ;;  %v237_v39 = vld [vmem:[%s570_s23 + $0xd8] sm:$0xff]  ;;  %v454_v40 = vpack.c.bf16 %v232_v37, %v230_v36  ;;  %v234_v42 = vld [vmem:[%s570_s23 + $0xc0] sm:$0xff] }
  0x1b   : > { %441 = vmatprep.subr.bf16.mxu0 %v440_v17  ;;  %v456_v41 = vpack.c.bf16 %v237_v39, %v235_v38  ;;  %v236_v43 = vld [vmem:[%s570_s23 + $0xd0] sm:$0xff]  ;;  %v239_v44 = vld [vmem:[%s570_s23 + $0xe8] sm:$0xff]  ;;  %v241_v45 = vld [vmem:[%s570_s23 + $0xf8] sm:$0xff] }
  0x1c   : > { %v458_v46 = vpack.c.bf16 %v236_v43, %v234_v42  ;;  %v460_v47 = vpack.c.bf16 %v241_v45, %v239_v44  ;;  %v238_v48 = vld [vmem:[%s570_s23 + $0xe0] sm:$0xff]  ;;  %v240_v49 = vld [vmem:[%s570_s23 + $0xf0] sm:$0xff]  ;;  %v243_v50 = vld [vmem:[%s570_s23 + $0x108] sm:$0xff] }
  0x1d   : > { %v245_v51 = vld [vmem:[%s570_s23 + $0x118] sm:$0xff]  ;;  %v462_v52 = vpack.c.bf16 %v240_v49, %v238_v48  ;;  %v242_v54 = vld [vmem:[%s570_s23 + $0x100] sm:$0xff]  ;;  %v244_v55 = vld [vmem:[%s570_s23 + $0x110] sm:$0xff] }
  0x1e   : > { %443 = vmatpush1.bf16.msra.mxu0 %v442_v22  ;;  %v464_v53 = vpack.c.bf16 %v245_v51, %v243_v50  ;;  %v466_v56 = vpack.c.bf16 %v244_v55, %v242_v54 }
  0x1f   : > { %445 = vmatprep.subr.bf16.mxu0 %v444_v23 }
  0x22   : > { %447 = vmatpush1.bf16.msra.mxu0 %v446_v28 }
  0x23   : > { %449 = vmatprep.subr.bf16.mxu0 %v448_v29 }
  0x26   : > { %451 = vmatpush1.bf16.msra.mxu0 %v450_v34 }
  0x27   : > { %453 = vmatprep.subr.bf16.mxu0 %v452_v35 }
  0x2a   : > { %455 = vmatpush1.bf16.msra.mxu0 %v454_v40 }
  0x2b   : > { %457 = vmatprep.subr.bf16.mxu0 %v456_v41 }
  0x2e   : > { %459 = vmatpush1.bf16.msra.mxu0 %v458_v46 }
  0x2f   : > { %461 = vmatprep.subr.bf16.mxu0 %v460_v47 }
  0x32   : > { %463 = vmatpush1.bf16.msra.mxu0 %v462_v52 }
  0x33   : > { %465 = vmatprep.subr.bf16.mxu0 %v464_v53 }
  0x36   : > { %467 = vmatpush1.bf16.msra.mxu0 %v466_v56 }
  0x39   : > { %323 = vmatmul.mubr.f32.vlgmr.msra.gmra.mrb[0].mxu0 %v246_v57 }
  0x87   : > { %v252_v58 = vpop.permute.xlu0 %251 }
 0x10c   : > { %v324_v59 = vpop.f32.mrb[0].mxu0 }
 0x10d   : > { %v325_v60 = vadd.f32 %v324_v59, %v252_v58  ;;  %v326_v61 = vpop.f32.mrb[1].mxu0 }
 0x10e   : > { %v327_v62 = vadd.f32 %v326_v61, %v252_v58 }
 0x10f   : > { %v329_v63 = vmax.f32 %v325_v60, 0.0 }
 0x110   : > { %v330_v0 = vmax.f32 %v327_v62, 0.0 }
 0x111   : > { %331 = vst [vmem:[%s208_s29] sm:$0xff] %v329_v63 }
 0x112   : > { %332 = vst [vmem:[%s208_s29 + $0x8] sm:$0xff] %v330_v0 }
 0x113 PF: > { %s13_s14 = sadd.s32 1, %s517_s14   ;;  %s628_s12 = smov %s513_s13 }
 0x114   : > { %p10_p5 = scmp.ge.s32.totalorder %s13_s14, 4   ;;  %s629_s13 = smov %s631_s15 }
 0x116   :  { %12 = sbr.rel (!%p10_p5) target bundleno = 2 (0x2), region = 62 }

// kernel: decoder_resnet_forward.37
= control target key start
LH: loop header
LB: loop body
LE: loop exit
PB: predicated region body
PF: predicated region fallthrough
CT: control target
= control target key end

     0   :  { %s401_s12 = smov 0   ;;  %s403_s13 = smov 0   ;;  %s437_s0 = inlined_call_operand.vmem [shape: f32[2,8,256], index: 0, kind: input, shape index: {}]   ;;  %s438_s1 = inlined_call_operand.vmem [shape: f32[8,1], index: 1, kind: input, shape index: {}]   ;;  %s439_s2 = inlined_call_operand.vmem [shape: f32[8,1], index: 2, kind: input, shape index: {}]   ;;  %s440_s3 = inlined_call_operand.vmem [shape: f32[2,8,256], index: 3, kind: output, shape index: {}]  }
   0x1   :  { %s405_s14 = smov 0  }
   0x2 LB: > { %s25_s15 = sadd.s32 1, %s374_s13  ;;  %p321_p0 = scmp.ge.s32.totalorder %s378_s14, 1  ;;  %s378_s14 = sphi %s405_s14, %s13_s14   ;;  %s374_s13 = sphi %s403_s13, %s442_s13   ;;  %s370_s12 = sphi %s401_s12, %s441_s12  }
   0x3   : > { %p27_p1 = scmp.ge.s32.totalorder %s25_s15, 2  ;;  %p158_p2 = scmp.lt.s32.totalorder %s378_s14, 3 }
   0x5   : > { %s444_s15 = smov (%p27_p1, %s25_s15), 0  ;;  %p159_p3 = pnand %p321_p0, %p158_p2 }
   0x6   : > { %v212_v0 = vld [vmem:[%s438_s1] sm:$0xff] (!%p159_p3)  ;;  %v380_v1 = vmov (!%p159_p3), 0   ;;  %p191_p4 = scmp.lt.s32.totalorder (!%p159_p3), %s370_s12, 1 }
   0x7   : > { %162 = sbr.rel (%p159_p3) target bundleno = 143 (0x8f), region = 32  ;;  %355 = vset.pattern.permute.xlu0 (!%p159_p3), %v380_v1  ;;  %v220_v2 = vld [vmem:[%s439_s2] sm:$0xff] (!%p159_p3) }
   0x8   : > { %215 = vperm.xlu0 (!%p159_p3), %355, %v212_v0  }
   0xc   : > { %223 = vperm.xlu0 (!%p159_p3), %355, %v220_v2  }
   0xe   : > { %s446_s12 = smov (!%p191_p4, %s370_s12), 1 }
   0xf   : > { %s328_s20 = sshll.u32 %s446_s12, 4 }
  0x10   : > { %s198_s23 = scalar_lea.vmem %s437_s0, %s328_s20  ;;  %s208_s26 = scalar_lea.vmem %s440_s3, %s328_s20 }
  0x11   : > { %v210_v4 = vld [vmem:[%s198_s23] sm:$0xff]  ;;  %v211_v5 = vld [vmem:[%s198_s23 + $0x8] sm:$0xff] }
  0x87   : > { %v216_v3 = vpop.permute.xlu0 %215 }
  0x88   : > { %v218_v6 = vmul.f32 %v216_v3, %v210_v4  ;;  %v219_v7 = vmul.f32 %v216_v3, %v211_v5 }
  0x8b   : > { %v224_v8 = vpop.permute.xlu0 %223 }
  0x8c   : > { %v226_v9 = vadd.f32 %v224_v8, %v218_v6  ;;  %v227_v10 = vadd.f32 %v224_v8, %v219_v7 }
  0x8e   : > { %228 = vst [vmem:[%s208_s26] sm:$0xff] %v226_v9  ;;  %229 = vst [vmem:[%s208_s26 + $0x8] sm:$0xff] %v227_v10 }
  0x8f PF: > { %s13_s14 = sadd.s32 1, %s378_s14   ;;  %s441_s12 = smov %s374_s13 }
  0x90   : > { %p10_p5 = scmp.ge.s32.totalorder %s13_s14, 4   ;;  %s442_s13 = smov %s444_s15 }
  0x92   :  { %12 = sbr.rel (!%p10_p5) target bundleno = 2 (0x2), region = 62 }

// kernel: tile.28
= control target key start
LH: loop header
LB: loop body
LE: loop exit
PB: predicated region body
PF: predicated region fallthrough
CT: control target
= control target key end

     0   :  { %s22_s0 = inlined_call_operand.vmem [shape: f32[8], index: 0, kind: input, shape index: {}]   ;;  %s23_s1 = inlined_call_operand.vmem [shape: f32[4,8], index: 1, kind: output, shape index: {}]  }
   0x1   :  { %v4_v0 = vld [vmem:[%s22_s0] ss:$0 sm:$0xff] }
   0x2   :  { %5 = vst [vmem:[%s23_s1] sm:$0xf] %v4_v0 }

// kernel: tile.1
= control target key start
LH: loop header
LB: loop body
LE: loop exit
PB: predicated region body
PF: predicated region fallthrough
CT: control target
= control target key end

     0   :  { %s66_s8 = smov 125   ;;  %vm7_vm0 = vcmask 7168   ;;  %s67_s11 = smov 126   ;;  %s117_s0 = inlined_call_operand.vmem [shape: f32[4,8], index: 0, kind: input, shape index: {}]   ;;  %s118_s1 = inlined_call_operand.vmem [shape: f32[32,1], index: 1, kind: output, shape index: {}]  }
   0x1   :  { %v4_v0 = vld [vmem:[%s117_s0] sm:$0xf]  ;;  %s65_s0 = smov 127   ;;  %s68_s12 = smov 124  }
   0x2   :  { %5 = vst [vmem:[#allocation0] sm:$0xf] %v4_v0  ;;  %s69_s13 = smov 123   ;;  %s70_s14 = smov 122  }
   0x3   :  { %s71_s15 = smov 121  }
   0x9   :  { %v9_v1 = vld [vmem:[#allocation0] sm:$0xf]  }
   0xa   :  { %v21_v2 = vld [vmem:[#allocation0] sm:$0xf]   ;;  %10 = vrot.lane.b32.xlu0 %v9_v1, %s65_s0 }
   0xb   :  { %22 = vrot.lane.b32.xlu1 %v21_v2, %s66_s8  ;;  %v15_v3 = vld [vmem:[#allocation0] sm:$0xf]  }
   0xc   :  { %v27_v4 = vld [vmem:[#allocation0] sm:$0xf]  }
   0xd   :  { %v6_v5 = vld [vmem:[#allocation0] sm:$0xf]  }
   0xe   :  { %8 = vst.msk [vmem:[%s118_s1] ss:$8 sm:$0xf] %vm7_vm0, %v6_v5   ;;  %16 = vrot.lane.b32.xlu0 %v15_v3, %s67_s11  ;;  %v33_v6 = vld [vmem:[#allocation0] sm:$0xf]  }
   0xf   :  { %28 = vrot.lane.b32.xlu1 %v27_v4, %s68_s12  ;;  %v39_v7 = vld [vmem:[#allocation0] sm:$0xf]  }
  0x10   :  { %v45_v8 = vld [vmem:[#allocation0] sm:$0xf]  }
  0x12   :  { %34 = vrot.lane.b32.xlu0 %v33_v6, %s69_s13 }
  0x13   :  { %40 = vrot.lane.b32.xlu1 %v39_v7, %s70_s14 }
  0x16   :  { %46 = vrot.lane.b32.xlu0 %v45_v8, %s71_s15 }
  0x7c   :  { %v11_v9 = vpop.permute.xlu0 %10  }
  0x7d   :  { %v23_v10 = vpop.permute.xlu1 %22   ;;  %51 = vst.msk [vmem:[%s118_s1 + $0x1] ss:$8 sm:$0xf] %vm7_vm0, %v11_v9  }
  0x7e   :  { %53 = vst.msk [vmem:[%s118_s1 + $0x3] ss:$8 sm:$0xf] %vm7_vm0, %v23_v10  }
  0x80   :  { %v17_v11 = vpop.permute.xlu0 %16  }
  0x81   :  { %v29_v12 = vpop.permute.xlu1 %28   ;;  %52 = vst.msk [vmem:[%s118_s1 + $0x2] ss:$8 sm:$0xf] %vm7_vm0, %v17_v11  }
  0x82   :  { %54 = vst.msk [vmem:[%s118_s1 + $0x4] ss:$8 sm:$0xf] %vm7_vm0, %v29_v12  }
  0x84   :  { %v35_v13 = vpop.permute.xlu0 %34  }
  0x85   :  { %v41_v14 = vpop.permute.xlu1 %40   ;;  %55 = vst.msk [vmem:[%s118_s1 + $0x5] ss:$8 sm:$0xf] %vm7_vm0, %v35_v13  }
  0x86   :  { %56 = vst.msk [vmem:[%s118_s1 + $0x6] ss:$8 sm:$0xf] %vm7_vm0, %v41_v14  }
  0x88   :  { %v47_v15 = vpop.permute.xlu0 %46  }
  0x89   :  { %57 = vst.msk [vmem:[%s118_s1 + $0x7] ss:$8 sm:$0xf] %vm7_vm0, %v47_v15  }

// kernel: decoder_resnet_forward.38
= control target key start
LH: loop header
LB: loop body
LE: loop exit
PB: predicated region body
PF: predicated region fallthrough
CT: control target
= control target key end

     0   :  { %s577_s12 = smov 0   ;;  %s579_s13 = smov 0   ;;  %s662_s0 = inlined_call_operand.vmem [shape: f32[2,72,256], index: 0, kind: input, shape index: {}]   ;;  %s663_s1 = inlined_call_operand.vmem [shape: f32[32,72], index: 1, kind: input, shape index: {}]   ;;  %s664_s2 = inlined_call_operand.vmem [shape: f32[32,1], index: 2, kind: input, shape index: {}]   ;;  %s665_s3 = inlined_call_operand.vmem [shape: f32[2,32,256], index: 3, kind: output, shape index: {}]  }
   0x1   :  { %s581_s14 = smov 0  }
   0x2 LB: > { %s25_s15 = sadd.s32 1, %s549_s13  ;;  %p465_p0 = scmp.ge.s32.totalorder %s553_s14, 1  ;;  %s553_s14 = sphi %s581_s14, %s13_s14   ;;  %s549_s13 = sphi %s579_s13, %s667_s13   ;;  %s545_s12 = sphi %s577_s12, %s666_s12  }
   0x3   : > { %p27_p1 = scmp.ge.s32.totalorder %s25_s15, 2  ;;  %p158_p2 = scmp.lt.s32.totalorder %s553_s14, 3 }
   0x5   : > { %s669_s15 = smov (%p27_p1, %s25_s15), 0  ;;  %p159_p3 = pnand %p465_p0, %p158_p2 }
   0x6   : > { %p191_p4 = scmp.lt.s32.totalorder (!%p159_p3), %s545_s12, 1  ;;  %v555_v0 = vmov (!%p159_p3), 0.0   ;;  %v234_v1 = vld [vmem:[%s664_s2 + $0x10] sm:$0xff] (!%p159_p3)  ;;  %v232_v2 = vld [vmem:[%s664_s2] sm:$0xff] (!%p159_p3)  ;;  %v556_v3 = vmov (!%p159_p3), 0   ;;  %v235_v4 = vld [vmem:[%s664_s2 + $0x18] sm:$0xff] (!%p159_p3) }
   0x7   : > { %162 = sbr.rel (%p159_p3) target bundleno = 261 (0x105), region = 32  ;;  %333 = vmatprep.mubr.f32.mxu0 (!%p159_p3), %v555_v0  ;;  %345 = vmatprep.mubr.f32.mxu1 (!%p159_p3), %v555_v0  ;;  %v233_v5 = vld [vmem:[%s664_s2 + $0x8] sm:$0xff] (!%p159_p3)  ;;  %v228_v32 = vld [vmem:[%s663_s1] sm:$0xff] (!%p159_p3)  ;;  %vm256_vm0 = vcmask (!%p159_p3), 588800   ;;  %v230_v33 = vld [vmem:[%s663_s1 + $0x10] sm:$0xff] (!%p159_p3) }
   0x8   : > { %530 = vset.pattern.permute.xlu1 (!%p159_p3), %v556_v3  ;;  %529 = vset.pattern.permute.xlu0 (!%p159_p3), %v556_v3  ;;  %v229_v34 = vld [vmem:[%s663_s1 + $0x8] sm:$0xff] (!%p159_p3)  ;;  %v231_v35 = vld [vmem:[%s663_s1 + $0x18] sm:$0xff] (!%p159_p3) }
   0x9   : > { %248 = vperm.xlu1 (!%p159_p3), %530, %v234_v1   ;;  %238 = vperm.xlu0 (!%p159_p3), %529, %v232_v2  }
   0xd   : > { %253 = vperm.xlu1 (!%p159_p3), %530, %v235_v4   ;;  %243 = vperm.xlu0 (!%p159_p3), %529, %v233_v5  }
   0xe   : > { %s671_s12 = smov (!%p191_p4, %s545_s12), 1 }
   0xf   : > { %s502_s20 = smul.u32 144, %s671_s12  ;;  %s475_s9 = sshll.u32 %s671_s12, 6 }
  0x10   : > { %s208_s16 = scalar_lea.vmem %s665_s3, %s475_s9 }
  0x11   : > { %s615_s27 = scalar_lea.vmem %s662_s0, %s502_s20 }
  0x12   : > { %v211_v6 = vld [vmem:[%s615_s27 + $0x8] sm:$0xff]  ;;  %v213_v7 = vld [vmem:[%s615_s27 + $0x18] sm:$0xff]  ;;  %v210_v8 = vld [vmem:[%s615_s27] sm:$0xff] }
  0x13   : > { %v476_v9 = vpack.c.bf16 %v213_v7, %v211_v6  ;;  %v212_v10 = vld [vmem:[%s615_s27 + $0x10] sm:$0xff]  ;;  %v215_v11 = vld [vmem:[%s615_s27 + $0x28] sm:$0xff]  ;;  %v217_v12 = vld [vmem:[%s615_s27 + $0x38] sm:$0xff] }
  0x14   : > { %v478_v13 = vpack.c.bf16 %v212_v10, %v210_v8  ;;  %v480_v14 = vpack.c.bf16 %v217_v12, %v215_v11  ;;  %v214_v15 = vld [vmem:[%s615_s27 + $0x20] sm:$0xff]  ;;  %v216_v16 = vld [vmem:[%s615_s27 + $0x30] sm:$0xff]  ;;  %v219_v17 = vld [vmem:[%s615_s27 + $0x48] sm:$0xff] }
  0x15   : > { %477 = vmatprep.subr.bf16.mxu0 %v476_v9  ;;  %492 = vmatprep.subr.bf16.mxu1 %v476_v9  ;;  %v221_v18 = vld [vmem:[%s615_s27 + $0x58] sm:$0xff]  ;;  %v482_v19 = vpack.c.bf16 %v216_v16, %v214_v15  ;;  %v218_v21 = vld [vmem:[%s615_s27 + $0x40] sm:$0xff]  ;;  %v220_v22 = vld [vmem:[%s615_s27 + $0x50] sm:$0xff] }
  0x16   : > { %479 = vmatpush1.bf16.msra.mxu0 %v478_v13  ;;  %497 = vmatpush1.bf16.msra.mxu1 %v478_v13  ;;  %v484_v20 = vpack.c.bf16 %v221_v18, %v219_v17  ;;  %v223_v23 = vld [vmem:[%s615_s27 + $0x68] sm:$0xff]  ;;  %v225_v24 = vld [vmem:[%s615_s27 + $0x78] sm:$0xff]  ;;  %v486_v25 = vpack.c.bf16 %v220_v22, %v218_v21  ;;  %v222_v27 = vld [vmem:[%s615_s27 + $0x60] sm:$0xff] }
  0x17   : > { %481 = vmatprep.subr.bf16.mxu0 %v480_v14  ;;  %493 = vmatprep.subr.bf16.mxu1 %v480_v14  ;;  %v488_v26 = vpack.c.bf16 %v225_v24, %v223_v23  ;;  %v224_v28 = vld [vmem:[%s615_s27 + $0x70] sm:$0xff]  ;;  %v227_v30 = vld [vmem:[%s615_s27 + $0x88] sm:$0xff]  ;;  %v226_v31 = vld [vmem:[%s615_s27 + $0x80] sm:$0xff] }
  0x18   : > { %v490_v29 = vpack.c.bf16 %v224_v28, %v222_v27 }
  0x1a   : > { %483 = vmatpush1.bf16.msra.mxu0 %v482_v19  ;;  %498 = vmatpush1.bf16.msra.mxu1 %v482_v19 }
  0x1b   : > { %485 = vmatprep.subr.bf16.mxu0 %v484_v20  ;;  %494 = vmatprep.subr.bf16.mxu1 %v484_v20 }
  0x1e   : > { %487 = vmatpush1.bf16.msra.mxu0 %v486_v25  ;;  %499 = vmatpush1.bf16.msra.mxu1 %v486_v25 }
  0x1f   : > { %489 = vmatprep.subr.bf16.mxu0 %v488_v26  ;;  %495 = vmatprep.subr.bf16.mxu1 %v488_v26 }
  0x22   : > { %491 = vmatpush1.bf16.msra.mxu0 %v490_v29  ;;  %500 = vmatpush1.bf16.msra.mxu1 %v490_v29 }
  0x23   : > { %285 = vmatprep.subr.mxu0 %v227_v30  ;;  %496 = vmatprep.subr.mxu1 %v227_v30 }
  0x26   : > { %286 = vmatpush1.msra.mxu0 %v226_v31  ;;  %501 = vmatpush1.msra.mxu1 %v226_v31 }
  0x27   : > { %469 = vmatmul.mubr.msk.f32.vlgmr.msra.gmra.mrb[0].mxu0 %vm256_vm0, %v228_v32  ;;  %471 = vmatmul.mubr.msk.f32.vlgmr.msra.gmra.mrb[0].mxu1 %vm256_vm0, %v230_v33 }
  0x28   : > { %339 = vmatprep.mubr.f32.mxu0 %v555_v0  ;;  %351 = vmatprep.mubr.f32.mxu1 %v555_v0 }
  0x2b   : > { %470 = vmatmul.mubr.msk.f32.gmra.mrb[2].mxu0 %vm256_vm0, %v229_v34  ;;  %472 = vmatmul.mubr.msk.f32.gmra.mrb[2].mxu1 %vm256_vm0, %v231_v35 }
  0x88   : > { %v249_v36 = vpop.permute.xlu1 %248  ;;  %v239_v37 = vpop.permute.xlu0 %238 }
  0x8c   : > { %v254_v48 = vpop.permute.xlu1 %253  ;;  %v244_v49 = vpop.permute.xlu0 %243 }
  0xfa   : > { %v335_v38 = vpop.f32.mrb[0].mxu0  ;;  %v347_v39 = vpop.f32.mrb[0].mxu1 }
  0xfb   : > { %v336_v40 = vadd.f32 %v335_v38, %v239_v37  ;;  %v348_v41 = vadd.f32 %v347_v39, %v249_v36  ;;  %v337_v42 = vpop.f32.mrb[1].mxu0  ;;  %v349_v43 = vpop.f32.mrb[1].mxu1 }
  0xfc   : > { %v338_v44 = vadd.f32 %v337_v42, %v239_v37  ;;  %v350_v45 = vadd.f32 %v349_v43, %v249_v36 }
  0xfd   : > { %v358_v46 = vmax.f32 %v336_v40, 0.0  ;;  %v362_v47 = vmax.f32 %v348_v41, 0.0 }
  0xfe   : > { %v359_v50 = vmax.f32 %v338_v44, 0.0  ;;  %v363_v51 = vmax.f32 %v350_v45, 0.0  ;;  %v341_v52 = vpop.f32.mrb[2].mxu0  ;;  %v353_v53 = vpop.f32.mrb[2].mxu1 }
  0xff   : > { %366 = vst [vmem:[%s208_s16] sm:$0xff] %v358_v46  ;;  %370 = vst [vmem:[%s208_s16 + $0x20] sm:$0xff] %v362_v47  ;;  %v342_v54 = vadd.f32 %v341_v52, %v244_v49  ;;  %v354_v55 = vadd.f32 %v353_v53, %v254_v48  ;;  %v343_v56 = vpop.f32.mrb[3].mxu0  ;;  %v355_v57 = vpop.f32.mrb[3].mxu1 }
 0x100   : > { %367 = vst [vmem:[%s208_s16 + $0x8] sm:$0xff] %v359_v50  ;;  %371 = vst [vmem:[%s208_s16 + $0x28] sm:$0xff] %v363_v51  ;;  %v344_v58 = vadd.f32 %v343_v56, %v244_v49  ;;  %v356_v59 = vadd.f32 %v355_v57, %v254_v48 }
 0x101   : > { %v360_v60 = vmax.f32 %v342_v54, 0.0  ;;  %v364_v61 = vmax.f32 %v354_v55, 0.0 }
 0x102   : > { %v361_v62 = vmax.f32 %v344_v58, 0.0  ;;  %v365_v63 = vmax.f32 %v356_v59, 0.0 }
 0x103   : > { %368 = vst [vmem:[%s208_s16 + $0x10] sm:$0xff] %v360_v60  ;;  %372 = vst [vmem:[%s208_s16 + $0x30] sm:$0xff] %v364_v61 }
 0x104   : > { %369 = vst [vmem:[%s208_s16 + $0x18] sm:$0xff] %v361_v62  ;;  %373 = vst [vmem:[%s208_s16 + $0x38] sm:$0xff] %v365_v63 }
 0x105 PF: > { %s13_s14 = sadd.s32 1, %s553_s14   ;;  %s666_s12 = smov %s549_s13 }
 0x106   : > { %p10_p5 = scmp.ge.s32.totalorder %s13_s14, 4   ;;  %s667_s13 = smov %s669_s15 }
 0x108   :  { %12 = sbr.rel (!%p10_p5) target bundleno = 2 (0x2), region = 62 }

// kernel: decoder_resnet_forward.40
= control target key start
LH: loop header
LB: loop body
LE: loop exit
PB: predicated region body
PF: predicated region fallthrough
CT: control target
= control target key end

     0   :  { %s346_s9 = smov 0   ;;  %s348_s10 = smov 0   ;;  %s412_s0 = inlined_call_operand.vmem [shape: f32[2,8,1024], index: 0, kind: input, shape index: {}]   ;;  %s413_s1 = inlined_call_operand.vmem [shape: f32[8,1], index: 1, kind: output, shape index: {0}]   ;;  %s414_s2 = inlined_call_operand.vmem [shape: f32[8,1], index: 2, kind: output, shape index: {1}]  }
   0x1   :  { %s350_s11 = smov 0   ;;  %s352_s12 = smov 0  }
   0x2   :  { %s354_s13 = smov 0  }
   0x3 LB: > { %s22_s14 = sadd.s32 1, %s320_s11  ;;  %s25_s15 = sadd.s32 1, %s324_s12  ;;  %s328_s13 = sphi %s354_s13, %s13_s13   ;;  %s324_s12 = sphi %s352_s12, %s418_s12   ;;  %s320_s11 = sphi %s350_s11, %s417_s11   ;;  %s316_s10 = sphi %s348_s10, %s416_s10   ;;  %s312_s9 = sphi %s346_s9, %s415_s9  }
   0x4   : > { %p23_p0 = scmp.ge.s32.totalorder %s22_s14, 2  ;;  %p243_p1 = scmp.ge.s32.totalorder %s328_s13, 1 }
   0x5   : > { %p124_p2 = scmp.lt.s32.totalorder %s328_s13, 5 }
   0x6   : > { %s420_s14 = smov (%p23_p0, %s22_s14), 0  ;;  %s422_s15 = smov (!%p23_p0, %s25_s15), %s324_s12 }
   0x7   : > { %p125_p3 = pnand %p243_p1, %p124_p2  ;;  %p27_p4 = scmp.ge.s32.totalorder %s422_s15, 2 }
   0x8   : > { %s244_s16 = sshll.u32 (!%p125_p3), %s312_s9, 2  ;;  %p146_p5 = scmp.lt.s32.totalorder (!%p125_p3), %s316_s10, 1 }
   0x9   : > { %s424_s15 = smov (%p27_p4, %s422_s15), 0  ;;  %128 = sbr.rel (%p125_p3) target bundleno = 180 (0xb4), region = 24 }
   0xa   : > { %p148_p6 = scmp.lt.s32.totalorder (!%p125_p3), %s244_s16, 7  ;;  %p155_p7 = scmp.eq.s32.totalorder (!%p125_p3), %s316_s10, 0 }
   0xb   : > { %p156_p8 = scmp.eq.s32.totalorder (!%p125_p3), %s312_s9, 0 }
   0xd   : > { %p157_p9 = pnand (!%p125_p3), %p156_p8, %p155_p7 }
  0x10   : > { %s426_s10 = smov (!%p146_p5, %s316_s10), 1  ;;  %s428_s16 = smov (!%p148_p6, %s244_s16), 7 }
  0x11   : > { %s245_s17 = sshll.u32 %s426_s10, 3  ;;  %160 = sbr.rel (%p157_p9) target bundleno = 24 (0x18), region = 28  ;;  %vm161_vm0 = vcmask (!%p157_p9), 7168   ;;  %v330_v0 = vmov (!%p157_p9), 0.0  }
  0x12   : > { %s151_s18 = sadd.s32 %s245_s17, %s428_s16  ;;  %162 = vst.msk [vmem:[%s413_s1] sm:$0xff] (!%p157_p9), %vm161_vm0, %v330_v0  ;;  %163 = vst.msk [vmem:[%s414_s2] sm:$0xff] (!%p157_p9), %vm161_vm0, %v330_v0 }
  0x13   : > { %s246_s19 = sshll.u32 %s151_s18, 3 }
  0x14   : > { %s153_s22 = scalar_lea.vmem %s412_s0, %s246_s19 }
  0x18 PF: > { %v164_v1 = vld [vmem:[%s153_s22] sm:$0xff]  ;;  %v165_v2 = vld [vmem:[%s153_s22 + $0x8] sm:$0xff]  ;;  %v166_v3 = vld [vmem:[%s153_s22 + $0x10] sm:$0xff]  ;;  %vm175_vm1 = vcmask 7168  }
  0x19   : > { %v169_v4 = vadd.f32 %v165_v2, %v164_v1  ;;  %v178_v5 = vmul.f32 %v164_v1, %v164_v1  ;;  %v179_v6 = vmul.f32 %v165_v2, %v165_v2  ;;  %v180_v7 = vmul.f32 %v166_v3, %v166_v3  ;;  %v167_v8 = vld [vmem:[%s153_s22 + $0x18] sm:$0xff]  ;;  %v168_v15 = vld [vmem:[%s413_s1] sm:$0xff] }
  0x1a   : > { %v181_v10 = vmul.f32 %v167_v8, %v167_v8  ;;  %v177_v18 = vld [vmem:[%s414_s2] sm:$0xff] }
  0x1b   : > { %v170_v9 = vadd.f32 %v169_v4, %v166_v3  ;;  %v182_v11 = vadd.f32 %v179_v6, %v178_v5 }
  0x1d   : > { %v171_v12 = vadd.f32 %v170_v9, %v167_v8  ;;  %v183_v13 = vadd.f32 %v182_v11, %v180_v7 }
  0x1f   : > { %172 = vadd.xlane.f32.xlu0 %v171_v12  ;;  %v184_v14 = vadd.f32 %v183_v13, %v181_v10 }
  0x23   : > { %185 = vadd.xlane.f32.xlu0 %v184_v14 }
  0xac   : > { %v173_v16 = vpop.xlane.xlu0 %172 }
  0xad   : > { %v174_v17 = vadd.f32 %v173_v16, %v168_v15 }
  0xaf   : > { %176 = vst.msk [vmem:[%s413_s1] sm:$0xff] %vm175_vm1, %v174_v17 }
  0xb0   : > { %v186_v19 = vpop.xlane.xlu0 %185 }
  0xb1   : > { %v187_v20 = vadd.f32 %v186_v19, %v177_v18 }
  0xb3   : > { %188 = vst.msk [vmem:[%s414_s2] sm:$0xff] %vm175_vm1, %v187_v20 }
  0xb4 PF: > { %s13_s13 = sadd.s32 1, %s328_s13   ;;  %s415_s9 = smov %s320_s11 }
  0xb5   : > { %p10_p10 = scmp.ge.s32.totalorder %s13_s13, 6   ;;  %s416_s10 = smov %s324_s12 }
  0xb6   : > { %s417_s11 = smov %s420_s14  ;;  %s418_s12 = smov %s424_s15 }
  0xb7   :  { %12 = sbr.rel (!%p10_p10) target bundleno = 3 (0x3), region = 62 }

// kernel: decoder_resnet_forward.39
= control target key start
LH: loop header
LB: loop body
LE: loop exit
PB: predicated region body
PF: predicated region fallthrough
CT: control target
= control target key end

     0   :  { %s797_s12 = smov 0   ;;  %s799_s13 = smov 0   ;;  %s1007_s0 = inlined_call_operand.vmem [shape: f32[2,72,1024], index: 0, kind: input, shape index: {}]   ;;  %s1008_s1 = inlined_call_operand.vmem [shape: f32[8,72], index: 1, kind: input, shape index: {}]   ;;  %s1009_s2 = inlined_call_operand.vmem [shape: f32[8,1], index: 2, kind: input, shape index: {}]   ;;  %s1010_s3 = inlined_call_operand.vmem [shape: f32[2,8,1024], index: 3, kind: output, shape index: {}]  }
   0x1   :  { %s801_s14 = smov 0   ;;  %s803_s15 = smov 0  }
   0x2   :  { %s805_s16 = smov 0   ;;  %s807_s17 = smov 0  }
   0x3   :  { %s809_s18 = smov 0  }
   0x4 LB: > { %s22_s19 = sadd.s32 1, %s765_s16  ;;  %s25_s20 = sadd.s32 1, %s769_s17  ;;  %s773_s18 = sphi %s809_s18, %s13_s18   ;;  %s769_s17 = sphi %s807_s17, %s1016_s17   ;;  %s765_s16 = sphi %s805_s16, %s1015_s16   ;;  %s761_s15 = sphi %s803_s15, %s1014_s15   ;;  %s757_s14 = sphi %s801_s14, %s1013_s14   ;;  %s753_s13 = sphi %s799_s13, %s1012_s13   ;;  %s749_s12 = sphi %s797_s12, %s1011_s12  }
   0x5   : > { %p23_p0 = scmp.ge.s32.totalorder %s22_s19, 2  ;;  %p41_p1 = scmp.ne.s32.totalorder %s753_s13, %s749_s12 }
   0x6   : > { %p42_p2 = scmp.eq.s32.totalorder %s773_s18, 0  ;;  %s34_s24 = sadd.s32 1, %s753_s13 }
   0x7   : > { %s1018_s19 = smov (%p23_p0, %s22_s19), 0  ;;  %s1020_s20 = smov (!%p23_p0, %s25_s20), %s769_s17 }
   0x8   : > { %p43_p3 = por %p42_p2, %p41_p1  ;;  %p27_p4 = scmp.ge.s32.totalorder %s1020_s20, 2 }
   0x9   : > { %s30_s21 = ssub.s32 %s765_s16, %s1018_s19  ;;  %p614_p6 = scmp.ge.s32.totalorder %s773_s18, 4 }
   0xa   : > { %s1022_s20 = smov (%p27_p4, %s1020_s20), 0 }
   0xb   : > { %s29_s22 = ssub.s32 %s769_s17, %s1022_s20  ;;  %143 = sbr.rel (%p614_p6) target bundleno = 44 (0x2c), region = 24 }
   0xc   : > { %s31_s23 = sor.u32 %s30_s21, %s29_s22 }
   0xd   : > { %p32_p5 = scmp.eq.s32.totalorder %s31_s23, 0 }
   0xf   : > { %s848_s25 = scalar_select %p32_p5, %s753_s13, %s34_s24  }
  0x12   : > { %146 = sbr.rel (!%p43_p3) target bundleno = 44 (0x2c), region = 28  ;;  %s148_s26 = sand.u32 (%p43_p3), 1, %s753_s13  }
  0x13   : > { %s657_s27 = smul.u32 (%p43_p3), 288, %s148_s26  ;;  %s615_s28 = sshll.u32 (%p43_p3), %s765_s16, 2 }
  0x14   : > { %s658_s29 = smul.u32 (%p43_p3), 72, %s769_s17 }
  0x15   : > { %s862_s8 = scalar_lea.vmem (%p43_p3), [#allocation2], %s657_s27 }
  0x16   : > { %s153_s30 = sadd.s32 (%p43_p3), %s658_s29, %s615_s28 }
  0x17   : > { %s616_s4 = sshll.u32 (%p43_p3), %s153_s30, 3 }
  0x18   : > { %s857_s7 = scalar_lea.vmem (%p43_p3), %s1007_s0, %s616_s4 }
  0x19   : > { %v168_v0 = vld [vmem:[%s857_s7] sm:$0xff]  ;;  %v170_v1 = vld [vmem:[%s857_s7 + $0x8] sm:$0xff]  ;;  %v172_v2 = vld [vmem:[%s857_s7 + $0x10] sm:$0xff] }
  0x1a   : > { %169 = vst [vmem:[%s862_s8] sm:$0xff] %v168_v0  ;;  %171 = vst [vmem:[%s862_s8 + $0x8] sm:$0xff] %v170_v1  ;;  %v174_v3 = vld [vmem:[%s857_s7 + $0x18] sm:$0xff]  ;;  %v176_v4 = vld [vmem:[%s857_s7 + $0x40] sm:$0xff] }
  0x1b   : > { %173 = vst [vmem:[%s862_s8 + $0x10] sm:$0xff] %v172_v2  ;;  %v178_v5 = vld [vmem:[%s857_s7 + $0x48] sm:$0xff]  ;;  %175 = vst [vmem:[%s862_s8 + $0x18] sm:$0xff] %v174_v3  ;;  %v180_v6 = vld [vmem:[%s857_s7 + $0x50] sm:$0xff] }
  0x1c   : > { %177 = vst [vmem:[%s862_s8 + $0x20] sm:$0xff] %v176_v4  ;;  %179 = vst [vmem:[%s862_s8 + $0x28] sm:$0xff] %v178_v5  ;;  %v182_v7 = vld [vmem:[%s857_s7 + $0x58] sm:$0xff]  ;;  %v184_v8 = vld [vmem:[%s857_s7 + $0x80] sm:$0xff] }
  0x1d   : > { %181 = vst [vmem:[%s862_s8 + $0x30] sm:$0xff] %v180_v6  ;;  %183 = vst [vmem:[%s862_s8 + $0x38] sm:$0xff] %v182_v7  ;;  %v186_v9 = vld [vmem:[%s857_s7 + $0x88] sm:$0xff]  ;;  %v188_v10 = vld [vmem:[%s857_s7 + $0x90] sm:$0xff] }
  0x1e   : > { %185 = vst [vmem:[%s862_s8 + $0x40] sm:$0xff] %v184_v8  ;;  %v190_v11 = vld [vmem:[%s857_s7 + $0x98] sm:$0xff]  ;;  %187 = vst [vmem:[%s862_s8 + $0x48] sm:$0xff] %v186_v9  ;;  %v192_v12 = vld [vmem:[%s857_s7 + $0xc0] sm:$0xff] }
  0x1f   : > { %189 = vst [vmem:[%s862_s8 + $0x50] sm:$0xff] %v188_v10  ;;  %191 = vst [vmem:[%s862_s8 + $0x58] sm:$0xff] %v190_v11  ;;  %v194_v13 = vld [vmem:[%s857_s7 + $0xc8] sm:$0xff]  ;;  %v196_v14 = vld [vmem:[%s857_s7 + $0xd0] sm:$0xff] }
  0x20   : > { %193 = vst [vmem:[%s862_s8 + $0x60] sm:$0xff] %v192_v12  ;;  %195 = vst [vmem:[%s862_s8 + $0x68] sm:$0xff] %v194_v13  ;;  %v198_v15 = vld [vmem:[%s857_s7 + $0xd8] sm:$0xff]  ;;  %v200_v16 = vld [vmem:[%s857_s7 + $0x100] sm:$0xff] }
  0x21   : > { %197 = vst [vmem:[%s862_s8 + $0x70] sm:$0xff] %v196_v14  ;;  %v202_v17 = vld [vmem:[%s857_s7 + $0x108] sm:$0xff]  ;;  %199 = vst [vmem:[%s862_s8 + $0x78] sm:$0xff] %v198_v15  ;;  %v204_v18 = vld [vmem:[%s857_s7 + $0x110] sm:$0xff] }
  0x22   : > { %201 = vst [vmem:[%s862_s8 + $0x80] sm:$0xff] %v200_v16  ;;  %203 = vst [vmem:[%s862_s8 + $0x88] sm:$0xff] %v202_v17  ;;  %v206_v19 = vld [vmem:[%s857_s7 + $0x118] sm:$0xff]  ;;  %v208_v20 = vld [vmem:[%s857_s7 + $0x140] sm:$0xff] }
  0x23   : > { %205 = vst [vmem:[%s862_s8 + $0x90] sm:$0xff] %v204_v18  ;;  %207 = vst [vmem:[%s862_s8 + $0x98] sm:$0xff] %v206_v19  ;;  %v210_v21 = vld [vmem:[%s857_s7 + $0x148] sm:$0xff]  ;;  %v212_v22 = vld [vmem:[%s857_s7 + $0x150] sm:$0xff] }
  0x24   : > { %209 = vst [vmem:[%s862_s8 + $0xa0] sm:$0xff] %v208_v20  ;;  %v214_v23 = vld [vmem:[%s857_s7 + $0x158] sm:$0xff]  ;;  %211 = vst [vmem:[%s862_s8 + $0xa8] sm:$0xff] %v210_v21  ;;  %v216_v24 = vld [vmem:[%s857_s7 + $0x180] sm:$0xff] }
  0x25   : > { %213 = vst [vmem:[%s862_s8 + $0xb0] sm:$0xff] %v212_v22  ;;  %215 = vst [vmem:[%s862_s8 + $0xb8] sm:$0xff] %v214_v23  ;;  %v218_v25 = vld [vmem:[%s857_s7 + $0x188] sm:$0xff]  ;;  %v220_v26 = vld [vmem:[%s857_s7 + $0x190] sm:$0xff] }
  0x26   : > { %217 = vst [vmem:[%s862_s8 + $0xc0] sm:$0xff] %v216_v24  ;;  %219 = vst [vmem:[%s862_s8 + $0xc8] sm:$0xff] %v218_v25  ;;  %v222_v27 = vld [vmem:[%s857_s7 + $0x198] sm:$0xff]  ;;  %v224_v28 = vld [vmem:[%s857_s7 + $0x1c0] sm:$0xff] }
  0x27   : > { %221 = vst [vmem:[%s862_s8 + $0xd0] sm:$0xff] %v220_v26  ;;  %v226_v29 = vld [vmem:[%s857_s7 + $0x1c8] sm:$0xff]  ;;  %223 = vst [vmem:[%s862_s8 + $0xd8] sm:$0xff] %v222_v27  ;;  %v228_v30 = vld [vmem:[%s857_s7 + $0x1d0] sm:$0xff] }
  0x28   : > { %225 = vst [vmem:[%s862_s8 + $0xe0] sm:$0xff] %v224_v28  ;;  %227 = vst [vmem:[%s862_s8 + $0xe8] sm:$0xff] %v226_v29  ;;  %v230_v31 = vld [vmem:[%s857_s7 + $0x1d8] sm:$0xff]  ;;  %v232_v32 = vld [vmem:[%s857_s7 + $0x200] sm:$0xff] }
  0x29   : > { %229 = vst [vmem:[%s862_s8 + $0xf0] sm:$0xff] %v228_v30  ;;  %231 = vst [vmem:[%s862_s8 + $0xf8] sm:$0xff] %v230_v31  ;;  %v234_v33 = vld [vmem:[%s857_s7 + $0x208] sm:$0xff]  ;;  %v236_v34 = vld [vmem:[%s857_s7 + $0x210] sm:$0xff] }
  0x2a   : > { %233 = vst [vmem:[%s862_s8 + $0x100] sm:$0xff] %v232_v32  ;;  %v238_v35 = vld [vmem:[%s857_s7 + $0x218] sm:$0xff]  ;;  %235 = vst [vmem:[%s862_s8 + $0x108] sm:$0xff] %v234_v33 }
  0x2b   : > { %237 = vst [vmem:[%s862_s8 + $0x110] sm:$0xff] %v236_v34  ;;  %239 = vst [vmem:[%s862_s8 + $0x118] sm:$0xff] %v238_v35 }
  0x2c PF: > { %p617_p7 = scmp.ge.s32.totalorder %s773_s18, 1  ;;  %p244_p8 = scmp.lt.s32.totalorder %s773_s18, 5 }
  0x2e   : > { %p245_p9 = pnand %p617_p7, %p244_p8 }
  0x2f   : > { %s251_s9 = sand.u32 (!%p245_p9), 1, %s749_s12   ;;  %v362_v36 = vld [vmem:[%s1009_s2] sm:$0xff] (!%p245_p9)  ;;  %v775_v37 = vmov (!%p245_p9), 0.0   ;;  %v776_v38 = vmov (!%p245_p9), 0   ;;  %vm368_vm0 = vcmask (!%p245_p9), 588800   ;;  %s618_s24 = sshll.u32 (!%p245_p9), %s757_s14, 2 }
  0x30   : > { %248 = sbr.rel (%p245_p9) target bundleno = 293 (0x125), region = 51  ;;  %436 = vmatprep.mubr.f32.mxu0 (!%p245_p9), %v775_v37  ;;  %507 = vmatprep.mubr.f32.mxu1 (!%p245_p9), %v775_v37  ;;  %p280_p10 = scmp.lt.s32.totalorder (!%p245_p9), %s761_s15, 1 }
  0x31   : > { %s659_s21 = smul.u32 (!%p245_p9), 288, %s251_s9  ;;  %718 = vset.pattern.permute.xlu0 (!%p245_p9), %v776_v38  ;;  %p282_p11 = scmp.lt.s32.totalorder (!%p245_p9), %s618_s24, 7 }
  0x32   : > { %365 = vperm.xlu0 (!%p245_p9), %718, %v362_v36  }
  0x33   : > { %s939_s22 = scalar_lea.vmem (!%p245_p9), [#allocation2], %s659_s21 }
  0x34   : > { %v290_v39 = vld [vmem:[%s939_s22 + $0x8] sm:$0xff] (!%p245_p9)  ;;  %v292_v41 = vld [vmem:[%s939_s22 + $0x18] sm:$0xff] (!%p245_p9)  ;;  %v289_v46 = vld [vmem:[%s939_s22] sm:$0xff] (!%p245_p9) }
  0x35   : > { %v294_v40 = vld [vmem:[%s939_s22 + $0x28] sm:$0xff] (!%p245_p9)  ;;  %v326_v42 = vmax.f32 (!%p245_p9), %v290_v39, 0.0  ;;  %v296_v44 = vld [vmem:[%s939_s22 + $0x38] sm:$0xff] (!%p245_p9)  ;;  %v328_v45 = vmax.f32 (!%p245_p9), %v292_v41, 0.0  ;;  %v293_v47 = vld [vmem:[%s939_s22 + $0x20] sm:$0xff] (!%p245_p9)  ;;  %v325_v49 = vmax.f32 (!%p245_p9), %v289_v46, 0.0 }
  0x36   : > { %v330_v43 = vmax.f32 (!%p245_p9), %v294_v40, 0.0  ;;  %v332_v48 = vmax.f32 (!%p245_p9), %v296_v44, 0.0  ;;  %v329_v50 = vmax.f32 (!%p245_p9), %v293_v47, 0.0  ;;  %v291_v51 = vld [vmem:[%s939_s22 + $0x10] sm:$0xff] (!%p245_p9)  ;;  %v298_v53 = vld [vmem:[%s939_s22 + $0x48] sm:$0xff] (!%p245_p9)  ;;  %v300_v59 = vld [vmem:[%s939_s22 + $0x58] sm:$0xff] (!%p245_p9) }
  0x37   : > { %v295_v52 = vld [vmem:[%s939_s22 + $0x30] sm:$0xff]  ;;  %v327_v55 = vmax.f32 %v291_v51, 0.0  ;;  %v302_v57 = vld [vmem:[%s939_s22 + $0x68] sm:$0xff]  ;;  %v334_v58 = vmax.f32 %v298_v53, 0.0  ;;  %v304_v60 = vld [vmem:[%s939_s22 + $0x78] sm:$0xff]  ;;  %v336_v0 = vmax.f32 %v300_v59, 0.0 }
  0x38   : > { %v625_v54 = vpack.c.bf16 %v330_v43, %v326_v42  ;;  %v331_v56 = vmax.f32 %v295_v52, 0.0  ;;  %v641_v61 = vpack.c.bf16 %v332_v48, %v328_v45  ;;  %v627_v62 = vpack.c.bf16 %v329_v50, %v325_v49  ;;  %v297_v1 = vld [vmem:[%s939_s22 + $0x40] sm:$0xff]  ;;  %v299_v3 = vld [vmem:[%s939_s22 + $0x50] sm:$0xff]  ;;  %v306_v9 = vld [vmem:[%s939_s22 + $0x88] sm:$0xff]  ;;  %s1024_s15 = smov (!%p280_p10, %s761_s15), 1  ;;  %s1026_s24 = smov (!%p282_p11, %s618_s24), 7 }
  0x39   : > { %v338_v63 = vmax.f32 %v302_v57, 0.0  ;;  %v301_v2 = vld [vmem:[%s939_s22 + $0x60] sm:$0xff]  ;;  %v340_v5 = vmax.f32 %v304_v60, 0.0  ;;  %v333_v6 = vmax.f32 %v297_v1, 0.0  ;;  %v303_v8 = vld [vmem:[%s939_s22 + $0x70] sm:$0xff]  ;;  %v310_v10 = vld [vmem:[%s939_s22 + $0xa8] sm:$0xff] }
  0x3a   : > { %626 = vmatprep.subr.bf16.mxu0 %v625_v54  ;;  %v643_v4 = vpack.c.bf16 %v331_v56, %v327_v55  ;;  %v337_v7 = vmax.f32 %v301_v2, 0.0  ;;  %642 = vmatprep.subr.bf16.mxu1 %v641_v61  ;;  %v335_v12 = vmax.f32 %v299_v3, 0.0  ;;  %v339_v13 = vmax.f32 %v303_v8, 0.0  ;;  %v308_v15 = vld [vmem:[%s939_s22 + $0x98] sm:$0xff]  ;;  %v305_v17 = vld [vmem:[%s939_s22 + $0x80] sm:$0xff]  ;;  %v307_v23 = vld [vmem:[%s939_s22 + $0x90] sm:$0xff] }
  0x3b   : > { %628 = vmatpush1.bf16.msra.mxu0 %v627_v62  ;;  %v629_v11 = vpack.c.bf16 %v338_v63, %v334_v58  ;;  %v342_v14 = vmax.f32 %v306_v9, 0.0  ;;  %v312_v16 = vld [vmem:[%s939_s22 + $0xb8] sm:$0xff]  ;;  %v645_v18 = vpack.c.bf16 %v340_v5, %v336_v0  ;;  %v346_v20 = vmax.f32 %v310_v10, 0.0  ;;  %v309_v22 = vld [vmem:[%s939_s22 + $0xa0] sm:$0xff]  ;;  %v311_v24 = vld [vmem:[%s939_s22 + $0xb0] sm:$0xff]  ;;  %s619_s26 = sshll.u32 %s1024_s15, 3 }
  0x3c   : > { %644 = vmatpush1.bf16.msra.mxu1 %v643_v4  ;;  %v631_v19 = vpack.c.bf16 %v337_v7, %v333_v6  ;;  %v344_v21 = vmax.f32 %v308_v15, 0.0  ;;  %v647_v25 = vpack.c.bf16 %v339_v13, %v335_v12  ;;  %v348_v26 = vmax.f32 %v312_v16, 0.0  ;;  %v314_v29 = vld [vmem:[%s939_s22 + $0xc8] sm:$0xff]  ;;  %v316_v31 = vld [vmem:[%s939_s22 + $0xd8] sm:$0xff]  ;;  %v313_v37 = vld [vmem:[%s939_s22 + $0xc0] sm:$0xff]  ;;  %s285_s27 = sadd.s32 %s619_s26, %s1026_s24 }
  0x3d   : > { %630 = vmatprep.subr.bf16.mxu0 %v629_v11  ;;  %v341_v27 = vmax.f32 %v305_v17, 0.0  ;;  %v345_v28 = vmax.f32 %v309_v22, 0.0  ;;  %v318_v30 = vld [vmem:[%s939_s22 + $0xe8] sm:$0xff]  ;;  %646 = vmatprep.subr.bf16.mxu1 %v645_v18  ;;  %v633_v32 = vpack.c.bf16 %v346_v20, %v342_v14  ;;  %v343_v33 = vmax.f32 %v307_v23, 0.0  ;;  %v320_v36 = vld [vmem:[%s939_s22 + $0xf8] sm:$0xff]  ;;  %v317_v38 = vld [vmem:[%s939_s22 + $0xe0] sm:$0xff] }
  0x3e   : > { %v347_v34 = vmax.f32 %v311_v24, 0.0  ;;  %v350_v35 = vmax.f32 %v314_v29, 0.0  ;;  %v649_v39 = vpack.c.bf16 %v348_v26, %v344_v21  ;;  %v354_v41 = vmax.f32 %v318_v30, 0.0  ;;  %v315_v43 = vld [vmem:[%s939_s22 + $0xd0] sm:$0xff]  ;;  %v322_v52 = vld [vmem:[%s939_s22 + $0x108] sm:$0xff]  ;;  %v324_v54 = vld [vmem:[%s939_s22 + $0x118] sm:$0xff] }
  0x3f   : > { %632 = vmatpush1.bf16.msra.mxu0 %v631_v19  ;;  %v635_v40 = vpack.c.bf16 %v345_v28, %v341_v27  ;;  %v352_v42 = vmax.f32 %v316_v31, 0.0  ;;  %v319_v44 = vld [vmem:[%s939_s22 + $0xf0] sm:$0xff]  ;;  %v356_v46 = vmax.f32 %v320_v36, 0.0  ;;  %v349_v47 = vmax.f32 %v313_v37, 0.0  ;;  %v321_v58 = vld [vmem:[%s939_s22 + $0x100] sm:$0xff]  ;;  %s620_s28 = sshll.u32 %s285_s27, 3 }
  0x40   : > { %648 = vmatpush1.bf16.msra.mxu1 %v647_v25  ;;  %634 = vmatprep.subr.bf16.mxu0 %v633_v32  ;;  %v651_v45 = vpack.c.bf16 %v347_v34, %v343_v33  ;;  %v353_v48 = vmax.f32 %v317_v38, 0.0  ;;  %v637_v49 = vpack.c.bf16 %v354_v41, %v350_v35  ;;  %v351_v50 = vmax.f32 %v315_v43, 0.0  ;;  %v323_v60 = vld [vmem:[%s939_s22 + $0x110] sm:$0xff]  ;;  %v361_v63 = vld [vmem:[%s1008_s1] sm:$0xff]  ;;  %s287_s4 = scalar_lea.vmem %s1010_s3, %s620_s28 }
  0x41   : > { %650 = vmatprep.subr.bf16.mxu1 %v649_v39  ;;  %v355_v51 = vmax.f32 %v319_v44, 0.0  ;;  %v653_v53 = vpack.c.bf16 %v356_v46, %v352_v42  ;;  %v358_v57 = vmax.f32 %v322_v52, 0.0  ;;  %v360_v59 = vmax.f32 %v324_v54, 0.0 }
  0x42   : > { %v639_v55 = vpack.c.bf16 %v353_v48, %v349_v47  ;;  %v357_v61 = vmax.f32 %v321_v58, 0.0  ;;  %v359_v62 = vmax.f32 %v323_v60, 0.0 }
  0x43   : > { %636 = vmatpush1.bf16.msra.mxu0 %v635_v40  ;;  %v655_v56 = vpack.c.bf16 %v355_v51, %v351_v50 }
  0x44   : > { %652 = vmatpush1.bf16.msra.mxu1 %v651_v45  ;;  %638 = vmatprep.subr.bf16.mxu0 %v637_v49 }
  0x45   : > { %654 = vmatprep.subr.bf16.mxu1 %v653_v53 }
  0x47   : > { %640 = vmatpush1.bf16.msra.mxu0 %v639_v55 }
  0x48   : > { %656 = vmatpush1.bf16.msra.mxu1 %v655_v56  ;;  %388 = vmatprep.subr.mxu0 %v358_v57 }
  0x49   : > { %459 = vmatprep.subr.mxu1 %v360_v59 }
  0x4b   : > { %389 = vmatpush1.msra.mxu0 %v357_v61 }
  0x4c   : > { %460 = vmatpush1.msra.mxu1 %v359_v62  ;;  %621 = vmatmul.mubr.msk.f32.vlgmr.msra.gmra.mrb[0].mxu0 %vm368_vm0, %v361_v63 }
  0x4d   : > { %622 = vmatmul.mubr.msk.f32.vlgmr.msra.gmra.mrb[0].mxu1 %vm368_vm0, %v361_v63 }
  0xb1   : > { %v366_v0 = vpop.permute.xlu0 %365 }
 0x11f   : > { %v438_v1 = vpop.f32.mrb[0].mxu0 }
 0x120   : > { %v439_v2 = vadd.f32 %v438_v1, %v366_v0  ;;  %v509_v3 = vpop.f32.mrb[0].mxu1  ;;  %v440_v4 = vpop.f32.mrb[1].mxu0 }
 0x121   : > { %v510_v5 = vadd.f32 %v509_v3, %v366_v0  ;;  %v441_v6 = vadd.f32 %v440_v4, %v366_v0  ;;  %v511_v7 = vpop.f32.mrb[1].mxu1 }
 0x122   : > { %514 = vst [vmem:[%s287_s4] sm:$0xff] %v439_v2  ;;  %v512_v8 = vadd.f32 %v511_v7, %v366_v0 }
 0x123   : > { %516 = vst [vmem:[%s287_s4 + $0x10] sm:$0xff] %v510_v5  ;;  %515 = vst [vmem:[%s287_s4 + $0x8] sm:$0xff] %v441_v6 }
 0x124   : > { %517 = vst [vmem:[%s287_s4 + $0x18] sm:$0xff] %v512_v8 }
 0x125 PF: > { %s13_s18 = sadd.s32 1, %s773_s18   ;;  %s1011_s12 = smov %s753_s13 }
 0x126   : > { %p10_p12 = scmp.ge.s32.totalorder %s13_s18, 6   ;;  %s1012_s13 = smov %s848_s25 }
 0x127   : > { %s1013_s14 = smov %s765_s16  ;;  %s1014_s15 = smov %s769_s17 }
 0x128   : > { %s1015_s16 = smov %s1018_s19  ;;  %s1016_s17 = smov %s1022_s20 }
 0x129   :  { %12 = sbr.rel (!%p10_p12) target bundleno = 4 (0x4), region = 90 }

// kernel: decoder_resnet_forward.41
= control target key start
LH: loop header
LB: loop body
LE: loop exit
PB: predicated region body
PF: predicated region fallthrough
CT: control target
= control target key end

     0   :  { %s767_s21 = smov 0   ;;  %s769_s22 = smov 0   ;;  %s845_s0 = inlined_call_operand.vmem [shape: f32[2,8,1024], index: 0, kind: input, shape index: {}]   ;;  %s846_s1 = inlined_call_operand.vmem [shape: f32[8,8], index: 1, kind: input, shape index: {}]   ;;  %s847_s2 = inlined_call_operand.vmem [shape: f32[8,1], index: 2, kind: input, shape index: {}]   ;;  %s848_s3 = inlined_call_operand.vmem [shape: f32[8,1], index: 3, kind: input, shape index: {}]   ;;  %s849_s4 = inlined_call_operand.vmem [shape: f32[8,1], index: 4, kind: input, shape index: {}]   ;;  %s850_s5 = inlined_call_operand.vmem [shape: f32[2,8,1024], index: 5, kind: input, shape index: {}]   ;;  %s851_s6 = inlined_call_operand.vmem [shape: f32[2,8,1024], index: 6, kind: output, shape index: {}]  }
   0x1   :  { %s771_s23 = smov 0   ;;  %s773_s24 = smov 0  }
   0x2   :  { %s775_s25 = smov 0  }
   0x3 LB: > { %s25_s26 = sadd.s32 1, %s720_s23  ;;  %s28_s27 = sadd.s32 1, %s724_s24  ;;  %s728_s25 = sphi %s775_s25, %s16_s25   ;;  %s724_s24 = sphi %s773_s24, %s855_s24   ;;  %s720_s23 = sphi %s771_s23, %s854_s23   ;;  %s716_s22 = sphi %s769_s22, %s853_s22   ;;  %s712_s21 = sphi %s767_s21, %s852_s21  }
   0x4   : > { %p26_p0 = scmp.ge.s32.totalorder %s25_s26, 2  ;;  %p632_p1 = scmp.ge.s32.totalorder %s728_s25, 1 }
   0x5   : > { %p250_p2 = scmp.lt.s32.totalorder %s728_s25, 5 }
   0x6   : > { %s857_s26 = smov (%p26_p0, %s25_s26), 0  ;;  %s859_s27 = smov (!%p26_p0, %s28_s27), %s724_s24 }
   0x7   : > { %p251_p3 = pnand %p632_p1, %p250_p2  ;;  %p30_p4 = scmp.ge.s32.totalorder %s859_s27, 2 }
   0x8   : > { %v331_v0 = vld [vmem:[%s848_s3] sm:$0xff] (!%p251_p3)  ;;  %v730_v1 = vmov (!%p251_p3), 0   ;;  %v731_v3 = vmov (!%p251_p3), 0.0   ;;  %s633_s10 = sshll.u32 (!%p251_p3), %s712_s21, 2  ;;  %p298_p5 = scmp.lt.s32.totalorder (!%p251_p3), %s716_s22, 1  ;;  %vm362_vm0 = vcmask (!%p251_p3), 64512  }
   0x9   : > { %s861_s27 = smov (%p30_p4, %s859_s27), 0  ;;  %254 = sbr.rel (%p251_p3) target bundleno = 367 (0x16f), region = 44 }
   0xa   : > { %688 = vset.pattern.permute.xlu0 (!%p251_p3), %v730_v1  ;;  %689 = vset.pattern.permute.xlu1 (!%p251_p3), %v730_v1  ;;  %v341_v2 = vld [vmem:[%s849_s4] sm:$0xff] (!%p251_p3)  ;;  %p300_p6 = scmp.lt.s32.totalorder (!%p251_p3), %s633_s10, 7 }
   0xb   : > { %334 = vperm.xlu0 (!%p251_p3), %688, %v331_v0   ;;  %430 = vmatprep.mubr.f32.mxu0 (!%p251_p3), %v731_v3  ;;  %v356_v4 = vld [vmem:[%s847_s2] sm:$0xff] (!%p251_p3) }
   0xc   : > { %501 = vmatprep.mubr.f32.mxu1 (!%p251_p3), %v731_v3  ;;  %359 = vperm.xlu1 (!%p251_p3), %689, %v356_v4   ;;  %v355_v23 = vld [vmem:[%s846_s1] sm:$0xff] (!%p251_p3) }
   0xf   : > { %344 = vperm.xlu0 (!%p251_p3), %688, %v341_v2  }
  0x10   : > { %s863_s22 = smov (!%p298_p5, %s716_s22), 1  ;;  %s865_s10 = smov (!%p300_p6, %s633_s10), 7 }
  0x11   : > { %s634_s11 = sshll.u32 %s863_s22, 3 }
  0x12   : > { %s303_s12 = sadd.s32 %s634_s11, %s865_s10 }
  0x13   : > { %s813_s13 = sshll.u32 %s303_s12, 3 }
  0x14   : > { %s305_s16 = scalar_lea.vmem %s845_s0, %s813_s13  ;;  %s315_s21 = scalar_lea.vmem %s850_s5, %s813_s13 }
  0x15   : > { %v328_v5 = vld [vmem:[%s305_s16 + $0x8] sm:$0xff]  ;;  %v330_v7 = vld [vmem:[%s305_s16 + $0x18] sm:$0xff]  ;;  %v327_v8 = vld [vmem:[%s305_s16] sm:$0xff]  ;;  %s325_s29 = scalar_lea.vmem %s851_s6, %s813_s13 }
  0x16   : > { %v329_v9 = vld [vmem:[%s305_s16 + $0x10] sm:$0xff]  ;;  %v508_v26 = vld [vmem:[%s315_s21] sm:$0xff]  ;;  %v509_v32 = vld [vmem:[%s315_s21 + $0x8] sm:$0xff] }
  0x17   : > { %v510_v28 = vld [vmem:[%s315_s21 + $0x10] sm:$0xff]  ;;  %v511_v34 = vld [vmem:[%s315_s21 + $0x18] sm:$0xff] }
  0x8a   : > { %v335_v6 = vpop.permute.xlu0 %334 }
  0x8b   : > { %v338_v10 = vmul.f32 %v335_v6, %v328_v5  ;;  %v340_v11 = vmul.f32 %v335_v6, %v330_v7  ;;  %v337_v12 = vmul.f32 %v335_v6, %v327_v8  ;;  %v339_v13 = vmul.f32 %v335_v6, %v329_v9  ;;  %v360_v24 = vpop.permute.xlu1 %359 }
  0x8e   : > { %v345_v14 = vpop.permute.xlu0 %344 }
  0x8f   : > { %v348_v15 = vadd.f32 %v345_v14, %v338_v10  ;;  %v350_v16 = vadd.f32 %v345_v14, %v340_v11  ;;  %v347_v17 = vadd.f32 %v345_v14, %v337_v12  ;;  %v349_v18 = vadd.f32 %v345_v14, %v339_v13 }
  0x91   : > { %v352_v19 = vmax.f32 %v348_v15, 0.0  ;;  %v354_v20 = vmax.f32 %v350_v16, 0.0  ;;  %v351_v21 = vmax.f32 %v347_v17, 0.0  ;;  %v353_v22 = vmax.f32 %v349_v18, 0.0 }
  0x93   : > { %366 = vmatprep.subr.mxu0 %v352_v19  ;;  %437 = vmatprep.subr.mxu1 %v354_v20 }
  0x94   : > { %367 = vmatpush1.msra.mxu0 %v351_v21  ;;  %438 = vmatpush1.msra.mxu1 %v353_v22 }
  0x95   : > { %642 = vmatmul.mubr.msk.f32.vlgmr.msra.gmra.mrb[0].mxu0 %vm362_vm0, %v355_v23  ;;  %643 = vmatmul.mubr.msk.f32.vlgmr.msra.gmra.mrb[0].mxu1 %vm362_vm0, %v355_v23 }
 0x168   : > { %v432_v25 = vpop.f32.mrb[0].mxu0  ;;  %v503_v27 = vpop.f32.mrb[0].mxu1 }
 0x169   : > { %v433_v29 = vadd.f32 %v432_v25, %v360_v24  ;;  %v504_v30 = vadd.f32 %v503_v27, %v360_v24  ;;  %v434_v31 = vpop.f32.mrb[1].mxu0  ;;  %v505_v33 = vpop.f32.mrb[1].mxu1 }
 0x16a   : > { %v435_v35 = vadd.f32 %v434_v31, %v360_v24  ;;  %v506_v36 = vadd.f32 %v505_v33, %v360_v24 }
 0x16b   : > { %v512_v37 = vadd.f32 %v508_v26, %v433_v29  ;;  %v514_v38 = vadd.f32 %v510_v28, %v504_v30 }
 0x16c   : > { %v513_v39 = vadd.f32 %v509_v32, %v435_v35  ;;  %v515_v40 = vadd.f32 %v511_v34, %v506_v36 }
 0x16d   : > { %516 = vst [vmem:[%s325_s29] sm:$0xff] %v512_v37  ;;  %518 = vst [vmem:[%s325_s29 + $0x10] sm:$0xff] %v514_v38 }
 0x16e   : > { %517 = vst [vmem:[%s325_s29 + $0x8] sm:$0xff] %v513_v39  ;;  %519 = vst [vmem:[%s325_s29 + $0x18] sm:$0xff] %v515_v40 }
 0x16f PF: > { %s16_s25 = sadd.s32 1, %s728_s25   ;;  %s852_s21 = smov %s720_s23 }
 0x170   : > { %p13_p7 = scmp.ge.s32.totalorder %s16_s25, 6   ;;  %s853_s22 = smov %s724_s24 }
 0x171   : > { %s854_s23 = smov %s857_s26  ;;  %s855_s24 = smov %s861_s27 }
 0x172   :  { %15 = sbr.rel (!%p13_p7) target bundleno = 3 (0x3), region = 77 }

// kernel: decoder_resnet_forward.42
= control target key start
LH: loop header
LB: loop body
LE: loop exit
PB: predicated region body
PF: predicated region fallthrough
CT: control target
= control target key end

     0   :  { %s771_s12 = smov 0   ;;  %s773_s13 = smov 0   ;;  %s981_s0 = inlined_call_operand.vmem [shape: f32[2,72,1024], index: 0, kind: input, shape index: {}]   ;;  %s982_s1 = inlined_call_operand.vmem [shape: f32[4,72], index: 1, kind: input, shape index: {}]   ;;  %s983_s2 = inlined_call_operand.vmem [shape: f32[4,1], index: 2, kind: input, shape index: {}]   ;;  %s984_s3 = inlined_call_operand.vmem [shape: f32[2,4,1024], index: 3, kind: output, shape index: {}]  }
   0x1   :  { %s775_s14 = smov 0   ;;  %s777_s15 = smov 0  }
   0x2   :  { %s779_s16 = smov 0   ;;  %s781_s17 = smov 0  }
   0x3   :  { %s783_s18 = smov 0  }
   0x4 LB: > { %s22_s19 = sadd.s32 1, %s739_s16  ;;  %s25_s20 = sadd.s32 1, %s743_s17  ;;  %s747_s18 = sphi %s783_s18, %s13_s18   ;;  %s743_s17 = sphi %s781_s17, %s990_s17   ;;  %s739_s16 = sphi %s779_s16, %s989_s16   ;;  %s735_s15 = sphi %s777_s15, %s988_s15   ;;  %s731_s14 = sphi %s775_s14, %s987_s14   ;;  %s727_s13 = sphi %s773_s13, %s986_s13   ;;  %s723_s12 = sphi %s771_s12, %s985_s12  }
   0x5   : > { %p23_p0 = scmp.ge.s32.totalorder %s22_s19, 2  ;;  %p41_p1 = scmp.ne.s32.totalorder %s727_s13, %s723_s12 }
   0x6   : > { %p42_p2 = scmp.eq.s32.totalorder %s747_s18, 0  ;;  %s34_s24 = sadd.s32 1, %s727_s13 }
   0x7   : > { %s992_s19 = smov (%p23_p0, %s22_s19), 0  ;;  %s994_s20 = smov (!%p23_p0, %s25_s20), %s743_s17 }
   0x8   : > { %p43_p3 = por %p42_p2, %p41_p1  ;;  %p27_p4 = scmp.ge.s32.totalorder %s994_s20, 2 }
   0x9   : > { %s30_s21 = ssub.s32 %s739_s16, %s992_s19  ;;  %p588_p6 = scmp.ge.s32.totalorder %s747_s18, 4 }
   0xa   : > { %s996_s20 = smov (%p27_p4, %s994_s20), 0 }
   0xb   : > { %s29_s22 = ssub.s32 %s743_s17, %s996_s20  ;;  %143 = sbr.rel (%p588_p6) target bundleno = 44 (0x2c), region = 24 }
   0xc   : > { %s31_s23 = sor.u32 %s30_s21, %s29_s22 }
   0xd   : > { %p32_p5 = scmp.eq.s32.totalorder %s31_s23, 0 }
   0xf   : > { %s822_s25 = scalar_select %p32_p5, %s727_s13, %s34_s24  }
  0x12   : > { %146 = sbr.rel (!%p43_p3) target bundleno = 44 (0x2c), region = 28  ;;  %s148_s26 = sand.u32 (%p43_p3), 1, %s727_s13  }
  0x13   : > { %s631_s27 = smul.u32 (%p43_p3), 288, %s148_s26  ;;  %s589_s28 = sshll.u32 (%p43_p3), %s739_s16, 2 }
  0x14   : > { %s632_s29 = smul.u32 (%p43_p3), 72, %s743_s17 }
  0x15   : > { %s836_s8 = scalar_lea.vmem (%p43_p3), [#allocation2], %s631_s27 }
  0x16   : > { %s153_s30 = sadd.s32 (%p43_p3), %s632_s29, %s589_s28 }
  0x17   : > { %s590_s4 = sshll.u32 (%p43_p3), %s153_s30, 3 }
  0x18   : > { %s831_s7 = scalar_lea.vmem (%p43_p3), %s981_s0, %s590_s4 }
  0x19   : > { %v168_v0 = vld [vmem:[%s831_s7] sm:$0xff]  ;;  %v170_v1 = vld [vmem:[%s831_s7 + $0x8] sm:$0xff]  ;;  %v172_v2 = vld [vmem:[%s831_s7 + $0x10] sm:$0xff] }
  0x1a   : > { %169 = vst [vmem:[%s836_s8] sm:$0xff] %v168_v0  ;;  %171 = vst [vmem:[%s836_s8 + $0x8] sm:$0xff] %v170_v1  ;;  %v174_v3 = vld [vmem:[%s831_s7 + $0x18] sm:$0xff]  ;;  %v176_v4 = vld [vmem:[%s831_s7 + $0x40] sm:$0xff] }
  0x1b   : > { %173 = vst [vmem:[%s836_s8 + $0x10] sm:$0xff] %v172_v2  ;;  %v178_v5 = vld [vmem:[%s831_s7 + $0x48] sm:$0xff]  ;;  %175 = vst [vmem:[%s836_s8 + $0x18] sm:$0xff] %v174_v3  ;;  %v180_v6 = vld [vmem:[%s831_s7 + $0x50] sm:$0xff] }
  0x1c   : > { %177 = vst [vmem:[%s836_s8 + $0x20] sm:$0xff] %v176_v4  ;;  %179 = vst [vmem:[%s836_s8 + $0x28] sm:$0xff] %v178_v5  ;;  %v182_v7 = vld [vmem:[%s831_s7 + $0x58] sm:$0xff]  ;;  %v184_v8 = vld [vmem:[%s831_s7 + $0x80] sm:$0xff] }
  0x1d   : > { %181 = vst [vmem:[%s836_s8 + $0x30] sm:$0xff] %v180_v6  ;;  %183 = vst [vmem:[%s836_s8 + $0x38] sm:$0xff] %v182_v7  ;;  %v186_v9 = vld [vmem:[%s831_s7 + $0x88] sm:$0xff]  ;;  %v188_v10 = vld [vmem:[%s831_s7 + $0x90] sm:$0xff] }
  0x1e   : > { %185 = vst [vmem:[%s836_s8 + $0x40] sm:$0xff] %v184_v8  ;;  %v190_v11 = vld [vmem:[%s831_s7 + $0x98] sm:$0xff]  ;;  %187 = vst [vmem:[%s836_s8 + $0x48] sm:$0xff] %v186_v9  ;;  %v192_v12 = vld [vmem:[%s831_s7 + $0xc0] sm:$0xff] }
  0x1f   : > { %189 = vst [vmem:[%s836_s8 + $0x50] sm:$0xff] %v188_v10  ;;  %191 = vst [vmem:[%s836_s8 + $0x58] sm:$0xff] %v190_v11  ;;  %v194_v13 = vld [vmem:[%s831_s7 + $0xc8] sm:$0xff]  ;;  %v196_v14 = vld [vmem:[%s831_s7 + $0xd0] sm:$0xff] }
  0x20   : > { %193 = vst [vmem:[%s836_s8 + $0x60] sm:$0xff] %v192_v12  ;;  %195 = vst [vmem:[%s836_s8 + $0x68] sm:$0xff] %v194_v13  ;;  %v198_v15 = vld [vmem:[%s831_s7 + $0xd8] sm:$0xff]  ;;  %v200_v16 = vld [vmem:[%s831_s7 + $0x100] sm:$0xff] }
  0x21   : > { %197 = vst [vmem:[%s836_s8 + $0x70] sm:$0xff] %v196_v14  ;;  %v202_v17 = vld [vmem:[%s831_s7 + $0x108] sm:$0xff]  ;;  %199 = vst [vmem:[%s836_s8 + $0x78] sm:$0xff] %v198_v15  ;;  %v204_v18 = vld [vmem:[%s831_s7 + $0x110] sm:$0xff] }
  0x22   : > { %201 = vst [vmem:[%s836_s8 + $0x80] sm:$0xff] %v200_v16  ;;  %203 = vst [vmem:[%s836_s8 + $0x88] sm:$0xff] %v202_v17  ;;  %v206_v19 = vld [vmem:[%s831_s7 + $0x118] sm:$0xff]  ;;  %v208_v20 = vld [vmem:[%s831_s7 + $0x140] sm:$0xff] }
  0x23   : > { %205 = vst [vmem:[%s836_s8 + $0x90] sm:$0xff] %v204_v18  ;;  %207 = vst [vmem:[%s836_s8 + $0x98] sm:$0xff] %v206_v19  ;;  %v210_v21 = vld [vmem:[%s831_s7 + $0x148] sm:$0xff]  ;;  %v212_v22 = vld [vmem:[%s831_s7 + $0x150] sm:$0xff] }
  0x24   : > { %209 = vst [vmem:[%s836_s8 + $0xa0] sm:$0xff] %v208_v20  ;;  %v214_v23 = vld [vmem:[%s831_s7 + $0x158] sm:$0xff]  ;;  %211 = vst [vmem:[%s836_s8 + $0xa8] sm:$0xff] %v210_v21  ;;  %v216_v24 = vld [vmem:[%s831_s7 + $0x180] sm:$0xff] }
  0x25   : > { %213 = vst [vmem:[%s836_s8 + $0xb0] sm:$0xff] %v212_v22  ;;  %215 = vst [vmem:[%s836_s8 + $0xb8] sm:$0xff] %v214_v23  ;;  %v218_v25 = vld [vmem:[%s831_s7 + $0x188] sm:$0xff]  ;;  %v220_v26 = vld [vmem:[%s831_s7 + $0x190] sm:$0xff] }
  0x26   : > { %217 = vst [vmem:[%s836_s8 + $0xc0] sm:$0xff] %v216_v24  ;;  %219 = vst [vmem:[%s836_s8 + $0xc8] sm:$0xff] %v218_v25  ;;  %v222_v27 = vld [vmem:[%s831_s7 + $0x198] sm:$0xff]  ;;  %v224_v28 = vld [vmem:[%s831_s7 + $0x1c0] sm:$0xff] }
  0x27   : > { %221 = vst [vmem:[%s836_s8 + $0xd0] sm:$0xff] %v220_v26  ;;  %v226_v29 = vld [vmem:[%s831_s7 + $0x1c8] sm:$0xff]  ;;  %223 = vst [vmem:[%s836_s8 + $0xd8] sm:$0xff] %v222_v27  ;;  %v228_v30 = vld [vmem:[%s831_s7 + $0x1d0] sm:$0xff] }
  0x28   : > { %225 = vst [vmem:[%s836_s8 + $0xe0] sm:$0xff] %v224_v28  ;;  %227 = vst [vmem:[%s836_s8 + $0xe8] sm:$0xff] %v226_v29  ;;  %v230_v31 = vld [vmem:[%s831_s7 + $0x1d8] sm:$0xff]  ;;  %v232_v32 = vld [vmem:[%s831_s7 + $0x200] sm:$0xff] }
  0x29   : > { %229 = vst [vmem:[%s836_s8 + $0xf0] sm:$0xff] %v228_v30  ;;  %231 = vst [vmem:[%s836_s8 + $0xf8] sm:$0xff] %v230_v31  ;;  %v234_v33 = vld [vmem:[%s831_s7 + $0x208] sm:$0xff]  ;;  %v236_v34 = vld [vmem:[%s831_s7 + $0x210] sm:$0xff] }
  0x2a   : > { %233 = vst [vmem:[%s836_s8 + $0x100] sm:$0xff] %v232_v32  ;;  %v238_v35 = vld [vmem:[%s831_s7 + $0x218] sm:$0xff]  ;;  %235 = vst [vmem:[%s836_s8 + $0x108] sm:$0xff] %v234_v33 }
  0x2b   : > { %237 = vst [vmem:[%s836_s8 + $0x110] sm:$0xff] %v236_v34  ;;  %239 = vst [vmem:[%s836_s8 + $0x118] sm:$0xff] %v238_v35 }
  0x2c PF: > { %p591_p7 = scmp.ge.s32.totalorder %s747_s18, 1  ;;  %p244_p8 = scmp.lt.s32.totalorder %s747_s18, 5 }
  0x2e   : > { %p245_p9 = pnand %p591_p7, %p244_p8 }
  0x2f   : > { %s251_s9 = sand.u32 (!%p245_p9), 1, %s723_s12   ;;  %v749_v36 = vmov (!%p245_p9), 0.0   ;;  %v326_v37 = vld [vmem:[%s983_s2] sm:$0xf] (!%p245_p9)  ;;  %v750_v38 = vmov (!%p245_p9), 0   ;;  %vm332_vm0 = vcmask (!%p245_p9), 588800  }
  0x30   : > { %248 = sbr.rel (%p245_p9) target bundleno = 295 (0x127), region = 51  ;;  %400 = vmatprep.mubr.f32.mxu0 (!%p245_p9), %v749_v36  ;;  %471 = vmatprep.mubr.f32.mxu1 (!%p245_p9), %v749_v36  ;;  %v325_v27 = vld [vmem:[%s982_s1] sm:$0xf] (!%p245_p9)  ;;  %s592_s24 = sshll.u32 (!%p245_p9), %s731_s14, 2 }
  0x31   : > { %s633_s10 = smul.u32 (!%p245_p9), 288, %s251_s9  ;;  %692 = vset.pattern.permute.xlu0 (!%p245_p9), %v750_v38  ;;  %p280_p10 = scmp.lt.s32.totalorder (!%p245_p9), %s735_s15, 1 }
  0x32   : > { %329 = vperm.xlu0 (!%p245_p9), %692, %v326_v37   ;;  %p282_p11 = scmp.lt.s32.totalorder (!%p245_p9), %s592_s24, 7 }
  0x33   : > { %s913_s22 = scalar_lea.vmem (!%p245_p9), [#allocation2], %s633_s10 }
  0x34   : > { %v290_v39 = vld [vmem:[%s913_s22 + $0x8] sm:$0xff] (!%p245_p9)  ;;  %v292_v41 = vld [vmem:[%s913_s22 + $0x18] sm:$0xff] (!%p245_p9)  ;;  %v289_v44 = vld [vmem:[%s913_s22] sm:$0xff] (!%p245_p9) }
  0x35   : > { %v294_v40 = vld [vmem:[%s913_s22 + $0x28] sm:$0xff] (!%p245_p9)  ;;  %v296_v43 = vld [vmem:[%s913_s22 + $0x38] sm:$0xff] (!%p245_p9)  ;;  %v293_v45 = vld [vmem:[%s913_s22 + $0x20] sm:$0xff] (!%p245_p9) }
  0x36   : > { %v599_v42 = vpack.c.bf16 (!%p245_p9), %v294_v40, %v290_v39  ;;  %v615_v46 = vpack.c.bf16 (!%p245_p9), %v296_v43, %v292_v41  ;;  %v601_v47 = vpack.c.bf16 (!%p245_p9), %v293_v45, %v289_v44  ;;  %v291_v48 = vld [vmem:[%s913_s22 + $0x10] sm:$0xff] (!%p245_p9)  ;;  %v298_v50 = vld [vmem:[%s913_s22 + $0x48] sm:$0xff] (!%p245_p9)  ;;  %v300_v53 = vld [vmem:[%s913_s22 + $0x58] sm:$0xff] (!%p245_p9) }
  0x37   : > { %v295_v49 = vld [vmem:[%s913_s22 + $0x30] sm:$0xff]  ;;  %v302_v52 = vld [vmem:[%s913_s22 + $0x68] sm:$0xff]  ;;  %v304_v54 = vld [vmem:[%s913_s22 + $0x78] sm:$0xff]  ;;  %s998_s15 = smov (!%p280_p10, %s735_s15), 1  ;;  %s1000_s24 = smov (!%p282_p11, %s592_s24), 7 }
  0x38   : > { %600 = vmatprep.subr.bf16.mxu0 %v599_v42  ;;  %v617_v51 = vpack.c.bf16 %v295_v49, %v291_v48  ;;  %616 = vmatprep.subr.bf16.mxu1 %v615_v46  ;;  %v603_v55 = vpack.c.bf16 %v302_v52, %v298_v50  ;;  %v619_v56 = vpack.c.bf16 %v304_v54, %v300_v53  ;;  %v297_v57 = vld [vmem:[%s913_s22 + $0x40] sm:$0xff]  ;;  %v299_v59 = vld [vmem:[%s913_s22 + $0x50] sm:$0xff]  ;;  %v306_v62 = vld [vmem:[%s913_s22 + $0x88] sm:$0xff]  ;;  %s593_s26 = sshll.u32 %s998_s15, 3 }
  0x39   : > { %602 = vmatpush1.bf16.msra.mxu0 %v601_v47  ;;  %v301_v58 = vld [vmem:[%s913_s22 + $0x60] sm:$0xff]  ;;  %v303_v61 = vld [vmem:[%s913_s22 + $0x70] sm:$0xff]  ;;  %v310_v63 = vld [vmem:[%s913_s22 + $0xa8] sm:$0xff]  ;;  %s285_s27 = sadd.s32 %s593_s26, %s1000_s24 }
  0x3a   : > { %618 = vmatpush1.bf16.msra.mxu1 %v617_v51  ;;  %v605_v60 = vpack.c.bf16 %v301_v58, %v297_v57  ;;  %604 = vmatprep.subr.bf16.mxu0 %v603_v55  ;;  %v621_v0 = vpack.c.bf16 %v303_v61, %v299_v59  ;;  %v607_v1 = vpack.c.bf16 %v310_v63, %v306_v62  ;;  %v308_v2 = vld [vmem:[%s913_s22 + $0x98] sm:$0xff]  ;;  %v305_v4 = vld [vmem:[%s913_s22 + $0x80] sm:$0xff]  ;;  %v307_v7 = vld [vmem:[%s913_s22 + $0x90] sm:$0xff]  ;;  %s594_s28 = sshll.u32 %s285_s27, 2 }
  0x3b   : > { %620 = vmatprep.subr.bf16.mxu1 %v619_v56  ;;  %v312_v3 = vld [vmem:[%s913_s22 + $0xb8] sm:$0xff]  ;;  %v309_v6 = vld [vmem:[%s913_s22 + $0xa0] sm:$0xff]  ;;  %v311_v8 = vld [vmem:[%s913_s22 + $0xb0] sm:$0xff]  ;;  %s287_s30 = scalar_lea.vmem %s984_s3, %s594_s28 }
  0x3c   : > { %v623_v5 = vpack.c.bf16 %v312_v3, %v308_v2  ;;  %v609_v9 = vpack.c.bf16 %v309_v6, %v305_v4  ;;  %v314_v10 = vld [vmem:[%s913_s22 + $0xc8] sm:$0xff]  ;;  %v316_v12 = vld [vmem:[%s913_s22 + $0xd8] sm:$0xff]  ;;  %v625_v13 = vpack.c.bf16 %v311_v8, %v307_v7  ;;  %v313_v16 = vld [vmem:[%s913_s22 + $0xc0] sm:$0xff] }
  0x3d   : > { %606 = vmatpush1.bf16.msra.mxu0 %v605_v60  ;;  %v318_v11 = vld [vmem:[%s913_s22 + $0xe8] sm:$0xff]  ;;  %v320_v15 = vld [vmem:[%s913_s22 + $0xf8] sm:$0xff]  ;;  %v317_v17 = vld [vmem:[%s913_s22 + $0xe0] sm:$0xff] }
  0x3e   : > { %622 = vmatpush1.bf16.msra.mxu1 %v621_v0  ;;  %608 = vmatprep.subr.bf16.mxu0 %v607_v1  ;;  %v611_v14 = vpack.c.bf16 %v318_v11, %v314_v10  ;;  %v627_v18 = vpack.c.bf16 %v320_v15, %v316_v12  ;;  %v315_v19 = vld [vmem:[%s913_s22 + $0xd0] sm:$0xff]  ;;  %v613_v21 = vpack.c.bf16 %v317_v17, %v313_v16  ;;  %v322_v23 = vld [vmem:[%s913_s22 + $0x108] sm:$0xff]  ;;  %v324_v24 = vld [vmem:[%s913_s22 + $0x118] sm:$0xff] }
  0x3f   : > { %624 = vmatprep.subr.bf16.mxu1 %v623_v5  ;;  %v319_v20 = vld [vmem:[%s913_s22 + $0xf0] sm:$0xff]  ;;  %v321_v25 = vld [vmem:[%s913_s22 + $0x100] sm:$0xff] }
  0x40   : > { %v629_v22 = vpack.c.bf16 %v319_v20, %v315_v19  ;;  %v323_v26 = vld [vmem:[%s913_s22 + $0x110] sm:$0xff] }
  0x41   : > { %610 = vmatpush1.bf16.msra.mxu0 %v609_v9 }
  0x42   : > { %626 = vmatpush1.bf16.msra.mxu1 %v625_v13  ;;  %612 = vmatprep.subr.bf16.mxu0 %v611_v14 }
  0x43   : > { %628 = vmatprep.subr.bf16.mxu1 %v627_v18 }
  0x45   : > { %614 = vmatpush1.bf16.msra.mxu0 %v613_v21 }
  0x46   : > { %630 = vmatpush1.bf16.msra.mxu1 %v629_v22  ;;  %352 = vmatprep.subr.mxu0 %v322_v23 }
  0x47   : > { %423 = vmatprep.subr.mxu1 %v324_v24 }
  0x49   : > { %353 = vmatpush1.msra.mxu0 %v321_v25 }
  0x4a   : > { %424 = vmatpush1.msra.mxu1 %v323_v26  ;;  %595 = vmatmul.mubr.msk.f32.vlgmr.msra.gmra.mrb[0].mxu0 %vm332_vm0, %v325_v27 }
  0x4b   : > { %596 = vmatmul.mubr.msk.f32.vlgmr.msra.gmra.mrb[0].mxu1 %vm332_vm0, %v325_v27 }
  0xb1   : > { %v330_v28 = vpop.permute.xlu0 %329 }
 0x11d   : > { %v402_v29 = vpop.f32.mrb[0].mxu0 }
 0x11e   : > { %v403_v30 = vadd.f32 %v402_v29, %v330_v28  ;;  %v473_v31 = vpop.f32.mrb[0].mxu1  ;;  %v404_v32 = vpop.f32.mrb[1].mxu0 }
 0x11f   : > { %v474_v33 = vadd.f32 %v473_v31, %v330_v28  ;;  %v405_v34 = vadd.f32 %v404_v32, %v330_v28  ;;  %v475_v35 = vpop.f32.mrb[1].mxu1 }
 0x120   : > { %v478_v36 = vmax.f32 %v403_v30, 0.0  ;;  %v476_v37 = vadd.f32 %v475_v35, %v330_v28 }
 0x121   : > { %v480_v38 = vmax.f32 %v474_v33, 0.0  ;;  %v479_v39 = vmax.f32 %v405_v34, 0.0 }
 0x122   : > { %v481_v40 = vmax.f32 %v476_v37, 0.0 }
 0x123   : > { %v486_v41 = vcombine.low %v478_v36, %v479_v39 }
 0x124   : > { %v487_v42 = vcombine.low %v480_v38, %v481_v40 }
 0x125   : > { %490 = vst [vmem:[%s287_s30] sm:$0xff] %v486_v41 }
 0x126   : > { %491 = vst [vmem:[%s287_s30 + $0x8] sm:$0xff] %v487_v42 }
 0x127 PF: > { %s13_s18 = sadd.s32 1, %s747_s18   ;;  %s985_s12 = smov %s727_s13 }
 0x128   : > { %p10_p12 = scmp.ge.s32.totalorder %s13_s18, 6   ;;  %s986_s13 = smov %s822_s25 }
 0x129   : > { %s987_s14 = smov %s739_s16  ;;  %s988_s15 = smov %s743_s17 }
 0x12a   : > { %s989_s16 = smov %s992_s19  ;;  %s990_s17 = smov %s996_s20 }
 0x12b   :  { %12 = sbr.rel (!%p10_p12) target bundleno = 4 (0x4), region = 90 }

// kernel: decoder_resnet_forward.43
= control target key start
LH: loop header
LB: loop body
LE: loop exit
PB: predicated region body
PF: predicated region fallthrough
CT: control target
= control target key end

     0   :  { %s365_s9 = smov 0   ;;  %s367_s10 = smov 0   ;;  %s439_s0 = inlined_call_operand.vmem [shape: f32[2,4,1024], index: 0, kind: input, shape index: {}]   ;;  %s440_s1 = inlined_call_operand.vmem [shape: f32[4,1], index: 1, kind: output, shape index: {0}]   ;;  %s441_s2 = inlined_call_operand.vmem [shape: f32[4,1], index: 2, kind: output, shape index: {1}]  }
   0x1   :  { %s369_s11 = smov 0   ;;  %s371_s12 = smov 0  }
   0x2   :  { %s373_s13 = smov 0  }
   0x3 LB: > { %s22_s14 = sadd.s32 1, %s339_s11  ;;  %s25_s15 = sadd.s32 1, %s343_s12  ;;  %s347_s13 = sphi %s373_s13, %s13_s13   ;;  %s343_s12 = sphi %s371_s12, %s445_s12   ;;  %s339_s11 = sphi %s369_s11, %s444_s11   ;;  %s335_s10 = sphi %s367_s10, %s443_s10   ;;  %s331_s9 = sphi %s365_s9, %s442_s9  }
   0x4   : > { %p23_p0 = scmp.ge.s32.totalorder %s22_s14, 2  ;;  %p260_p1 = scmp.ge.s32.totalorder %s347_s13, 1 }
   0x5   : > { %p124_p2 = scmp.lt.s32.totalorder %s347_s13, 5 }
   0x6   : > { %s447_s14 = smov (%p23_p0, %s22_s14), 0  ;;  %s449_s15 = smov (!%p23_p0, %s25_s15), %s343_s12 }
   0x7   : > { %p125_p3 = pnand %p260_p1, %p124_p2  ;;  %p27_p4 = scmp.ge.s32.totalorder %s449_s15, 2 }
   0x8   : > { %s261_s16 = sshll.u32 (!%p125_p3), %s331_s9, 2  ;;  %p146_p5 = scmp.lt.s32.totalorder (!%p125_p3), %s335_s10, 1 }
   0x9   : > { %s451_s15 = smov (%p27_p4, %s449_s15), 0  ;;  %128 = sbr.rel (%p125_p3) target bundleno = 183 (0xb7), region = 24 }
   0xa   : > { %p148_p6 = scmp.lt.s32.totalorder (!%p125_p3), %s261_s16, 7  ;;  %p155_p7 = scmp.eq.s32.totalorder (!%p125_p3), %s335_s10, 0 }
   0xb   : > { %p156_p8 = scmp.eq.s32.totalorder (!%p125_p3), %s331_s9, 0 }
   0xd   : > { %p157_p9 = pnand (!%p125_p3), %p156_p8, %p155_p7 }
  0x10   : > { %s453_s10 = smov (!%p146_p5, %s335_s10), 1  ;;  %s455_s16 = smov (!%p148_p6, %s261_s16), 7 }
  0x11   : > { %s262_s17 = sshll.u32 %s453_s10, 3  ;;  %160 = sbr.rel (%p157_p9) target bundleno = 24 (0x18), region = 28  ;;  %vm161_vm0 = vcmask (!%p157_p9), 3072   ;;  %v349_v0 = vmov (!%p157_p9), 0.0  }
  0x12   : > { %s151_s18 = sadd.s32 %s262_s17, %s455_s16  ;;  %162 = vst.msk [vmem:[%s440_s1] sm:$0xf] (!%p157_p9), %vm161_vm0, %v349_v0  ;;  %163 = vst.msk [vmem:[%s441_s2] sm:$0xf] (!%p157_p9), %vm161_vm0, %v349_v0 }
  0x13   : > { %s263_s19 = sshll.u32 %s151_s18, 2 }
  0x14   : > { %s153_s22 = scalar_lea.vmem %s439_s0, %s263_s19 }
  0x18 PF: > { %v164_v1 = vld [vmem:[%s153_s22] sm:$0xff]  ;;  %v165_v2 = vld [vmem:[%s153_s22 + $0x8] sm:$0xff]  ;;  %vm173_vm1 = vcmask 1043456   ;;  %vm184_vm2 = vcmask 3072  }
  0x19   : > { %v169_v3 = vcombine.high %v164_v1, %v164_v1  ;;  %v170_v4 = vcombine.high %v165_v2, %v165_v2  ;;  %v174_v5 = vsel %vm173_vm1, %v164_v1, 0.0  ;;  %v187_v6 = vmul.f32 %v164_v1, %v164_v1  ;;  %v166_v23 = vld [vmem:[%s440_s1] sm:$0xf] }
  0x1a   : > { %v188_v7 = vmul.f32 %v165_v2, %v165_v2  ;;  %v177_v9 = vsel %vm173_vm1, %v165_v2, 0.0  ;;  %v186_v26 = vld [vmem:[%s441_s2] sm:$0xf] }
  0x1b   : > { %v175_v8 = vsel %vm173_vm1, %v169_v3, 0.0  ;;  %v191_v11 = vcombine.high %v187_v6, %v187_v6  ;;  %v195_v13 = vsel %vm173_vm1, %v187_v6, 0.0  ;;  %v179_v14 = vsel %vm173_vm1, %v170_v4, 0.0 }
  0x1c   : > { %v176_v10 = vadd.f32 %v175_v8, %v174_v5  ;;  %v192_v12 = vcombine.high %v188_v7, %v188_v7  ;;  %v198_v17 = vsel %vm173_vm1, %v188_v7, 0.0 }
  0x1d   : > { %v196_v16 = vsel %vm173_vm1, %v191_v11, 0.0 }
  0x1e   : > { %v178_v15 = vadd.f32 %v177_v9, %v176_v10  ;;  %v197_v18 = vadd.f32 %v196_v16, %v195_v13  ;;  %v200_v20 = vsel %vm173_vm1, %v192_v12, 0.0 }
  0x20   : > { %v180_v19 = vadd.f32 %v179_v14, %v178_v15  ;;  %v199_v21 = vadd.f32 %v198_v17, %v197_v18 }
  0x22   : > { %181 = vadd.xlane.f32.xlu0 %v180_v19  ;;  %v201_v22 = vadd.f32 %v200_v20, %v199_v21 }
  0x26   : > { %202 = vadd.xlane.f32.xlu0 %v201_v22 }
  0xaf   : > { %v182_v24 = vpop.xlane.xlu0 %181 }
  0xb0   : > { %v183_v25 = vadd.f32 %v182_v24, %v166_v23 }
  0xb2   : > { %185 = vst.msk [vmem:[%s440_s1] sm:$0xf] %vm184_vm2, %v183_v25 }
  0xb3   : > { %v203_v27 = vpop.xlane.xlu0 %202 }
  0xb4   : > { %v204_v28 = vadd.f32 %v203_v27, %v186_v26 }
  0xb6   : > { %205 = vst.msk [vmem:[%s441_s2] sm:$0xf] %vm184_vm2, %v204_v28 }
  0xb7 PF: > { %s13_s13 = sadd.s32 1, %s347_s13   ;;  %s442_s9 = smov %s339_s11 }
  0xb8   : > { %p10_p10 = scmp.ge.s32.totalorder %s13_s13, 6   ;;  %s443_s10 = smov %s343_s12 }
  0xb9   : > { %s444_s11 = smov %s447_s14  ;;  %s445_s12 = smov %s451_s15 }
  0xba   :  { %12 = sbr.rel (!%p10_p10) target bundleno = 3 (0x3), region = 62 }

// kernel: decoder_resnet_forward.44
= control target key start
LH: loop header
LB: loop body
LE: loop exit
PB: predicated region body
PF: predicated region fallthrough
CT: control target
= control target key end

     0   :  { %s452_s12 = smov 0   ;;  %s454_s13 = smov 0   ;;  %s512_s0 = inlined_call_operand.vmem [shape: f32[2,4,1024], index: 0, kind: input, shape index: {}]   ;;  %s513_s1 = inlined_call_operand.vmem [shape: f32[4,1], index: 1, kind: input, shape index: {}]   ;;  %s514_s2 = inlined_call_operand.vmem [shape: f32[4,1], index: 2, kind: input, shape index: {}]   ;;  %s515_s3 = inlined_call_operand.vmem [shape: f32[2,4,1024], index: 3, kind: output, shape index: {}]  }
   0x1   :  { %s456_s14 = smov 0   ;;  %s458_s15 = smov 0  }
   0x2   :  { %s460_s16 = smov 0  }
   0x3 LB: > { %s22_s17 = sadd.s32 1, %s420_s14  ;;  %s25_s18 = sadd.s32 1, %s424_s15  ;;  %s428_s16 = sphi %s460_s16, %s13_s16   ;;  %s424_s15 = sphi %s458_s15, %s519_s15   ;;  %s420_s14 = sphi %s456_s14, %s518_s14   ;;  %s416_s13 = sphi %s454_s13, %s517_s13   ;;  %s412_s12 = sphi %s452_s12, %s516_s12  }
   0x4   : > { %p23_p0 = scmp.ge.s32.totalorder %s22_s17, 2  ;;  %p338_p1 = scmp.ge.s32.totalorder %s428_s16, 1 }
   0x5   : > { %p158_p2 = scmp.lt.s32.totalorder %s428_s16, 5 }
   0x6   : > { %s521_s17 = smov (%p23_p0, %s22_s17), 0  ;;  %s523_s18 = smov (!%p23_p0, %s25_s18), %s424_s15 }
   0x7   : > { %p159_p3 = pnand %p338_p1, %p158_p2  ;;  %p27_p4 = scmp.ge.s32.totalorder %s523_s18, 2 }
   0x8   : > { %v212_v0 = vld [vmem:[%s513_s1] sm:$0xf] (!%p159_p3)  ;;  %v430_v1 = vmov (!%p159_p3), 0   ;;  %s339_s23 = sshll.u32 (!%p159_p3), %s412_s12, 2  ;;  %p191_p5 = scmp.lt.s32.totalorder (!%p159_p3), %s416_s13, 1  ;;  %v220_v5 = vlaneseq (!%p159_p3) }
   0x9   : > { %s525_s18 = smov (%p27_p4, %s523_s18), 0  ;;  %162 = sbr.rel (%p159_p3) target bundleno = 148 (0x94), region = 32 }
   0xa   : > { %389 = vset.pattern.permute.xlu0 (!%p159_p3), %v430_v1  ;;  %v227_v2 = vld [vmem:[%s514_s2] sm:$0xf] (!%p159_p3)  ;;  %p193_p6 = scmp.lt.s32.totalorder (!%p159_p3), %s339_s23, 7  ;;  %v431_v3 = vmov (!%p159_p3), 839922192   ;;  %v221_v7 = vshrl.u32 (!%p159_p3), %v220_v5, 7 }
   0xb   : > { %215 = vperm.xlu0 (!%p159_p3), %389, %v212_v0   ;;  %v218_v4 = vunpack.c.l.s4 (!%p159_p3), %v431_v3 }
   0xd   : > { %v219_v6 = vunpack.c.0.s8 (!%p159_p3), %v218_v4 }
   0xf   : > { %230 = vperm.xlu0 (!%p159_p3), %389, %v227_v2   ;;  %v222_v8 = vsub.s32 (!%p159_p3), %v219_v6, %v221_v7 }
  0x10   : > { %s527_s13 = smov (!%p191_p5, %s416_s13), 1  ;;  %s529_s23 = smov (!%p193_p6, %s339_s23), 7 }
  0x11   : > { %s340_s24 = sshll.u32 %s527_s13, 3 }
  0x12   : > { %s196_s25 = sadd.s32 %s340_s24, %s529_s23 }
  0x13   : > { %s341_s26 = sshll.u32 %s196_s25, 2 }
  0x14   : > { %s198_s29 = scalar_lea.vmem %s512_s0, %s341_s26  ;;  %s208_s5 = scalar_lea.vmem %s515_s3, %s341_s26 }
  0x15   : > { %v210_v11 = vld [vmem:[%s198_s29] sm:$0xff]  ;;  %v211_v12 = vld [vmem:[%s198_s29 + $0x8] sm:$0xff] }
  0x8a   : > { %v216_v9 = vpop.permute.xlu0 %215 }
  0x8b   : > { %v223_v10 = vrot.slane %v216_v9, %v222_v8 }
  0x8d   : > { %v225_v14 = vmul.f32 %v223_v10, %v210_v11  ;;  %v226_v15 = vmul.f32 %v223_v10, %v211_v12 }
  0x8e   : > { %v231_v13 = vpop.permute.xlu0 %230 }
  0x8f   : > { %v238_v16 = vrot.slane %v231_v13, %v222_v8 }
  0x91   : > { %v240_v17 = vadd.f32 %v238_v16, %v225_v14  ;;  %v241_v18 = vadd.f32 %v238_v16, %v226_v15 }
  0x93   : > { %242 = vst [vmem:[%s208_s5] sm:$0xff] %v240_v17  ;;  %243 = vst [vmem:[%s208_s5 + $0x8] sm:$0xff] %v241_v18 }
  0x94 PF: > { %s13_s16 = sadd.s32 1, %s428_s16   ;;  %s516_s12 = smov %s420_s14 }
  0x95   : > { %p10_p7 = scmp.ge.s32.totalorder %s13_s16, 6   ;;  %s517_s13 = smov %s424_s15 }
  0x96   : > { %s518_s14 = smov %s521_s17  ;;  %s519_s15 = smov %s525_s18 }
  0x97   :  { %12 = sbr.rel (!%p10_p7) target bundleno = 3 (0x3), region = 62 }

// kernel: tile.33
= control target key start
LH: loop header
LB: loop body
LE: loop exit
PB: predicated region body
PF: predicated region fallthrough
CT: control target
= control target key end

     0   :  { %s22_s0 = inlined_call_operand.vmem [shape: f32[4], index: 0, kind: input, shape index: {}]   ;;  %s23_s1 = inlined_call_operand.vmem [shape: f32[4,4], index: 1, kind: output, shape index: {}]  }
   0x1   :  { %v4_v0 = vld [vmem:[%s22_s0] ss:$0 sm:$0xff] }
   0x2   :  { %5 = vst [vmem:[%s23_s1] sm:$0xf] %v4_v0 }

// kernel: tile.2
= control target key start
LH: loop header
LB: loop body
LE: loop exit
PB: predicated region body
PF: predicated region fallthrough
CT: control target
= control target key end

     0   :  { %s34_s8 = smov 125   ;;  %vm7_vm0 = vcmask 7168   ;;  %s35_s11 = smov 126   ;;  %s61_s0 = inlined_call_operand.vmem [shape: f32[4,4], index: 0, kind: input, shape index: {}]   ;;  %s62_s1 = inlined_call_operand.vmem [shape: f32[16,1], index: 1, kind: output, shape index: {}]  }
   0x1   :  { %v4_v0 = vld [vmem:[%s61_s0] sm:$0xf]  ;;  %s33_s0 = smov 127  }
   0x2   :  { %5 = vst [vmem:[#allocation0] sm:$0xf] %v4_v0 }
   0x9   :  { %v9_v1 = vld [vmem:[#allocation0] sm:$0xf]  }
   0xa   :  { %v21_v2 = vld [vmem:[#allocation0] sm:$0xf]   ;;  %10 = vrot.lane.b32.xlu0 %v9_v1, %s33_s0 }
   0xb   :  { %22 = vrot.lane.b32.xlu1 %v21_v2, %s34_s8  ;;  %v6_v3 = vld [vmem:[#allocation0] sm:$0xf]  }
   0xc   :  { %v15_v4 = vld [vmem:[#allocation0] sm:$0xf]   ;;  %8 = vst.msk [vmem:[%s62_s1] ss:$4 sm:$0xf] %vm7_vm0, %v6_v3  }
   0xe   :  { %16 = vrot.lane.b32.xlu0 %v15_v4, %s35_s11 }
  0x7c   :  { %v11_v5 = vpop.permute.xlu0 %10  }
  0x7d   :  { %v23_v6 = vpop.permute.xlu1 %22   ;;  %27 = vst.msk [vmem:[%s62_s1 + $0x1] ss:$4 sm:$0xf] %vm7_vm0, %v11_v5  }
  0x7e   :  { %29 = vst.msk [vmem:[%s62_s1 + $0x3] ss:$4 sm:$0xf] %vm7_vm0, %v23_v6  }
  0x80   :  { %v17_v7 = vpop.permute.xlu0 %16  }
  0x81   :  { %28 = vst.msk [vmem:[%s62_s1 + $0x2] ss:$4 sm:$0xf] %vm7_vm0, %v17_v7  }

// kernel: decoder_resnet_forward.45
= control target key start
LH: loop header
LB: loop body
LE: loop exit
PB: predicated region body
PF: predicated region fallthrough
CT: control target
= control target key end

     0   :  { %s762_s12 = smov 0   ;;  %s764_s13 = smov 0   ;;  %s958_s0 = inlined_call_operand.vmem [shape: f32[2,36,1024], index: 0, kind: input, shape index: {}]   ;;  %s959_s1 = inlined_call_operand.vmem [shape: f32[16,36], index: 1, kind: input, shape index: {}]   ;;  %s960_s2 = inlined_call_operand.vmem [shape: f32[16,1], index: 2, kind: input, shape index: {}]   ;;  %s961_s3 = inlined_call_operand.vmem [shape: f32[2,16,1024], index: 3, kind: output, shape index: {}]  }
   0x1   :  { %s766_s14 = smov 0   ;;  %s768_s15 = smov 0  }
   0x2   :  { %s770_s16 = smov 0   ;;  %s772_s17 = smov 0  }
   0x3   :  { %s774_s18 = smov 0  }
   0x4 LB: > { %s22_s19 = sadd.s32 1, %s730_s16  ;;  %s25_s20 = sadd.s32 1, %s734_s17  ;;  %s738_s18 = sphi %s774_s18, %s13_s18   ;;  %s734_s17 = sphi %s772_s17, %s968_s17   ;;  %s730_s16 = sphi %s770_s16, %s967_s16   ;;  %s726_s15 = sphi %s768_s15, %s966_s15   ;;  %s722_s14 = sphi %s766_s14, %s965_s14   ;;  %s718_s13 = sphi %s764_s13, %s964_s13   ;;  %s714_s12 = sphi %s762_s12, %s963_s12  }
   0x5   : > { %p23_p0 = scmp.ge.s32.totalorder %s22_s19, 2  ;;  %s584_s21 = sadd.s32 4294967295, %s738_s18  }
   0x6   : > { %p41_p1 = scmp.ne.s32.totalorder %s718_s13, %s714_s12  ;;  %p42_p2 = scmp.eq.s32.totalorder %s738_s18, 0 }
   0x7   : > { %s970_s19 = smov (%p23_p0, %s22_s19), 0  ;;  %s972_s20 = smov (!%p23_p0, %s25_s20), %s734_s17 }
   0x8   : > { %p27_p3 = scmp.ge.s32.totalorder %s972_s20, 2  ;;  %p115_p4 = scmp.eq.s32.totalorder %s584_s21, 3 }
   0x9   : > { %s30_s22 = ssub.s32 %s730_s16, %s970_s19  ;;  %p43_p5 = por %p42_p2, %p41_p1 }
   0xa   : > { %s974_s20 = smov (%p27_p3, %s972_s20), 0  ;;  %p810_p6 = por %p115_p4, %p41_p1 }
   0xb   : > { %s29_s24 = ssub.s32 %s734_s17, %s974_s20  ;;  %s34_s26 = sadd.s32 1, %s718_s13 }
   0xc   : > { %s31_s25 = sor.u32 %s30_s22, %s29_s24  ;;  %p587_p8 = scmp.ge.s32.totalorder %s738_s18, 4 }
   0xd   : > { %p32_p7 = scmp.eq.s32.totalorder %s31_s25, 0 }
   0xe   : > { %143 = sbr.rel (%p587_p8) target bundleno = 39 (0x27), region = 24 }
   0xf   : > { %s818_s27 = scalar_select %p32_p7, %s718_s13, %s34_s26  }
  0x15   : > { %146 = sbr.rel (!%p43_p5) target bundleno = 39 (0x27), region = 28  ;;  %s148_s28 = sand.u32 (%p43_p5), 1, %s718_s13  }
  0x16   : > { %s622_s29 = smul.u32 (%p43_p5), 160, %s148_s28  ;;  %s588_s30 = sshll.u32 (%p43_p5), %s730_s16, 2 }
  0x17   : > { %s623_s4 = smul.u32 (%p43_p5), 40, %s734_s17 }
  0x18   : > { %s832_s10 = scalar_lea.vmem (%p43_p5), [#allocation2], %s622_s29 }
  0x19   : > { %s153_s5 = sadd.s32 (%p43_p5), %s623_s4, %s588_s30 }
  0x1a   : > { %s589_s6 = sshll.u32 (%p43_p5), %s153_s5, 3 }
  0x1b   : > { %s827_s9 = scalar_lea.vmem (%p43_p5), %s958_s0, %s589_s6 }
  0x1c   : > { %v168_v0 = vld [vmem:[%s827_s9] sm:$0xff]  ;;  %v170_v1 = vld [vmem:[%s827_s9 + $0x8] sm:$0xff]  ;;  %v172_v2 = vld [vmem:[%s827_s9 + $0x10] sm:$0xff] }
  0x1d   : > { %169 = vst [vmem:[%s832_s10] sm:$0xff] %v168_v0  ;;  %171 = vst [vmem:[%s832_s10 + $0x8] sm:$0xff] %v170_v1  ;;  %v174_v3 = vld [vmem:[%s827_s9 + $0x18] sm:$0xff]  ;;  %v176_v4 = vld [vmem:[%s827_s9 + $0x40] sm:$0xff] }
  0x1e   : > { %173 = vst [vmem:[%s832_s10 + $0x10] sm:$0xff] %v172_v2  ;;  %v178_v5 = vld [vmem:[%s827_s9 + $0x48] sm:$0xff]  ;;  %175 = vst [vmem:[%s832_s10 + $0x18] sm:$0xff] %v174_v3  ;;  %v180_v6 = vld [vmem:[%s827_s9 + $0x50] sm:$0xff] }
  0x1f   : > { %177 = vst [vmem:[%s832_s10 + $0x20] sm:$0xff] %v176_v4  ;;  %179 = vst [vmem:[%s832_s10 + $0x28] sm:$0xff] %v178_v5  ;;  %v182_v7 = vld [vmem:[%s827_s9 + $0x58] sm:$0xff]  ;;  %v184_v8 = vld [vmem:[%s827_s9 + $0x80] sm:$0xff] }
  0x20   : > { %181 = vst [vmem:[%s832_s10 + $0x30] sm:$0xff] %v180_v6  ;;  %183 = vst [vmem:[%s832_s10 + $0x38] sm:$0xff] %v182_v7  ;;  %v186_v9 = vld [vmem:[%s827_s9 + $0x88] sm:$0xff]  ;;  %v188_v10 = vld [vmem:[%s827_s9 + $0x90] sm:$0xff] }
  0x21   : > { %185 = vst [vmem:[%s832_s10 + $0x40] sm:$0xff] %v184_v8  ;;  %v190_v11 = vld [vmem:[%s827_s9 + $0x98] sm:$0xff]  ;;  %187 = vst [vmem:[%s832_s10 + $0x48] sm:$0xff] %v186_v9  ;;  %v192_v12 = vld [vmem:[%s827_s9 + $0xc0] sm:$0xff] }
  0x22   : > { %189 = vst [vmem:[%s832_s10 + $0x50] sm:$0xff] %v188_v10  ;;  %191 = vst [vmem:[%s832_s10 + $0x58] sm:$0xff] %v190_v11  ;;  %v194_v13 = vld [vmem:[%s827_s9 + $0xc8] sm:$0xff]  ;;  %v196_v14 = vld [vmem:[%s827_s9 + $0xd0] sm:$0xff] }
  0x23   : > { %193 = vst [vmem:[%s832_s10 + $0x60] sm:$0xff] %v192_v12  ;;  %195 = vst [vmem:[%s832_s10 + $0x68] sm:$0xff] %v194_v13  ;;  %v198_v15 = vld [vmem:[%s827_s9 + $0xd8] sm:$0xff]  ;;  %v200_v16 = vld [vmem:[%s827_s9 + $0x100] sm:$0xff] }
  0x24   : > { %197 = vst [vmem:[%s832_s10 + $0x70] sm:$0xff] %v196_v14  ;;  %v202_v17 = vld [vmem:[%s827_s9 + $0x108] sm:$0xff]  ;;  %199 = vst [vmem:[%s832_s10 + $0x78] sm:$0xff] %v198_v15  ;;  %v204_v18 = vld [vmem:[%s827_s9 + $0x110] sm:$0xff] }
  0x25   : > { %201 = vst [vmem:[%s832_s10 + $0x80] sm:$0xff] %v200_v16  ;;  %203 = vst [vmem:[%s832_s10 + $0x88] sm:$0xff] %v202_v17  ;;  %v206_v19 = vld [vmem:[%s827_s9 + $0x118] sm:$0xff] }
  0x26   : > { %205 = vst [vmem:[%s832_s10 + $0x90] sm:$0xff] %v204_v18  ;;  %207 = vst [vmem:[%s832_s10 + $0x98] sm:$0xff] %v206_v19 }
  0x27 PF: > { %p590_p9 = scmp.ge.s32.totalorder %s738_s18, 1  ;;  %p212_p10 = scmp.lt.s32.totalorder %s738_s18, 5 }
  0x29   : > { %p213_p11 = pnand %p590_p9, %p212_p10 }
  0x2a   : > { %s219_s11 = sand.u32 (!%p213_p11), 1, %s714_s12   ;;  %v740_v20 = vmov (!%p213_p11), 0.0   ;;  %v265_v21 = vld [vmem:[%s960_s2] sm:$0xff] (!%p213_p11)  ;;  %v741_v22 = vmov (!%p213_p11), 0   ;;  %v266_v23 = vld [vmem:[%s960_s2 + $0x8] sm:$0xff] (!%p213_p11)  ;;  %vm284_vm0 = vcmask (!%p213_p11), 1043456  }
  0x2b   : > { %216 = sbr.rel (%p213_p11) target bundleno = 292 (0x124), region = 51  ;;  %361 = vmatprep.mubr.f32.mxu0 (!%p213_p11), %v740_v20  ;;  %438 = vmatprep.mubr.f32.mxu1 (!%p213_p11), %v740_v20  ;;  %v263_v52 = vld [vmem:[%s959_s1] sm:$0xff] (!%p213_p11)  ;;  %vm277_vm1 = vcmask (!%p213_p11), 293888   ;;  %v264_v53 = vld [vmem:[%s959_s1 + $0x8] sm:$0xff] (!%p213_p11)  ;;  %s591_s6 = sshll.u32 (!%p213_p11), %s219_s11, 6 }
  0x2c   : > { %s624_s21 = smul.u32 (!%p213_p11), 160, %s219_s11  ;;  %683 = vset.pattern.permute.xlu0 (!%p213_p11), %v741_v22  ;;  %s912_s7 = scalar_lea.vmem (!%p213_p11), [#allocation3], %s591_s6 }
  0x2d   : > { %269 = vperm.xlu0 (!%p213_p11), %683, %v265_v21  }
  0x2e   : > { %s882_s28 = scalar_lea.vmem (!%p213_p11), [#allocation2], %s624_s21 }
  0x2f   : > { %v244_v24 = vld [vmem:[%s882_s28 + $0x8] sm:$0xff] (!%p213_p11)  ;;  %v246_v26 = vld [vmem:[%s882_s28 + $0x18] sm:$0xff] (!%p213_p11)  ;;  %v243_v29 = vld [vmem:[%s882_s28] sm:$0xff] (!%p213_p11) }
  0x30   : > { %v248_v25 = vld [vmem:[%s882_s28 + $0x28] sm:$0xff] (!%p213_p11)  ;;  %v250_v28 = vld [vmem:[%s882_s28 + $0x38] sm:$0xff] (!%p213_p11)  ;;  %v247_v30 = vld [vmem:[%s882_s28 + $0x20] sm:$0xff] (!%p213_p11) }
  0x31   : > { %v606_v27 = vpack.c.bf16 (!%p213_p11), %v248_v25, %v244_v24  ;;  %v614_v31 = vpack.c.bf16 (!%p213_p11), %v250_v28, %v246_v26  ;;  %v608_v32 = vpack.c.bf16 (!%p213_p11), %v247_v30, %v243_v29  ;;  %v245_v33 = vld [vmem:[%s882_s28 + $0x10] sm:$0xff] (!%p213_p11)  ;;  %v252_v35 = vld [vmem:[%s882_s28 + $0x48] sm:$0xff] (!%p213_p11)  ;;  %v254_v38 = vld [vmem:[%s882_s28 + $0x58] sm:$0xff] (!%p213_p11)  ;;  %274 = vperm.xlu0 (!%p213_p11), %683, %v266_v23  }
  0x32   : > { %v249_v34 = vld [vmem:[%s882_s28 + $0x30] sm:$0xff]  ;;  %v256_v37 = vld [vmem:[%s882_s28 + $0x68] sm:$0xff]  ;;  %v258_v39 = vld [vmem:[%s882_s28 + $0x78] sm:$0xff]  ;;  %s601_s12 = sshll.u32 (%p810_p6), %s722_s14, 2  ;;  %s602_s8 = sshll.u32 (%p810_p6), %s726_s15, 4 }
  0x33   : > { %607 = vmatprep.subr.bf16.mxu0 %v606_v27  ;;  %v616_v36 = vpack.c.bf16 %v249_v34, %v245_v33  ;;  %615 = vmatprep.subr.bf16.mxu1 %v614_v31  ;;  %v610_v40 = vpack.c.bf16 %v256_v37, %v252_v35  ;;  %v618_v41 = vpack.c.bf16 %v258_v39, %v254_v38  ;;  %v251_v42 = vld [vmem:[%s882_s28 + $0x40] sm:$0xff]  ;;  %v253_v44 = vld [vmem:[%s882_s28 + $0x50] sm:$0xff]  ;;  %v260_v48 = vld [vmem:[%s882_s28 + $0x88] sm:$0xf]  ;;  %s476_s9 = sadd.s32 (%p810_p6), %s602_s8, %s601_s12 }
  0x34   : > { %609 = vmatpush1.bf16.msra.mxu0 %v608_v32  ;;  %v255_v43 = vld [vmem:[%s882_s28 + $0x60] sm:$0xff]  ;;  %v257_v46 = vld [vmem:[%s882_s28 + $0x70] sm:$0xff]  ;;  %v262_v49 = vld [vmem:[%s882_s28 + $0x98] sm:$0xf]  ;;  %s603_s23 = sshll.u32 (%p810_p6), %s476_s9, 3 }
  0x35   : > { %617 = vmatpush1.bf16.msra.mxu1 %v616_v36  ;;  %v612_v45 = vpack.c.bf16 %v255_v43, %v251_v42  ;;  %611 = vmatprep.subr.bf16.mxu0 %v610_v40  ;;  %v620_v47 = vpack.c.bf16 %v257_v46, %v253_v44  ;;  %v259_v50 = vld [vmem:[%s882_s28 + $0x80] sm:$0xf]  ;;  %v261_v51 = vld [vmem:[%s882_s28 + $0x90] sm:$0xf]  ;;  %s478_s21 = scalar_lea.vmem (%p810_p6), %s961_s3, %s603_s23 }
  0x36   : > { %619 = vmatprep.subr.bf16.mxu1 %v618_v41 }
  0x38   : > { %613 = vmatpush1.bf16.msra.mxu0 %v612_v45 }
  0x39   : > { %621 = vmatpush1.bf16.msra.mxu1 %v620_v47  ;;  %592 = vmatprep.subr.msk.mxu0 %vm284_vm0, %v260_v48 }
  0x3a   : > { %596 = vmatprep.subr.msk.mxu1 %vm284_vm0, %v262_v49 }
  0x3c   : > { %593 = vmatpush1.msk.msra.mxu0 %vm284_vm0, %v259_v50 }
  0x3d   : > { %597 = vmatpush1.msk.msra.mxu1 %vm284_vm0, %v261_v51  ;;  %594 = vmatmul.mubr.msk.f32.vlgmr.msra.gmra.mrb[0].mxu0 %vm277_vm1, %v263_v52 }
  0x3e   : > { %598 = vmatmul.mubr.msk.f32.vlgmr.msra.gmra.mrb[0].mxu1 %vm277_vm1, %v263_v52  ;;  %367 = vmatprep.mubr.f32.mxu0 %v740_v20 }
  0x3f   : > { %444 = vmatprep.mubr.f32.mxu1 %v740_v20 }
  0x41   : > { %595 = vmatmul.mubr.msk.f32.gmra.mrb[2].mxu0 %vm277_vm1, %v264_v53 }
  0x42   : > { %599 = vmatmul.mubr.msk.f32.gmra.mrb[2].mxu1 %vm277_vm1, %v264_v53 }
  0xac   : > { %v270_v54 = vpop.permute.xlu0 %269 }
  0xb0   : > { %v275_v1 = vpop.permute.xlu0 %274 }
 0x110   : > { %v363_v55 = vpop.f32.mrb[0].mxu0 }
 0x111   : > { %v364_v56 = vadd.f32 %v363_v55, %v270_v54  ;;  %v440_v57 = vpop.f32.mrb[0].mxu1  ;;  %v365_v58 = vpop.f32.mrb[1].mxu0 }
 0x112   : > { %v441_v59 = vadd.f32 %v440_v57, %v270_v54  ;;  %v366_v60 = vadd.f32 %v365_v58, %v270_v54  ;;  %v442_v61 = vpop.f32.mrb[1].mxu1 }
 0x113   : > { %v451_v62 = vmax.f32 %v364_v56, 0.0  ;;  %v443_v63 = vadd.f32 %v442_v61, %v270_v54 }
 0x114   : > { %v453_v0 = vmax.f32 %v441_v59, 0.0  ;;  %v452_v2 = vmax.f32 %v366_v60, 0.0  ;;  %v369_v3 = vpop.f32.mrb[2].mxu0 }
 0x115   : > { %459 = vst [vmem:[%s912_s7] sm:$0xff] %v451_v62  ;;  %v454_v4 = vmax.f32 %v443_v63, 0.0  ;;  %v370_v5 = vadd.f32 %v369_v3, %v275_v1  ;;  %v446_v6 = vpop.f32.mrb[2].mxu1  ;;  %v371_v7 = vpop.f32.mrb[3].mxu0  ;;  %473 = sbr.rel (!%p810_p6) target bundleno = 292 (0x124), region = 59 }
 0x116   : > { %461 = vst [vmem:[%s912_s7 + $0x10] sm:$0xff] %v453_v0  ;;  %460 = vst [vmem:[%s912_s7 + $0x8] sm:$0xff] %v452_v2  ;;  %v447_v8 = vadd.f32 %v446_v6, %v275_v1  ;;  %v372_v9 = vadd.f32 %v371_v7, %v275_v1  ;;  %v448_v10 = vpop.f32.mrb[3].mxu1 }
 0x117   : > { %462 = vst [vmem:[%s912_s7 + $0x18] sm:$0xff] %v454_v4  ;;  %v455_v11 = vmax.f32 %v370_v5, 0.0  ;;  %v449_v12 = vadd.f32 %v448_v10, %v275_v1 }
 0x118   : > { %v457_v13 = vmax.f32 %v447_v8, 0.0  ;;  %v456_v14 = vmax.f32 %v372_v9, 0.0 }
 0x119   : > { %463 = vst [vmem:[%s912_s7 + $0x20] sm:$0xff] %v455_v11  ;;  %v458_v15 = vmax.f32 %v449_v12, 0.0 }
 0x11a   : > { %465 = vst [vmem:[%s912_s7 + $0x30] sm:$0xff] %v457_v13  ;;  %464 = vst [vmem:[%s912_s7 + $0x28] sm:$0xff] %v456_v14 }
 0x11b   : > { %466 = vst [vmem:[%s912_s7 + $0x38] sm:$0xff] %v458_v15 }
 0x11c   : > { %v491_v16 = vld [vmem:[%s912_s7] sm:$0xff] }
 0x11d   : > { %v493_v17 = vld [vmem:[%s912_s7 + $0x8] sm:$0xff]  ;;  %v495_v18 = vld [vmem:[%s912_s7 + $0x10] sm:$0xff]  ;;  %492 = vst [vmem:[%s478_s21] sm:$0xff] %v491_v16 }
 0x11e   : > { %v497_v19 = vld [vmem:[%s912_s7 + $0x18] sm:$0xff]  ;;  %494 = vst [vmem:[%s478_s21 + $0x8] sm:$0xff] %v493_v17  ;;  %496 = vst [vmem:[%s478_s21 + $0x10] sm:$0xff] %v495_v18 }
 0x11f   : > { %498 = vst [vmem:[%s478_s21 + $0x18] sm:$0xff] %v497_v19 }
 0x120   : > { %v499_v20 = vld [vmem:[%s912_s7 + $0x20] sm:$0xff] }
 0x121   : > { %v501_v21 = vld [vmem:[%s912_s7 + $0x28] sm:$0xff]  ;;  %v503_v22 = vld [vmem:[%s912_s7 + $0x30] sm:$0xff]  ;;  %500 = vst [vmem:[%s478_s21 + $0x40] sm:$0xff] %v499_v20 }
 0x122   : > { %v505_v23 = vld [vmem:[%s912_s7 + $0x38] sm:$0xff]  ;;  %502 = vst [vmem:[%s478_s21 + $0x48] sm:$0xff] %v501_v21  ;;  %504 = vst [vmem:[%s478_s21 + $0x50] sm:$0xff] %v503_v22 }
 0x123   : > { %506 = vst [vmem:[%s478_s21 + $0x58] sm:$0xff] %v505_v23 }
 0x124 PF: > { %s13_s18 = sadd.s32 1, %s738_s18   ;;  %s963_s12 = smov %s718_s13 }
 0x125   : > { %p10_p12 = scmp.ge.s32.totalorder %s13_s18, 6   ;;  %s964_s13 = smov %s818_s27 }
 0x126   : > { %s965_s14 = smov %s730_s16  ;;  %s966_s15 = smov %s734_s17 }
 0x127   : > { %s967_s16 = smov %s970_s19  ;;  %s968_s17 = smov %s974_s20 }
 0x128   :  { %12 = sbr.rel (!%p10_p12) target bundleno = 4 (0x4), region = 113 }

// kernel: decoder_resnet_forward.46
= control target key start
LH: loop header
LB: loop body
LE: loop exit
PB: predicated region body
PF: predicated region fallthrough
CT: control target
= control target key end

     0   :  { %s724_s12 = smov 0   ;;  %s726_s13 = smov 0   ;;  %s886_s0 = inlined_call_operand.vmem [shape: f32[2,36,4096], index: 0, kind: input, shape index: {}]   ;;  %s887_s1 = inlined_call_operand.vmem [shape: f32[3,36], index: 1, kind: input, shape index: {}]   ;;  %s888_s2 = inlined_call_operand.vmem [shape: f32[3,1], index: 2, kind: input, shape index: {}]   ;;  %s889_s3 = inlined_call_operand.vmem [shape: f32[2,3,4096], index: 3, kind: output, shape index: {}]  }
   0x1   :  { %s728_s14 = smov 0   ;;  %s730_s15 = smov 0  }
   0x2   :  { %s732_s16 = smov 0   ;;  %s734_s17 = smov 0  }
   0x3   :  { %s736_s18 = smov 0  }
   0x4 LB: > { %s22_s19 = sadd.s32 1, %s692_s16  ;;  %s25_s20 = sadd.s32 1, %s696_s17  ;;  %s700_s18 = sphi %s736_s18, %s13_s18   ;;  %s696_s17 = sphi %s734_s17, %s895_s17   ;;  %s692_s16 = sphi %s732_s16, %s894_s16   ;;  %s688_s15 = sphi %s730_s15, %s893_s15   ;;  %s684_s14 = sphi %s728_s14, %s892_s14   ;;  %s680_s13 = sphi %s726_s13, %s891_s13   ;;  %s676_s12 = sphi %s724_s12, %s890_s12  }
   0x5   : > { %p23_p0 = scmp.ge.s32.totalorder %s22_s19, 8  ;;  %p41_p1 = scmp.ne.s32.totalorder %s680_s13, %s676_s12 }
   0x6   : > { %p42_p2 = scmp.eq.s32.totalorder %s700_s18, 0  ;;  %s34_s24 = sadd.s32 1, %s680_s13 }
   0x7   : > { %s897_s19 = smov (%p23_p0, %s22_s19), 0  ;;  %s899_s20 = smov (!%p23_p0, %s25_s20), %s696_s17 }
   0x8   : > { %p43_p3 = por %p42_p2, %p41_p1  ;;  %p27_p4 = scmp.ge.s32.totalorder %s899_s20, 2 }
   0x9   : > { %s30_s21 = ssub.s32 %s692_s16, %s897_s19  ;;  %p553_p6 = scmp.ge.s32.totalorder %s700_s18, 16 }
   0xa   : > { %s901_s20 = smov (%p27_p4, %s899_s20), 0 }
   0xb   : > { %s29_s22 = ssub.s32 %s696_s17, %s901_s20  ;;  %143 = sbr.rel (%p553_p6) target bundleno = 36 (0x24), region = 24 }
   0xc   : > { %s31_s23 = sor.u32 %s30_s21, %s29_s22 }
   0xd   : > { %p32_p5 = scmp.eq.s32.totalorder %s31_s23, 0 }
   0xf   : > { %s775_s25 = scalar_select %p32_p5, %s680_s13, %s34_s24  }
  0x12   : > { %146 = sbr.rel (!%p43_p3) target bundleno = 36 (0x24), region = 28  ;;  %s148_s26 = sand.u32 (%p43_p3), 1, %s680_s13  }
  0x13   : > { %s584_s27 = smul.u32 (%p43_p3), 160, %s148_s26  ;;  %s554_s28 = sshll.u32 (%p43_p3), %s692_s16, 2 }
  0x14   : > { %s585_s29 = smul.u32 (%p43_p3), 160, %s696_s17 }
  0x15   : > { %s789_s8 = scalar_lea.vmem (%p43_p3), [#allocation2], %s584_s27 }
  0x16   : > { %s153_s30 = sadd.s32 (%p43_p3), %s585_s29, %s554_s28 }
  0x17   : > { %s555_s4 = sshll.u32 (%p43_p3), %s153_s30, 3 }
  0x18   : > { %s784_s7 = scalar_lea.vmem (%p43_p3), %s886_s0, %s555_s4 }
  0x19   : > { %v168_v0 = vld [vmem:[%s784_s7] sm:$0xff]  ;;  %v170_v1 = vld [vmem:[%s784_s7 + $0x8] sm:$0xff]  ;;  %v172_v2 = vld [vmem:[%s784_s7 + $0x10] sm:$0xff] }
  0x1a   : > { %169 = vst [vmem:[%s789_s8] sm:$0xff] %v168_v0  ;;  %171 = vst [vmem:[%s789_s8 + $0x8] sm:$0xff] %v170_v1  ;;  %v174_v3 = vld [vmem:[%s784_s7 + $0x18] sm:$0xff]  ;;  %v176_v4 = vld [vmem:[%s784_s7 + $0x100] sm:$0xff] }
  0x1b   : > { %173 = vst [vmem:[%s789_s8 + $0x10] sm:$0xff] %v172_v2  ;;  %v178_v5 = vld [vmem:[%s784_s7 + $0x108] sm:$0xff]  ;;  %175 = vst [vmem:[%s789_s8 + $0x18] sm:$0xff] %v174_v3  ;;  %v180_v6 = vld [vmem:[%s784_s7 + $0x110] sm:$0xff] }
  0x1c   : > { %177 = vst [vmem:[%s789_s8 + $0x20] sm:$0xff] %v176_v4  ;;  %179 = vst [vmem:[%s789_s8 + $0x28] sm:$0xff] %v178_v5  ;;  %v182_v7 = vld [vmem:[%s784_s7 + $0x118] sm:$0xff]  ;;  %v184_v8 = vld [vmem:[%s784_s7 + $0x200] sm:$0xff] }
  0x1d   : > { %181 = vst [vmem:[%s789_s8 + $0x30] sm:$0xff] %v180_v6  ;;  %183 = vst [vmem:[%s789_s8 + $0x38] sm:$0xff] %v182_v7  ;;  %v186_v9 = vld [vmem:[%s784_s7 + $0x208] sm:$0xff]  ;;  %v188_v10 = vld [vmem:[%s784_s7 + $0x210] sm:$0xff] }
  0x1e   : > { %185 = vst [vmem:[%s789_s8 + $0x40] sm:$0xff] %v184_v8  ;;  %v190_v11 = vld [vmem:[%s784_s7 + $0x218] sm:$0xff]  ;;  %187 = vst [vmem:[%s789_s8 + $0x48] sm:$0xff] %v186_v9  ;;  %v192_v12 = vld [vmem:[%s784_s7 + $0x300] sm:$0xff] }
  0x1f   : > { %189 = vst [vmem:[%s789_s8 + $0x50] sm:$0xff] %v188_v10  ;;  %191 = vst [vmem:[%s789_s8 + $0x58] sm:$0xff] %v190_v11  ;;  %v194_v13 = vld [vmem:[%s784_s7 + $0x308] sm:$0xff]  ;;  %v196_v14 = vld [vmem:[%s784_s7 + $0x310] sm:$0xff] }
  0x20   : > { %193 = vst [vmem:[%s789_s8 + $0x60] sm:$0xff] %v192_v12  ;;  %195 = vst [vmem:[%s789_s8 + $0x68] sm:$0xff] %v194_v13  ;;  %v198_v15 = vld [vmem:[%s784_s7 + $0x318] sm:$0xff]  ;;  %v200_v16 = vld [vmem:[%s784_s7 + $0x400] sm:$0xff] }
  0x21   : > { %197 = vst [vmem:[%s789_s8 + $0x70] sm:$0xff] %v196_v14  ;;  %v202_v17 = vld [vmem:[%s784_s7 + $0x408] sm:$0xff]  ;;  %199 = vst [vmem:[%s789_s8 + $0x78] sm:$0xff] %v198_v15  ;;  %v204_v18 = vld [vmem:[%s784_s7 + $0x410] sm:$0xff] }
  0x22   : > { %201 = vst [vmem:[%s789_s8 + $0x80] sm:$0xff] %v200_v16  ;;  %203 = vst [vmem:[%s789_s8 + $0x88] sm:$0xff] %v202_v17  ;;  %v206_v19 = vld [vmem:[%s784_s7 + $0x418] sm:$0xff] }
  0x23   : > { %205 = vst [vmem:[%s789_s8 + $0x90] sm:$0xff] %v204_v18  ;;  %207 = vst [vmem:[%s789_s8 + $0x98] sm:$0xff] %v206_v19 }
  0x24 PF: > { %p556_p7 = scmp.ge.s32.totalorder %s700_s18, 1  ;;  %p212_p8 = scmp.lt.s32.totalorder %s700_s18, 17 }
  0x26   : > { %p213_p9 = pnand %p556_p7, %p212_p8 }
  0x27   : > { %s219_s9 = sand.u32 (!%p213_p9), 1, %s676_s12   ;;  %v702_v20 = vmov (!%p213_p9), 0.0   ;;  %v278_v21 = vld [vmem:[%s888_s2] sm:$0x7] (!%p213_p9)  ;;  %v703_v22 = vmov (!%p213_p9), 0   ;;  %vm288_vm0 = vcmask (!%p213_p9), 1043456  }
  0x28   : > { %216 = sbr.rel (%p213_p9) target bundleno = 279 (0x117), region = 51  ;;  %365 = vmatprep.mubr.f32.mxu0 (!%p213_p9), %v702_v20  ;;  %436 = vmatprep.mubr.f32.mxu1 (!%p213_p9), %v702_v20  ;;  %v277_v51 = vld [vmem:[%s887_s1] sm:$0x7] (!%p213_p9)  ;;  %vm284_vm1 = vcmask (!%p213_p9), 293888   ;;  %s557_s24 = sshll.u32 (!%p213_p9), %s684_s14, 2 }
  0x29   : > { %s586_s10 = smul.u32 (!%p213_p9), 160, %s219_s9  ;;  %645 = vset.pattern.permute.xlu0 (!%p213_p9), %v703_v22  ;;  %p248_p10 = scmp.lt.s32.totalorder (!%p213_p9), %s688_s15, 1 }
  0x2a   : > { %281 = vperm.xlu0 (!%p213_p9), %645, %v278_v21   ;;  %p250_p11 = scmp.lt.s32.totalorder (!%p213_p9), %s557_s24, 31 }
  0x2b   : > { %s834_s22 = scalar_lea.vmem (!%p213_p9), [#allocation2], %s586_s10 }
  0x2c   : > { %v258_v23 = vld [vmem:[%s834_s22 + $0x8] sm:$0xff] (!%p213_p9)  ;;  %v260_v25 = vld [vmem:[%s834_s22 + $0x18] sm:$0xff] (!%p213_p9)  ;;  %v257_v28 = vld [vmem:[%s834_s22] sm:$0xff] (!%p213_p9) }
  0x2d   : > { %v262_v24 = vld [vmem:[%s834_s22 + $0x28] sm:$0xff] (!%p213_p9)  ;;  %v264_v27 = vld [vmem:[%s834_s22 + $0x38] sm:$0xff] (!%p213_p9)  ;;  %v261_v29 = vld [vmem:[%s834_s22 + $0x20] sm:$0xff] (!%p213_p9) }
  0x2e   : > { %v568_v26 = vpack.c.bf16 (!%p213_p9), %v262_v24, %v258_v23  ;;  %v576_v30 = vpack.c.bf16 (!%p213_p9), %v264_v27, %v260_v25  ;;  %v570_v31 = vpack.c.bf16 (!%p213_p9), %v261_v29, %v257_v28  ;;  %v259_v32 = vld [vmem:[%s834_s22 + $0x10] sm:$0xff] (!%p213_p9)  ;;  %v266_v34 = vld [vmem:[%s834_s22 + $0x48] sm:$0xff] (!%p213_p9)  ;;  %v268_v37 = vld [vmem:[%s834_s22 + $0x58] sm:$0xff] (!%p213_p9) }
  0x2f   : > { %v263_v33 = vld [vmem:[%s834_s22 + $0x30] sm:$0xff]  ;;  %v270_v36 = vld [vmem:[%s834_s22 + $0x68] sm:$0xff]  ;;  %v272_v38 = vld [vmem:[%s834_s22 + $0x78] sm:$0xff]  ;;  %s903_s15 = smov (!%p248_p10, %s688_s15), 1  ;;  %s905_s24 = smov (!%p250_p11, %s557_s24), 31 }
  0x30   : > { %569 = vmatprep.subr.bf16.mxu0 %v568_v26  ;;  %v578_v35 = vpack.c.bf16 %v263_v33, %v259_v32  ;;  %577 = vmatprep.subr.bf16.mxu1 %v576_v30  ;;  %v572_v39 = vpack.c.bf16 %v270_v36, %v266_v34  ;;  %v580_v40 = vpack.c.bf16 %v272_v38, %v268_v37  ;;  %v265_v41 = vld [vmem:[%s834_s22 + $0x40] sm:$0xff]  ;;  %v267_v43 = vld [vmem:[%s834_s22 + $0x50] sm:$0xff]  ;;  %v274_v47 = vld [vmem:[%s834_s22 + $0x88] sm:$0xf]  ;;  %s558_s26 = sshll.u32 %s903_s15, 5 }
  0x31   : > { %571 = vmatpush1.bf16.msra.mxu0 %v570_v31  ;;  %v269_v42 = vld [vmem:[%s834_s22 + $0x60] sm:$0xff]  ;;  %v271_v45 = vld [vmem:[%s834_s22 + $0x70] sm:$0xff]  ;;  %v276_v48 = vld [vmem:[%s834_s22 + $0x98] sm:$0xf]  ;;  %s253_s27 = sadd.s32 %s558_s26, %s905_s24 }
  0x32   : > { %579 = vmatpush1.bf16.msra.mxu1 %v578_v35  ;;  %v574_v44 = vpack.c.bf16 %v269_v42, %v265_v41  ;;  %573 = vmatprep.subr.bf16.mxu0 %v572_v39  ;;  %v582_v46 = vpack.c.bf16 %v271_v45, %v267_v43  ;;  %v273_v49 = vld [vmem:[%s834_s22 + $0x80] sm:$0xf]  ;;  %v275_v50 = vld [vmem:[%s834_s22 + $0x90] sm:$0xf]  ;;  %s559_s28 = sshll.u32 %s253_s27, 2 }
  0x33   : > { %581 = vmatprep.subr.bf16.mxu1 %v580_v40  ;;  %s255_s30 = scalar_lea.vmem %s889_s3, %s559_s28 }
  0x35   : > { %575 = vmatpush1.bf16.msra.mxu0 %v574_v44 }
  0x36   : > { %583 = vmatpush1.bf16.msra.mxu1 %v582_v46  ;;  %560 = vmatprep.subr.msk.mxu0 %vm288_vm0, %v274_v47 }
  0x37   : > { %563 = vmatprep.subr.msk.mxu1 %vm288_vm0, %v276_v48 }
  0x39   : > { %561 = vmatpush1.msk.msra.mxu0 %vm288_vm0, %v273_v49 }
  0x3a   : > { %564 = vmatpush1.msk.msra.mxu1 %vm288_vm0, %v275_v50  ;;  %562 = vmatmul.mubr.msk.f32.vlgmr.msra.gmra.mrb[0].mxu0 %vm284_vm1, %v277_v51 }
  0x3b   : > { %565 = vmatmul.mubr.msk.f32.vlgmr.msra.gmra.mrb[0].mxu1 %vm284_vm1, %v277_v51 }
  0xa9   : > { %v282_v52 = vpop.permute.xlu0 %281 }
 0x10d   : > { %v367_v53 = vpop.f32.mrb[0].mxu0 }
 0x10e   : > { %v368_v54 = vadd.f32 %v367_v53, %v282_v52  ;;  %v438_v55 = vpop.f32.mrb[0].mxu1  ;;  %v369_v56 = vpop.f32.mrb[1].mxu0 }
 0x10f   : > { %v439_v57 = vadd.f32 %v438_v55, %v282_v52  ;;  %v370_v58 = vadd.f32 %v369_v56, %v282_v52  ;;  %v440_v59 = vpop.f32.mrb[1].mxu1 }
 0x110   : > { %v443_v60 = vmax.f32 %v368_v54, 0.0  ;;  %v441_v61 = vadd.f32 %v440_v59, %v282_v52 }
 0x111   : > { %v445_v62 = vmax.f32 %v439_v57, 0.0  ;;  %v444_v63 = vmax.f32 %v370_v58, 0.0 }
 0x112   : > { %v446_v0 = vmax.f32 %v441_v61, 0.0 }
 0x113   : > { %v451_v1 = vcombine.low %v443_v60, %v444_v63 }
 0x114   : > { %v452_v2 = vcombine.low %v445_v62, %v446_v0 }
 0x115   : > { %455 = vst [vmem:[%s255_s30] sm:$0x77] %v451_v1 }
 0x116   : > { %456 = vst [vmem:[%s255_s30 + $0x8] sm:$0x77] %v452_v2 }
 0x117 PF: > { %s13_s18 = sadd.s32 1, %s700_s18   ;;  %s890_s12 = smov %s680_s13 }
 0x118   : > { %p10_p12 = scmp.ge.s32.totalorder %s13_s18, 18   ;;  %s891_s13 = smov %s775_s25 }
 0x119   : > { %s892_s14 = smov %s692_s16  ;;  %s893_s15 = smov %s696_s17 }
 0x11a   : > { %s894_s16 = smov %s897_s19  ;;  %s895_s17 = smov %s901_s20 }
 0x11b   :  { %12 = sbr.rel (!%p10_p12) target bundleno = 4 (0x4), region = 90 }

// kernel: decoder_resnet_forward.47
= control target key start
LH: loop header
LB: loop body
LE: loop exit
PB: predicated region body
PF: predicated region fallthrough
CT: control target
= control target key end

     0   :  { %s365_s9 = smov 0   ;;  %s367_s10 = smov 0   ;;  %s439_s0 = inlined_call_operand.vmem [shape: f32[2,3,4096], index: 0, kind: input, shape index: {}]   ;;  %s440_s1 = inlined_call_operand.vmem [shape: f32[3,1], index: 1, kind: output, shape index: {0}]   ;;  %s441_s2 = inlined_call_operand.vmem [shape: f32[3,1], index: 2, kind: output, shape index: {1}]  }
   0x1   :  { %s369_s11 = smov 0   ;;  %s371_s12 = smov 0  }
   0x2   :  { %s373_s13 = smov 0  }
   0x3 LB: > { %s22_s14 = sadd.s32 1, %s339_s11  ;;  %s25_s15 = sadd.s32 1, %s343_s12  ;;  %s347_s13 = sphi %s373_s13, %s13_s13   ;;  %s343_s12 = sphi %s371_s12, %s445_s12   ;;  %s339_s11 = sphi %s369_s11, %s444_s11   ;;  %s335_s10 = sphi %s367_s10, %s443_s10   ;;  %s331_s9 = sphi %s365_s9, %s442_s9  }
   0x4   : > { %p23_p0 = scmp.ge.s32.totalorder %s22_s14, 8  ;;  %p260_p1 = scmp.ge.s32.totalorder %s347_s13, 1 }
   0x5   : > { %p124_p2 = scmp.lt.s32.totalorder %s347_s13, 17 }
   0x6   : > { %s447_s14 = smov (%p23_p0, %s22_s14), 0  ;;  %s449_s15 = smov (!%p23_p0, %s25_s15), %s343_s12 }
   0x7   : > { %p125_p3 = pnand %p260_p1, %p124_p2  ;;  %p27_p4 = scmp.ge.s32.totalorder %s449_s15, 2 }
   0x8   : > { %s261_s16 = sshll.u32 (!%p125_p3), %s331_s9, 2  ;;  %p146_p5 = scmp.lt.s32.totalorder (!%p125_p3), %s335_s10, 1 }
   0x9   : > { %s451_s15 = smov (%p27_p4, %s449_s15), 0  ;;  %128 = sbr.rel (%p125_p3) target bundleno = 183 (0xb7), region = 24 }
   0xa   : > { %p148_p6 = scmp.lt.s32.totalorder (!%p125_p3), %s261_s16, 31  ;;  %p155_p7 = scmp.eq.s32.totalorder (!%p125_p3), %s335_s10, 0 }
   0xb   : > { %p156_p8 = scmp.eq.s32.totalorder (!%p125_p3), %s331_s9, 0 }
   0xd   : > { %p157_p9 = pnand (!%p125_p3), %p156_p8, %p155_p7 }
  0x10   : > { %s453_s10 = smov (!%p146_p5, %s335_s10), 1  ;;  %s455_s16 = smov (!%p148_p6, %s261_s16), 31 }
  0x11   : > { %s262_s17 = sshll.u32 %s453_s10, 5  ;;  %160 = sbr.rel (%p157_p9) target bundleno = 24 (0x18), region = 28  ;;  %vm161_vm0 = vcmask (!%p157_p9), 2048   ;;  %v349_v0 = vmov (!%p157_p9), 0.0  }
  0x12   : > { %s151_s18 = sadd.s32 %s262_s17, %s455_s16  ;;  %162 = vst.msk [vmem:[%s440_s1] sm:$0x7] (!%p157_p9), %vm161_vm0, %v349_v0  ;;  %163 = vst.msk [vmem:[%s441_s2] sm:$0x7] (!%p157_p9), %vm161_vm0, %v349_v0 }
  0x13   : > { %s263_s19 = sshll.u32 %s151_s18, 2 }
  0x14   : > { %s153_s22 = scalar_lea.vmem %s439_s0, %s263_s19 }
  0x18 PF: > { %v164_v1 = vld [vmem:[%s153_s22] sm:$0x77]  ;;  %v165_v2 = vld [vmem:[%s153_s22 + $0x8] sm:$0x77]  ;;  %vm173_vm1 = vcmask 1042432   ;;  %vm184_vm2 = vcmask 2048  }
  0x19   : > { %v169_v3 = vcombine.high %v164_v1, %v164_v1  ;;  %v170_v4 = vcombine.high %v165_v2, %v165_v2  ;;  %v174_v5 = vsel %vm173_vm1, %v164_v1, 0.0  ;;  %v187_v6 = vmul.f32 %v164_v1, %v164_v1  ;;  %v166_v23 = vld [vmem:[%s440_s1] sm:$0x7] }
  0x1a   : > { %v188_v7 = vmul.f32 %v165_v2, %v165_v2  ;;  %v177_v9 = vsel %vm173_vm1, %v165_v2, 0.0  ;;  %v186_v26 = vld [vmem:[%s441_s2] sm:$0x7] }
  0x1b   : > { %v175_v8 = vsel %vm173_vm1, %v169_v3, 0.0  ;;  %v191_v11 = vcombine.high %v187_v6, %v187_v6  ;;  %v195_v13 = vsel %vm173_vm1, %v187_v6, 0.0  ;;  %v179_v14 = vsel %vm173_vm1, %v170_v4, 0.0 }
  0x1c   : > { %v176_v10 = vadd.f32 %v175_v8, %v174_v5  ;;  %v192_v12 = vcombine.high %v188_v7, %v188_v7  ;;  %v198_v17 = vsel %vm173_vm1, %v188_v7, 0.0 }
  0x1d   : > { %v196_v16 = vsel %vm173_vm1, %v191_v11, 0.0 }
  0x1e   : > { %v178_v15 = vadd.f32 %v177_v9, %v176_v10  ;;  %v197_v18 = vadd.f32 %v196_v16, %v195_v13  ;;  %v200_v20 = vsel %vm173_vm1, %v192_v12, 0.0 }
  0x20   : > { %v180_v19 = vadd.f32 %v179_v14, %v178_v15  ;;  %v199_v21 = vadd.f32 %v198_v17, %v197_v18 }
  0x22   : > { %181 = vadd.xlane.f32.xlu0 %v180_v19  ;;  %v201_v22 = vadd.f32 %v200_v20, %v199_v21 }
  0x26   : > { %202 = vadd.xlane.f32.xlu0 %v201_v22 }
  0xaf   : > { %v182_v24 = vpop.xlane.xlu0 %181 }
  0xb0   : > { %v183_v25 = vadd.f32 %v182_v24, %v166_v23 }
  0xb2   : > { %185 = vst.msk [vmem:[%s440_s1] sm:$0x7] %vm184_vm2, %v183_v25 }
  0xb3   : > { %v203_v27 = vpop.xlane.xlu0 %202 }
  0xb4   : > { %v204_v28 = vadd.f32 %v203_v27, %v186_v26 }
  0xb6   : > { %205 = vst.msk [vmem:[%s441_s2] sm:$0x7] %vm184_vm2, %v204_v28 }
  0xb7 PF: > { %s13_s13 = sadd.s32 1, %s347_s13   ;;  %s442_s9 = smov %s339_s11 }
  0xb8   : > { %p10_p10 = scmp.ge.s32.totalorder %s13_s13, 18   ;;  %s443_s10 = smov %s343_s12 }
  0xb9   : > { %s444_s11 = smov %s447_s14  ;;  %s445_s12 = smov %s451_s15 }
  0xba   :  { %12 = sbr.rel (!%p10_p10) target bundleno = 3 (0x3), region = 62 }

// kernel: decoder_resnet_forward.48
= control target key start
LH: loop header
LB: loop body
LE: loop exit
PB: predicated region body
PF: predicated region fallthrough
CT: control target
= control target key end

     0   :  { %s452_s12 = smov 0   ;;  %s454_s13 = smov 0   ;;  %s512_s0 = inlined_call_operand.vmem [shape: f32[2,3,4096], index: 0, kind: input, shape index: {}]   ;;  %s513_s1 = inlined_call_operand.vmem [shape: f32[3,1], index: 1, kind: input, shape index: {}]   ;;  %s514_s2 = inlined_call_operand.vmem [shape: f32[3,1], index: 2, kind: input, shape index: {}]   ;;  %s515_s3 = inlined_call_operand.vmem [shape: f32[2,3,4096], index: 3, kind: output, shape index: {}]  }
   0x1   :  { %s456_s14 = smov 0   ;;  %s458_s15 = smov 0  }
   0x2   :  { %s460_s16 = smov 0  }
   0x3 LB: > { %s22_s17 = sadd.s32 1, %s420_s14  ;;  %s25_s18 = sadd.s32 1, %s424_s15  ;;  %s428_s16 = sphi %s460_s16, %s13_s16   ;;  %s424_s15 = sphi %s458_s15, %s519_s15   ;;  %s420_s14 = sphi %s456_s14, %s518_s14   ;;  %s416_s13 = sphi %s454_s13, %s517_s13   ;;  %s412_s12 = sphi %s452_s12, %s516_s12  }
   0x4   : > { %p23_p0 = scmp.ge.s32.totalorder %s22_s17, 8  ;;  %p338_p1 = scmp.ge.s32.totalorder %s428_s16, 1 }
   0x5   : > { %p158_p2 = scmp.lt.s32.totalorder %s428_s16, 17 }
   0x6   : > { %s521_s17 = smov (%p23_p0, %s22_s17), 0  ;;  %s523_s18 = smov (!%p23_p0, %s25_s18), %s424_s15 }
   0x7   : > { %p159_p3 = pnand %p338_p1, %p158_p2  ;;  %p27_p4 = scmp.ge.s32.totalorder %s523_s18, 2 }
   0x8   : > { %v212_v0 = vld [vmem:[%s513_s1] sm:$0x7] (!%p159_p3)  ;;  %v430_v1 = vmov (!%p159_p3), 0   ;;  %s339_s23 = sshll.u32 (!%p159_p3), %s412_s12, 2  ;;  %p191_p5 = scmp.lt.s32.totalorder (!%p159_p3), %s416_s13, 1  ;;  %v220_v5 = vlaneseq (!%p159_p3) }
   0x9   : > { %s525_s18 = smov (%p27_p4, %s523_s18), 0  ;;  %162 = sbr.rel (%p159_p3) target bundleno = 148 (0x94), region = 32 }
   0xa   : > { %389 = vset.pattern.permute.xlu0 (!%p159_p3), %v430_v1  ;;  %v227_v2 = vld [vmem:[%s514_s2] sm:$0x7] (!%p159_p3)  ;;  %p193_p6 = scmp.lt.s32.totalorder (!%p159_p3), %s339_s23, 31  ;;  %v431_v3 = vmov (!%p159_p3), 839922192   ;;  %v221_v7 = vshrl.u32 (!%p159_p3), %v220_v5, 7 }
   0xb   : > { %215 = vperm.xlu0 (!%p159_p3), %389, %v212_v0   ;;  %v218_v4 = vunpack.c.l.s4 (!%p159_p3), %v431_v3 }
   0xd   : > { %v219_v6 = vunpack.c.0.s8 (!%p159_p3), %v218_v4 }
   0xf   : > { %230 = vperm.xlu0 (!%p159_p3), %389, %v227_v2   ;;  %v222_v8 = vsub.s32 (!%p159_p3), %v219_v6, %v221_v7 }
  0x10   : > { %s527_s13 = smov (!%p191_p5, %s416_s13), 1  ;;  %s529_s23 = smov (!%p193_p6, %s339_s23), 31 }
  0x11   : > { %s340_s24 = sshll.u32 %s527_s13, 5 }
  0x12   : > { %s196_s25 = sadd.s32 %s340_s24, %s529_s23 }
  0x13   : > { %s341_s26 = sshll.u32 %s196_s25, 2 }
  0x14   : > { %s198_s29 = scalar_lea.vmem %s512_s0, %s341_s26  ;;  %s208_s5 = scalar_lea.vmem %s515_s3, %s341_s26 }
  0x15   : > { %v210_v11 = vld [vmem:[%s198_s29] sm:$0x77]  ;;  %v211_v12 = vld [vmem:[%s198_s29 + $0x8] sm:$0x77] }
  0x8a   : > { %v216_v9 = vpop.permute.xlu0 %215 }
  0x8b   : > { %v223_v10 = vrot.slane %v216_v9, %v222_v8 }
  0x8d   : > { %v225_v14 = vmul.f32 %v223_v10, %v210_v11  ;;  %v226_v15 = vmul.f32 %v223_v10, %v211_v12 }
  0x8e   : > { %v231_v13 = vpop.permute.xlu0 %230 }
  0x8f   : > { %v238_v16 = vrot.slane %v231_v13, %v222_v8 }
  0x91   : > { %v240_v17 = vadd.f32 %v238_v16, %v225_v14  ;;  %v241_v18 = vadd.f32 %v238_v16, %v226_v15 }
  0x93   : > { %242 = vst [vmem:[%s208_s5] sm:$0x77] %v240_v17  ;;  %243 = vst [vmem:[%s208_s5 + $0x8] sm:$0x77] %v241_v18 }
  0x94 PF: > { %s13_s16 = sadd.s32 1, %s428_s16   ;;  %s516_s12 = smov %s420_s14 }
  0x95   : > { %p10_p7 = scmp.ge.s32.totalorder %s13_s16, 18   ;;  %s517_s13 = smov %s424_s15 }
  0x96   : > { %s518_s14 = smov %s521_s17  ;;  %s519_s15 = smov %s525_s18 }
  0x97   :  { %12 = sbr.rel (!%p10_p7) target bundleno = 3 (0x3), region = 62 }

// kernel: tile.38
= control target key start
LH: loop header
LB: loop body
LE: loop exit
PB: predicated region body
PF: predicated region fallthrough
CT: control target
= control target key end

     0   :  { %s22_s0 = inlined_call_operand.vmem [shape: f32[3], index: 0, kind: input, shape index: {}]   ;;  %s23_s1 = inlined_call_operand.vmem [shape: f32[4,3], index: 1, kind: output, shape index: {}]  }
   0x1   :  { %v4_v0 = vld [vmem:[%s22_s0] ss:$0 sm:$0xff] }
   0x2   :  { %5 = vst [vmem:[%s23_s1] sm:$0xf] %v4_v0 }

// kernel: tile.3
= control target key start
LH: loop header
LB: loop body
LE: loop exit
PB: predicated region body
PF: predicated region fallthrough
CT: control target
= control target key end

     0   :  { %vm7_vm0 = vcmask 7168   ;;  %s26_s10 = smov 126   ;;  %s49_s0 = inlined_call_operand.vmem [shape: f32[4,3], index: 0, kind: input, shape index: {}]   ;;  %s50_s1 = inlined_call_operand.vmem [shape: f32[12,1], index: 1, kind: output, shape index: {}]  }
   0x1   :  { %v4_v0 = vld [vmem:[%s49_s0] sm:$0xf]  ;;  %s25_s0 = smov 127  }
   0x2   :  { %5 = vst [vmem:[#allocation0] sm:$0xf] %v4_v0 }
   0x9   :  { %v9_v1 = vld [vmem:[#allocation0] sm:$0xf]  }
   0xa   :  { %v6_v2 = vld [vmem:[#allocation0] sm:$0xf]   ;;  %10 = vrot.lane.b32.xlu0 %v9_v1, %s25_s0 }
   0xb   :  { %8 = vst.msk [vmem:[%s50_s1] ss:$3 sm:$0xf] %vm7_vm0, %v6_v2   ;;  %v15_v3 = vld [vmem:[#allocation0] sm:$0xf]  }
   0xe   :  { %16 = vrot.lane.b32.xlu0 %v15_v3, %s26_s10 }
  0x7c   :  { %v11_v4 = vpop.permute.xlu0 %10  }
  0x7d   :  { %21 = vst.msk [vmem:[%s50_s1 + $0x1] ss:$3 sm:$0xf] %vm7_vm0, %v11_v4  }
  0x80   :  { %v17_v5 = vpop.permute.xlu0 %16  }
  0x81   :  { %22 = vst.msk [vmem:[%s50_s1 + $0x2] ss:$3 sm:$0xf] %vm7_vm0, %v17_v5  }

// kernel: decoder_resnet_forward.49
= control target key start
LH: loop header
LB: loop body
LE: loop exit
PB: predicated region body
PF: predicated region fallthrough
CT: control target
= control target key end

     0   :  { %s772_s12 = smov 0   ;;  %s774_s13 = smov 0   ;;  %s914_s0 = inlined_call_operand.vmem [shape: f32[2,27,4096], index: 0, kind: input, shape index: {}]   ;;  %s915_s1 = inlined_call_operand.vmem [shape: f32[12,27], index: 1, kind: input, shape index: {}]   ;;  %s916_s2 = inlined_call_operand.vmem [shape: f32[12,1], index: 2, kind: input, shape index: {}]   ;;  %s917_s3 = inlined_call_operand.vmem [shape: f32[2,12,4096], index: 3, kind: output, shape index: {}]  }
   0x1   :  { %s776_s14 = smov 0   ;;  %s778_s15 = smov 0  }
   0x2   :  { %s780_s16 = smov 0   ;;  %s782_s17 = smov 0  }
   0x3   :  { %s784_s18 = smov 0  }
   0x4 LB: > { %s22_s19 = sadd.s32 1, %s739_s16  ;;  %s25_s20 = sadd.s32 1, %s743_s17  ;;  %s747_s18 = sphi %s784_s18, %s13_s18   ;;  %s743_s17 = sphi %s782_s17, %s926_s17   ;;  %s739_s16 = sphi %s780_s16, %s925_s16   ;;  %s735_s15 = sphi %s778_s15, %s924_s15   ;;  %s731_s14 = sphi %s776_s14, %s923_s14   ;;  %s727_s13 = sphi %s774_s13, %s922_s13   ;;  %s723_s12 = sphi %s772_s12, %s921_s12  }
   0x5   : > { %p23_p0 = scmp.ge.s32.totalorder %s22_s19, 8  ;;  %s572_s21 = sadd.s32 4294967295, %s747_s18  }
   0x6   : > { %p41_p1 = scmp.ne.s32.totalorder %s727_s13, %s723_s12  ;;  %p42_p2 = scmp.eq.s32.totalorder %s747_s18, 0 }
   0x7   : > { %s928_s19 = smov (%p23_p0, %s22_s19), 0  ;;  %s930_s20 = smov (!%p23_p0, %s25_s20), %s743_s17 }
   0x8   : > { %p27_p3 = scmp.ge.s32.totalorder %s930_s20, 2  ;;  %p115_p4 = scmp.eq.s32.totalorder %s572_s21, 15 }
   0x9   : > { %s30_s22 = ssub.s32 %s739_s16, %s928_s19  ;;  %p43_p5 = por %p42_p2, %p41_p1 }
   0xa   : > { %s932_s20 = smov (%p27_p3, %s930_s20), 0  ;;  %p820_p6 = por %p115_p4, %p41_p1 }
   0xb   : > { %s29_s24 = ssub.s32 %s743_s17, %s932_s20  ;;  %s34_s26 = sadd.s32 1, %s727_s13 }
   0xc   : > { %s31_s25 = sor.u32 %s30_s22, %s29_s24  ;;  %p575_p8 = scmp.ge.s32.totalorder %s747_s18, 16 }
   0xd   : > { %p32_p7 = scmp.eq.s32.totalorder %s31_s25, 0 }
   0xe   : > { %143 = sbr.rel (%p575_p8) target bundleno = 36 (0x24), region = 24 }
   0xf   : > { %s828_s27 = scalar_select %p32_p7, %s727_s13, %s34_s26  }
  0x15   : > { %146 = sbr.rel (!%p43_p5) target bundleno = 36 (0x24), region = 28  ;;  %s148_s28 = sand.u32 (%p43_p5), 1, %s727_s13  }
  0x16   : > { %s577_s29 = sshll.u32 (%p43_p5), %s739_s16, 2  ;;  %s576_s30 = sshll.u32 (%p43_p5), %s148_s28, 7 }
  0x17   : > { %s578_s4 = sshll.u32 (%p43_p5), %s743_s17, 7  ;;  %s150_s10 = scalar_lea.vmem (%p43_p5), [#allocation2], %s576_s30 }
  0x18   : > { %s153_s5 = sadd.s32 (%p43_p5), %s578_s4, %s577_s29 }
  0x19   : > { %s579_s6 = sshll.u32 (%p43_p5), %s153_s5, 3 }
  0x1a   : > { %s837_s9 = scalar_lea.vmem (%p43_p5), %s914_s0, %s579_s6 }
  0x1b   : > { %v168_v0 = vld [vmem:[%s837_s9] sm:$0xff] (%p43_p5)  ;;  %v170_v1 = vld [vmem:[%s837_s9 + $0x8] sm:$0xff] (%p43_p5)  ;;  %v172_v2 = vld [vmem:[%s837_s9 + $0x10] sm:$0xff] (%p43_p5) }
  0x1c   : > { %169 = vst [vmem:[%s150_s10] sm:$0xff] %v168_v0  ;;  %171 = vst [vmem:[%s150_s10 + $0x8] sm:$0xff] %v170_v1  ;;  %v174_v3 = vld [vmem:[%s837_s9 + $0x18] sm:$0xff]  ;;  %v176_v4 = vld [vmem:[%s837_s9 + $0x100] sm:$0xff] }
  0x1d   : > { %173 = vst [vmem:[%s150_s10 + $0x10] sm:$0xff] %v172_v2  ;;  %v178_v5 = vld [vmem:[%s837_s9 + $0x108] sm:$0xff]  ;;  %175 = vst [vmem:[%s150_s10 + $0x18] sm:$0xff] %v174_v3  ;;  %v180_v6 = vld [vmem:[%s837_s9 + $0x110] sm:$0xff] }
  0x1e   : > { %177 = vst [vmem:[%s150_s10 + $0x20] sm:$0xff] %v176_v4  ;;  %179 = vst [vmem:[%s150_s10 + $0x28] sm:$0xff] %v178_v5  ;;  %v182_v7 = vld [vmem:[%s837_s9 + $0x118] sm:$0xff]  ;;  %v184_v8 = vld [vmem:[%s837_s9 + $0x200] sm:$0xff] }
  0x1f   : > { %181 = vst [vmem:[%s150_s10 + $0x30] sm:$0xff] %v180_v6  ;;  %183 = vst [vmem:[%s150_s10 + $0x38] sm:$0xff] %v182_v7  ;;  %v186_v9 = vld [vmem:[%s837_s9 + $0x208] sm:$0xff]  ;;  %v188_v10 = vld [vmem:[%s837_s9 + $0x210] sm:$0xff] }
  0x20   : > { %185 = vst [vmem:[%s150_s10 + $0x40] sm:$0xff] %v184_v8  ;;  %v190_v11 = vld [vmem:[%s837_s9 + $0x218] sm:$0xff]  ;;  %187 = vst [vmem:[%s150_s10 + $0x48] sm:$0xff] %v186_v9  ;;  %v192_v12 = vld [vmem:[%s837_s9 + $0x300] sm:$0xff] }
  0x21   : > { %189 = vst [vmem:[%s150_s10 + $0x50] sm:$0xff] %v188_v10  ;;  %191 = vst [vmem:[%s150_s10 + $0x58] sm:$0xff] %v190_v11  ;;  %v194_v13 = vld [vmem:[%s837_s9 + $0x308] sm:$0xff]  ;;  %v196_v14 = vld [vmem:[%s837_s9 + $0x310] sm:$0xff] }
  0x22   : > { %193 = vst [vmem:[%s150_s10 + $0x60] sm:$0xff] %v192_v12  ;;  %195 = vst [vmem:[%s150_s10 + $0x68] sm:$0xff] %v194_v13  ;;  %v198_v15 = vld [vmem:[%s837_s9 + $0x318] sm:$0xff] }
  0x23   : > { %197 = vst [vmem:[%s150_s10 + $0x70] sm:$0xff] %v196_v14  ;;  %199 = vst [vmem:[%s150_s10 + $0x78] sm:$0xff] %v198_v15 }
  0x24 PF: > { %p580_p9 = scmp.ge.s32.totalorder %s747_s18, 1  ;;  %p204_p10 = scmp.lt.s32.totalorder %s747_s18, 17 }
  0x26   : > { %p205_p11 = pnand %p580_p9, %p204_p10 }
  0x27   : > { %s211_s11 = sand.u32 (!%p205_p11), 1, %s723_s12   ;;  %vm272_vm0 = vcmask (!%p205_p11), 1042432   ;;  %v749_v16 = vmov (!%p205_p11), 0.0   ;;  %v253_v17 = vld [vmem:[%s916_s2] sm:$0xff] (!%p205_p11)  ;;  %vm750_vm1 = vmmov (!%p205_p11), 1   ;;  %v751_v19 = vmov (!%p205_p11), 0  }
  0x28   : > { %208 = sbr.rel (%p205_p11) target bundleno = 295 (0x127), region = 51  ;;  %s581_s21 = sshll.u32 (!%p205_p11), %s211_s11, 7  ;;  %349 = vmatprep.mubr.f32.mxu0 (!%p205_p11), %v749_v16  ;;  %426 = vmatprep.mubr.f32.mxu1 (!%p205_p11), %v749_v16  ;;  %vm863_vm2 = vmpackc.low (!%p205_p11), %vm272_vm0, %vm750_vm1  ;;  %v254_v23 = vld [vmem:[%s916_s2 + $0x8] sm:$0xf] (!%p205_p11)  ;;  %v251_v45 = vld [vmem:[%s915_s1] sm:$0xff] (!%p205_p11)  ;;  %vm265_vm3 = vcmask (!%p205_p11), 220160  }
  0x29   : > { %676 = vset.pattern.permute.xlu0 (!%p205_p11), %v751_v19  ;;  %s213_s25 = scalar_lea.vmem (!%p205_p11), [#allocation2], %s581_s21  ;;  %v252_v46 = vld [vmem:[%s915_s1 + $0x8] sm:$0xf] (!%p205_p11)  ;;  %s582_s6 = sshll.u32 (!%p205_p11), %s211_s11, 6 }
  0x2a   : > { %v236_v20 = vld [vmem:[%s213_s25 + $0x8] sm:$0xff] (!%p205_p11)  ;;  %v238_v22 = vld [vmem:[%s213_s25 + $0x18] sm:$0xff] (!%p205_p11)  ;;  %257 = vperm.xlu0 (!%p205_p11), %676, %v253_v17   ;;  %v235_v26 = vld [vmem:[%s213_s25] sm:$0xff] (!%p205_p11)  ;;  %s232_s7 = scalar_lea.vmem (!%p205_p11), [#allocation3], %s582_s6 }
  0x2b   : > { %v240_v21 = vld [vmem:[%s213_s25 + $0x28] sm:$0xff] (!%p205_p11)  ;;  %v242_v25 = vld [vmem:[%s213_s25 + $0x38] sm:$0xff] (!%p205_p11)  ;;  %v239_v27 = vld [vmem:[%s213_s25 + $0x20] sm:$0xff] (!%p205_p11) }
  0x2c   : > { %v597_v24 = vpack.c.bf16 (!%p205_p11), %v240_v21, %v236_v20  ;;  %v607_v28 = vpack.c.bf16 (!%p205_p11), %v242_v25, %v238_v22  ;;  %v599_v29 = vpack.c.bf16 (!%p205_p11), %v239_v27, %v235_v26  ;;  %v237_v30 = vld [vmem:[%s213_s25 + $0x10] sm:$0xff] (!%p205_p11)  ;;  %v244_v32 = vld [vmem:[%s213_s25 + $0x48] sm:$0xff] (!%p205_p11)  ;;  %v246_v35 = vld [vmem:[%s213_s25 + $0x58] sm:$0xff] (!%p205_p11) }
  0x2d   : > { %v241_v31 = vld [vmem:[%s213_s25 + $0x30] sm:$0xff] (!%p205_p11)  ;;  %v248_v34 = vld [vmem:[%s213_s25 + $0x68] sm:$0x7] (!%p205_p11)  ;;  %v250_v36 = vld [vmem:[%s213_s25 + $0x78] sm:$0x7] (!%p205_p11) }
  0x2e   : > { %598 = vmatprep.subr.bf16.mxu0 (!%p205_p11), %v597_v24  ;;  %v609_v33 = vpack.c.bf16 (!%p205_p11), %v241_v31, %v237_v30  ;;  %608 = vmatprep.subr.bf16.mxu1 (!%p205_p11), %v607_v28  ;;  %v601_v37 = vpack.c.bf16 (!%p205_p11), %v248_v34, %v244_v32  ;;  %v611_v38 = vpack.c.bf16 (!%p205_p11), %v250_v36, %v246_v35  ;;  %v243_v39 = vld [vmem:[%s213_s25 + $0x40] sm:$0xff] (!%p205_p11)  ;;  %v245_v41 = vld [vmem:[%s213_s25 + $0x50] sm:$0xff] (!%p205_p11) }
  0x2f   : > { %600 = vmatpush1.bf16.msra.mxu0 %v599_v29  ;;  %v247_v40 = vld [vmem:[%s213_s25 + $0x60] sm:$0x7]  ;;  %v249_v43 = vld [vmem:[%s213_s25 + $0x70] sm:$0x7]  ;;  %262 = vperm.xlu0 %676, %v254_v23   ;;  %s592_s12 = sshll.u32 (%p820_p6), %s731_s14, 2  ;;  %s593_s8 = sshll.u32 (%p820_p6), %s735_s15, 6 }
  0x30   : > { %610 = vmatpush1.bf16.msra.mxu1 %v609_v33  ;;  %v604_v42 = vpack.c.bf16 %v247_v40, %v243_v39  ;;  %603 = vmatprep.subr.msk.bf16.mxu0 %vm863_vm2, %v601_v37  ;;  %v614_v44 = vpack.c.bf16 %v249_v43, %v245_v41  ;;  %s464_s9 = sadd.s32 (%p820_p6), %s593_s8, %s592_s12 }
  0x31   : > { %613 = vmatprep.subr.msk.bf16.mxu1 %vm863_vm2, %v611_v38  ;;  %s594_s10 = sshll.u32 (%p820_p6), %s464_s9, 3 }
  0x32   : > { %s466_s22 = scalar_lea.vmem (%p820_p6), %s917_s3, %s594_s10 }
  0x33   : > { %606 = vmatpush1.bf16.msk.msra.mxu0 %vm863_vm2, %v604_v42 }
  0x34   : > { %616 = vmatpush1.bf16.msk.msra.mxu1 %vm863_vm2, %v614_v44 }
  0x36   : > { %585 = vmatmul.mubr.msk.f32.vlgmr.msra.gmra.mrb[0].mxu0 %vm265_vm3, %v251_v45 }
  0x37   : > { %589 = vmatmul.mubr.msk.f32.vlgmr.msra.gmra.mrb[0].mxu1 %vm265_vm3, %v251_v45  ;;  %355 = vmatprep.mubr.f32.mxu0 %v749_v16 }
  0x38   : > { %432 = vmatprep.mubr.f32.mxu1 %v749_v16 }
  0x3a   : > { %586 = vmatmul.mubr.msk.f32.gmra.mrb[2].mxu0 %vm265_vm3, %v252_v46 }
  0x3b   : > { %590 = vmatmul.mubr.msk.f32.gmra.mrb[2].mxu1 %vm265_vm3, %v252_v46 }
  0xa9   : > { %v258_v47 = vpop.permute.xlu0 %257 }
  0xae   : > { %v263_v56 = vpop.permute.xlu0 %262 }
 0x109   : > { %v351_v48 = vpop.f32.mrb[0].mxu0 }
 0x10a   : > { %v352_v49 = vadd.f32 %v351_v48, %v258_v47  ;;  %v428_v50 = vpop.f32.mrb[0].mxu1  ;;  %v353_v51 = vpop.f32.mrb[1].mxu0 }
 0x10b   : > { %v429_v52 = vadd.f32 %v428_v50, %v258_v47  ;;  %v354_v53 = vadd.f32 %v353_v51, %v258_v47  ;;  %v430_v54 = vpop.f32.mrb[1].mxu1 }
 0x10c   : > { %677 = vtanh.f32 %v352_v49  ;;  %v431_v55 = vadd.f32 %v430_v54, %v258_v47 }
 0x10d   : > { %679 = vtanh.f32 %v429_v52  ;;  %v357_v57 = vpop.f32.mrb[2].mxu0 }
 0x10e   : > { %681 = vtanh.f32 %v354_v53  ;;  %v358_v58 = vadd.f32 %v357_v57, %v263_v56  ;;  %v434_v59 = vpop.f32.mrb[2].mxu1  ;;  %v359_v60 = vpop.f32.mrb[3].mxu0 }
 0x10f   : > { %683 = vtanh.f32 %v431_v55  ;;  %v435_v61 = vadd.f32 %v434_v59, %v263_v56  ;;  %v360_v62 = vadd.f32 %v359_v60, %v263_v56  ;;  %v436_v63 = vpop.f32.mrb[3].mxu1 }
 0x110   : > { %685 = vtanh.f32 %v358_v58  ;;  %v437_v0 = vadd.f32 %v436_v63, %v263_v56 }
 0x111   : > { %687 = vtanh.f32 %v435_v61 }
 0x112   : > { %689 = vtanh.f32 %v360_v62 }
 0x113   : > { %691 = vtanh.f32 %v437_v0 }
 0x116   : > { %v678_v1 = vpop.eup %677 }
 0x117   : > { %v680_v2 = vpop.eup %679  ;;  %447 = vst [vmem:[%s232_s7] sm:$0xff] %v678_v1 }
 0x118   : > { %v682_v3 = vpop.eup %681  ;;  %449 = vst [vmem:[%s232_s7 + $0x10] sm:$0xff] %v680_v2  ;;  %461 = sbr.rel (!%p820_p6) target bundleno = 295 (0x127), region = 59 }
 0x119   : > { %v684_v4 = vpop.eup %683  ;;  %448 = vst [vmem:[%s232_s7 + $0x8] sm:$0xff] %v682_v3 }
 0x11a   : > { %v686_v5 = vpop.eup %685  ;;  %450 = vst [vmem:[%s232_s7 + $0x18] sm:$0xff] %v684_v4 }
 0x11b   : > { %v688_v6 = vpop.eup %687  ;;  %451 = vst [vmem:[%s232_s7 + $0x20] sm:$0xf] %v686_v5 }
 0x11c   : > { %v690_v7 = vpop.eup %689  ;;  %453 = vst [vmem:[%s232_s7 + $0x30] sm:$0xf] %v688_v6 }
 0x11d   : > { %v692_v8 = vpop.eup %691  ;;  %452 = vst [vmem:[%s232_s7 + $0x28] sm:$0xf] %v690_v7 }
 0x11e   : > { %454 = vst [vmem:[%s232_s7 + $0x38] sm:$0xf] %v692_v8  ;;  %v479_v9 = vld [vmem:[%s232_s7] sm:$0xff] (%p820_p6) }
 0x11f   : > { %v483_v11 = vld [vmem:[%s232_s7 + $0x10] sm:$0xff]  ;;  %480 = vst [vmem:[%s466_s22] sm:$0xff] %v479_v9 }
 0x120   : > { %v481_v10 = vld [vmem:[%s232_s7 + $0x8] sm:$0xff]  ;;  %484 = vst [vmem:[%s466_s22 + $0x10] sm:$0xff] %v483_v11 }
 0x121   : > { %v485_v12 = vld [vmem:[%s232_s7 + $0x18] sm:$0xff]  ;;  %482 = vst [vmem:[%s466_s22 + $0x8] sm:$0xff] %v481_v10 }
 0x122   : > { %v487_v13 = vld [vmem:[%s232_s7 + $0x20] sm:$0xff]  ;;  %486 = vst [vmem:[%s466_s22 + $0x18] sm:$0xff] %v485_v12 }
 0x123   : > { %v491_v15 = vld [vmem:[%s232_s7 + $0x30] sm:$0xff]  ;;  %488 = vst [vmem:[%s466_s22 + $0x100] sm:$0xff] %v487_v13 }
 0x124   : > { %v489_v14 = vld [vmem:[%s232_s7 + $0x28] sm:$0xff]  ;;  %492 = vst [vmem:[%s466_s22 + $0x110] sm:$0xff] %v491_v15 }
 0x125   : > { %v493_v16 = vld [vmem:[%s232_s7 + $0x38] sm:$0xff]  ;;  %490 = vst [vmem:[%s466_s22 + $0x108] sm:$0xff] %v489_v14 }
 0x126   : > { %494 = vst [vmem:[%s466_s22 + $0x118] sm:$0xff] %v493_v16 }
 0x127 PF: > { %s13_s18 = sadd.s32 1, %s747_s18   ;;  %s921_s12 = smov %s727_s13 }
 0x128   : > { %p10_p12 = scmp.ge.s32.totalorder %s13_s18, 18   ;;  %s922_s13 = smov %s828_s27 }
 0x129   : > { %s923_s14 = smov %s739_s16  ;;  %s924_s15 = smov %s743_s17 }
 0x12a   : > { %s925_s16 = smov %s928_s19  ;;  %s926_s17 = smov %s932_s20 }
 0x12b   :  { %12 = sbr.rel (!%p10_p12) target bundleno = 4 (0x4), region = 113 }

</bundles_post_ra>
